<compile_context>
chip_gen: v7x
topology: tpu7x:2x2x1
jax: 0.10.0
libtpu: 0.0.40
codegen_flags: <defaults>
</compile_context>

<pallas_src>
import numpy as np
import jax
import jax.numpy as jnp
from jax.experimental import pallas as pl
from jax.experimental.pallas import tpu as pltpu

ACT_DTYPE = jnp.bfloat16
VMEM_LIMIT_BYTES = 64 * 1024 * 1024


# ---------------------------------------------------------------------------
# host-side constant builders (compile-time constants under jit)
# ---------------------------------------------------------------------------

def _interior_mask(H, W):
    """(1, T) f32 mask over the contiguous conv-output range [t0, t0+T) of the
    padded-flat layout: 1 at interior pixels, 0 at left/right padding cols."""
    Wp = W + 2
    t0 = Wp + 1
    T = H * Wp - 2
    t = np.arange(t0, t0 + T)
    col = t % Wp
    return jnp.asarray(((col >= 1) & (col <= W)).astype(np.float32)[None, :])


def _pool_select(W):
    """(W, W//2) 0/1 matrices selecting even / odd columns (2x2 maxpool)."""
    W2 = W // 2
    se = np.zeros((W, W2), np.float32)
    so = np.zeros((W, W2), np.float32)
    for j in range(W2):
        se[2 * j, j] = 1.0
        so[2 * j + 1, j] = 1.0
    return jnp.asarray(se, ACT_DTYPE), jnp.asarray(so, ACT_DTYPE)


def _upsample_row_coeffs(H):
    """Per output row (2H rows): (i0, i1, a0, a1), bilinear x2 align_corners."""
    out = 2 * H
    coeffs = []
    for u in range(out):
        if H == 1:
            coeffs.append((0, 0, 1.0, 0.0))
            continue
        src = u * (H - 1) / (out - 1)
        i0 = int(np.floor(src))
        f = float(src - i0)
        i1 = min(i0 + 1, H - 1)
        coeffs.append((i0, i1, 1.0 - f, f))
    return coeffs


def _upsample_col_matrix_padded(W):
    """(W, 2W+2) right-multiply width-interp matrix whose first/last output
    columns are zero, so width-passed rows come out already zero-padded."""
    out = 2 * W
    A = np.zeros((W, out + 2), np.float32)
    for v in range(out):
        if W == 1:
            A[0, v + 1] = 1.0
            continue
        src = v * (W - 1) / (out - 1)
        i0 = int(np.floor(src))
        f = src - i0
        i1 = min(i0 + 1, W - 1)
        A[i0, v + 1] += 1.0 - f
        A[i1, v + 1] += f
    return jnp.asarray(A)


# ---------------------------------------------------------------------------
# in-kernel 3x3 conv with taps folded into the contraction dimension
# ---------------------------------------------------------------------------

def _conv3x3(sources, w_ref, t0, Wp, T):
    """sources: list of (read_fn, Ci); read_fn(start) -> (Ci, T) bf16 slice.
    w_ref: (3, Co, 3*sum(Ci)) bf16, K ordered dx-major then (concat) channel.
    Returns f32 (Co, T)."""
    ctot = sum(ci for _, ci in sources)
    acc = None
    for dy in range(3):
        wdy = w_ref[dy]                                        # (Co, 3*ctot)
        if ctot == 1:
            # single input channel: broadcast MAC on the VPU (MXU K=1 is waste)
            read, _ = sources[0]
            part = None
            for dx in range(3):
                off = (dy - 1) * Wp + (dx - 1)
                sl = read(t0 + off).astype(jnp.float32)        # (1, T)
                wk = wdy[:, dx:dx + 1].astype(jnp.float32)     # (Co, 1)
                term = wk * sl
                part = term if part is None else part + term
        else:
            pieces = []
            for dx in range(3):
                off = (dy - 1) * Wp + (dx - 1)
                for read, _ in sources:
                    pieces.append(read(t0 + off))              # (Ci, T) bf16
            slab = jnp.concatenate(pieces, axis=0)             # (3*ctot, T)
            part = jnp.dot(wdy, slab, preferred_element_type=jnp.float32)
        acc = part if acc is None else acc + part
    return acc


# ---------------------------------------------------------------------------
# fused DoubleConv (+ optional 2x2 maxpool) kernel  (encoder / bottom)
# ---------------------------------------------------------------------------

def double_conv_stage(x, w1, b1, w2, b2, H, W, pool):
    """3x3 conv+bias+ReLU -> 3x3 conv+bias+ReLU (-> optional 2x2 maxpool),
    all in one pallas_call.  x: padded-flat bf16 (N, Ci, (H+2)*(W+2))."""
    N, Ci, P = x.shape
    Cmid = w1.shape[1]
    Cout = w2.shape[1]
    Wp = W + 2
    assert P == (H + 2) * Wp
    t0 = Wp + 1
    T = H * Wp - 2
    mask = _interior_mask(H, W)
    if pool:
        H2, W2 = H // 2, W // 2
        Wp2 = W2 + 2
        P2 = (H2 + 2) * Wp2
        se_mat, so_mat = _pool_select(W)

    def kernel(*refs):
        if pool:
            (x_ref, mask_ref, w1_ref, b1_ref, w2_ref, b2_ref, se_ref, so_ref,
             out_ref, pool_ref, mid_ref) = refs
        else:
            (x_ref, mask_ref, w1_ref, b1_ref, w2_ref, b2_ref,
             out_ref, mid_ref) = refs

        m = mask_ref[...]                                      # (1, T) f32

        # conv1 -> mid scratch (padded-flat, border-only zero stores)
        acc1 = _conv3x3([(lambda s: x_ref[0, :, s:s + T], Ci)],
                        w1_ref, t0, Wp, T)
        acc1 = jnp.maximum(acc1 + b1_ref[...], 0.0) * m        # (Cmid, T) f32
        mid_ref[:, 0:t0] = jnp.zeros((Cmid, t0), ACT_DTYPE)
        mid_ref[:, t0 + T:P] = jnp.zeros((Cmid, P - t0 - T), ACT_DTYPE)
        mid_ref[:, t0:t0 + T] = acc1.astype(ACT_DTYPE)

        # conv2 (reads the padded intermediate straight from VMEM)
        acc2 = _conv3x3([(lambda s: mid_ref[:, s:s + T], Cmid)],
                        w2_ref, t0, Wp, T)
        acc2 = jnp.maximum(acc2 + b2_ref[...], 0.0) * m        # (Cout, T) f32
        a2 = acc2.astype(ACT_DTYPE)
        out_ref[0, :, 0:t0] = jnp.zeros((Cout, t0), ACT_DTYPE)
        out_ref[0, :, t0 + T:P] = jnp.zeros((Cout, P - t0 - T), ACT_DTYPE)
        out_ref[0, :, t0:t0 + T] = a2

        if pool:
            # fused 2x2/2 maxpool on the conv2 result (never re-read from HBM),
            # emitted directly in the next level's zero-padded flat layout.
            # TODO(synk): move the even/odd column compaction off the MXU onto
            # strided lane loads (pl.ds(..., stride=2)) once validated.
            se = se_ref[...]
            so = so_ref[...]
            pool_ref[...] = jnp.zeros_like(pool_ref)
            for r in range(H2):
                a = a2[:, 2 * r * Wp:2 * r * Wp + W]           # (Cout, W)
                b = a2[:, (2 * r + 1) * Wp:(2 * r + 1) * Wp + W]
                v = jnp.maximum(a, b)
                h = jnp.maximum(
                    jnp.dot(v, se, preferred_element_type=jnp.float32),
                    jnp.dot(v, so, preferred_element_type=jnp.float32))
                s0 = (r + 1) * Wp2 + 1
                pool_ref[0, :, s0:s0 + W2] = h.astype(ACT_DTYPE)

    in_specs = [pl.BlockSpec((1, Ci, P), lambda n: (n, 0, 0)),
                pl.BlockSpec((1, T), lambda n: (0, 0)),
                pl.BlockSpec(tuple(w1.shape), lambda n: (0, 0, 0)),
                pl.BlockSpec(tuple(b1.shape), lambda n: (0, 0)),
                pl.BlockSpec(tuple(w2.shape), lambda n: (0, 0, 0)),
                pl.BlockSpec(tuple(b2.shape), lambda n: (0, 0))]
    operands = [x, mask, w1, b1, w2, b2]
    out_shape = jax.ShapeDtypeStruct((N, Cout, P), ACT_DTYPE)
    out_specs = pl.BlockSpec((1, Cout, P), lambda n: (n, 0, 0))
    out_bytes = N * Cout * P * 2
    if pool:
        in_specs += [pl.BlockSpec((W, W2), lambda n: (0, 0)),
                     pl.BlockSpec((W, W2), lambda n: (0, 0))]
        operands += [se_mat, so_mat]
        out_shape = (out_shape, jax.ShapeDtypeStruct((N, Cout, P2), ACT_DTYPE))
        out_specs = (out_specs, pl.BlockSpec((1, Cout, P2), lambda n: (n, 0, 0)))
        out_bytes += N * Cout * P2 * 2

    flops = 2 * 9 * T * (Cmid * Ci + Cout * Cmid) * N
    if pool:
        flops += 2 * 2 * Cout * W * W2 * H2 * N
    bytes_accessed = sum(int(np.prod(a.shape)) * a.dtype.itemsize
                         for a in operands) + out_bytes

    return pl.pallas_call(
        kernel,
        out_shape=out_shape,
        grid=(N,),
        in_specs=in_specs,
        out_specs=out_specs,
        scratch_shapes=[pltpu.VMEM((Cmid, P), ACT_DTYPE)],
        compiler_params=pltpu.CompilerParams(
            dimension_semantics=("parallel",),
            vmem_limit_bytes=VMEM_LIMIT_BYTES),
        cost_estimate=pl.CostEstimate(flops=int(flops), transcendentals=0,
                                      bytes_accessed=int(bytes_accessed)),
    )(*operands)


# ---------------------------------------------------------------------------
# fused decoder stage: bilinear x2 upsample + concat + DoubleConv (+ final 1x1)
# ---------------------------------------------------------------------------

def decode_stage(xlow, skip, w1, b1, w2, b2, Hl, Wl, final=None):
    """Fused: upsample(xlow) x2 (bilinear, align_corners=True) in VMEM,
    channel-concat with `skip` (virtual, via the conv weight layout),
    3x3 conv+ReLU -> 3x3 conv+ReLU, optionally followed by the fused final
    1x1 conv.  xlow: (N, Cx, (Hl+2)*(Wl+2)) bf16, skip at (2Hl, 2Wl)."""
    N, Cx, Pl = xlow.shape
    _, Cs, P = skip.shape
    H, W = 2 * Hl, 2 * Wl
    Wpl = Wl + 2
    Wp = W + 2
    assert Pl == (Hl + 2) * Wpl and P == (H + 2) * Wp
    t0 = Wp + 1
    T = H * Wp - 2
    Cmid = w1.shape[1]
    Cout = w2.shape[1]
    mask = _interior_mask(H, W)
    awp = _upsample_col_matrix_padded(Wl)          # (Wl, Wp) f32, zero borders
    rows = _upsample_row_coeffs(Hl)                # 2*Hl = H entries
    if final is not None:
        wf, bf = final                             # (Cf, Cout, 1), (Cf, 1, 1)
        Cf = wf.shape[0]

    def kernel(*refs):
        if final is not None:
            (xl_ref, sk_ref, mask_ref, awp_ref, w1_ref, b1_ref, w2_ref, b2_ref,
             wf_ref, bf_ref, out_ref, up_ref, wrow_ref, mid_ref) = refs
        else:
            (xl_ref, sk_ref, mask_ref, awp_ref, w1_ref, b1_ref, w2_ref, b2_ref,
             out_ref, up_ref, wrow_ref, mid_ref) = refs

        m = mask_ref[...]
        aw = awp_ref[...]

        # ---- bilinear x2 upsample of xlow, held entirely in VMEM scratch ----
        # width pass (per low-res row), staged in wrow scratch so vreg live
        # ranges stay bounded.  Output rows already carry their zero pads.
        # TODO(synk): replace the per-row width/height loops by slab-level
        # matmuls for large Hl (compile-time / MXU-push count).
        for y in range(Hl):
            r = xl_ref[0, :, (y + 1) * Wpl + 1:(y + 1) * Wpl + 1 + Wl]
            wr = jnp.dot(r, aw, preferred_element_type=jnp.float32)  # (Cx, Wp)
            wrow_ref[:, y * Wp:(y + 1) * Wp] = wr.astype(ACT_DTYPE)
        # height pass: 2-tap blends written as full padded rows so up_ref is
        # completely (re)defined each grid step (no persistent-zero assumption)
        up_ref[:, 0:Wp] = jnp.zeros((Cx, Wp), ACT_DTYPE)
        up_ref[:, (H + 1) * Wp:P] = jnp.zeros((Cx, Wp), ACT_DTYPE)
        for u, (i0, i1, a0, a1) in enumerate(rows):
            w0 = wrow_ref[:, i0 * Wp:(i0 + 1) * Wp].astype(jnp.float32)
            w1r = wrow_ref[:, i1 * Wp:(i1 + 1) * Wp].astype(jnp.float32)
            row = a0 * w0 + a1 * w1r                            # (Cx, Wp) f32
            up_ref[:, (u + 1) * Wp:(u + 2) * Wp] = row.astype(ACT_DTYPE)

        # ---- conv1 over the (virtual) channel concat [skip, upsampled] ----
        acc1 = _conv3x3([(lambda s: sk_ref[0, :, s:s + T], Cs),
                         (lambda s: up_ref[:, s:s + T], Cx)],
                        w1_ref, t0, Wp, T)
        acc1 = jnp.maximum(acc1 + b1_ref[...], 0.0) * m
        mid_ref[:, 0:t0] = jnp.zeros((Cmid, t0), ACT_DTYPE)
        mid_ref[:, t0 + T:P] = jnp.zeros((Cmid, P - t0 - T), ACT_DTYPE)
        mid_ref[:, t0:t0 + T] = acc1.astype(ACT_DTYPE)

        # ---- conv2 ----
        acc2 = _conv3x3([(lambda s: mid_ref[:, s:s + T], Cmid)],
                        w2_ref, t0, Wp, T)
        acc2 = jnp.maximum(acc2 + b2_ref[...], 0.0) * m          # (Cout, T) f32

        if final is None:
            out_ref[0, :, 0:t0] = jnp.zeros((Cout, t0), ACT_DTYPE)
            out_ref[0, :, t0 + T:P] = jnp.zeros((Cout, P - t0 - T), ACT_DTYPE)
            out_ref[0, :, t0:t0 + T] = acc2.astype(ACT_DTYPE)
        else:
            # fused final 1x1 conv: VPU broadcast-mul + sublane reduce per
            # class (num_clases is tiny; a matmul here would be M=1 on the MXU)
            out_ref[0, :, 0:t0] = jnp.zeros((Cf, t0), jnp.float32)
            out_ref[0, :, t0 + T:P] = jnp.zeros((Cf, P - t0 - T), jnp.float32)
            for j in range(Cf):
                cls = jnp.sum(wf_ref[j] * acc2, axis=0, keepdims=True)
                out_ref[0, j:j + 1, t0:t0 + T] = cls + bf_ref[j]

    in_specs = [pl.BlockSpec((1, Cx, Pl), lambda n: (n, 0, 0)),
                pl.BlockSpec((1, Cs, P), lambda n: (n, 0, 0)),
                pl.BlockSpec((1, T), lambda n: (0, 0)),
                pl.BlockSpec((Wl, Wp), lambda n: (0, 0)),
                pl.BlockSpec(tuple(w1.shape), lambda n: (0, 0, 0)),
                pl.BlockSpec(tuple(b1.shape), lambda n: (0, 0)),
                pl.BlockSpec(tuple(w2.shape), lambda n: (0, 0, 0)),
                pl.BlockSpec(tuple(b2.shape), lambda n: (0, 0))]
    operands = [xlow, skip, mask, awp, w1, b1, w2, b2]
    if final is None:
        out_shape = jax.ShapeDtypeStruct((N, Cout, P), ACT_DTYPE)
        out_specs = pl.BlockSpec((1, Cout, P), lambda n: (n, 0, 0))
        out_bytes = N * Cout * P * 2
    else:
        in_specs += [pl.BlockSpec(tuple(wf.shape), lambda n: (0, 0, 0)),
                     pl.BlockSpec(tuple(bf.shape), lambda n: (0, 0, 0))]
        operands += [wf, bf]
        out_shape = jax.ShapeDtypeStruct((N, Cf, P), jnp.float32)
        out_specs = pl.BlockSpec((1, Cf, P), lambda n: (n, 0, 0))
        out_bytes = N * Cf * P * 4

    flops = N * (2 * 9 * T * (Cmid * (Cs + Cx) + Cout * Cmid)
                 + 2 * Hl * Cx * Wl * Wp + 4 * H * Cx * Wp
                 + (2 * Cf * Cout * T if final is not None else 0))
    bytes_accessed = sum(int(np.prod(a.shape)) * a.dtype.itemsize
                         for a in operands) + out_bytes

    return pl.pallas_call(
        kernel,
        out_shape=out_shape,
        grid=(N,),
        in_specs=in_specs,
        out_specs=out_specs,
        scratch_shapes=[pltpu.VMEM((Cx, P), ACT_DTYPE),
                        pltpu.VMEM((Cx, Hl * Wp), ACT_DTYPE),
                        pltpu.VMEM((Cmid, P), ACT_DTYPE)],
        compiler_params=pltpu.CompilerParams(
            dimension_semantics=("parallel",),
            vmem_limit_bytes=VMEM_LIMIT_BYTES),
        cost_estimate=pl.CostEstimate(flops=int(flops), transcendentals=0,
                                      bytes_accessed=int(bytes_accessed)),
    )(*operands)


# ---------------------------------------------------------------------------
# parameters (deterministic synthetic init, PyTorch conv layout then repacked)
# ---------------------------------------------------------------------------

def _conv3_torch_init(key, cin, cout):
    k1, k2 = jax.random.split(key)
    w = jax.random.normal(k1, (cout, cin, 3, 3), jnp.float32) * (2.0 / (9 * cin)) ** 0.5
    b = 0.01 * jax.random.normal(k2, (cout,), jnp.float32)
    return w, b


def repack_conv3(w_oihw):
    """(Co, Ci, ky, kx) torch layout -> (3, Co, 3*Ci) bf16 with K = kx*Ci + ci,
    matching the dx-major-then-channel slab order used in _conv3x3."""
    co, ci, _, _ = w_oihw.shape
    return jnp.transpose(w_oihw, (2, 0, 3, 1)).reshape(3, co, 3 * ci).astype(ACT_DTYPE)


def init_unet_params(key, canles_entrada=1, num_clases=1, canles_base=8,
                     profundidade=2):
    keys = iter(jax.random.split(key, 4 * profundidade + 3))
    params = {"enc": [], "dec": []}
    c = canles_entrada
    for i in range(profundidade):
        co = canles_base * 2 ** i
        w1t, b1 = _conv3_torch_init(next(keys), c, co)
        w2t, b2 = _conv3_torch_init(next(keys), co, co)
        params["enc"].append((repack_conv3(w1t), b1.reshape(co, 1),
                              repack_conv3(w2t), b2.reshape(co, 1)))
        c = co
    w1t, b1 = _conv3_torch_init(next(keys), c, 2 * c)
    w2t, b2 = _conv3_torch_init(next(keys), 2 * c, 2 * c)
    params["bottom"] = (repack_conv3(w1t), b1.reshape(2 * c, 1),
                        repack_conv3(w2t), b2.reshape(2 * c, 1))
    c = 2 * c
    for i in reversed(range(profundidade)):
        cs = canles_base * 2 ** i
        # conv1 input channels ordered [skip (cs), upsampled (c)], matching
        # torch.cat([atallo, x], dim=1); the concat itself is never built.
        w1t, b1 = _conv3_torch_init(next(keys), cs + c, cs)
        w2t, b2 = _conv3_torch_init(next(keys), cs, cs)
        params["dec"].append((repack_conv3(w1t), b1.reshape(cs, 1),
                              repack_conv3(w2t), b2.reshape(cs, 1)))
        c = cs
    k1, k2 = jax.random.split(next(keys))
    wf = jax.random.normal(k1, (num_clases, canles_base, 1), jnp.float32) \
        * (2.0 / canles_base) ** 0.5
    bf = 0.01 * jax.random.normal(k2, (num_clases, 1, 1), jnp.float32)
    params["final"] = (wf, bf)
    return params


def to_padded_flat(x_nchw):
    N, C, H, W = x_nchw.shape
    xp = jnp.pad(x_nchw, ((0, 0), (0, 0), (1, 1), (1, 1)))
    return xp.reshape(N, C, (H + 2) * (W + 2))


# ---------------------------------------------------------------------------
# forward pass (matches UNet.forward; probabilidade_dropout=0 => no Dropout2d)
# ---------------------------------------------------------------------------

def unet_forward(params, x_nchw):
    N, _, H, W = x_nchw.shape
    x = to_padded_flat(x_nchw).astype(ACT_DTYPE)   # only jnp.pad of the forward
    h, w = H, W
    skips = []
    for (w1, b1, w2, b2) in params["enc"]:
        act, x = double_conv_stage(x, w1, b1, w2, b2, h, w, pool=True)
        skips.append((act, h, w))
        h, w = h // 2, w // 2
    w1, b1, w2, b2 = params["bottom"]
    x = double_conv_stage(x, w1, b1, w2, b2, h, w, pool=False)
    n_dec = len(params["dec"])
    for idx, ((w1, b1, w2, b2), (skip, hs, ws)) in enumerate(
            zip(params["dec"], reversed(skips))):
        final = params["final"] if idx == n_dec - 1 else None
        # TODO(synk): axusta_tamano() is undefined in the reference source; for
        # the even spatial sizes used here the x2-upsampled tensor already
        # matches the skip exactly, so it is the identity (and the channel
        # concat is fused into conv1 via the weight layout).
        x = decode_stage(x, skip, w1, b1, w2, b2, h, w, final=final)
        h, w = hs, ws
    Cf = params["final"][0].shape[0]
    y = x.reshape(N, Cf, h + 2, w + 2)[:, :, 1:h + 1, 1:w + 1]
    return y.astype(jnp.float32)


if __name__ == "__main__":
    key = jax.random.PRNGKey(0)
    pkey, xkey = jax.random.split(key)
    # small config: canles_entrada=1, num_clases=1, canles_base=8, profundidade=2
    params = init_unet_params(pkey, canles_entrada=1, num_clases=1,
                              canles_base=8, profundidade=2)
    x = jax.random.normal(xkey, (2, 1, 16, 16), jnp.float32)   # NCHW
    fwd = jax.jit(unet_forward)
    out = jax.block_until_ready(fwd(params, x))
    assert out.shape == (2, 1, 16, 16), out.shape
    assert bool(jnp.all(jnp.isfinite(out)))
    print("KERNEL_OK")
</pallas_src>

<mosaic_0001>
module attributes {stable_mosaic.version = 11 : i64} {
  func.func @kernel(%arg0: i32, %arg1: memref<1x16x36xbf16, #tpu.memory_space<vmem>>, %arg2: memref<1x22xf32, #tpu.memory_space<vmem>>, %arg3: memref<3x32x48xbf16, #tpu.memory_space<vmem>>, %arg4: memref<32x1xf32, #tpu.memory_space<vmem>>, %arg5: memref<3x32x96xbf16, #tpu.memory_space<vmem>>, %arg6: memref<32x1xf32, #tpu.memory_space<vmem>>, %arg7: memref<1x32x36xbf16, #tpu.memory_space<vmem>>, %arg8: memref<32x36xbf16, #tpu.memory_space<vmem>>) attributes {dimension_semantics = [#tpu.dimension_semantics<parallel>], iteration_bounds = array<i64: 2>, scalar_prefetch = 0 : i64, scratch_operands = 1 : i64, tpu.core_type = #tpu.core_type<tc>, window_params = [{transform_indices = @transform_0, window_bounds = array<i64: 1, 16, 36>}, {pipeline_mode = #tpu.pipeline_mode<synchronous>, transform_indices = @transform_1, window_bounds = array<i64: 1, 22>}, {pipeline_mode = #tpu.pipeline_mode<synchronous>, transform_indices = @transform_2, window_bounds = array<i64: 3, 32, 48>}, {pipeline_mode = #tpu.pipeline_mode<synchronous>, transform_indices = @transform_3, window_bounds = array<i64: 32, 1>}, {pipeline_mode = #tpu.pipeline_mode<synchronous>, transform_indices = @transform_4, window_bounds = array<i64: 3, 32, 96>}, {pipeline_mode = #tpu.pipeline_mode<synchronous>, transform_indices = @transform_5, window_bounds = array<i64: 32, 1>}, {transform_indices = @transform_6, window_bounds = array<i64: 1, 32, 36>}]} {
    %c0 = arith.constant 0 : index
    %c0_0 = arith.constant 0 : index
    %0 = vector.load %arg2[%c0, %c0_0] : memref<1x22xf32, #tpu.memory_space<vmem>>, vector<1x22xf32>
    %c0_1 = arith.constant 0 : index
    %c0_2 = arith.constant 0 : index
    %c0_3 = arith.constant 0 : index
    %1 = vector.load %arg3[%c0_1, %c0_2, %c0_3] : memref<3x32x48xbf16, #tpu.memory_space<vmem>>, vector<1x32x48xbf16>
    %2 = vector.shape_cast %1 : vector<1x32x48xbf16> to vector<32x48xbf16>
    %c0_4 = arith.constant 0 : index
    %c0_5 = arith.constant 0 : index
    %c0_6 = arith.constant 0 : index
    %3 = vector.load %arg1[%c0_4, %c0_5, %c0_6] : memref<1x16x36xbf16, #tpu.memory_space<vmem>>, vector<1x16x22xbf16>
    %4 = vector.shape_cast %3 : vector<1x16x22xbf16> to vector<16x22xbf16>
    %c0_7 = arith.constant 0 : index
    %c0_8 = arith.constant 0 : index
    %c1 = arith.constant 1 : index
    %5 = vector.load %arg1[%c0_7, %c0_8, %c1] : memref<1x16x36xbf16, #tpu.memory_space<vmem>>, vector<1x16x22xbf16>
    %6 = vector.shape_cast %5 : vector<1x16x22xbf16> to vector<16x22xbf16>
    %c0_9 = arith.constant 0 : index
    %c0_10 = arith.constant 0 : index
    %c2 = arith.constant 2 : index
    %7 = vector.load %arg1[%c0_9, %c0_10, %c2] : memref<1x16x36xbf16, #tpu.memory_space<vmem>>, vector<1x16x22xbf16>
    %8 = vector.shape_cast %7 : vector<1x16x22xbf16> to vector<16x22xbf16>
    %9 = tpu.concatenate %4, %6, %8 in 0 : vector<16x22xbf16>, vector<16x22xbf16>, vector<16x22xbf16> -> vector<48x22xbf16>
    %cst = arith.constant dense<0.000000e+00> : vector<32x22xf32>
    %10 = tpu.matmul %2, %9, %cst {dimension_numbers = #tpu.dot_dimension_numbers<[1], [0], [0], [1], [0, 0, 1, 1], [], []>} : vector<32x48xbf16>, vector<48x22xbf16>, vector<32x22xf32> -> vector<32x22xf32>
    %c1_11 = arith.constant 1 : index
    %c0_12 = arith.constant 0 : index
    %c0_13 = arith.constant 0 : index
    %11 = vector.load %arg3[%c1_11, %c0_12, %c0_13] : memref<3x32x48xbf16, #tpu.memory_space<vmem>>, vector<1x32x48xbf16>
    %12 = vector.shape_cast %11 : vector<1x32x48xbf16> to vector<32x48xbf16>
    %c0_14 = arith.constant 0 : index
    %c0_15 = arith.constant 0 : index
    %c6 = arith.constant 6 : index
    %13 = vector.load %arg1[%c0_14, %c0_15, %c6] : memref<1x16x36xbf16, #tpu.memory_space<vmem>>, vector<1x16x22xbf16>
    %14 = vector.shape_cast %13 : vector<1x16x22xbf16> to vector<16x22xbf16>
    %c0_16 = arith.constant 0 : index
    %c0_17 = arith.constant 0 : index
    %c7 = arith.constant 7 : index
    %15 = vector.load %arg1[%c0_16, %c0_17, %c7] : memref<1x16x36xbf16, #tpu.memory_space<vmem>>, vector<1x16x22xbf16>
    %16 = vector.shape_cast %15 : vector<1x16x22xbf16> to vector<16x22xbf16>
    %c0_18 = arith.constant 0 : index
    %c0_19 = arith.constant 0 : index
    %c8 = arith.constant 8 : index
    %17 = vector.load %arg1[%c0_18, %c0_19, %c8] : memref<1x16x36xbf16, #tpu.memory_space<vmem>>, vector<1x16x22xbf16>
    %18 = vector.shape_cast %17 : vector<1x16x22xbf16> to vector<16x22xbf16>
    %19 = tpu.concatenate %14, %16, %18 in 0 : vector<16x22xbf16>, vector<16x22xbf16>, vector<16x22xbf16> -> vector<48x22xbf16>
    %cst_20 = arith.constant dense<0.000000e+00> : vector<32x22xf32>
    %20 = tpu.matmul %12, %19, %cst_20 {dimension_numbers = #tpu.dot_dimension_numbers<[1], [0], [0], [1], [0, 0, 1, 1], [], []>} : vector<32x48xbf16>, vector<48x22xbf16>, vector<32x22xf32> -> vector<32x22xf32>
    %21 = arith.addf %10, %20 : vector<32x22xf32>
    %c2_21 = arith.constant 2 : index
    %c0_22 = arith.constant 0 : index
    %c0_23 = arith.constant 0 : index
    %22 = vector.load %arg3[%c2_21, %c0_22, %c0_23] : memref<3x32x48xbf16, #tpu.memory_space<vmem>>, vector<1x32x48xbf16>
    %23 = vector.shape_cast %22 : vector<1x32x48xbf16> to vector<32x48xbf16>
    %c0_24 = arith.constant 0 : index
    %c0_25 = arith.constant 0 : index
    %c12 = arith.constant 12 : index
    %24 = vector.load %arg1[%c0_24, %c0_25, %c12] : memref<1x16x36xbf16, #tpu.memory_space<vmem>>, vector<1x16x22xbf16>
    %25 = vector.shape_cast %24 : vector<1x16x22xbf16> to vector<16x22xbf16>
    %c0_26 = arith.constant 0 : index
    %c0_27 = arith.constant 0 : index
    %c13 = arith.constant 13 : index
    %26 = vector.load %arg1[%c0_26, %c0_27, %c13] : memref<1x16x36xbf16, #tpu.memory_space<vmem>>, vector<1x16x22xbf16>
    %27 = vector.shape_cast %26 : vector<1x16x22xbf16> to vector<16x22xbf16>
    %c0_28 = arith.constant 0 : index
    %c0_29 = arith.constant 0 : index
    %c14 = arith.constant 14 : index
    %28 = vector.load %arg1[%c0_28, %c0_29, %c14] : memref<1x16x36xbf16, #tpu.memory_space<vmem>>, vector<1x16x22xbf16>
    %29 = vector.shape_cast %28 : vector<1x16x22xbf16> to vector<16x22xbf16>
    %30 = tpu.concatenate %25, %27, %29 in 0 : vector<16x22xbf16>, vector<16x22xbf16>, vector<16x22xbf16> -> vector<48x22xbf16>
    %cst_30 = arith.constant dense<0.000000e+00> : vector<32x22xf32>
    %31 = tpu.matmul %23, %30, %cst_30 {dimension_numbers = #tpu.dot_dimension_numbers<[1], [0], [0], [1], [0, 0, 1, 1], [], []>} : vector<32x48xbf16>, vector<48x22xbf16>, vector<32x22xf32> -> vector<32x22xf32>
    %32 = arith.addf %21, %31 : vector<32x22xf32>
    %c0_31 = arith.constant 0 : index
    %c0_32 = arith.constant 0 : index
    %33 = vector.load %arg4[%c0_31, %c0_32] : memref<32x1xf32, #tpu.memory_space<vmem>>, vector<32x1xf32>
    %34 = vector.broadcast %33 : vector<32x1xf32> to vector<32x22xf32>
    %35 = arith.addf %32, %34 : vector<32x22xf32>
    %cst_33 = arith.constant 0.000000e+00 : f32
    %36 = vector.broadcast %cst_33 : f32 to vector<32x22xf32>
    %37 = arith.maximumf %35, %36 : vector<32x22xf32>
    %38 = vector.broadcast %0 : vector<1x22xf32> to vector<32x22xf32>
    %39 = arith.mulf %37, %38 : vector<32x22xf32>
    %cst_34 = arith.constant 0.000000e+00 : bf16
    %40 = vector.broadcast %cst_34 : bf16 to vector<32x7xbf16>
    %c0_35 = arith.constant 0 : index
    %c0_36 = arith.constant 0 : index
    %41 = vector.load %arg8[%c0_35, %c0_36] : memref<32x36xbf16, #tpu.memory_space<vmem>>, vector<32x7xbf16>
    tpu.vector_store %arg8[%c0_35, %c0_36], %40 {strides = array<i32>} : memref<32x36xbf16, #tpu.memory_space<vmem>>, vector<32x7xbf16>,
    %cst_37 = arith.constant 0.000000e+00 : bf16
    %42 = vector.broadcast %cst_37 : bf16 to vector<32x7xbf16>
    %c0_38 = arith.constant 0 : index
    %c29 = arith.constant 29 : index
    %43 = vector.load %arg8[%c0_38, %c29] : memref<32x36xbf16, #tpu.memory_space<vmem>>, vector<32x7xbf16>
    tpu.vector_store %arg8[%c0_38, %c29], %42 {strides = array<i32>} : memref<32x36xbf16, #tpu.memory_space<vmem>>, vector<32x7xbf16>,
    %44 = arith.truncf %39 : vector<32x22xf32> to vector<32x22xbf16>
    %c0_39 = arith.constant 0 : index
    %c7_40 = arith.constant 7 : index
    %45 = vector.load %arg8[%c0_39, %c7_40] : memref<32x36xbf16, #tpu.memory_space<vmem>>, vector<32x22xbf16>
    tpu.vector_store %arg8[%c0_39, %c7_40], %44 {strides = array<i32>} : memref<32x36xbf16, #tpu.memory_space<vmem>>, vector<32x22xbf16>,
    %c0_41 = arith.constant 0 : index
    %c0_42 = arith.constant 0 : index
    %c0_43 = arith.constant 0 : index
    %46 = vector.load %arg5[%c0_41, %c0_42, %c0_43] : memref<3x32x96xbf16, #tpu.memory_space<vmem>>, vector<1x32x96xbf16>
    %47 = vector.shape_cast %46 : vector<1x32x96xbf16> to vector<32x96xbf16>
    %c0_44 = arith.constant 0 : index
    %c0_45 = arith.constant 0 : index
    %48 = vector.load %arg8[%c0_44, %c0_45] : memref<32x36xbf16, #tpu.memory_space<vmem>>, vector<32x22xbf16>
    %c0_46 = arith.constant 0 : index
    %c1_47 = arith.constant 1 : index
    %49 = vector.load %arg8[%c0_46, %c1_47] : memref<32x36xbf16, #tpu.memory_space<vmem>>, vector<32x22xbf16>
    %c0_48 = arith.constant 0 : index
    %c2_49 = arith.constant 2 : index
    %50 = vector.load %arg8[%c0_48, %c2_49] : memref<32x36xbf16, #tpu.memory_space<vmem>>, vector<32x22xbf16>
    %51 = tpu.concatenate %48, %49, %50 in 0 : vector<32x22xbf16>, vector<32x22xbf16>, vector<32x22xbf16> -> vector<96x22xbf16>
    %cst_50 = arith.constant dense<0.000000e+00> : vector<32x22xf32>
    %52 = tpu.matmul %47, %51, %cst_50 {dimension_numbers = #tpu.dot_dimension_numbers<[1], [0], [0], [1], [0, 0, 1, 1], [], []>} : vector<32x96xbf16>, vector<96x22xbf16>, vector<32x22xf32> -> vector<32x22xf32>
    %c1_51 = arith.constant 1 : index
    %c0_52 = arith.constant 0 : index
    %c0_53 = arith.constant 0 : index
    %53 = vector.load %arg5[%c1_51, %c0_52, %c0_53] : memref<3x32x96xbf16, #tpu.memory_space<vmem>>, vector<1x32x96xbf16>
    %54 = vector.shape_cast %53 : vector<1x32x96xbf16> to vector<32x96xbf16>
    %c0_54 = arith.constant 0 : index
    %c6_55 = arith.constant 6 : index
    %55 = vector.load %arg8[%c0_54, %c6_55] : memref<32x36xbf16, #tpu.memory_space<vmem>>, vector<32x22xbf16>
    %c0_56 = arith.constant 0 : index
    %c7_57 = arith.constant 7 : index
    %56 = vector.load %arg8[%c0_56, %c7_57] : memref<32x36xbf16, #tpu.memory_space<vmem>>, vector<32x22xbf16>
    %c0_58 = arith.constant 0 : index
    %c8_59 = arith.constant 8 : index
    %57 = vector.load %arg8[%c0_58, %c8_59] : memref<32x36xbf16, #tpu.memory_space<vmem>>, vector<32x22xbf16>
    %58 = tpu.concatenate %55, %56, %57 in 0 : vector<32x22xbf16>, vector<32x22xbf16>, vector<32x22xbf16> -> vector<96x22xbf16>
    %cst_60 = arith.constant dense<0.000000e+00> : vector<32x22xf32>
    %59 = tpu.matmul %54, %58, %cst_60 {dimension_numbers = #tpu.dot_dimension_numbers<[1], [0], [0], [1], [0, 0, 1, 1], [], []>} : vector<32x96xbf16>, vector<96x22xbf16>, vector<32x22xf32> -> vector<32x22xf32>
    %60 = arith.addf %52, %59 : vector<32x22xf32>
    %c2_61 = arith.constant 2 : index
    %c0_62 = arith.constant 0 : index
    %c0_63 = arith.constant 0 : index
    %61 = vector.load %arg5[%c2_61, %c0_62, %c0_63] : memref<3x32x96xbf16, #tpu.memory_space<vmem>>, vector<1x32x96xbf16>
    %62 = vector.shape_cast %61 : vector<1x32x96xbf16> to vector<32x96xbf16>
    %c0_64 = arith.constant 0 : index
    %c12_65 = arith.constant 12 : index
    %63 = vector.load %arg8[%c0_64, %c12_65] : memref<32x36xbf16, #tpu.memory_space<vmem>>, vector<32x22xbf16>
    %c0_66 = arith.constant 0 : index
    %c13_67 = arith.constant 13 : index
    %64 = vector.load %arg8[%c0_66, %c13_67] : memref<32x36xbf16, #tpu.memory_space<vmem>>, vector<32x22xbf16>
    %c0_68 = arith.constant 0 : index
    %c14_69 = arith.constant 14 : index
    %65 = vector.load %arg8[%c0_68, %c14_69] : memref<32x36xbf16, #tpu.memory_space<vmem>>, vector<32x22xbf16>
    %66 = tpu.concatenate %63, %64, %65 in 0 : vector<32x22xbf16>, vector<32x22xbf16>, vector<32x22xbf16> -> vector<96x22xbf16>
    %cst_70 = arith.constant dense<0.000000e+00> : vector<32x22xf32>
    %67 = tpu.matmul %62, %66, %cst_70 {dimension_numbers = #tpu.dot_dimension_numbers<[1], [0], [0], [1], [0, 0, 1, 1], [], []>} : vector<32x96xbf16>, vector<96x22xbf16>, vector<32x22xf32> -> vector<32x22xf32>
    %68 = arith.addf %60, %67 : vector<32x22xf32>
    %c0_71 = arith.constant 0 : index
    %c0_72 = arith.constant 0 : index
    %69 = vector.load %arg6[%c0_71, %c0_72] : memref<32x1xf32, #tpu.memory_space<vmem>>, vector<32x1xf32>
    %70 = vector.broadcast %69 : vector<32x1xf32> to vector<32x22xf32>
    %71 = arith.addf %68, %70 : vector<32x22xf32>
    %cst_73 = arith.constant 0.000000e+00 : f32
    %72 = vector.broadcast %cst_73 : f32 to vector<32x22xf32>
    %73 = arith.maximumf %71, %72 : vector<32x22xf32>
    %74 = vector.broadcast %0 : vector<1x22xf32> to vector<32x22xf32>
    %75 = arith.mulf %73, %74 : vector<32x22xf32>
    %76 = arith.truncf %75 : vector<32x22xf32> to vector<32x22xbf16>
    %cst_74 = arith.constant 0.000000e+00 : bf16
    %77 = vector.broadcast %cst_74 : bf16 to vector<32x7xbf16>
    %c0_75 = arith.constant 0 : index
    %c0_76 = arith.constant 0 : index
    %c0_77 = arith.constant 0 : index
    %78 = vector.load %arg7[%c0_75, %c0_76, %c0_77] : memref<1x32x36xbf16, #tpu.memory_space<vmem>>, vector<1x32x7xbf16>
    %79 = vector.shape_cast %78 : vector<1x32x7xbf16> to vector<32x7xbf16>
    %80 = vector.shape_cast %77 : vector<32x7xbf16> to vector<1x32x7xbf16>
    tpu.vector_store %arg7[%c0_75, %c0_76, %c0_77], %80 {strides = array<i32>} : memref<1x32x36xbf16, #tpu.memory_space<vmem>>, vector<1x32x7xbf16>,
    %cst_78 = arith.constant 0.000000e+00 : bf16
    %81 = vector.broadcast %cst_78 : bf16 to vector<32x7xbf16>
    %c0_79 = arith.constant 0 : index
    %c0_80 = arith.constant 0 : index
    %c29_81 = arith.constant 29 : index
    %82 = vector.load %arg7[%c0_79, %c0_80, %c29_81] : memref<1x32x36xbf16, #tpu.memory_space<vmem>>, vector<1x32x7xbf16>
    %83 = vector.shape_cast %82 : vector<1x32x7xbf16> to vector<32x7xbf16>
    %84 = vector.shape_cast %81 : vector<32x7xbf16> to vector<1x32x7xbf16>
    tpu.vector_store %arg7[%c0_79, %c0_80, %c29_81], %84 {strides = array<i32>} : memref<1x32x36xbf16, #tpu.memory_space<vmem>>, vector<1x32x7xbf16>,
    %c0_82 = arith.constant 0 : index
    %c0_83 = arith.constant 0 : index
    %c7_84 = arith.constant 7 : index
    %85 = vector.load %arg7[%c0_82, %c0_83, %c7_84] : memref<1x32x36xbf16, #tpu.memory_space<vmem>>, vector<1x32x22xbf16>
    %86 = vector.shape_cast %85 : vector<1x32x22xbf16> to vector<32x22xbf16>
    %87 = vector.shape_cast %76 : vector<32x22xbf16> to vector<1x32x22xbf16>
    tpu.vector_store %arg7[%c0_82, %c0_83, %c7_84], %87 {strides = array<i32>} : memref<1x32x36xbf16, #tpu.memory_space<vmem>>, vector<1x32x22xbf16>,
    return
  }
  func.func @transform_0(%arg0: i32) -> (i32, i32, i32) {
    %c0_i32 = arith.constant 0 : i32
    %c0_i32_0 = arith.constant 0 : i32
    %c0_i32_1 = arith.constant 0 : i32
    return %arg0, %c0_i32, %c0_i32_0 : i32, i32, i32
  }
  func.func @transform_1(%arg0: i32) -> (i32, i32) {
    %c0_i32 = arith.constant 0 : i32
    %c0_i32_0 = arith.constant 0 : i32
    %c0_i32_1 = arith.constant 0 : i32
    return %c0_i32, %c0_i32_0 : i32, i32
  }
  func.func @transform_2(%arg0: i32) -> (i32, i32, i32) {
    %c0_i32 = arith.constant 0 : i32
    %c0_i32_0 = arith.constant 0 : i32
    %c0_i32_1 = arith.constant 0 : i32
    %c0_i32_2 = arith.constant 0 : i32
    return %c0_i32, %c0_i32_0, %c0_i32_1 : i32, i32, i32
  }
  func.func @transform_3(%arg0: i32) -> (i32, i32) {
    %c0_i32 = arith.constant 0 : i32
    %c0_i32_0 = arith.constant 0 : i32
    %c0_i32_1 = arith.constant 0 : i32
    return %c0_i32, %c0_i32_0 : i32, i32
  }
  func.func @transform_4(%arg0: i32) -> (i32, i32, i32) {
    %c0_i32 = arith.constant 0 : i32
    %c0_i32_0 = arith.constant 0 : i32
    %c0_i32_1 = arith.constant 0 : i32
    %c0_i32_2 = arith.constant 0 : i32
    return %c0_i32, %c0_i32_0, %c0_i32_1 : i32, i32, i32
  }
  func.func @transform_5(%arg0: i32) -> (i32, i32) {
    %c0_i32 = arith.constant 0 : i32
    %c0_i32_0 = arith.constant 0 : i32
    %c0_i32_1 = arith.constant 0 : i32
    return %c0_i32, %c0_i32_0 : i32, i32
  }
  func.func @transform_6(%arg0: i32) -> (i32, i32, i32) {
    %c0_i32 = arith.constant 0 : i32
    %c0_i32_0 = arith.constant 0 : i32
    %c0_i32_1 = arith.constant 0 : i32
    return %arg0, %c0_i32, %c0_i32_0 : i32, i32, i32
  }
}

module attributes {stable_mosaic.version = 11 : i64} {
  func.func @kernel(%arg0: i32, %arg1: memref<1x8x100xbf16, #tpu.memory_space<vmem>>, %arg2: memref<1x78xf32, #tpu.memory_space<vmem>>, %arg3: memref<3x16x24xbf16, #tpu.memory_space<vmem>>, %arg4: memref<16x1xf32, #tpu.memory_space<vmem>>, %arg5: memref<3x16x48xbf16, #tpu.memory_space<vmem>>, %arg6: memref<16x1xf32, #tpu.memory_space<vmem>>, %arg7: memref<8x4xbf16, #tpu.memory_space<vmem>>, %arg8: memref<8x4xbf16, #tpu.memory_space<vmem>>, %arg9: memref<1x16x100xbf16, #tpu.memory_space<vmem>>, %arg10: memref<1x16x36xbf16, #tpu.memory_space<vmem>>, %arg11: memref<16x100xbf16, #tpu.memory_space<vmem>>) attributes {dimension_semantics = [#tpu.dimension_semantics<parallel>], iteration_bounds = array<i64: 2>, scalar_prefetch = 0 : i64, scratch_operands = 1 : i64, tpu.core_type = #tpu.core_type<tc>, window_params = [{transform_indices = @transform_0, window_bounds = array<i64: 1, 8, 100>}, {pipeline_mode = #tpu.pipeline_mode<synchronous>, transform_indices = @transform_1, window_bounds = array<i64: 1, 78>}, {pipeline_mode = #tpu.pipeline_mode<synchronous>, transform_indices = @transform_2, window_bounds = array<i64: 3, 16, 24>}, {pipeline_mode = #tpu.pipeline_mode<synchronous>, transform_indices = @transform_3, window_bounds = array<i64: 16, 1>}, {pipeline_mode = #tpu.pipeline_mode<synchronous>, transform_indices = @transform_4, window_bounds = array<i64: 3, 16, 48>}, {pipeline_mode = #tpu.pipeline_mode<synchronous>, transform_indices = @transform_5, window_bounds = array<i64: 16, 1>}, {pipeline_mode = #tpu.pipeline_mode<synchronous>, transform_indices = @transform_6, window_bounds = array<i64: 8, 4>}, {pipeline_mode = #tpu.pipeline_mode<synchronous>, transform_indices = @transform_7, window_bounds = array<i64: 8, 4>}, {transform_indices = @transform_8, window_bounds = array<i64: 1, 16, 100>}, {transform_indices = @transform_9, window_bounds = array<i64: 1, 16, 36>}]} {
    %c0 = arith.constant 0 : index
    %c0_0 = arith.constant 0 : index
    %0 = vector.load %arg2[%c0, %c0_0] : memref<1x78xf32, #tpu.memory_space<vmem>>, vector<1x78xf32>
    %c0_1 = arith.constant 0 : index
    %c0_2 = arith.constant 0 : index
    %c0_3 = arith.constant 0 : index
    %1 = vector.load %arg3[%c0_1, %c0_2, %c0_3] : memref<3x16x24xbf16, #tpu.memory_space<vmem>>, vector<1x16x24xbf16>
    %2 = vector.shape_cast %1 : vector<1x16x24xbf16> to vector<16x24xbf16>
    %c0_4 = arith.constant 0 : index
    %c0_5 = arith.constant 0 : index
    %c0_6 = arith.constant 0 : index
    %3 = vector.load %arg1[%c0_4, %c0_5, %c0_6] : memref<1x8x100xbf16, #tpu.memory_space<vmem>>, vector<1x8x78xbf16>
    %4 = vector.shape_cast %3 : vector<1x8x78xbf16> to vector<8x78xbf16>
    %c0_7 = arith.constant 0 : index
    %c0_8 = arith.constant 0 : index
    %c1 = arith.constant 1 : index
    %5 = vector.load %arg1[%c0_7, %c0_8, %c1] : memref<1x8x100xbf16, #tpu.memory_space<vmem>>, vector<1x8x78xbf16>
    %6 = vector.shape_cast %5 : vector<1x8x78xbf16> to vector<8x78xbf16>
    %c0_9 = arith.constant 0 : index
    %c0_10 = arith.constant 0 : index
    %c2 = arith.constant 2 : index
    %7 = vector.load %arg1[%c0_9, %c0_10, %c2] : memref<1x8x100xbf16, #tpu.memory_space<vmem>>, vector<1x8x78xbf16>
    %8 = vector.shape_cast %7 : vector<1x8x78xbf16> to vector<8x78xbf16>
    %9 = tpu.concatenate %4, %6, %8 in 0 : vector<8x78xbf16>, vector<8x78xbf16>, vector<8x78xbf16> -> vector<24x78xbf16>
    %cst = arith.constant dense<0.000000e+00> : vector<16x78xf32>
    %10 = tpu.matmul %2, %9, %cst {dimension_numbers = #tpu.dot_dimension_numbers<[1], [0], [0], [1], [0, 0, 1, 1], [], []>} : vector<16x24xbf16>, vector<24x78xbf16>, vector<16x78xf32> -> vector<16x78xf32>
    %c1_11 = arith.constant 1 : index
    %c0_12 = arith.constant 0 : index
    %c0_13 = arith.constant 0 : index
    %11 = vector.load %arg3[%c1_11, %c0_12, %c0_13] : memref<3x16x24xbf16, #tpu.memory_space<vmem>>, vector<1x16x24xbf16>
    %12 = vector.shape_cast %11 : vector<1x16x24xbf16> to vector<16x24xbf16>
    %c0_14 = arith.constant 0 : index
    %c0_15 = arith.constant 0 : index
    %c10 = arith.constant 10 : index
    %13 = vector.load %arg1[%c0_14, %c0_15, %c10] : memref<1x8x100xbf16, #tpu.memory_space<vmem>>, vector<1x8x78xbf16>
    %14 = vector.shape_cast %13 : vector<1x8x78xbf16> to vector<8x78xbf16>
    %c0_16 = arith.constant 0 : index
    %c0_17 = arith.constant 0 : index
    %c11 = arith.constant 11 : index
    %15 = vector.load %arg1[%c0_16, %c0_17, %c11] : memref<1x8x100xbf16, #tpu.memory_space<vmem>>, vector<1x8x78xbf16>
    %16 = vector.shape_cast %15 : vector<1x8x78xbf16> to vector<8x78xbf16>
    %c0_18 = arith.constant 0 : index
    %c0_19 = arith.constant 0 : index
    %c12 = arith.constant 12 : index
    %17 = vector.load %arg1[%c0_18, %c0_19, %c12] : memref<1x8x100xbf16, #tpu.memory_space<vmem>>, vector<1x8x78xbf16>
    %18 = vector.shape_cast %17 : vector<1x8x78xbf16> to vector<8x78xbf16>
    %19 = tpu.concatenate %14, %16, %18 in 0 : vector<8x78xbf16>, vector<8x78xbf16>, vector<8x78xbf16> -> vector<24x78xbf16>
    %cst_20 = arith.constant dense<0.000000e+00> : vector<16x78xf32>
    %20 = tpu.matmul %12, %19, %cst_20 {dimension_numbers = #tpu.dot_dimension_numbers<[1], [0], [0], [1], [0, 0, 1, 1], [], []>} : vector<16x24xbf16>, vector<24x78xbf16>, vector<16x78xf32> -> vector<16x78xf32>
    %21 = arith.addf %10, %20 : vector<16x78xf32>
    %c2_21 = arith.constant 2 : index
    %c0_22 = arith.constant 0 : index
    %c0_23 = arith.constant 0 : index
    %22 = vector.load %arg3[%c2_21, %c0_22, %c0_23] : memref<3x16x24xbf16, #tpu.memory_space<vmem>>, vector<1x16x24xbf16>
    %23 = vector.shape_cast %22 : vector<1x16x24xbf16> to vector<16x24xbf16>
    %c0_24 = arith.constant 0 : index
    %c0_25 = arith.constant 0 : index
    %c20 = arith.constant 20 : index
    %24 = vector.load %arg1[%c0_24, %c0_25, %c20] : memref<1x8x100xbf16, #tpu.memory_space<vmem>>, vector<1x8x78xbf16>
    %25 = vector.shape_cast %24 : vector<1x8x78xbf16> to vector<8x78xbf16>
    %c0_26 = arith.constant 0 : index
    %c0_27 = arith.constant 0 : index
    %c21 = arith.constant 21 : index
    %26 = vector.load %arg1[%c0_26, %c0_27, %c21] : memref<1x8x100xbf16, #tpu.memory_space<vmem>>, vector<1x8x78xbf16>
    %27 = vector.shape_cast %26 : vector<1x8x78xbf16> to vector<8x78xbf16>
    %c0_28 = arith.constant 0 : index
    %c0_29 = arith.constant 0 : index
    %c22 = arith.constant 22 : index
    %28 = vector.load %arg1[%c0_28, %c0_29, %c22] : memref<1x8x100xbf16, #tpu.memory_space<vmem>>, vector<1x8x78xbf16>
    %29 = vector.shape_cast %28 : vector<1x8x78xbf16> to vector<8x78xbf16>
    %30 = tpu.concatenate %25, %27, %29 in 0 : vector<8x78xbf16>, vector<8x78xbf16>, vector<8x78xbf16> -> vector<24x78xbf16>
    %cst_30 = arith.constant dense<0.000000e+00> : vector<16x78xf32>
    %31 = tpu.matmul %23, %30, %cst_30 {dimension_numbers = #tpu.dot_dimension_numbers<[1], [0], [0], [1], [0, 0, 1, 1], [], []>} : vector<16x24xbf16>, vector<24x78xbf16>, vector<16x78xf32> -> vector<16x78xf32>
    %32 = arith.addf %21, %31 : vector<16x78xf32>
    %c0_31 = arith.constant 0 : index
    %c0_32 = arith.constant 0 : index
    %33 = vector.load %arg4[%c0_31, %c0_32] : memref<16x1xf32, #tpu.memory_space<vmem>>, vector<16x1xf32>
    %34 = vector.broadcast %33 : vector<16x1xf32> to vector<16x78xf32>
    %35 = arith.addf %32, %34 : vector<16x78xf32>
    %cst_33 = arith.constant 0.000000e+00 : f32
    %36 = vector.broadcast %cst_33 : f32 to vector<16x78xf32>
    %37 = arith.maximumf %35, %36 : vector<16x78xf32>
    %38 = vector.broadcast %0 : vector<1x78xf32> to vector<16x78xf32>
    %39 = arith.mulf %37, %38 : vector<16x78xf32>
    %cst_34 = arith.constant 0.000000e+00 : bf16
    %40 = vector.broadcast %cst_34 : bf16 to vector<16x11xbf16>
    %c0_35 = arith.constant 0 : index
    %c0_36 = arith.constant 0 : index
    %41 = vector.load %arg11[%c0_35, %c0_36] : memref<16x100xbf16, #tpu.memory_space<vmem>>, vector<16x11xbf16>
    tpu.vector_store %arg11[%c0_35, %c0_36], %40 {strides = array<i32>} : memref<16x100xbf16, #tpu.memory_space<vmem>>, vector<16x11xbf16>,
    %cst_37 = arith.constant 0.000000e+00 : bf16
    %42 = vector.broadcast %cst_37 : bf16 to vector<16x11xbf16>
    %c0_38 = arith.constant 0 : index
    %c89 = arith.constant 89 : index
    %43 = vector.load %arg11[%c0_38, %c89] : memref<16x100xbf16, #tpu.memory_space<vmem>>, vector<16x11xbf16>
    tpu.vector_store %arg11[%c0_38, %c89], %42 {strides = array<i32>} : memref<16x100xbf16, #tpu.memory_space<vmem>>, vector<16x11xbf16>,
    %44 = arith.truncf %39 : vector<16x78xf32> to vector<16x78xbf16>
    %c0_39 = arith.constant 0 : index
    %c11_40 = arith.constant 11 : index
    %45 = vector.load %arg11[%c0_39, %c11_40] : memref<16x100xbf16, #tpu.memory_space<vmem>>, vector<16x78xbf16>
    tpu.vector_store %arg11[%c0_39, %c11_40], %44 {strides = array<i32>} : memref<16x100xbf16, #tpu.memory_space<vmem>>, vector<16x78xbf16>,
    %c0_41 = arith.constant 0 : index
    %c0_42 = arith.constant 0 : index
    %c0_43 = arith.constant 0 : index
    %46 = vector.load %arg5[%c0_41, %c0_42, %c0_43] : memref<3x16x48xbf16, #tpu.memory_space<vmem>>, vector<1x16x48xbf16>
    %47 = vector.shape_cast %46 : vector<1x16x48xbf16> to vector<16x48xbf16>
    %c0_44 = arith.constant 0 : index
    %c0_45 = arith.constant 0 : index
    %48 = vector.load %arg11[%c0_44, %c0_45] : memref<16x100xbf16, #tpu.memory_space<vmem>>, vector<16x78xbf16>
    %c0_46 = arith.constant 0 : index
    %c1_47 = arith.constant 1 : index
    %49 = vector.load %arg11[%c0_46, %c1_47] : memref<16x100xbf16, #tpu.memory_space<vmem>>, vector<16x78xbf16>
    %c0_48 = arith.constant 0 : index
    %c2_49 = arith.constant 2 : index
    %50 = vector.load %arg11[%c0_48, %c2_49] : memref<16x100xbf16, #tpu.memory_space<vmem>>, vector<16x78xbf16>
    %51 = tpu.concatenate %48, %49, %50 in 0 : vector<16x78xbf16>, vector<16x78xbf16>, vector<16x78xbf16> -> vector<48x78xbf16>
    %cst_50 = arith.constant dense<0.000000e+00> : vector<16x78xf32>
    %52 = tpu.matmul %47, %51, %cst_50 {dimension_numbers = #tpu.dot_dimension_numbers<[1], [0], [0], [1], [0, 0, 1, 1], [], []>} : vector<16x48xbf16>, vector<48x78xbf16>, vector<16x78xf32> -> vector<16x78xf32>
    %c1_51 = arith.constant 1 : index
    %c0_52 = arith.constant 0 : index
    %c0_53 = arith.constant 0 : index
    %53 = vector.load %arg5[%c1_51, %c0_52, %c0_53] : memref<3x16x48xbf16, #tpu.memory_space<vmem>>, vector<1x16x48xbf16>
    %54 = vector.shape_cast %53 : vector<1x16x48xbf16> to vector<16x48xbf16>
    %c0_54 = arith.constant 0 : index
    %c10_55 = arith.constant 10 : index
    %55 = vector.load %arg11[%c0_54, %c10_55] : memref<16x100xbf16, #tpu.memory_space<vmem>>, vector<16x78xbf16>
    %c0_56 = arith.constant 0 : index
    %c11_57 = arith.constant 11 : index
    %56 = vector.load %arg11[%c0_56, %c11_57] : memref<16x100xbf16, #tpu.memory_space<vmem>>, vector<16x78xbf16>
    %c0_58 = arith.constant 0 : index
    %c12_59 = arith.constant 12 : index
    %57 = vector.load %arg11[%c0_58, %c12_59] : memref<16x100xbf16, #tpu.memory_space<vmem>>, vector<16x78xbf16>
    %58 = tpu.concatenate %55, %56, %57 in 0 : vector<16x78xbf16>, vector<16x78xbf16>, vector<16x78xbf16> -> vector<48x78xbf16>
    %cst_60 = arith.constant dense<0.000000e+00> : vector<16x78xf32>
    %59 = tpu.matmul %54, %58, %cst_60 {dimension_numbers = #tpu.dot_dimension_numbers<[1], [0], [0], [1], [0, 0, 1, 1], [], []>} : vector<16x48xbf16>, vector<48x78xbf16>, vector<16x78xf32> -> vector<16x78xf32>
    %60 = arith.addf %52, %59 : vector<16x78xf32>
    %c2_61 = arith.constant 2 : index
    %c0_62 = arith.constant 0 : index
    %c0_63 = arith.constant 0 : index
    %61 = vector.load %arg5[%c2_61, %c0_62, %c0_63] : memref<3x16x48xbf16, #tpu.memory_space<vmem>>, vector<1x16x48xbf16>
    %62 = vector.shape_cast %61 : vector<1x16x48xbf16> to vector<16x48xbf16>
    %c0_64 = arith.constant 0 : index
    %c20_65 = arith.constant 20 : index
    %63 = vector.load %arg11[%c0_64, %c20_65] : memref<16x100xbf16, #tpu.memory_space<vmem>>, vector<16x78xbf16>
    %c0_66 = arith.constant 0 : index
    %c21_67 = arith.constant 21 : index
    %64 = vector.load %arg11[%c0_66, %c21_67] : memref<16x100xbf16, #tpu.memory_space<vmem>>, vector<16x78xbf16>
    %c0_68 = arith.constant 0 : index
    %c22_69 = arith.constant 22 : index
    %65 = vector.load %arg11[%c0_68, %c22_69] : memref<16x100xbf16, #tpu.memory_space<vmem>>, vector<16x78xbf16>
    %66 = tpu.concatenate %63, %64, %65 in 0 : vector<16x78xbf16>, vector<16x78xbf16>, vector<16x78xbf16> -> vector<48x78xbf16>
    %cst_70 = arith.constant dense<0.000000e+00> : vector<16x78xf32>
    %67 = tpu.matmul %62, %66, %cst_70 {dimension_numbers = #tpu.dot_dimension_numbers<[1], [0], [0], [1], [0, 0, 1, 1], [], []>} : vector<16x48xbf16>, vector<48x78xbf16>, vector<16x78xf32> -> vector<16x78xf32>
    %68 = arith.addf %60, %67 : vector<16x78xf32>
    %c0_71 = arith.constant 0 : index
    %c0_72 = arith.constant 0 : index
    %69 = vector.load %arg6[%c0_71, %c0_72] : memref<16x1xf32, #tpu.memory_space<vmem>>, vector<16x1xf32>
    %70 = vector.broadcast %69 : vector<16x1xf32> to vector<16x78xf32>
    %71 = arith.addf %68, %70 : vector<16x78xf32>
    %cst_73 = arith.constant 0.000000e+00 : f32
    %72 = vector.broadcast %cst_73 : f32 to vector<16x78xf32>
    %73 = arith.maximumf %71, %72 : vector<16x78xf32>
    %74 = vector.broadcast %0 : vector<1x78xf32> to vector<16x78xf32>
    %75 = arith.mulf %73, %74 : vector<16x78xf32>
    %76 = arith.truncf %75 : vector<16x78xf32> to vector<16x78xbf16>
    %cst_74 = arith.constant 0.000000e+00 : bf16
    %77 = vector.broadcast %cst_74 : bf16 to vector<16x11xbf16>
    %c0_75 = arith.constant 0 : index
    %c0_76 = arith.constant 0 : index
    %c0_77 = arith.constant 0 : index
    %78 = vector.load %arg9[%c0_75, %c0_76, %c0_77] : memref<1x16x100xbf16, #tpu.memory_space<vmem>>, vector<1x16x11xbf16>
    %79 = vector.shape_cast %78 : vector<1x16x11xbf16> to vector<16x11xbf16>
    %80 = vector.shape_cast %77 : vector<16x11xbf16> to vector<1x16x11xbf16>
    tpu.vector_store %arg9[%c0_75, %c0_76, %c0_77], %80 {strides = array<i32>} : memref<1x16x100xbf16, #tpu.memory_space<vmem>>, vector<1x16x11xbf16>,
    %cst_78 = arith.constant 0.000000e+00 : bf16
    %81 = vector.broadcast %cst_78 : bf16 to vector<16x11xbf16>
    %c0_79 = arith.constant 0 : index
    %c0_80 = arith.constant 0 : index
    %c89_81 = arith.constant 89 : index
    %82 = vector.load %arg9[%c0_79, %c0_80, %c89_81] : memref<1x16x100xbf16, #tpu.memory_space<vmem>>, vector<1x16x11xbf16>
    %83 = vector.shape_cast %82 : vector<1x16x11xbf16> to vector<16x11xbf16>
    %84 = vector.shape_cast %81 : vector<16x11xbf16> to vector<1x16x11xbf16>
    tpu.vector_store %arg9[%c0_79, %c0_80, %c89_81], %84 {strides = array<i32>} : memref<1x16x100xbf16, #tpu.memory_space<vmem>>, vector<1x16x11xbf16>,
    %c0_82 = arith.constant 0 : index
    %c0_83 = arith.constant 0 : index
    %c11_84 = arith.constant 11 : index
    %85 = vector.load %arg9[%c0_82, %c0_83, %c11_84] : memref<1x16x100xbf16, #tpu.memory_space<vmem>>, vector<1x16x78xbf16>
    %86 = vector.shape_cast %85 : vector<1x16x78xbf16> to vector<16x78xbf16>
    %87 = vector.shape_cast %76 : vector<16x78xbf16> to vector<1x16x78xbf16>
    tpu.vector_store %arg9[%c0_82, %c0_83, %c11_84], %87 {strides = array<i32>} : memref<1x16x100xbf16, #tpu.memory_space<vmem>>, vector<1x16x78xbf16>,
    %c0_85 = arith.constant 0 : index
    %c0_86 = arith.constant 0 : index
    %88 = vector.load %arg7[%c0_85, %c0_86] : memref<8x4xbf16, #tpu.memory_space<vmem>>, vector<8x4xbf16>
    %c0_87 = arith.constant 0 : index
    %c0_88 = arith.constant 0 : index
    %89 = vector.load %arg8[%c0_87, %c0_88] : memref<8x4xbf16, #tpu.memory_space<vmem>>, vector<8x4xbf16>
    %cst_89 = arith.constant 0.000000e+00 : bf16
    %90 = vector.broadcast %cst_89 : bf16 to vector<1x16x36xbf16>
    %c0_90 = arith.constant 0 : index
    %c0_91 = arith.constant 0 : index
    %c0_92 = arith.constant 0 : index
    %91 = vector.load %arg10[%c0_90, %c0_91, %c0_92] : memref<1x16x36xbf16, #tpu.memory_space<vmem>>, vector<1x16x36xbf16>
    tpu.vector_store %arg10[%c0_90, %c0_91, %c0_92], %90 {strides = array<i32>} : memref<1x16x36xbf16, #tpu.memory_space<vmem>>, vector<1x16x36xbf16>,
    %92 = vector.extract_strided_slice %76 {offsets = [0, 0], sizes = [16, 8], strides = [1, 1]} : vector<16x78xbf16> to vector<16x8xbf16>
    %93 = vector.extract_strided_slice %76 {offsets = [0, 10], sizes = [16, 8], strides = [1, 1]} : vector<16x78xbf16> to vector<16x8xbf16>
    %94 = arith.maximumf %92, %93 : vector<16x8xbf16>
    %cst_93 = arith.constant dense<0.000000e+00> : vector<16x4xf32>
    %95 = tpu.matmul %94, %88, %cst_93 {dimension_numbers = #tpu.dot_dimension_numbers<[1], [0], [0], [1], [0, 0, 1, 1], [], []>} : vector<16x8xbf16>, vector<8x4xbf16>, vector<16x4xf32> -> vector<16x4xf32>
    %cst_94 = arith.constant dense<0.000000e+00> : vector<16x4xf32>
    %96 = tpu.matmul %94, %89, %cst_94 {dimension_numbers = #tpu.dot_dimension_numbers<[1], [0], [0], [1], [0, 0, 1, 1], [], []>} : vector<16x8xbf16>, vector<8x4xbf16>, vector<16x4xf32> -> vector<16x4xf32>
    %97 = arith.maximumf %95, %96 : vector<16x4xf32>
    %98 = arith.truncf %97 : vector<16x4xf32> to vector<16x4xbf16>
    %c0_95 = arith.constant 0 : index
    %c0_96 = arith.constant 0 : index
    %c7 = arith.constant 7 : index
    %99 = vector.load %arg10[%c0_95, %c0_96, %c7] : memref<1x16x36xbf16, #tpu.memory_space<vmem>>, vector<1x16x4xbf16>
    %100 = vector.shape_cast %99 : vector<1x16x4xbf16> to vector<16x4xbf16>
    %101 = vector.shape_cast %98 : vector<16x4xbf16> to vector<1x16x4xbf16>
    tpu.vector_store %arg10[%c0_95, %c0_96, %c7], %101 {strides = array<i32>} : memref<1x16x36xbf16, #tpu.memory_space<vmem>>, vector<1x16x4xbf16>,
    %102 = vector.extract_strided_slice %76 {offsets = [0, 20], sizes = [16, 8], strides = [1, 1]} : vector<16x78xbf16> to vector<16x8xbf16>
    %103 = vector.extract_strided_slice %76 {offsets = [0, 30], sizes = [16, 8], strides = [1, 1]} : vector<16x78xbf16> to vector<16x8xbf16>
    %104 = arith.maximumf %102, %103 : vector<16x8xbf16>
    %cst_97 = arith.constant dense<0.000000e+00> : vector<16x4xf32>
    %105 = tpu.matmul %104, %88, %cst_97 {dimension_numbers = #tpu.dot_dimension_numbers<[1], [0], [0], [1], [0, 0, 1, 1], [], []>} : vector<16x8xbf16>, vector<8x4xbf16>, vector<16x4xf32> -> vector<16x4xf32>
    %cst_98 = arith.constant dense<0.000000e+00> : vector<16x4xf32>
    %106 = tpu.matmul %104, %89, %cst_98 {dimension_numbers = #tpu.dot_dimension_numbers<[1], [0], [0], [1], [0, 0, 1, 1], [], []>} : vector<16x8xbf16>, vector<8x4xbf16>, vector<16x4xf32> -> vector<16x4xf32>
    %107 = arith.maximumf %105, %106 : vector<16x4xf32>
    %108 = arith.truncf %107 : vector<16x4xf32> to vector<16x4xbf16>
    %c0_99 = arith.constant 0 : index
    %c0_100 = arith.constant 0 : index
    %c13 = arith.constant 13 : index
    %109 = vector.load %arg10[%c0_99, %c0_100, %c13] : memref<1x16x36xbf16, #tpu.memory_space<vmem>>, vector<1x16x4xbf16>
    %110 = vector.shape_cast %109 : vector<1x16x4xbf16> to vector<16x4xbf16>
    %111 = vector.shape_cast %108 : vector<16x4xbf16> to vector<1x16x4xbf16>
    tpu.vector_store %arg10[%c0_99, %c0_100, %c13], %111 {strides = array<i32>} : memref<1x16x36xbf16, #tpu.memory_space<vmem>>, vector<1x16x4xbf16>,
    %112 = vector.extract_strided_slice %76 {offsets = [0, 40], sizes = [16, 8], strides = [1, 1]} : vector<16x78xbf16> to vector<16x8xbf16>
    %113 = vector.extract_strided_slice %76 {offsets = [0, 50], sizes = [16, 8], strides = [1, 1]} : vector<16x78xbf16> to vector<16x8xbf16>
    %114 = arith.maximumf %112, %113 : vector<16x8xbf16>
    %cst_101 = arith.constant dense<0.000000e+00> : vector<16x4xf32>
    %115 = tpu.matmul %114, %88, %cst_101 {dimension_numbers = #tpu.dot_dimension_numbers<[1], [0], [0], [1], [0, 0, 1, 1], [], []>} : vector<16x8xbf16>, vector<8x4xbf16>, vector<16x4xf32> -> vector<16x4xf32>
    %cst_102 = arith.constant dense<0.000000e+00> : vector<16x4xf32>
    %116 = tpu.matmul %114, %89, %cst_102 {dimension_numbers = #tpu.dot_dimension_numbers<[1], [0], [0], [1], [0, 0, 1, 1], [], []>} : vector<16x8xbf16>, vector<8x4xbf16>, vector<16x4xf32> -> vector<16x4xf32>
    %117 = arith.maximumf %115, %116 : vector<16x4xf32>
    %118 = arith.truncf %117 : vector<16x4xf32> to vector<16x4xbf16>
    %c0_103 = arith.constant 0 : index
    %c0_104 = arith.constant 0 : index
    %c19 = arith.constant 19 : index
    %119 = vector.load %arg10[%c0_103, %c0_104, %c19] : memref<1x16x36xbf16, #tpu.memory_space<vmem>>, vector<1x16x4xbf16>
    %120 = vector.shape_cast %119 : vector<1x16x4xbf16> to vector<16x4xbf16>
    %121 = vector.shape_cast %118 : vector<16x4xbf16> to vector<1x16x4xbf16>
    tpu.vector_store %arg10[%c0_103, %c0_104, %c19], %121 {strides = array<i32>} : memref<1x16x36xbf16, #tpu.memory_space<vmem>>, vector<1x16x4xbf16>,
    %122 = vector.extract_strided_slice %76 {offsets = [0, 60], sizes = [16, 8], strides = [1, 1]} : vector<16x78xbf16> to vector<16x8xbf16>
    %123 = vector.extract_strided_slice %76 {offsets = [0, 70], sizes = [16, 8], strides = [1, 1]} : vector<16x78xbf16> to vector<16x8xbf16>
    %124 = arith.maximumf %122, %123 : vector<16x8xbf16>
    %cst_105 = arith.constant dense<0.000000e+00> : vector<16x4xf32>
    %125 = tpu.matmul %124, %88, %cst_105 {dimension_numbers = #tpu.dot_dimension_numbers<[1], [0], [0], [1], [0, 0, 1, 1], [], []>} : vector<16x8xbf16>, vector<8x4xbf16>, vector<16x4xf32> -> vector<16x4xf32>
    %cst_106 = arith.constant dense<0.000000e+00> : vector<16x4xf32>
    %126 = tpu.matmul %124, %89, %cst_106 {dimension_numbers = #tpu.dot_dimension_numbers<[1], [0], [0], [1], [0, 0, 1, 1], [], []>} : vector<16x8xbf16>, vector<8x4xbf16>, vector<16x4xf32> -> vector<16x4xf32>
    %127 = arith.maximumf %125, %126 : vector<16x4xf32>
    %128 = arith.truncf %127 : vector<16x4xf32> to vector<16x4xbf16>
    %c0_107 = arith.constant 0 : index
    %c0_108 = arith.constant 0 : index
    %c25 = arith.constant 25 : index
    %129 = vector.load %arg10[%c0_107, %c0_108, %c25] : memref<1x16x36xbf16, #tpu.memory_space<vmem>>, vector<1x16x4xbf16>
    %130 = vector.shape_cast %129 : vector<1x16x4xbf16> to vector<16x4xbf16>
    %131 = vector.shape_cast %128 : vector<16x4xbf16> to vector<1x16x4xbf16>
    tpu.vector_store %arg10[%c0_107, %c0_108, %c25], %131 {strides = array<i32>} : memref<1x16x36xbf16, #tpu.memory_space<vmem>>, vector<1x16x4xbf16>,
    return
  }
  func.func @transform_0(%arg0: i32) -> (i32, i32, i32) {
    %c0_i32 = arith.constant 0 : i32
    %c0_i32_0 = arith.constant 0 : i32
    %c0_i32_1 = arith.constant 0 : i32
    return %arg0, %c0_i32, %c0_i32_0 : i32, i32, i32
  }
  func.func @transform_1(%arg0: i32) -> (i32, i32) {
    %c0_i32 = arith.constant 0 : i32
    %c0_i32_0 = arith.constant 0 : i32
    %c0_i32_1 = arith.constant 0 : i32
    return %c0_i32, %c0_i32_0 : i32, i32
  }
  func.func @transform_2(%arg0: i32) -> (i32, i32, i32) {
    %c0_i32 = arith.constant 0 : i32
    %c0_i32_0 = arith.constant 0 : i32
    %c0_i32_1 = arith.constant 0 : i32
    %c0_i32_2 = arith.constant 0 : i32
    return %c0_i32, %c0_i32_0, %c0_i32_1 : i32, i32, i32
  }
  func.func @transform_3(%arg0: i32) -> (i32, i32) {
    %c0_i32 = arith.constant 0 : i32
    %c0_i32_0 = arith.constant 0 : i32
    %c0_i32_1 = arith.constant 0 : i32
    return %c0_i32, %c0_i32_0 : i32, i32
  }
  func.func @transform_4(%arg0: i32) -> (i32, i32, i32) {
    %c0_i32 = arith.constant 0 : i32
    %c0_i32_0 = arith.constant 0 : i32
    %c0_i32_1 = arith.constant 0 : i32
    %c0_i32_2 = arith.constant 0 : i32
    return %c0_i32, %c0_i32_0, %c0_i32_1 : i32, i32, i32
  }
  func.func @transform_5(%arg0: i32) -> (i32, i32) {
    %c0_i32 = arith.constant 0 : i32
    %c0_i32_0 = arith.constant 0 : i32
    %c0_i32_1 = arith.constant 0 : i32
    return %c0_i32, %c0_i32_0 : i32, i32
  }
  func.func @transform_6(%arg0: i32) -> (i32, i32) {
    %c0_i32 = arith.constant 0 : i32
    %c0_i32_0 = arith.constant 0 : i32
    %c0_i32_1 = arith.constant 0 : i32
    return %c0_i32, %c0_i32_0 : i32, i32
  }
  func.func @transform_7(%arg0: i32) -> (i32, i32) {
    %c0_i32 = arith.constant 0 : i32
    %c0_i32_0 = arith.constant 0 : i32
    %c0_i32_1 = arith.constant 0 : i32
    return %c0_i32, %c0_i32_0 : i32, i32
  }
  func.func @transform_8(%arg0: i32) -> (i32, i32, i32) {
    %c0_i32 = arith.constant 0 : i32
    %c0_i32_0 = arith.constant 0 : i32
    %c0_i32_1 = arith.constant 0 : i32
    return %arg0, %c0_i32, %c0_i32_0 : i32, i32, i32
  }
  func.func @transform_9(%arg0: i32) -> (i32, i32, i32) {
    %c0_i32 = arith.constant 0 : i32
    %c0_i32_0 = arith.constant 0 : i32
    %c0_i32_1 = arith.constant 0 : i32
    return %arg0, %c0_i32, %c0_i32_0 : i32, i32, i32
  }
}

module attributes {stable_mosaic.version = 11 : i64} {
  func.func @kernel(%arg0: i32, %arg1: memref<1x1x324xbf16, #tpu.memory_space<vmem>>, %arg2: memref<1x286xf32, #tpu.memory_space<vmem>>, %arg3: memref<3x8x3xbf16, #tpu.memory_space<vmem>>, %arg4: memref<8x1xf32, #tpu.memory_space<vmem>>, %arg5: memref<3x8x24xbf16, #tpu.memory_space<vmem>>, %arg6: memref<8x1xf32, #tpu.memory_space<vmem>>, %arg7: memref<16x8xbf16, #tpu.memory_space<vmem>>, %arg8: memref<16x8xbf16, #tpu.memory_space<vmem>>, %arg9: memref<1x8x324xbf16, #tpu.memory_space<vmem>>, %arg10: memref<1x8x100xbf16, #tpu.memory_space<vmem>>, %arg11: memref<8x324xbf16, #tpu.memory_space<vmem>>) attributes {dimension_semantics = [#tpu.dimension_semantics<parallel>], iteration_bounds = array<i64: 2>, scalar_prefetch = 0 : i64, scratch_operands = 1 : i64, tpu.core_type = #tpu.core_type<tc>, window_params = [{transform_indices = @transform_0, window_bounds = array<i64: 1, 1, 324>}, {pipeline_mode = #tpu.pipeline_mode<synchronous>, transform_indices = @transform_1, window_bounds = array<i64: 1, 286>}, {pipeline_mode = #tpu.pipeline_mode<synchronous>, transform_indices = @transform_2, window_bounds = array<i64: 3, 8, 3>}, {pipeline_mode = #tpu.pipeline_mode<synchronous>, transform_indices = @transform_3, window_bounds = array<i64: 8, 1>}, {pipeline_mode = #tpu.pipeline_mode<synchronous>, transform_indices = @transform_4, window_bounds = array<i64: 3, 8, 24>}, {pipeline_mode = #tpu.pipeline_mode<synchronous>, transform_indices = @transform_5, window_bounds = array<i64: 8, 1>}, {pipeline_mode = #tpu.pipeline_mode<synchronous>, transform_indices = @transform_6, window_bounds = array<i64: 16, 8>}, {pipeline_mode = #tpu.pipeline_mode<synchronous>, transform_indices = @transform_7, window_bounds = array<i64: 16, 8>}, {transform_indices = @transform_8, window_bounds = array<i64: 1, 8, 324>}, {transform_indices = @transform_9, window_bounds = array<i64: 1, 8, 100>}]} {
    %c0 = arith.constant 0 : index
    %c0_0 = arith.constant 0 : index
    %0 = vector.load %arg2[%c0, %c0_0] : memref<1x286xf32, #tpu.memory_space<vmem>>, vector<1x286xf32>
    %c0_1 = arith.constant 0 : index
    %c0_2 = arith.constant 0 : index
    %c0_3 = arith.constant 0 : index
    %1 = vector.load %arg3[%c0_1, %c0_2, %c0_3] : memref<3x8x3xbf16, #tpu.memory_space<vmem>>, vector<1x8x3xbf16>
    %2 = vector.shape_cast %1 : vector<1x8x3xbf16> to vector<8x3xbf16>
    %c0_4 = arith.constant 0 : index
    %c0_5 = arith.constant 0 : index
    %c0_6 = arith.constant 0 : index
    %3 = vector.load %arg1[%c0_4, %c0_5, %c0_6] : memref<1x1x324xbf16, #tpu.memory_space<vmem>>, vector<1x1x286xbf16>
    %4 = vector.shape_cast %3 : vector<1x1x286xbf16> to vector<1x286xbf16>
    %5 = arith.extf %4 : vector<1x286xbf16> to vector<1x286xf32>
    %6 = vector.extract_strided_slice %2 {offsets = [0, 0], sizes = [8, 1], strides = [1, 1]} : vector<8x3xbf16> to vector<8x1xbf16>
    %7 = arith.extf %6 : vector<8x1xbf16> to vector<8x1xf32>
    %8 = vector.broadcast %7 : vector<8x1xf32> to vector<8x286xf32>
    %9 = vector.broadcast %5 : vector<1x286xf32> to vector<8x286xf32>
    %10 = arith.mulf %8, %9 : vector<8x286xf32>
    %c0_7 = arith.constant 0 : index
    %c0_8 = arith.constant 0 : index
    %c1 = arith.constant 1 : index
    %11 = vector.load %arg1[%c0_7, %c0_8, %c1] : memref<1x1x324xbf16, #tpu.memory_space<vmem>>, vector<1x1x286xbf16>
    %12 = vector.shape_cast %11 : vector<1x1x286xbf16> to vector<1x286xbf16>
    %13 = arith.extf %12 : vector<1x286xbf16> to vector<1x286xf32>
    %14 = vector.extract_strided_slice %2 {offsets = [0, 1], sizes = [8, 1], strides = [1, 1]} : vector<8x3xbf16> to vector<8x1xbf16>
    %15 = arith.extf %14 : vector<8x1xbf16> to vector<8x1xf32>
    %16 = vector.broadcast %15 : vector<8x1xf32> to vector<8x286xf32>
    %17 = vector.broadcast %13 : vector<1x286xf32> to vector<8x286xf32>
    %18 = arith.mulf %16, %17 : vector<8x286xf32>
    %19 = arith.addf %10, %18 : vector<8x286xf32>
    %c0_9 = arith.constant 0 : index
    %c0_10 = arith.constant 0 : index
    %c2 = arith.constant 2 : index
    %20 = vector.load %arg1[%c0_9, %c0_10, %c2] : memref<1x1x324xbf16, #tpu.memory_space<vmem>>, vector<1x1x286xbf16>
    %21 = vector.shape_cast %20 : vector<1x1x286xbf16> to vector<1x286xbf16>
    %22 = arith.extf %21 : vector<1x286xbf16> to vector<1x286xf32>
    %23 = vector.extract_strided_slice %2 {offsets = [0, 2], sizes = [8, 1], strides = [1, 1]} : vector<8x3xbf16> to vector<8x1xbf16>
    %24 = arith.extf %23 : vector<8x1xbf16> to vector<8x1xf32>
    %25 = vector.broadcast %24 : vector<8x1xf32> to vector<8x286xf32>
    %26 = vector.broadcast %22 : vector<1x286xf32> to vector<8x286xf32>
    %27 = arith.mulf %25, %26 : vector<8x286xf32>
    %28 = arith.addf %19, %27 : vector<8x286xf32>
    %c1_11 = arith.constant 1 : index
    %c0_12 = arith.constant 0 : index
    %c0_13 = arith.constant 0 : index
    %29 = vector.load %arg3[%c1_11, %c0_12, %c0_13] : memref<3x8x3xbf16, #tpu.memory_space<vmem>>, vector<1x8x3xbf16>
    %30 = vector.shape_cast %29 : vector<1x8x3xbf16> to vector<8x3xbf16>
    %c0_14 = arith.constant 0 : index
    %c0_15 = arith.constant 0 : index
    %c18 = arith.constant 18 : index
    %31 = vector.load %arg1[%c0_14, %c0_15, %c18] : memref<1x1x324xbf16, #tpu.memory_space<vmem>>, vector<1x1x286xbf16>
    %32 = vector.shape_cast %31 : vector<1x1x286xbf16> to vector<1x286xbf16>
    %33 = arith.extf %32 : vector<1x286xbf16> to vector<1x286xf32>
    %34 = vector.extract_strided_slice %30 {offsets = [0, 0], sizes = [8, 1], strides = [1, 1]} : vector<8x3xbf16> to vector<8x1xbf16>
    %35 = arith.extf %34 : vector<8x1xbf16> to vector<8x1xf32>
    %36 = vector.broadcast %35 : vector<8x1xf32> to vector<8x286xf32>
    %37 = vector.broadcast %33 : vector<1x286xf32> to vector<8x286xf32>
    %38 = arith.mulf %36, %37 : vector<8x286xf32>
    %c0_16 = arith.constant 0 : index
    %c0_17 = arith.constant 0 : index
    %c19 = arith.constant 19 : index
    %39 = vector.load %arg1[%c0_16, %c0_17, %c19] : memref<1x1x324xbf16, #tpu.memory_space<vmem>>, vector<1x1x286xbf16>
    %40 = vector.shape_cast %39 : vector<1x1x286xbf16> to vector<1x286xbf16>
    %41 = arith.extf %40 : vector<1x286xbf16> to vector<1x286xf32>
    %42 = vector.extract_strided_slice %30 {offsets = [0, 1], sizes = [8, 1], strides = [1, 1]} : vector<8x3xbf16> to vector<8x1xbf16>
    %43 = arith.extf %42 : vector<8x1xbf16> to vector<8x1xf32>
    %44 = vector.broadcast %43 : vector<8x1xf32> to vector<8x286xf32>
    %45 = vector.broadcast %41 : vector<1x286xf32> to vector<8x286xf32>
    %46 = arith.mulf %44, %45 : vector<8x286xf32>
    %47 = arith.addf %38, %46 : vector<8x286xf32>
    %c0_18 = arith.constant 0 : index
    %c0_19 = arith.constant 0 : index
    %c20 = arith.constant 20 : index
    %48 = vector.load %arg1[%c0_18, %c0_19, %c20] : memref<1x1x324xbf16, #tpu.memory_space<vmem>>, vector<1x1x286xbf16>
    %49 = vector.shape_cast %48 : vector<1x1x286xbf16> to vector<1x286xbf16>
    %50 = arith.extf %49 : vector<1x286xbf16> to vector<1x286xf32>
    %51 = vector.extract_strided_slice %30 {offsets = [0, 2], sizes = [8, 1], strides = [1, 1]} : vector<8x3xbf16> to vector<8x1xbf16>
    %52 = arith.extf %51 : vector<8x1xbf16> to vector<8x1xf32>
    %53 = vector.broadcast %52 : vector<8x1xf32> to vector<8x286xf32>
    %54 = vector.broadcast %50 : vector<1x286xf32> to vector<8x286xf32>
    %55 = arith.mulf %53, %54 : vector<8x286xf32>
    %56 = arith.addf %47, %55 : vector<8x286xf32>
    %57 = arith.addf %28, %56 : vector<8x286xf32>
    %c2_20 = arith.constant 2 : index
    %c0_21 = arith.constant 0 : index
    %c0_22 = arith.constant 0 : index
    %58 = vector.load %arg3[%c2_20, %c0_21, %c0_22] : memref<3x8x3xbf16, #tpu.memory_space<vmem>>, vector<1x8x3xbf16>
    %59 = vector.shape_cast %58 : vector<1x8x3xbf16> to vector<8x3xbf16>
    %c0_23 = arith.constant 0 : index
    %c0_24 = arith.constant 0 : index
    %c36 = arith.constant 36 : index
    %60 = vector.load %arg1[%c0_23, %c0_24, %c36] : memref<1x1x324xbf16, #tpu.memory_space<vmem>>, vector<1x1x286xbf16>
    %61 = vector.shape_cast %60 : vector<1x1x286xbf16> to vector<1x286xbf16>
    %62 = arith.extf %61 : vector<1x286xbf16> to vector<1x286xf32>
    %63 = vector.extract_strided_slice %59 {offsets = [0, 0], sizes = [8, 1], strides = [1, 1]} : vector<8x3xbf16> to vector<8x1xbf16>
    %64 = arith.extf %63 : vector<8x1xbf16> to vector<8x1xf32>
    %65 = vector.broadcast %64 : vector<8x1xf32> to vector<8x286xf32>
    %66 = vector.broadcast %62 : vector<1x286xf32> to vector<8x286xf32>
    %67 = arith.mulf %65, %66 : vector<8x286xf32>
    %c0_25 = arith.constant 0 : index
    %c0_26 = arith.constant 0 : index
    %c37 = arith.constant 37 : index
    %68 = vector.load %arg1[%c0_25, %c0_26, %c37] : memref<1x1x324xbf16, #tpu.memory_space<vmem>>, vector<1x1x286xbf16>
    %69 = vector.shape_cast %68 : vector<1x1x286xbf16> to vector<1x286xbf16>
    %70 = arith.extf %69 : vector<1x286xbf16> to vector<1x286xf32>
    %71 = vector.extract_strided_slice %59 {offsets = [0, 1], sizes = [8, 1], strides = [1, 1]} : vector<8x3xbf16> to vector<8x1xbf16>
    %72 = arith.extf %71 : vector<8x1xbf16> to vector<8x1xf32>
    %73 = vector.broadcast %72 : vector<8x1xf32> to vector<8x286xf32>
    %74 = vector.broadcast %70 : vector<1x286xf32> to vector<8x286xf32>
    %75 = arith.mulf %73, %74 : vector<8x286xf32>
    %76 = arith.addf %67, %75 : vector<8x286xf32>
    %c0_27 = arith.constant 0 : index
    %c0_28 = arith.constant 0 : index
    %c38 = arith.constant 38 : index
    %77 = vector.load %arg1[%c0_27, %c0_28, %c38] : memref<1x1x324xbf16, #tpu.memory_space<vmem>>, vector<1x1x286xbf16>
    %78 = vector.shape_cast %77 : vector<1x1x286xbf16> to vector<1x286xbf16>
    %79 = arith.extf %78 : vector<1x286xbf16> to vector<1x286xf32>
    %80 = vector.extract_strided_slice %59 {offsets = [0, 2], sizes = [8, 1], strides = [1, 1]} : vector<8x3xbf16> to vector<8x1xbf16>
    %81 = arith.extf %80 : vector<8x1xbf16> to vector<8x1xf32>
    %82 = vector.broadcast %81 : vector<8x1xf32> to vector<8x286xf32>
    %83 = vector.broadcast %79 : vector<1x286xf32> to vector<8x286xf32>
    %84 = arith.mulf %82, %83 : vector<8x286xf32>
    %85 = arith.addf %76, %84 : vector<8x286xf32>
    %86 = arith.addf %57, %85 : vector<8x286xf32>
    %c0_29 = arith.constant 0 : index
    %c0_30 = arith.constant 0 : index
    %87 = vector.load %arg4[%c0_29, %c0_30] : memref<8x1xf32, #tpu.memory_space<vmem>>, vector<8x1xf32>
    %88 = vector.broadcast %87 : vector<8x1xf32> to vector<8x286xf32>
    %89 = arith.addf %86, %88 : vector<8x286xf32>
    %cst = arith.constant 0.000000e+00 : f32
    %90 = vector.broadcast %cst : f32 to vector<8x286xf32>
    %91 = arith.maximumf %89, %90 : vector<8x286xf32>
    %92 = vector.broadcast %0 : vector<1x286xf32> to vector<8x286xf32>
    %93 = arith.mulf %91, %92 : vector<8x286xf32>
    %cst_31 = arith.constant 0.000000e+00 : bf16
    %94 = vector.broadcast %cst_31 : bf16 to vector<8x19xbf16>
    %c0_32 = arith.constant 0 : index
    %c0_33 = arith.constant 0 : index
    %95 = vector.load %arg11[%c0_32, %c0_33] : memref<8x324xbf16, #tpu.memory_space<vmem>>, vector<8x19xbf16>
    tpu.vector_store %arg11[%c0_32, %c0_33], %94 {strides = array<i32>} : memref<8x324xbf16, #tpu.memory_space<vmem>>, vector<8x19xbf16>,
    %cst_34 = arith.constant 0.000000e+00 : bf16
    %96 = vector.broadcast %cst_34 : bf16 to vector<8x19xbf16>
    %c0_35 = arith.constant 0 : index
    %c305 = arith.constant 305 : index
    %97 = vector.load %arg11[%c0_35, %c305] : memref<8x324xbf16, #tpu.memory_space<vmem>>, vector<8x19xbf16>
    tpu.vector_store %arg11[%c0_35, %c305], %96 {strides = array<i32>} : memref<8x324xbf16, #tpu.memory_space<vmem>>, vector<8x19xbf16>,
    %98 = arith.truncf %93 : vector<8x286xf32> to vector<8x286xbf16>
    %c0_36 = arith.constant 0 : index
    %c19_37 = arith.constant 19 : index
    %99 = vector.load %arg11[%c0_36, %c19_37] : memref<8x324xbf16, #tpu.memory_space<vmem>>, vector<8x286xbf16>
    tpu.vector_store %arg11[%c0_36, %c19_37], %98 {strides = array<i32>} : memref<8x324xbf16, #tpu.memory_space<vmem>>, vector<8x286xbf16>,
    %c0_38 = arith.constant 0 : index
    %c0_39 = arith.constant 0 : index
    %c0_40 = arith.constant 0 : index
    %100 = vector.load %arg5[%c0_38, %c0_39, %c0_40] : memref<3x8x24xbf16, #tpu.memory_space<vmem>>, vector<1x8x24xbf16>
    %101 = vector.shape_cast %100 : vector<1x8x24xbf16> to vector<8x24xbf16>
    %c0_41 = arith.constant 0 : index
    %c0_42 = arith.constant 0 : index
    %102 = vector.load %arg11[%c0_41, %c0_42] : memref<8x324xbf16, #tpu.memory_space<vmem>>, vector<8x286xbf16>
    %c0_43 = arith.constant 0 : index
    %c1_44 = arith.constant 1 : index
    %103 = vector.load %arg11[%c0_43, %c1_44] : memref<8x324xbf16, #tpu.memory_space<vmem>>, vector<8x286xbf16>
    %c0_45 = arith.constant 0 : index
    %c2_46 = arith.constant 2 : index
    %104 = vector.load %arg11[%c0_45, %c2_46] : memref<8x324xbf16, #tpu.memory_space<vmem>>, vector<8x286xbf16>
    %105 = tpu.concatenate %102, %103, %104 in 0 : vector<8x286xbf16>, vector<8x286xbf16>, vector<8x286xbf16> -> vector<24x286xbf16>
    %cst_47 = arith.constant dense<0.000000e+00> : vector<8x286xf32>
    %106 = tpu.matmul %101, %105, %cst_47 {dimension_numbers = #tpu.dot_dimension_numbers<[1], [0], [0], [1], [0, 0, 1, 1], [], []>} : vector<8x24xbf16>, vector<24x286xbf16>, vector<8x286xf32> -> vector<8x286xf32>
    %c1_48 = arith.constant 1 : index
    %c0_49 = arith.constant 0 : index
    %c0_50 = arith.constant 0 : index
    %107 = vector.load %arg5[%c1_48, %c0_49, %c0_50] : memref<3x8x24xbf16, #tpu.memory_space<vmem>>, vector<1x8x24xbf16>
    %108 = vector.shape_cast %107 : vector<1x8x24xbf16> to vector<8x24xbf16>
    %c0_51 = arith.constant 0 : index
    %c18_52 = arith.constant 18 : index
    %109 = vector.load %arg11[%c0_51, %c18_52] : memref<8x324xbf16, #tpu.memory_space<vmem>>, vector<8x286xbf16>
    %c0_53 = arith.constant 0 : index
    %c19_54 = arith.constant 19 : index
    %110 = vector.load %arg11[%c0_53, %c19_54] : memref<8x324xbf16, #tpu.memory_space<vmem>>, vector<8x286xbf16>
    %c0_55 = arith.constant 0 : index
    %c20_56 = arith.constant 20 : index
    %111 = vector.load %arg11[%c0_55, %c20_56] : memref<8x324xbf16, #tpu.memory_space<vmem>>, vector<8x286xbf16>
    %112 = tpu.concatenate %109, %110, %111 in 0 : vector<8x286xbf16>, vector<8x286xbf16>, vector<8x286xbf16> -> vector<24x286xbf16>
    %cst_57 = arith.constant dense<0.000000e+00> : vector<8x286xf32>
    %113 = tpu.matmul %108, %112, %cst_57 {dimension_numbers = #tpu.dot_dimension_numbers<[1], [0], [0], [1], [0, 0, 1, 1], [], []>} : vector<8x24xbf16>, vector<24x286xbf16>, vector<8x286xf32> -> vector<8x286xf32>
    %114 = arith.addf %106, %113 : vector<8x286xf32>
    %c2_58 = arith.constant 2 : index
    %c0_59 = arith.constant 0 : index
    %c0_60 = arith.constant 0 : index
    %115 = vector.load %arg5[%c2_58, %c0_59, %c0_60] : memref<3x8x24xbf16, #tpu.memory_space<vmem>>, vector<1x8x24xbf16>
    %116 = vector.shape_cast %115 : vector<1x8x24xbf16> to vector<8x24xbf16>
    %c0_61 = arith.constant 0 : index
    %c36_62 = arith.constant 36 : index
    %117 = vector.load %arg11[%c0_61, %c36_62] : memref<8x324xbf16, #tpu.memory_space<vmem>>, vector<8x286xbf16>
    %c0_63 = arith.constant 0 : index
    %c37_64 = arith.constant 37 : index
    %118 = vector.load %arg11[%c0_63, %c37_64] : memref<8x324xbf16, #tpu.memory_space<vmem>>, vector<8x286xbf16>
    %c0_65 = arith.constant 0 : index
    %c38_66 = arith.constant 38 : index
    %119 = vector.load %arg11[%c0_65, %c38_66] : memref<8x324xbf16, #tpu.memory_space<vmem>>, vector<8x286xbf16>
    %120 = tpu.concatenate %117, %118, %119 in 0 : vector<8x286xbf16>, vector<8x286xbf16>, vector<8x286xbf16> -> vector<24x286xbf16>
    %cst_67 = arith.constant dense<0.000000e+00> : vector<8x286xf32>
    %121 = tpu.matmul %116, %120, %cst_67 {dimension_numbers = #tpu.dot_dimension_numbers<[1], [0], [0], [1], [0, 0, 1, 1], [], []>} : vector<8x24xbf16>, vector<24x286xbf16>, vector<8x286xf32> -> vector<8x286xf32>
    %122 = arith.addf %114, %121 : vector<8x286xf32>
    %c0_68 = arith.constant 0 : index
    %c0_69 = arith.constant 0 : index
    %123 = vector.load %arg6[%c0_68, %c0_69] : memref<8x1xf32, #tpu.memory_space<vmem>>, vector<8x1xf32>
    %124 = vector.broadcast %123 : vector<8x1xf32> to vector<8x286xf32>
    %125 = arith.addf %122, %124 : vector<8x286xf32>
    %cst_70 = arith.constant 0.000000e+00 : f32
    %126 = vector.broadcast %cst_70 : f32 to vector<8x286xf32>
    %127 = arith.maximumf %125, %126 : vector<8x286xf32>
    %128 = vector.broadcast %0 : vector<1x286xf32> to vector<8x286xf32>
    %129 = arith.mulf %127, %128 : vector<8x286xf32>
    %130 = arith.truncf %129 : vector<8x286xf32> to vector<8x286xbf16>
    %cst_71 = arith.constant 0.000000e+00 : bf16
    %131 = vector.broadcast %cst_71 : bf16 to vector<8x19xbf16>
    %c0_72 = arith.constant 0 : index
    %c0_73 = arith.constant 0 : index
    %c0_74 = arith.constant 0 : index
    %132 = vector.load %arg9[%c0_72, %c0_73, %c0_74] : memref<1x8x324xbf16, #tpu.memory_space<vmem>>, vector<1x8x19xbf16>
    %133 = vector.shape_cast %132 : vector<1x8x19xbf16> to vector<8x19xbf16>
    %134 = vector.shape_cast %131 : vector<8x19xbf16> to vector<1x8x19xbf16>
    tpu.vector_store %arg9[%c0_72, %c0_73, %c0_74], %134 {strides = array<i32>} : memref<1x8x324xbf16, #tpu.memory_space<vmem>>, vector<1x8x19xbf16>,
    %cst_75 = arith.constant 0.000000e+00 : bf16
    %135 = vector.broadcast %cst_75 : bf16 to vector<8x19xbf16>
    %c0_76 = arith.constant 0 : index
    %c0_77 = arith.constant 0 : index
    %c305_78 = arith.constant 305 : index
    %136 = vector.load %arg9[%c0_76, %c0_77, %c305_78] : memref<1x8x324xbf16, #tpu.memory_space<vmem>>, vector<1x8x19xbf16>
    %137 = vector.shape_cast %136 : vector<1x8x19xbf16> to vector<8x19xbf16>
    %138 = vector.shape_cast %135 : vector<8x19xbf16> to vector<1x8x19xbf16>
    tpu.vector_store %arg9[%c0_76, %c0_77, %c305_78], %138 {strides = array<i32>} : memref<1x8x324xbf16, #tpu.memory_space<vmem>>, vector<1x8x19xbf16>,
    %c0_79 = arith.constant 0 : index
    %c0_80 = arith.constant 0 : index
    %c19_81 = arith.constant 19 : index
    %139 = vector.load %arg9[%c0_79, %c0_80, %c19_81] : memref<1x8x324xbf16, #tpu.memory_space<vmem>>, vector<1x8x286xbf16>
    %140 = vector.shape_cast %139 : vector<1x8x286xbf16> to vector<8x286xbf16>
    %141 = vector.shape_cast %130 : vector<8x286xbf16> to vector<1x8x286xbf16>
    tpu.vector_store %arg9[%c0_79, %c0_80, %c19_81], %141 {strides = array<i32>} : memref<1x8x324xbf16, #tpu.memory_space<vmem>>, vector<1x8x286xbf16>,
    %c0_82 = arith.constant 0 : index
    %c0_83 = arith.constant 0 : index
    %142 = vector.load %arg7[%c0_82, %c0_83] : memref<16x8xbf16, #tpu.memory_space<vmem>>, vector<16x8xbf16>
    %c0_84 = arith.constant 0 : index
    %c0_85 = arith.constant 0 : index
    %143 = vector.load %arg8[%c0_84, %c0_85] : memref<16x8xbf16, #tpu.memory_space<vmem>>, vector<16x8xbf16>
    %cst_86 = arith.constant 0.000000e+00 : bf16
    %144 = vector.broadcast %cst_86 : bf16 to vector<1x8x100xbf16>
    %c0_87 = arith.constant 0 : index
    %c0_88 = arith.constant 0 : index
    %c0_89 = arith.constant 0 : index
    %145 = vector.load %arg10[%c0_87, %c0_88, %c0_89] : memref<1x8x100xbf16, #tpu.memory_space<vmem>>, vector<1x8x100xbf16>
    tpu.vector_store %arg10[%c0_87, %c0_88, %c0_89], %144 {strides = array<i32>} : memref<1x8x100xbf16, #tpu.memory_space<vmem>>, vector<1x8x100xbf16>,
    %146 = vector.extract_strided_slice %130 {offsets = [0, 0], sizes = [8, 16], strides = [1, 1]} : vector<8x286xbf16> to vector<8x16xbf16>
    %147 = vector.extract_strided_slice %130 {offsets = [0, 18], sizes = [8, 16], strides = [1, 1]} : vector<8x286xbf16> to vector<8x16xbf16>
    %148 = arith.maximumf %146, %147 : vector<8x16xbf16>
    %cst_90 = arith.constant dense<0.000000e+00> : vector<8x8xf32>
    %149 = tpu.matmul %148, %142, %cst_90 {dimension_numbers = #tpu.dot_dimension_numbers<[1], [0], [0], [1], [0, 0, 1, 1], [], []>} : vector<8x16xbf16>, vector<16x8xbf16>, vector<8x8xf32> -> vector<8x8xf32>
    %cst_91 = arith.constant dense<0.000000e+00> : vector<8x8xf32>
    %150 = tpu.matmul %148, %143, %cst_91 {dimension_numbers = #tpu.dot_dimension_numbers<[1], [0], [0], [1], [0, 0, 1, 1], [], []>} : vector<8x16xbf16>, vector<16x8xbf16>, vector<8x8xf32> -> vector<8x8xf32>
    %151 = arith.maximumf %149, %150 : vector<8x8xf32>
    %152 = arith.truncf %151 : vector<8x8xf32> to vector<8x8xbf16>
    %c0_92 = arith.constant 0 : index
    %c0_93 = arith.constant 0 : index
    %c11 = arith.constant 11 : index
    %153 = vector.load %arg10[%c0_92, %c0_93, %c11] : memref<1x8x100xbf16, #tpu.memory_space<vmem>>, vector<1x8x8xbf16>
    %154 = vector.shape_cast %153 : vector<1x8x8xbf16> to vector<8x8xbf16>
    %155 = vector.shape_cast %152 : vector<8x8xbf16> to vector<1x8x8xbf16>
    tpu.vector_store %arg10[%c0_92, %c0_93, %c11], %155 {strides = array<i32>} : memref<1x8x100xbf16, #tpu.memory_space<vmem>>, vector<1x8x8xbf16>,
    %156 = vector.extract_strided_slice %130 {offsets = [0, 36], sizes = [8, 16], strides = [1, 1]} : vector<8x286xbf16> to vector<8x16xbf16>
    %157 = vector.extract_strided_slice %130 {offsets = [0, 54], sizes = [8, 16], strides = [1, 1]} : vector<8x286xbf16> to vector<8x16xbf16>
    %158 = arith.maximumf %156, %157 : vector<8x16xbf16>
    %cst_94 = arith.constant dense<0.000000e+00> : vector<8x8xf32>
    %159 = tpu.matmul %158, %142, %cst_94 {dimension_numbers = #tpu.dot_dimension_numbers<[1], [0], [0], [1], [0, 0, 1, 1], [], []>} : vector<8x16xbf16>, vector<16x8xbf16>, vector<8x8xf32> -> vector<8x8xf32>
    %cst_95 = arith.constant dense<0.000000e+00> : vector<8x8xf32>
    %160 = tpu.matmul %158, %143, %cst_95 {dimension_numbers = #tpu.dot_dimension_numbers<[1], [0], [0], [1], [0, 0, 1, 1], [], []>} : vector<8x16xbf16>, vector<16x8xbf16>, vector<8x8xf32> -> vector<8x8xf32>
    %161 = arith.maximumf %159, %160 : vector<8x8xf32>
    %162 = arith.truncf %161 : vector<8x8xf32> to vector<8x8xbf16>
    %c0_96 = arith.constant 0 : index
    %c0_97 = arith.constant 0 : index
    %c21 = arith.constant 21 : index
    %163 = vector.load %arg10[%c0_96, %c0_97, %c21] : memref<1x8x100xbf16, #tpu.memory_space<vmem>>, vector<1x8x8xbf16>
    %164 = vector.shape_cast %163 : vector<1x8x8xbf16> to vector<8x8xbf16>
    %165 = vector.shape_cast %162 : vector<8x8xbf16> to vector<1x8x8xbf16>
    tpu.vector_store %arg10[%c0_96, %c0_97, %c21], %165 {strides = array<i32>} : memref<1x8x100xbf16, #tpu.memory_space<vmem>>, vector<1x8x8xbf16>,
    %166 = vector.extract_strided_slice %130 {offsets = [0, 72], sizes = [8, 16], strides = [1, 1]} : vector<8x286xbf16> to vector<8x16xbf16>
    %167 = vector.extract_strided_slice %130 {offsets = [0, 90], sizes = [8, 16], strides = [1, 1]} : vector<8x286xbf16> to vector<8x16xbf16>
    %168 = arith.maximumf %166, %167 : vector<8x16xbf16>
    %cst_98 = arith.constant dense<0.000000e+00> : vector<8x8xf32>
    %169 = tpu.matmul %168, %142, %cst_98 {dimension_numbers = #tpu.dot_dimension_numbers<[1], [0], [0], [1], [0, 0, 1, 1], [], []>} : vector<8x16xbf16>, vector<16x8xbf16>, vector<8x8xf32> -> vector<8x8xf32>
    %cst_99 = arith.constant dense<0.000000e+00> : vector<8x8xf32>
    %170 = tpu.matmul %168, %143, %cst_99 {dimension_numbers = #tpu.dot_dimension_numbers<[1], [0], [0], [1], [0, 0, 1, 1], [], []>} : vector<8x16xbf16>, vector<16x8xbf16>, vector<8x8xf32> -> vector<8x8xf32>
    %171 = arith.maximumf %169, %170 : vector<8x8xf32>
    %172 = arith.truncf %171 : vector<8x8xf32> to vector<8x8xbf16>
    %c0_100 = arith.constant 0 : index
    %c0_101 = arith.constant 0 : index
    %c31 = arith.constant 31 : index
    %173 = vector.load %arg10[%c0_100, %c0_101, %c31] : memref<1x8x100xbf16, #tpu.memory_space<vmem>>, vector<1x8x8xbf16>
    %174 = vector.shape_cast %173 : vector<1x8x8xbf16> to vector<8x8xbf16>
    %175 = vector.shape_cast %172 : vector<8x8xbf16> to vector<1x8x8xbf16>
    tpu.vector_store %arg10[%c0_100, %c0_101, %c31], %175 {strides = array<i32>} : memref<1x8x100xbf16, #tpu.memory_space<vmem>>, vector<1x8x8xbf16>,
    %176 = vector.extract_strided_slice %130 {offsets = [0, 108], sizes = [8, 16], strides = [1, 1]} : vector<8x286xbf16> to vector<8x16xbf16>
    %177 = vector.extract_strided_slice %130 {offsets = [0, 126], sizes = [8, 16], strides = [1, 1]} : vector<8x286xbf16> to vector<8x16xbf16>
    %178 = arith.maximumf %176, %177 : vector<8x16xbf16>
    %cst_102 = arith.constant dense<0.000000e+00> : vector<8x8xf32>
    %179 = tpu.matmul %178, %142, %cst_102 {dimension_numbers = #tpu.dot_dimension_numbers<[1], [0], [0], [1], [0, 0, 1, 1], [], []>} : vector<8x16xbf16>, vector<16x8xbf16>, vector<8x8xf32> -> vector<8x8xf32>
    %cst_103 = arith.constant dense<0.000000e+00> : vector<8x8xf32>
    %180 = tpu.matmul %178, %143, %cst_103 {dimension_numbers = #tpu.dot_dimension_numbers<[1], [0], [0], [1], [0, 0, 1, 1], [], []>} : vector<8x16xbf16>, vector<16x8xbf16>, vector<8x8xf32> -> vector<8x8xf32>
    %181 = arith.maximumf %179, %180 : vector<8x8xf32>
    %182 = arith.truncf %181 : vector<8x8xf32> to vector<8x8xbf16>
    %c0_104 = arith.constant 0 : index
    %c0_105 = arith.constant 0 : index
    %c41 = arith.constant 41 : index
    %183 = vector.load %arg10[%c0_104, %c0_105, %c41] : memref<1x8x100xbf16, #tpu.memory_space<vmem>>, vector<1x8x8xbf16>
    %184 = vector.shape_cast %183 : vector<1x8x8xbf16> to vector<8x8xbf16>
    %185 = vector.shape_cast %182 : vector<8x8xbf16> to vector<1x8x8xbf16>
    tpu.vector_store %arg10[%c0_104, %c0_105, %c41], %185 {strides = array<i32>} : memref<1x8x100xbf16, #tpu.memory_space<vmem>>, vector<1x8x8xbf16>,
    %186 = vector.extract_strided_slice %130 {offsets = [0, 144], sizes = [8, 16], strides = [1, 1]} : vector<8x286xbf16> to vector<8x16xbf16>
    %187 = vector.extract_strided_slice %130 {offsets = [0, 162], sizes = [8, 16], strides = [1, 1]} : vector<8x286xbf16> to vector<8x16xbf16>
    %188 = arith.maximumf %186, %187 : vector<8x16xbf16>
    %cst_106 = arith.constant dense<0.000000e+00> : vector<8x8xf32>
    %189 = tpu.matmul %188, %142, %cst_106 {dimension_numbers = #tpu.dot_dimension_numbers<[1], [0], [0], [1], [0, 0, 1, 1], [], []>} : vector<8x16xbf16>, vector<16x8xbf16>, vector<8x8xf32> -> vector<8x8xf32>
    %cst_107 = arith.constant dense<0.000000e+00> : vector<8x8xf32>
    %190 = tpu.matmul %188, %143, %cst_107 {dimension_numbers = #tpu.dot_dimension_numbers<[1], [0], [0], [1], [0, 0, 1, 1], [], []>} : vector<8x16xbf16>, vector<16x8xbf16>, vector<8x8xf32> -> vector<8x8xf32>
    %191 = arith.maximumf %189, %190 : vector<8x8xf32>
    %192 = arith.truncf %191 : vector<8x8xf32> to vector<8x8xbf16>
    %c0_108 = arith.constant 0 : index
    %c0_109 = arith.constant 0 : index
    %c51 = arith.constant 51 : index
    %193 = vector.load %arg10[%c0_108, %c0_109, %c51] : memref<1x8x100xbf16, #tpu.memory_space<vmem>>, vector<1x8x8xbf16>
    %194 = vector.shape_cast %193 : vector<1x8x8xbf16> to vector<8x8xbf16>
    %195 = vector.shape_cast %192 : vector<8x8xbf16> to vector<1x8x8xbf16>
    tpu.vector_store %arg10[%c0_108, %c0_109, %c51], %195 {strides = array<i32>} : memref<1x8x100xbf16, #tpu.memory_space<vmem>>, vector<1x8x8xbf16>,
    %196 = vector.extract_strided_slice %130 {offsets = [0, 180], sizes = [8, 16], strides = [1, 1]} : vector<8x286xbf16> to vector<8x16xbf16>
    %197 = vector.extract_strided_slice %130 {offsets = [0, 198], sizes = [8, 16], strides = [1, 1]} : vector<8x286xbf16> to vector<8x16xbf16>
    %198 = arith.maximumf %196, %197 : vector<8x16xbf16>
    %cst_110 = arith.constant dense<0.000000e+00> : vector<8x8xf32>
    %199 = tpu.matmul %198, %142, %cst_110 {dimension_numbers = #tpu.dot_dimension_numbers<[1], [0], [0], [1], [0, 0, 1, 1], [], []>} : vector<8x16xbf16>, vector<16x8xbf16>, vector<8x8xf32> -> vector<8x8xf32>
    %cst_111 = arith.constant dense<0.000000e+00> : vector<8x8xf32>
    %200 = tpu.matmul %198, %143, %cst_111 {dimension_numbers = #tpu.dot_dimension_numbers<[1], [0], [0], [1], [0, 0, 1, 1], [], []>} : vector<8x16xbf16>, vector<16x8xbf16>, vector<8x8xf32> -> vector<8x8xf32>
    %201 = arith.maximumf %199, %200 : vector<8x8xf32>
    %202 = arith.truncf %201 : vector<8x8xf32> to vector<8x8xbf16>
    %c0_112 = arith.constant 0 : index
    %c0_113 = arith.constant 0 : index
    %c61 = arith.constant 61 : index
    %203 = vector.load %arg10[%c0_112, %c0_113, %c61] : memref<1x8x100xbf16, #tpu.memory_space<vmem>>, vector<1x8x8xbf16>
    %204 = vector.shape_cast %203 : vector<1x8x8xbf16> to vector<8x8xbf16>
    %205 = vector.shape_cast %202 : vector<8x8xbf16> to vector<1x8x8xbf16>
    tpu.vector_store %arg10[%c0_112, %c0_113, %c61], %205 {strides = array<i32>} : memref<1x8x100xbf16, #tpu.memory_space<vmem>>, vector<1x8x8xbf16>,
    %206 = vector.extract_strided_slice %130 {offsets = [0, 216], sizes = [8, 16], strides = [1, 1]} : vector<8x286xbf16> to vector<8x16xbf16>
    %207 = vector.extract_strided_slice %130 {offsets = [0, 234], sizes = [8, 16], strides = [1, 1]} : vector<8x286xbf16> to vector<8x16xbf16>
    %208 = arith.maximumf %206, %207 : vector<8x16xbf16>
    %cst_114 = arith.constant dense<0.000000e+00> : vector<8x8xf32>
    %209 = tpu.matmul %208, %142, %cst_114 {dimension_numbers = #tpu.dot_dimension_numbers<[1], [0], [0], [1], [0, 0, 1, 1], [], []>} : vector<8x16xbf16>, vector<16x8xbf16>, vector<8x8xf32> -> vector<8x8xf32>
    %cst_115 = arith.constant dense<0.000000e+00> : vector<8x8xf32>
    %210 = tpu.matmul %208, %143, %cst_115 {dimension_numbers = #tpu.dot_dimension_numbers<[1], [0], [0], [1], [0, 0, 1, 1], [], []>} : vector<8x16xbf16>, vector<16x8xbf16>, vector<8x8xf32> -> vector<8x8xf32>
    %211 = arith.maximumf %209, %210 : vector<8x8xf32>
    %212 = arith.truncf %211 : vector<8x8xf32> to vector<8x8xbf16>
    %c0_116 = arith.constant 0 : index
    %c0_117 = arith.constant 0 : index
    %c71 = arith.constant 71 : index
    %213 = vector.load %arg10[%c0_116, %c0_117, %c71] : memref<1x8x100xbf16, #tpu.memory_space<vmem>>, vector<1x8x8xbf16>
    %214 = vector.shape_cast %213 : vector<1x8x8xbf16> to vector<8x8xbf16>
    %215 = vector.shape_cast %212 : vector<8x8xbf16> to vector<1x8x8xbf16>
    tpu.vector_store %arg10[%c0_116, %c0_117, %c71], %215 {strides = array<i32>} : memref<1x8x100xbf16, #tpu.memory_space<vmem>>, vector<1x8x8xbf16>,
    %216 = vector.extract_strided_slice %130 {offsets = [0, 252], sizes = [8, 16], strides = [1, 1]} : vector<8x286xbf16> to vector<8x16xbf16>
    %217 = vector.extract_strided_slice %130 {offsets = [0, 270], sizes = [8, 16], strides = [1, 1]} : vector<8x286xbf16> to vector<8x16xbf16>
    %218 = arith.maximumf %216, %217 : vector<8x16xbf16>
    %cst_118 = arith.constant dense<0.000000e+00> : vector<8x8xf32>
    %219 = tpu.matmul %218, %142, %cst_118 {dimension_numbers = #tpu.dot_dimension_numbers<[1], [0], [0], [1], [0, 0, 1, 1], [], []>} : vector<8x16xbf16>, vector<16x8xbf16>, vector<8x8xf32> -> vector<8x8xf32>
    %cst_119 = arith.constant dense<0.000000e+00> : vector<8x8xf32>
    %220 = tpu.matmul %218, %143, %cst_119 {dimension_numbers = #tpu.dot_dimension_numbers<[1], [0], [0], [1], [0, 0, 1, 1], [], []>} : vector<8x16xbf16>, vector<16x8xbf16>, vector<8x8xf32> -> vector<8x8xf32>
    %221 = arith.maximumf %219, %220 : vector<8x8xf32>
    %222 = arith.truncf %221 : vector<8x8xf32> to vector<8x8xbf16>
    %c0_120 = arith.constant 0 : index
    %c0_121 = arith.constant 0 : index
    %c81 = arith.constant 81 : index
    %223 = vector.load %arg10[%c0_120, %c0_121, %c81] : memref<1x8x100xbf16, #tpu.memory_space<vmem>>, vector<1x8x8xbf16>
    %224 = vector.shape_cast %223 : vector<1x8x8xbf16> to vector<8x8xbf16>
    %225 = vector.shape_cast %222 : vector<8x8xbf16> to vector<1x8x8xbf16>
    tpu.vector_store %arg10[%c0_120, %c0_121, %c81], %225 {strides = array<i32>} : memref<1x8x100xbf16, #tpu.memory_space<vmem>>, vector<1x8x8xbf16>,
    return
  }
  func.func @transform_0(%arg0: i32) -> (i32, i32, i32) {
    %c0_i32 = arith.constant 0 : i32
    %c0_i32_0 = arith.constant 0 : i32
    %c0_i32_1 = arith.constant 0 : i32
    return %arg0, %c0_i32, %c0_i32_0 : i32, i32, i32
  }
  func.func @transform_1(%arg0: i32) -> (i32, i32) {
    %c0_i32 = arith.constant 0 : i32
    %c0_i32_0 = arith.constant 0 : i32
    %c0_i32_1 = arith.constant 0 : i32
    return %c0_i32, %c0_i32_0 : i32, i32
  }
  func.func @transform_2(%arg0: i32) -> (i32, i32, i32) {
    %c0_i32 = arith.constant 0 : i32
    %c0_i32_0 = arith.constant 0 : i32
    %c0_i32_1 = arith.constant 0 : i32
    %c0_i32_2 = arith.constant 0 : i32
    return %c0_i32, %c0_i32_0, %c0_i32_1 : i32, i32, i32
  }
  func.func @transform_3(%arg0: i32) -> (i32, i32) {
    %c0_i32 = arith.constant 0 : i32
    %c0_i32_0 = arith.constant 0 : i32
    %c0_i32_1 = arith.constant 0 : i32
    return %c0_i32, %c0_i32_0 : i32, i32
  }
  func.func @transform_4(%arg0: i32) -> (i32, i32, i32) {
    %c0_i32 = arith.constant 0 : i32
    %c0_i32_0 = arith.constant 0 : i32
    %c0_i32_1 = arith.constant 0 : i32
    %c0_i32_2 = arith.constant 0 : i32
    return %c0_i32, %c0_i32_0, %c0_i32_1 : i32, i32, i32
  }
  func.func @transform_5(%arg0: i32) -> (i32, i32) {
    %c0_i32 = arith.constant 0 : i32
    %c0_i32_0 = arith.constant 0 : i32
    %c0_i32_1 = arith.constant 0 : i32
    return %c0_i32, %c0_i32_0 : i32, i32
  }
  func.func @transform_6(%arg0: i32) -> (i32, i32) {
    %c0_i32 = arith.constant 0 : i32
    %c0_i32_0 = arith.constant 0 : i32
    %c0_i32_1 = arith.constant 0 : i32
    return %c0_i32, %c0_i32_0 : i32, i32
  }
  func.func @transform_7(%arg0: i32) -> (i32, i32) {
    %c0_i32 = arith.constant 0 : i32
    %c0_i32_0 = arith.constant 0 : i32
    %c0_i32_1 = arith.constant 0 : i32
    return %c0_i32, %c0_i32_0 : i32, i32
  }
  func.func @transform_8(%arg0: i32) -> (i32, i32, i32) {
    %c0_i32 = arith.constant 0 : i32
    %c0_i32_0 = arith.constant 0 : i32
    %c0_i32_1 = arith.constant 0 : i32
    return %arg0, %c0_i32, %c0_i32_0 : i32, i32, i32
  }
  func.func @transform_9(%arg0: i32) -> (i32, i32, i32) {
    %c0_i32 = arith.constant 0 : i32
    %c0_i32_0 = arith.constant 0 : i32
    %c0_i32_1 = arith.constant 0 : i32
    return %arg0, %c0_i32, %c0_i32_0 : i32, i32, i32
  }
}

module attributes {stable_mosaic.version = 11 : i64} {
  func.func @kernel(%arg0: i32, %arg1: memref<1x32x36xbf16, #tpu.memory_space<vmem>>, %arg2: memref<1x16x100xbf16, #tpu.memory_space<vmem>>, %arg3: memref<1x78xf32, #tpu.memory_space<vmem>>, %arg4: memref<4x10xf32, #tpu.memory_space<vmem>>, %arg5: memref<3x16x144xbf16, #tpu.memory_space<vmem>>, %arg6: memref<16x1xf32, #tpu.memory_space<vmem>>, %arg7: memref<3x16x48xbf16, #tpu.memory_space<vmem>>, %arg8: memref<16x1xf32, #tpu.memory_space<vmem>>, %arg9: memref<1x16x100xbf16, #tpu.memory_space<vmem>>, %arg10: memref<32x100xbf16, #tpu.memory_space<vmem>>, %arg11: memref<32x40xbf16, #tpu.memory_space<vmem>>, %arg12: memref<16x100xbf16, #tpu.memory_space<vmem>>) attributes {dimension_semantics = [#tpu.dimension_semantics<parallel>], iteration_bounds = array<i64: 2>, scalar_prefetch = 0 : i64, scratch_operands = 3 : i64, tpu.core_type = #tpu.core_type<tc>, window_params = [{transform_indices = @transform_0, window_bounds = array<i64: 1, 32, 36>}, {transform_indices = @transform_1, window_bounds = array<i64: 1, 16, 100>}, {pipeline_mode = #tpu.pipeline_mode<synchronous>, transform_indices = @transform_2, window_bounds = array<i64: 1, 78>}, {pipeline_mode = #tpu.pipeline_mode<synchronous>, transform_indices = @transform_3, window_bounds = array<i64: 4, 10>}, {pipeline_mode = #tpu.pipeline_mode<synchronous>, transform_indices = @transform_4, window_bounds = array<i64: 3, 16, 144>}, {pipeline_mode = #tpu.pipeline_mode<synchronous>, transform_indices = @transform_5, window_bounds = array<i64: 16, 1>}, {pipeline_mode = #tpu.pipeline_mode<synchronous>, transform_indices = @transform_6, window_bounds = array<i64: 3, 16, 48>}, {pipeline_mode = #tpu.pipeline_mode<synchronous>, transform_indices = @transform_7, window_bounds = array<i64: 16, 1>}, {transform_indices = @transform_8, window_bounds = array<i64: 1, 16, 100>}]} {
    %c0 = arith.constant 0 : index
    %c0_0 = arith.constant 0 : index
    %0 = vector.load %arg3[%c0, %c0_0] : memref<1x78xf32, #tpu.memory_space<vmem>>, vector<1x78xf32>
    %c0_1 = arith.constant 0 : index
    %c0_2 = arith.constant 0 : index
    %1 = vector.load %arg4[%c0_1, %c0_2] : memref<4x10xf32, #tpu.memory_space<vmem>>, vector<4x10xf32>
    %c0_3 = arith.constant 0 : index
    %c0_4 = arith.constant 0 : index
    %c7 = arith.constant 7 : index
    %2 = vector.load %arg1[%c0_3, %c0_4, %c7] : memref<1x32x36xbf16, #tpu.memory_space<vmem>>, vector<1x32x4xbf16>
    %3 = vector.shape_cast %2 : vector<1x32x4xbf16> to vector<32x4xbf16>
    %cst = arith.constant dense<0.000000e+00> : vector<32x10xf32>
    %4 = tpu.matmul %3, %1, %cst {dimension_numbers = #tpu.dot_dimension_numbers<[1], [0], [0], [1], [0, 0, 1, 1], [], []>} : vector<32x4xbf16>, vector<4x10xf32>, vector<32x10xf32> -> vector<32x10xf32>
    %5 = arith.truncf %4 : vector<32x10xf32> to vector<32x10xbf16>
    %c0_5 = arith.constant 0 : index
    %c0_6 = arith.constant 0 : index
    %6 = vector.load %arg11[%c0_5, %c0_6] : memref<32x40xbf16, #tpu.memory_space<vmem>>, vector<32x10xbf16>
    tpu.vector_store %arg11[%c0_5, %c0_6], %5 {strides = array<i32>} : memref<32x40xbf16, #tpu.memory_space<vmem>>, vector<32x10xbf16>,
    %c0_7 = arith.constant 0 : index
    %c0_8 = arith.constant 0 : index
    %c13 = arith.constant 13 : index
    %7 = vector.load %arg1[%c0_7, %c0_8, %c13] : memref<1x32x36xbf16, #tpu.memory_space<vmem>>, vector<1x32x4xbf16>
    %8 = vector.shape_cast %7 : vector<1x32x4xbf16> to vector<32x4xbf16>
    %cst_9 = arith.constant dense<0.000000e+00> : vector<32x10xf32>
    %9 = tpu.matmul %8, %1, %cst_9 {dimension_numbers = #tpu.dot_dimension_numbers<[1], [0], [0], [1], [0, 0, 1, 1], [], []>} : vector<32x4xbf16>, vector<4x10xf32>, vector<32x10xf32> -> vector<32x10xf32>
    %10 = arith.truncf %9 : vector<32x10xf32> to vector<32x10xbf16>
    %c0_10 = arith.constant 0 : index
    %c10 = arith.constant 10 : index
    %11 = vector.load %arg11[%c0_10, %c10] : memref<32x40xbf16, #tpu.memory_space<vmem>>, vector<32x10xbf16>
    tpu.vector_store %arg11[%c0_10, %c10], %10 {strides = array<i32>} : memref<32x40xbf16, #tpu.memory_space<vmem>>, vector<32x10xbf16>,
    %c0_11 = arith.constant 0 : index
    %c0_12 = arith.constant 0 : index
    %c19 = arith.constant 19 : index
    %12 = vector.load %arg1[%c0_11, %c0_12, %c19] : memref<1x32x36xbf16, #tpu.memory_space<vmem>>, vector<1x32x4xbf16>
    %13 = vector.shape_cast %12 : vector<1x32x4xbf16> to vector<32x4xbf16>
    %cst_13 = arith.constant dense<0.000000e+00> : vector<32x10xf32>
    %14 = tpu.matmul %13, %1, %cst_13 {dimension_numbers = #tpu.dot_dimension_numbers<[1], [0], [0], [1], [0, 0, 1, 1], [], []>} : vector<32x4xbf16>, vector<4x10xf32>, vector<32x10xf32> -> vector<32x10xf32>
    %15 = arith.truncf %14 : vector<32x10xf32> to vector<32x10xbf16>
    %c0_14 = arith.constant 0 : index
    %c20 = arith.constant 20 : index
    %16 = vector.load %arg11[%c0_14, %c20] : memref<32x40xbf16, #tpu.memory_space<vmem>>, vector<32x10xbf16>
    tpu.vector_store %arg11[%c0_14, %c20], %15 {strides = array<i32>} : memref<32x40xbf16, #tpu.memory_space<vmem>>, vector<32x10xbf16>,
    %c0_15 = arith.constant 0 : index
    %c0_16 = arith.constant 0 : index
    %c25 = arith.constant 25 : index
    %17 = vector.load %arg1[%c0_15, %c0_16, %c25] : memref<1x32x36xbf16, #tpu.memory_space<vmem>>, vector<1x32x4xbf16>
    %18 = vector.shape_cast %17 : vector<1x32x4xbf16> to vector<32x4xbf16>
    %cst_17 = arith.constant dense<0.000000e+00> : vector<32x10xf32>
    %19 = tpu.matmul %18, %1, %cst_17 {dimension_numbers = #tpu.dot_dimension_numbers<[1], [0], [0], [1], [0, 0, 1, 1], [], []>} : vector<32x4xbf16>, vector<4x10xf32>, vector<32x10xf32> -> vector<32x10xf32>
    %20 = arith.truncf %19 : vector<32x10xf32> to vector<32x10xbf16>
    %c0_18 = arith.constant 0 : index
    %c30 = arith.constant 30 : index
    %21 = vector.load %arg11[%c0_18, %c30] : memref<32x40xbf16, #tpu.memory_space<vmem>>, vector<32x10xbf16>
    tpu.vector_store %arg11[%c0_18, %c30], %20 {strides = array<i32>} : memref<32x40xbf16, #tpu.memory_space<vmem>>, vector<32x10xbf16>,
    %cst_19 = arith.constant 0.000000e+00 : bf16
    %22 = vector.broadcast %cst_19 : bf16 to vector<32x10xbf16>
    %c0_20 = arith.constant 0 : index
    %c0_21 = arith.constant 0 : index
    %23 = vector.load %arg10[%c0_20, %c0_21] : memref<32x100xbf16, #tpu.memory_space<vmem>>, vector<32x10xbf16>
    tpu.vector_store %arg10[%c0_20, %c0_21], %22 {strides = array<i32>} : memref<32x100xbf16, #tpu.memory_space<vmem>>, vector<32x10xbf16>,
    %cst_22 = arith.constant 0.000000e+00 : bf16
    %24 = vector.broadcast %cst_22 : bf16 to vector<32x10xbf16>
    %c0_23 = arith.constant 0 : index
    %c90 = arith.constant 90 : index
    %25 = vector.load %arg10[%c0_23, %c90] : memref<32x100xbf16, #tpu.memory_space<vmem>>, vector<32x10xbf16>
    tpu.vector_store %arg10[%c0_23, %c90], %24 {strides = array<i32>} : memref<32x100xbf16, #tpu.memory_space<vmem>>, vector<32x10xbf16>,
    %c0_24 = arith.constant 0 : index
    %c0_25 = arith.constant 0 : index
    %26 = vector.load %arg11[%c0_24, %c0_25] : memref<32x40xbf16, #tpu.memory_space<vmem>>, vector<32x10xbf16>
    %27 = arith.extf %26 : vector<32x10xbf16> to vector<32x10xf32>
    %c0_26 = arith.constant 0 : index
    %c10_27 = arith.constant 10 : index
    %28 = vector.load %arg11[%c0_26, %c10_27] : memref<32x40xbf16, #tpu.memory_space<vmem>>, vector<32x10xbf16>
    %29 = arith.extf %28 : vector<32x10xbf16> to vector<32x10xf32>
    %cst_28 = arith.constant 1.000000e+00 : f32
    %30 = vector.broadcast %cst_28 : f32 to vector<32x10xf32>
    %31 = arith.mulf %30, %27 : vector<32x10xf32>
    %cst_29 = arith.constant 0.000000e+00 : f32
    %32 = vector.broadcast %cst_29 : f32 to vector<32x10xf32>
    %33 = arith.mulf %32, %29 : vector<32x10xf32>
    %34 = arith.addf %31, %33 : vector<32x10xf32>
    %35 = arith.truncf %34 : vector<32x10xf32> to vector<32x10xbf16>
    %c0_30 = arith.constant 0 : index
    %c10_31 = arith.constant 10 : index
    %36 = vector.load %arg10[%c0_30, %c10_31] : memref<32x100xbf16, #tpu.memory_space<vmem>>, vector<32x10xbf16>
    tpu.vector_store %arg10[%c0_30, %c10_31], %35 {strides = array<i32>} : memref<32x100xbf16, #tpu.memory_space<vmem>>, vector<32x10xbf16>,
    %c0_32 = arith.constant 0 : index
    %c0_33 = arith.constant 0 : index
    %37 = vector.load %arg11[%c0_32, %c0_33] : memref<32x40xbf16, #tpu.memory_space<vmem>>, vector<32x10xbf16>
    %38 = arith.extf %37 : vector<32x10xbf16> to vector<32x10xf32>
    %c0_34 = arith.constant 0 : index
    %c10_35 = arith.constant 10 : index
    %39 = vector.load %arg11[%c0_34, %c10_35] : memref<32x40xbf16, #tpu.memory_space<vmem>>, vector<32x10xbf16>
    %40 = arith.extf %39 : vector<32x10xbf16> to vector<32x10xf32>
    %cst_36 = arith.constant 0.571428597 : f32
    %41 = vector.broadcast %cst_36 : f32 to vector<32x10xf32>
    %42 = arith.mulf %41, %38 : vector<32x10xf32>
    %cst_37 = arith.constant 0.428571433 : f32
    %43 = vector.broadcast %cst_37 : f32 to vector<32x10xf32>
    %44 = arith.mulf %43, %40 : vector<32x10xf32>
    %45 = arith.addf %42, %44 : vector<32x10xf32>
    %46 = arith.truncf %45 : vector<32x10xf32> to vector<32x10xbf16>
    %c0_38 = arith.constant 0 : index
    %c20_39 = arith.constant 20 : index
    %47 = vector.load %arg10[%c0_38, %c20_39] : memref<32x100xbf16, #tpu.memory_space<vmem>>, vector<32x10xbf16>
    tpu.vector_store %arg10[%c0_38, %c20_39], %46 {strides = array<i32>} : memref<32x100xbf16, #tpu.memory_space<vmem>>, vector<32x10xbf16>,
    %c0_40 = arith.constant 0 : index
    %c0_41 = arith.constant 0 : index
    %48 = vector.load %arg11[%c0_40, %c0_41] : memref<32x40xbf16, #tpu.memory_space<vmem>>, vector<32x10xbf16>
    %49 = arith.extf %48 : vector<32x10xbf16> to vector<32x10xf32>
    %c0_42 = arith.constant 0 : index
    %c10_43 = arith.constant 10 : index
    %50 = vector.load %arg11[%c0_42, %c10_43] : memref<32x40xbf16, #tpu.memory_space<vmem>>, vector<32x10xbf16>
    %51 = arith.extf %50 : vector<32x10xbf16> to vector<32x10xf32>
    %cst_44 = arith.constant 0.142857149 : f32
    %52 = vector.broadcast %cst_44 : f32 to vector<32x10xf32>
    %53 = arith.mulf %52, %49 : vector<32x10xf32>
    %cst_45 = arith.constant 0.857142865 : f32
    %54 = vector.broadcast %cst_45 : f32 to vector<32x10xf32>
    %55 = arith.mulf %54, %51 : vector<32x10xf32>
    %56 = arith.addf %53, %55 : vector<32x10xf32>
    %57 = arith.truncf %56 : vector<32x10xf32> to vector<32x10xbf16>
    %c0_46 = arith.constant 0 : index
    %c30_47 = arith.constant 30 : index
    %58 = vector.load %arg10[%c0_46, %c30_47] : memref<32x100xbf16, #tpu.memory_space<vmem>>, vector<32x10xbf16>
    tpu.vector_store %arg10[%c0_46, %c30_47], %57 {strides = array<i32>} : memref<32x100xbf16, #tpu.memory_space<vmem>>, vector<32x10xbf16>,
    %c0_48 = arith.constant 0 : index
    %c10_49 = arith.constant 10 : index
    %59 = vector.load %arg11[%c0_48, %c10_49] : memref<32x40xbf16, #tpu.memory_space<vmem>>, vector<32x10xbf16>
    %60 = arith.extf %59 : vector<32x10xbf16> to vector<32x10xf32>
    %c0_50 = arith.constant 0 : index
    %c20_51 = arith.constant 20 : index
    %61 = vector.load %arg11[%c0_50, %c20_51] : memref<32x40xbf16, #tpu.memory_space<vmem>>, vector<32x10xbf16>
    %62 = arith.extf %61 : vector<32x10xbf16> to vector<32x10xf32>
    %cst_52 = arith.constant 0.714285731 : f32
    %63 = vector.broadcast %cst_52 : f32 to vector<32x10xf32>
    %64 = arith.mulf %63, %60 : vector<32x10xf32>
    %cst_53 = arith.constant 0.285714298 : f32
    %65 = vector.broadcast %cst_53 : f32 to vector<32x10xf32>
    %66 = arith.mulf %65, %62 : vector<32x10xf32>
    %67 = arith.addf %64, %66 : vector<32x10xf32>
    %68 = arith.truncf %67 : vector<32x10xf32> to vector<32x10xbf16>
    %c0_54 = arith.constant 0 : index
    %c40 = arith.constant 40 : index
    %69 = vector.load %arg10[%c0_54, %c40] : memref<32x100xbf16, #tpu.memory_space<vmem>>, vector<32x10xbf16>
    tpu.vector_store %arg10[%c0_54, %c40], %68 {strides = array<i32>} : memref<32x100xbf16, #tpu.memory_space<vmem>>, vector<32x10xbf16>,
    %c0_55 = arith.constant 0 : index
    %c10_56 = arith.constant 10 : index
    %70 = vector.load %arg11[%c0_55, %c10_56] : memref<32x40xbf16, #tpu.memory_space<vmem>>, vector<32x10xbf16>
    %71 = arith.extf %70 : vector<32x10xbf16> to vector<32x10xf32>
    %c0_57 = arith.constant 0 : index
    %c20_58 = arith.constant 20 : index
    %72 = vector.load %arg11[%c0_57, %c20_58] : memref<32x40xbf16, #tpu.memory_space<vmem>>, vector<32x10xbf16>
    %73 = arith.extf %72 : vector<32x10xbf16> to vector<32x10xf32>
    %cst_59 = arith.constant 0.285714298 : f32
    %74 = vector.broadcast %cst_59 : f32 to vector<32x10xf32>
    %75 = arith.mulf %74, %71 : vector<32x10xf32>
    %cst_60 = arith.constant 0.714285731 : f32
    %76 = vector.broadcast %cst_60 : f32 to vector<32x10xf32>
    %77 = arith.mulf %76, %73 : vector<32x10xf32>
    %78 = arith.addf %75, %77 : vector<32x10xf32>
    %79 = arith.truncf %78 : vector<32x10xf32> to vector<32x10xbf16>
    %c0_61 = arith.constant 0 : index
    %c50 = arith.constant 50 : index
    %80 = vector.load %arg10[%c0_61, %c50] : memref<32x100xbf16, #tpu.memory_space<vmem>>, vector<32x10xbf16>
    tpu.vector_store %arg10[%c0_61, %c50], %79 {strides = array<i32>} : memref<32x100xbf16, #tpu.memory_space<vmem>>, vector<32x10xbf16>,
    %c0_62 = arith.constant 0 : index
    %c20_63 = arith.constant 20 : index
    %81 = vector.load %arg11[%c0_62, %c20_63] : memref<32x40xbf16, #tpu.memory_space<vmem>>, vector<32x10xbf16>
    %82 = arith.extf %81 : vector<32x10xbf16> to vector<32x10xf32>
    %c0_64 = arith.constant 0 : index
    %c30_65 = arith.constant 30 : index
    %83 = vector.load %arg11[%c0_64, %c30_65] : memref<32x40xbf16, #tpu.memory_space<vmem>>, vector<32x10xbf16>
    %84 = arith.extf %83 : vector<32x10xbf16> to vector<32x10xf32>
    %cst_66 = arith.constant 0.857142865 : f32
    %85 = vector.broadcast %cst_66 : f32 to vector<32x10xf32>
    %86 = arith.mulf %85, %82 : vector<32x10xf32>
    %cst_67 = arith.constant 0.142857149 : f32
    %87 = vector.broadcast %cst_67 : f32 to vector<32x10xf32>
    %88 = arith.mulf %87, %84 : vector<32x10xf32>
    %89 = arith.addf %86, %88 : vector<32x10xf32>
    %90 = arith.truncf %89 : vector<32x10xf32> to vector<32x10xbf16>
    %c0_68 = arith.constant 0 : index
    %c60 = arith.constant 60 : index
    %91 = vector.load %arg10[%c0_68, %c60] : memref<32x100xbf16, #tpu.memory_space<vmem>>, vector<32x10xbf16>
    tpu.vector_store %arg10[%c0_68, %c60], %90 {strides = array<i32>} : memref<32x100xbf16, #tpu.memory_space<vmem>>, vector<32x10xbf16>,
    %c0_69 = arith.constant 0 : index
    %c20_70 = arith.constant 20 : index
    %92 = vector.load %arg11[%c0_69, %c20_70] : memref<32x40xbf16, #tpu.memory_space<vmem>>, vector<32x10xbf16>
    %93 = arith.extf %92 : vector<32x10xbf16> to vector<32x10xf32>
    %c0_71 = arith.constant 0 : index
    %c30_72 = arith.constant 30 : index
    %94 = vector.load %arg11[%c0_71, %c30_72] : memref<32x40xbf16, #tpu.memory_space<vmem>>, vector<32x10xbf16>
    %95 = arith.extf %94 : vector<32x10xbf16> to vector<32x10xf32>
    %cst_73 = arith.constant 0.428571433 : f32
    %96 = vector.broadcast %cst_73 : f32 to vector<32x10xf32>
    %97 = arith.mulf %96, %93 : vector<32x10xf32>
    %cst_74 = arith.constant 0.571428597 : f32
    %98 = vector.broadcast %cst_74 : f32 to vector<32x10xf32>
    %99 = arith.mulf %98, %95 : vector<32x10xf32>
    %100 = arith.addf %97, %99 : vector<32x10xf32>
    %101 = arith.truncf %100 : vector<32x10xf32> to vector<32x10xbf16>
    %c0_75 = arith.constant 0 : index
    %c70 = arith.constant 70 : index
    %102 = vector.load %arg10[%c0_75, %c70] : memref<32x100xbf16, #tpu.memory_space<vmem>>, vector<32x10xbf16>
    tpu.vector_store %arg10[%c0_75, %c70], %101 {strides = array<i32>} : memref<32x100xbf16, #tpu.memory_space<vmem>>, vector<32x10xbf16>,
    %c0_76 = arith.constant 0 : index
    %c30_77 = arith.constant 30 : index
    %103 = vector.load %arg11[%c0_76, %c30_77] : memref<32x40xbf16, #tpu.memory_space<vmem>>, vector<32x10xbf16>
    %104 = arith.extf %103 : vector<32x10xbf16> to vector<32x10xf32>
    %c0_78 = arith.constant 0 : index
    %c30_79 = arith.constant 30 : index
    %105 = vector.load %arg11[%c0_78, %c30_79] : memref<32x40xbf16, #tpu.memory_space<vmem>>, vector<32x10xbf16>
    %106 = arith.extf %105 : vector<32x10xbf16> to vector<32x10xf32>
    %cst_80 = arith.constant 1.000000e+00 : f32
    %107 = vector.broadcast %cst_80 : f32 to vector<32x10xf32>
    %108 = arith.mulf %107, %104 : vector<32x10xf32>
    %cst_81 = arith.constant 0.000000e+00 : f32
    %109 = vector.broadcast %cst_81 : f32 to vector<32x10xf32>
    %110 = arith.mulf %109, %106 : vector<32x10xf32>
    %111 = arith.addf %108, %110 : vector<32x10xf32>
    %112 = arith.truncf %111 : vector<32x10xf32> to vector<32x10xbf16>
    %c0_82 = arith.constant 0 : index
    %c80 = arith.constant 80 : index
    %113 = vector.load %arg10[%c0_82, %c80] : memref<32x100xbf16, #tpu.memory_space<vmem>>, vector<32x10xbf16>
    tpu.vector_store %arg10[%c0_82, %c80], %112 {strides = array<i32>} : memref<32x100xbf16, #tpu.memory_space<vmem>>, vector<32x10xbf16>,
    %c0_83 = arith.constant 0 : index
    %c0_84 = arith.constant 0 : index
    %c0_85 = arith.constant 0 : index
    %114 = vector.load %arg5[%c0_83, %c0_84, %c0_85] : memref<3x16x144xbf16, #tpu.memory_space<vmem>>, vector<1x16x144xbf16>
    %115 = vector.shape_cast %114 : vector<1x16x144xbf16> to vector<16x144xbf16>
    %c0_86 = arith.constant 0 : index
    %c0_87 = arith.constant 0 : index
    %c0_88 = arith.constant 0 : index
    %116 = vector.load %arg2[%c0_86, %c0_87, %c0_88] : memref<1x16x100xbf16, #tpu.memory_space<vmem>>, vector<1x16x78xbf16>
    %117 = vector.shape_cast %116 : vector<1x16x78xbf16> to vector<16x78xbf16>
    %c0_89 = arith.constant 0 : index
    %c0_90 = arith.constant 0 : index
    %118 = vector.load %arg10[%c0_89, %c0_90] : memref<32x100xbf16, #tpu.memory_space<vmem>>, vector<32x78xbf16>
    %c0_91 = arith.constant 0 : index
    %c0_92 = arith.constant 0 : index
    %c1 = arith.constant 1 : index
    %119 = vector.load %arg2[%c0_91, %c0_92, %c1] : memref<1x16x100xbf16, #tpu.memory_space<vmem>>, vector<1x16x78xbf16>
    %120 = vector.shape_cast %119 : vector<1x16x78xbf16> to vector<16x78xbf16>
    %c0_93 = arith.constant 0 : index
    %c1_94 = arith.constant 1 : index
    %121 = vector.load %arg10[%c0_93, %c1_94] : memref<32x100xbf16, #tpu.memory_space<vmem>>, vector<32x78xbf16>
    %c0_95 = arith.constant 0 : index
    %c0_96 = arith.constant 0 : index
    %c2 = arith.constant 2 : index
    %122 = vector.load %arg2[%c0_95, %c0_96, %c2] : memref<1x16x100xbf16, #tpu.memory_space<vmem>>, vector<1x16x78xbf16>
    %123 = vector.shape_cast %122 : vector<1x16x78xbf16> to vector<16x78xbf16>
    %c0_97 = arith.constant 0 : index
    %c2_98 = arith.constant 2 : index
    %124 = vector.load %arg10[%c0_97, %c2_98] : memref<32x100xbf16, #tpu.memory_space<vmem>>, vector<32x78xbf16>
    %125 = tpu.concatenate %117, %118, %120, %121, %123, %124 in 0 : vector<16x78xbf16>, vector<32x78xbf16>, vector<16x78xbf16>, vector<32x78xbf16>, vector<16x78xbf16>, vector<32x78xbf16> -> vector<144x78xbf16>
    %cst_99 = arith.constant dense<0.000000e+00> : vector<16x78xf32>
    %126 = tpu.matmul %115, %125, %cst_99 {dimension_numbers = #tpu.dot_dimension_numbers<[1], [0], [0], [1], [0, 0, 1, 1], [], []>} : vector<16x144xbf16>, vector<144x78xbf16>, vector<16x78xf32> -> vector<16x78xf32>
    %c1_100 = arith.constant 1 : index
    %c0_101 = arith.constant 0 : index
    %c0_102 = arith.constant 0 : index
    %127 = vector.load %arg5[%c1_100, %c0_101, %c0_102] : memref<3x16x144xbf16, #tpu.memory_space<vmem>>, vector<1x16x144xbf16>
    %128 = vector.shape_cast %127 : vector<1x16x144xbf16> to vector<16x144xbf16>
    %c0_103 = arith.constant 0 : index
    %c0_104 = arith.constant 0 : index
    %c10_105 = arith.constant 10 : index
    %129 = vector.load %arg2[%c0_103, %c0_104, %c10_105] : memref<1x16x100xbf16, #tpu.memory_space<vmem>>, vector<1x16x78xbf16>
    %130 = vector.shape_cast %129 : vector<1x16x78xbf16> to vector<16x78xbf16>
    %c0_106 = arith.constant 0 : index
    %c10_107 = arith.constant 10 : index
    %131 = vector.load %arg10[%c0_106, %c10_107] : memref<32x100xbf16, #tpu.memory_space<vmem>>, vector<32x78xbf16>
    %c0_108 = arith.constant 0 : index
    %c0_109 = arith.constant 0 : index
    %c11 = arith.constant 11 : index
    %132 = vector.load %arg2[%c0_108, %c0_109, %c11] : memref<1x16x100xbf16, #tpu.memory_space<vmem>>, vector<1x16x78xbf16>
    %133 = vector.shape_cast %132 : vector<1x16x78xbf16> to vector<16x78xbf16>
    %c0_110 = arith.constant 0 : index
    %c11_111 = arith.constant 11 : index
    %134 = vector.load %arg10[%c0_110, %c11_111] : memref<32x100xbf16, #tpu.memory_space<vmem>>, vector<32x78xbf16>
    %c0_112 = arith.constant 0 : index
    %c0_113 = arith.constant 0 : index
    %c12 = arith.constant 12 : index
    %135 = vector.load %arg2[%c0_112, %c0_113, %c12] : memref<1x16x100xbf16, #tpu.memory_space<vmem>>, vector<1x16x78xbf16>
    %136 = vector.shape_cast %135 : vector<1x16x78xbf16> to vector<16x78xbf16>
    %c0_114 = arith.constant 0 : index
    %c12_115 = arith.constant 12 : index
    %137 = vector.load %arg10[%c0_114, %c12_115] : memref<32x100xbf16, #tpu.memory_space<vmem>>, vector<32x78xbf16>
    %138 = tpu.concatenate %130, %131, %133, %134, %136, %137 in 0 : vector<16x78xbf16>, vector<32x78xbf16>, vector<16x78xbf16>, vector<32x78xbf16>, vector<16x78xbf16>, vector<32x78xbf16> -> vector<144x78xbf16>
    %cst_116 = arith.constant dense<0.000000e+00> : vector<16x78xf32>
    %139 = tpu.matmul %128, %138, %cst_116 {dimension_numbers = #tpu.dot_dimension_numbers<[1], [0], [0], [1], [0, 0, 1, 1], [], []>} : vector<16x144xbf16>, vector<144x78xbf16>, vector<16x78xf32> -> vector<16x78xf32>
    %140 = arith.addf %126, %139 : vector<16x78xf32>
    %c2_117 = arith.constant 2 : index
    %c0_118 = arith.constant 0 : index
    %c0_119 = arith.constant 0 : index
    %141 = vector.load %arg5[%c2_117, %c0_118, %c0_119] : memref<3x16x144xbf16, #tpu.memory_space<vmem>>, vector<1x16x144xbf16>
    %142 = vector.shape_cast %141 : vector<1x16x144xbf16> to vector<16x144xbf16>
    %c0_120 = arith.constant 0 : index
    %c0_121 = arith.constant 0 : index
    %c20_122 = arith.constant 20 : index
    %143 = vector.load %arg2[%c0_120, %c0_121, %c20_122] : memref<1x16x100xbf16, #tpu.memory_space<vmem>>, vector<1x16x78xbf16>
    %144 = vector.shape_cast %143 : vector<1x16x78xbf16> to vector<16x78xbf16>
    %c0_123 = arith.constant 0 : index
    %c20_124 = arith.constant 20 : index
    %145 = vector.load %arg10[%c0_123, %c20_124] : memref<32x100xbf16, #tpu.memory_space<vmem>>, vector<32x78xbf16>
    %c0_125 = arith.constant 0 : index
    %c0_126 = arith.constant 0 : index
    %c21 = arith.constant 21 : index
    %146 = vector.load %arg2[%c0_125, %c0_126, %c21] : memref<1x16x100xbf16, #tpu.memory_space<vmem>>, vector<1x16x78xbf16>
    %147 = vector.shape_cast %146 : vector<1x16x78xbf16> to vector<16x78xbf16>
    %c0_127 = arith.constant 0 : index
    %c21_128 = arith.constant 21 : index
    %148 = vector.load %arg10[%c0_127, %c21_128] : memref<32x100xbf16, #tpu.memory_space<vmem>>, vector<32x78xbf16>
    %c0_129 = arith.constant 0 : index
    %c0_130 = arith.constant 0 : index
    %c22 = arith.constant 22 : index
    %149 = vector.load %arg2[%c0_129, %c0_130, %c22] : memref<1x16x100xbf16, #tpu.memory_space<vmem>>, vector<1x16x78xbf16>
    %150 = vector.shape_cast %149 : vector<1x16x78xbf16> to vector<16x78xbf16>
    %c0_131 = arith.constant 0 : index
    %c22_132 = arith.constant 22 : index
    %151 = vector.load %arg10[%c0_131, %c22_132] : memref<32x100xbf16, #tpu.memory_space<vmem>>, vector<32x78xbf16>
    %152 = tpu.concatenate %144, %145, %147, %148, %150, %151 in 0 : vector<16x78xbf16>, vector<32x78xbf16>, vector<16x78xbf16>, vector<32x78xbf16>, vector<16x78xbf16>, vector<32x78xbf16> -> vector<144x78xbf16>
    %cst_133 = arith.constant dense<0.000000e+00> : vector<16x78xf32>
    %153 = tpu.matmul %142, %152, %cst_133 {dimension_numbers = #tpu.dot_dimension_numbers<[1], [0], [0], [1], [0, 0, 1, 1], [], []>} : vector<16x144xbf16>, vector<144x78xbf16>, vector<16x78xf32> -> vector<16x78xf32>
    %154 = arith.addf %140, %153 : vector<16x78xf32>
    %c0_134 = arith.constant 0 : index
    %c0_135 = arith.constant 0 : index
    %155 = vector.load %arg6[%c0_134, %c0_135] : memref<16x1xf32, #tpu.memory_space<vmem>>, vector<16x1xf32>
    %156 = vector.broadcast %155 : vector<16x1xf32> to vector<16x78xf32>
    %157 = arith.addf %154, %156 : vector<16x78xf32>
    %cst_136 = arith.constant 0.000000e+00 : f32
    %158 = vector.broadcast %cst_136 : f32 to vector<16x78xf32>
    %159 = arith.maximumf %157, %158 : vector<16x78xf32>
    %160 = vector.broadcast %0 : vector<1x78xf32> to vector<16x78xf32>
    %161 = arith.mulf %159, %160 : vector<16x78xf32>
    %cst_137 = arith.constant 0.000000e+00 : bf16
    %162 = vector.broadcast %cst_137 : bf16 to vector<16x11xbf16>
    %c0_138 = arith.constant 0 : index
    %c0_139 = arith.constant 0 : index
    %163 = vector.load %arg12[%c0_138, %c0_139] : memref<16x100xbf16, #tpu.memory_space<vmem>>, vector<16x11xbf16>
    tpu.vector_store %arg12[%c0_138, %c0_139], %162 {strides = array<i32>} : memref<16x100xbf16, #tpu.memory_space<vmem>>, vector<16x11xbf16>,
    %cst_140 = arith.constant 0.000000e+00 : bf16
    %164 = vector.broadcast %cst_140 : bf16 to vector<16x11xbf16>
    %c0_141 = arith.constant 0 : index
    %c89 = arith.constant 89 : index
    %165 = vector.load %arg12[%c0_141, %c89] : memref<16x100xbf16, #tpu.memory_space<vmem>>, vector<16x11xbf16>
    tpu.vector_store %arg12[%c0_141, %c89], %164 {strides = array<i32>} : memref<16x100xbf16, #tpu.memory_space<vmem>>, vector<16x11xbf16>,
    %166 = arith.truncf %161 : vector<16x78xf32> to vector<16x78xbf16>
    %c0_142 = arith.constant 0 : index
    %c11_143 = arith.constant 11 : index
    %167 = vector.load %arg12[%c0_142, %c11_143] : memref<16x100xbf16, #tpu.memory_space<vmem>>, vector<16x78xbf16>
    tpu.vector_store %arg12[%c0_142, %c11_143], %166 {strides = array<i32>} : memref<16x100xbf16, #tpu.memory_space<vmem>>, vector<16x78xbf16>,
    %c0_144 = arith.constant 0 : index
    %c0_145 = arith.constant 0 : index
    %c0_146 = arith.constant 0 : index
    %168 = vector.load %arg7[%c0_144, %c0_145, %c0_146] : memref<3x16x48xbf16, #tpu.memory_space<vmem>>, vector<1x16x48xbf16>
    %169 = vector.shape_cast %168 : vector<1x16x48xbf16> to vector<16x48xbf16>
    %c0_147 = arith.constant 0 : index
    %c0_148 = arith.constant 0 : index
    %170 = vector.load %arg12[%c0_147, %c0_148] : memref<16x100xbf16, #tpu.memory_space<vmem>>, vector<16x78xbf16>
    %c0_149 = arith.constant 0 : index
    %c1_150 = arith.constant 1 : index
    %171 = vector.load %arg12[%c0_149, %c1_150] : memref<16x100xbf16, #tpu.memory_space<vmem>>, vector<16x78xbf16>
    %c0_151 = arith.constant 0 : index
    %c2_152 = arith.constant 2 : index
    %172 = vector.load %arg12[%c0_151, %c2_152] : memref<16x100xbf16, #tpu.memory_space<vmem>>, vector<16x78xbf16>
    %173 = tpu.concatenate %170, %171, %172 in 0 : vector<16x78xbf16>, vector<16x78xbf16>, vector<16x78xbf16> -> vector<48x78xbf16>
    %cst_153 = arith.constant dense<0.000000e+00> : vector<16x78xf32>
    %174 = tpu.matmul %169, %173, %cst_153 {dimension_numbers = #tpu.dot_dimension_numbers<[1], [0], [0], [1], [0, 0, 1, 1], [], []>} : vector<16x48xbf16>, vector<48x78xbf16>, vector<16x78xf32> -> vector<16x78xf32>
    %c1_154 = arith.constant 1 : index
    %c0_155 = arith.constant 0 : index
    %c0_156 = arith.constant 0 : index
    %175 = vector.load %arg7[%c1_154, %c0_155, %c0_156] : memref<3x16x48xbf16, #tpu.memory_space<vmem>>, vector<1x16x48xbf16>
    %176 = vector.shape_cast %175 : vector<1x16x48xbf16> to vector<16x48xbf16>
    %c0_157 = arith.constant 0 : index
    %c10_158 = arith.constant 10 : index
    %177 = vector.load %arg12[%c0_157, %c10_158] : memref<16x100xbf16, #tpu.memory_space<vmem>>, vector<16x78xbf16>
    %c0_159 = arith.constant 0 : index
    %c11_160 = arith.constant 11 : index
    %178 = vector.load %arg12[%c0_159, %c11_160] : memref<16x100xbf16, #tpu.memory_space<vmem>>, vector<16x78xbf16>
    %c0_161 = arith.constant 0 : index
    %c12_162 = arith.constant 12 : index
    %179 = vector.load %arg12[%c0_161, %c12_162] : memref<16x100xbf16, #tpu.memory_space<vmem>>, vector<16x78xbf16>
    %180 = tpu.concatenate %177, %178, %179 in 0 : vector<16x78xbf16>, vector<16x78xbf16>, vector<16x78xbf16> -> vector<48x78xbf16>
    %cst_163 = arith.constant dense<0.000000e+00> : vector<16x78xf32>
    %181 = tpu.matmul %176, %180, %cst_163 {dimension_numbers = #tpu.dot_dimension_numbers<[1], [0], [0], [1], [0, 0, 1, 1], [], []>} : vector<16x48xbf16>, vector<48x78xbf16>, vector<16x78xf32> -> vector<16x78xf32>
    %182 = arith.addf %174, %181 : vector<16x78xf32>
    %c2_164 = arith.constant 2 : index
    %c0_165 = arith.constant 0 : index
    %c0_166 = arith.constant 0 : index
    %183 = vector.load %arg7[%c2_164, %c0_165, %c0_166] : memref<3x16x48xbf16, #tpu.memory_space<vmem>>, vector<1x16x48xbf16>
    %184 = vector.shape_cast %183 : vector<1x16x48xbf16> to vector<16x48xbf16>
    %c0_167 = arith.constant 0 : index
    %c20_168 = arith.constant 20 : index
    %185 = vector.load %arg12[%c0_167, %c20_168] : memref<16x100xbf16, #tpu.memory_space<vmem>>, vector<16x78xbf16>
    %c0_169 = arith.constant 0 : index
    %c21_170 = arith.constant 21 : index
    %186 = vector.load %arg12[%c0_169, %c21_170] : memref<16x100xbf16, #tpu.memory_space<vmem>>, vector<16x78xbf16>
    %c0_171 = arith.constant 0 : index
    %c22_172 = arith.constant 22 : index
    %187 = vector.load %arg12[%c0_171, %c22_172] : memref<16x100xbf16, #tpu.memory_space<vmem>>, vector<16x78xbf16>
    %188 = tpu.concatenate %185, %186, %187 in 0 : vector<16x78xbf16>, vector<16x78xbf16>, vector<16x78xbf16> -> vector<48x78xbf16>
    %cst_173 = arith.constant dense<0.000000e+00> : vector<16x78xf32>
    %189 = tpu.matmul %184, %188, %cst_173 {dimension_numbers = #tpu.dot_dimension_numbers<[1], [0], [0], [1], [0, 0, 1, 1], [], []>} : vector<16x48xbf16>, vector<48x78xbf16>, vector<16x78xf32> -> vector<16x78xf32>
    %190 = arith.addf %182, %189 : vector<16x78xf32>
    %c0_174 = arith.constant 0 : index
    %c0_175 = arith.constant 0 : index
    %191 = vector.load %arg8[%c0_174, %c0_175] : memref<16x1xf32, #tpu.memory_space<vmem>>, vector<16x1xf32>
    %192 = vector.broadcast %191 : vector<16x1xf32> to vector<16x78xf32>
    %193 = arith.addf %190, %192 : vector<16x78xf32>
    %cst_176 = arith.constant 0.000000e+00 : f32
    %194 = vector.broadcast %cst_176 : f32 to vector<16x78xf32>
    %195 = arith.maximumf %193, %194 : vector<16x78xf32>
    %196 = vector.broadcast %0 : vector<1x78xf32> to vector<16x78xf32>
    %197 = arith.mulf %195, %196 : vector<16x78xf32>
    %cst_177 = arith.constant 0.000000e+00 : bf16
    %198 = vector.broadcast %cst_177 : bf16 to vector<16x11xbf16>
    %c0_178 = arith.constant 0 : index
    %c0_179 = arith.constant 0 : index
    %c0_180 = arith.constant 0 : index
    %199 = vector.load %arg9[%c0_178, %c0_179, %c0_180] : memref<1x16x100xbf16, #tpu.memory_space<vmem>>, vector<1x16x11xbf16>
    %200 = vector.shape_cast %199 : vector<1x16x11xbf16> to vector<16x11xbf16>
    %201 = vector.shape_cast %198 : vector<16x11xbf16> to vector<1x16x11xbf16>
    tpu.vector_store %arg9[%c0_178, %c0_179, %c0_180], %201 {strides = array<i32>} : memref<1x16x100xbf16, #tpu.memory_space<vmem>>, vector<1x16x11xbf16>,
    %cst_181 = arith.constant 0.000000e+00 : bf16
    %202 = vector.broadcast %cst_181 : bf16 to vector<16x11xbf16>
    %c0_182 = arith.constant 0 : index
    %c0_183 = arith.constant 0 : index
    %c89_184 = arith.constant 89 : index
    %203 = vector.load %arg9[%c0_182, %c0_183, %c89_184] : memref<1x16x100xbf16, #tpu.memory_space<vmem>>, vector<1x16x11xbf16>
    %204 = vector.shape_cast %203 : vector<1x16x11xbf16> to vector<16x11xbf16>
    %205 = vector.shape_cast %202 : vector<16x11xbf16> to vector<1x16x11xbf16>
    tpu.vector_store %arg9[%c0_182, %c0_183, %c89_184], %205 {strides = array<i32>} : memref<1x16x100xbf16, #tpu.memory_space<vmem>>, vector<1x16x11xbf16>,
    %206 = arith.truncf %197 : vector<16x78xf32> to vector<16x78xbf16>
    %c0_185 = arith.constant 0 : index
    %c0_186 = arith.constant 0 : index
    %c11_187 = arith.constant 11 : index
    %207 = vector.load %arg9[%c0_185, %c0_186, %c11_187] : memref<1x16x100xbf16, #tpu.memory_space<vmem>>, vector<1x16x78xbf16>
    %208 = vector.shape_cast %207 : vector<1x16x78xbf16> to vector<16x78xbf16>
    %209 = vector.shape_cast %206 : vector<16x78xbf16> to vector<1x16x78xbf16>
    tpu.vector_store %arg9[%c0_185, %c0_186, %c11_187], %209 {strides = array<i32>} : memref<1x16x100xbf16, #tpu.memory_space<vmem>>, vector<1x16x78xbf16>,
    return
  }
  func.func @transform_0(%arg0: i32) -> (i32, i32, i32) {
    %c0_i32 = arith.constant 0 : i32
    %c0_i32_0 = arith.constant 0 : i32
    %c0_i32_1 = arith.constant 0 : i32
    return %arg0, %c0_i32, %c0_i32_0 : i32, i32, i32
  }
  func.func @transform_1(%arg0: i32) -> (i32, i32, i32) {
    %c0_i32 = arith.constant 0 : i32
    %c0_i32_0 = arith.constant 0 : i32
    %c0_i32_1 = arith.constant 0 : i32
    return %arg0, %c0_i32, %c0_i32_0 : i32, i32, i32
  }
  func.func @transform_2(%arg0: i32) -> (i32, i32) {
    %c0_i32 = arith.constant 0 : i32
    %c0_i32_0 = arith.constant 0 : i32
    %c0_i32_1 = arith.constant 0 : i32
    return %c0_i32, %c0_i32_0 : i32, i32
  }
  func.func @transform_3(%arg0: i32) -> (i32, i32) {
    %c0_i32 = arith.constant 0 : i32
    %c0_i32_0 = arith.constant 0 : i32
    %c0_i32_1 = arith.constant 0 : i32
    return %c0_i32, %c0_i32_0 : i32, i32
  }
  func.func @transform_4(%arg0: i32) -> (i32, i32, i32) {
    %c0_i32 = arith.constant 0 : i32
    %c0_i32_0 = arith.constant 0 : i32
    %c0_i32_1 = arith.constant 0 : i32
    %c0_i32_2 = arith.constant 0 : i32
    return %c0_i32, %c0_i32_0, %c0_i32_1 : i32, i32, i32
  }
  func.func @transform_5(%arg0: i32) -> (i32, i32) {
    %c0_i32 = arith.constant 0 : i32
    %c0_i32_0 = arith.constant 0 : i32
    %c0_i32_1 = arith.constant 0 : i32
    return %c0_i32, %c0_i32_0 : i32, i32
  }
  func.func @transform_6(%arg0: i32) -> (i32, i32, i32) {
    %c0_i32 = arith.constant 0 : i32
    %c0_i32_0 = arith.constant 0 : i32
    %c0_i32_1 = arith.constant 0 : i32
    %c0_i32_2 = arith.constant 0 : i32
    return %c0_i32, %c0_i32_0, %c0_i32_1 : i32, i32, i32
  }
  func.func @transform_7(%arg0: i32) -> (i32, i32) {
    %c0_i32 = arith.constant 0 : i32
    %c0_i32_0 = arith.constant 0 : i32
    %c0_i32_1 = arith.constant 0 : i32
    return %c0_i32, %c0_i32_0 : i32, i32
  }
  func.func @transform_8(%arg0: i32) -> (i32, i32, i32) {
    %c0_i32 = arith.constant 0 : i32
    %c0_i32_0 = arith.constant 0 : i32
    %c0_i32_1 = arith.constant 0 : i32
    return %arg0, %c0_i32, %c0_i32_0 : i32, i32, i32
  }
}

module attributes {stable_mosaic.version = 11 : i64} {
  func.func @kernel(%arg0: i32, %arg1: memref<1x16x100xbf16, #tpu.memory_space<vmem>>, %arg2: memref<1x8x324xbf16, #tpu.memory_space<vmem>>, %arg3: memref<1x286xf32, #tpu.memory_space<vmem>>, %arg4: memref<8x18xf32, #tpu.memory_space<vmem>>, %arg5: memref<3x8x72xbf16, #tpu.memory_space<vmem>>, %arg6: memref<8x1xf32, #tpu.memory_space<vmem>>, %arg7: memref<3x8x24xbf16, #tpu.memory_space<vmem>>, %arg8: memref<8x1xf32, #tpu.memory_space<vmem>>, %arg9: memref<1x8x1xf32, #tpu.memory_space<vmem>>, %arg10: memref<1x1x1xf32, #tpu.memory_space<vmem>>, %arg11: memref<1x1x324xf32, #tpu.memory_space<vmem>>, %arg12: memref<16x324xbf16, #tpu.memory_space<vmem>>, %arg13: memref<16x144xbf16, #tpu.memory_space<vmem>>, %arg14: memref<8x324xbf16, #tpu.memory_space<vmem>>) attributes {dimension_semantics = [#tpu.dimension_semantics<parallel>], iteration_bounds = array<i64: 2>, scalar_prefetch = 0 : i64, scratch_operands = 3 : i64, tpu.core_type = #tpu.core_type<tc>, window_params = [{transform_indices = @transform_0, window_bounds = array<i64: 1, 16, 100>}, {transform_indices = @transform_1, window_bounds = array<i64: 1, 8, 324>}, {pipeline_mode = #tpu.pipeline_mode<synchronous>, transform_indices = @transform_2, window_bounds = array<i64: 1, 286>}, {pipeline_mode = #tpu.pipeline_mode<synchronous>, transform_indices = @transform_3, window_bounds = array<i64: 8, 18>}, {pipeline_mode = #tpu.pipeline_mode<synchronous>, transform_indices = @transform_4, window_bounds = array<i64: 3, 8, 72>}, {pipeline_mode = #tpu.pipeline_mode<synchronous>, transform_indices = @transform_5, window_bounds = array<i64: 8, 1>}, {pipeline_mode = #tpu.pipeline_mode<synchronous>, transform_indices = @transform_6, window_bounds = array<i64: 3, 8, 24>}, {pipeline_mode = #tpu.pipeline_mode<synchronous>, transform_indices = @transform_7, window_bounds = array<i64: 8, 1>}, {pipeline_mode = #tpu.pipeline_mode<synchronous>, transform_indices = @transform_8, window_bounds = array<i64: 1, 8, 1>}, {pipeline_mode = #tpu.pipeline_mode<synchronous>, transform_indices = @transform_9, window_bounds = array<i64: 1, 1, 1>}, {transform_indices = @transform_10, window_bounds = array<i64: 1, 1, 324>}]} {
    %c0 = arith.constant 0 : index
    %c0_0 = arith.constant 0 : index
    %0 = vector.load %arg3[%c0, %c0_0] : memref<1x286xf32, #tpu.memory_space<vmem>>, vector<1x286xf32>
    %c0_1 = arith.constant 0 : index
    %c0_2 = arith.constant 0 : index
    %1 = vector.load %arg4[%c0_1, %c0_2] : memref<8x18xf32, #tpu.memory_space<vmem>>, vector<8x18xf32>
    %c0_3 = arith.constant 0 : index
    %c0_4 = arith.constant 0 : index
    %c11 = arith.constant 11 : index
    %2 = vector.load %arg1[%c0_3, %c0_4, %c11] : memref<1x16x100xbf16, #tpu.memory_space<vmem>>, vector<1x16x8xbf16>
    %3 = vector.shape_cast %2 : vector<1x16x8xbf16> to vector<16x8xbf16>
    %cst = arith.constant dense<0.000000e+00> : vector<16x18xf32>
    %4 = tpu.matmul %3, %1, %cst {dimension_numbers = #tpu.dot_dimension_numbers<[1], [0], [0], [1], [0, 0, 1, 1], [], []>} : vector<16x8xbf16>, vector<8x18xf32>, vector<16x18xf32> -> vector<16x18xf32>
    %5 = arith.truncf %4 : vector<16x18xf32> to vector<16x18xbf16>
    %c0_5 = arith.constant 0 : index
    %c0_6 = arith.constant 0 : index
    %6 = vector.load %arg13[%c0_5, %c0_6] : memref<16x144xbf16, #tpu.memory_space<vmem>>, vector<16x18xbf16>
    tpu.vector_store %arg13[%c0_5, %c0_6], %5 {strides = array<i32>} : memref<16x144xbf16, #tpu.memory_space<vmem>>, vector<16x18xbf16>,
    %c0_7 = arith.constant 0 : index
    %c0_8 = arith.constant 0 : index
    %c21 = arith.constant 21 : index
    %7 = vector.load %arg1[%c0_7, %c0_8, %c21] : memref<1x16x100xbf16, #tpu.memory_space<vmem>>, vector<1x16x8xbf16>
    %8 = vector.shape_cast %7 : vector<1x16x8xbf16> to vector<16x8xbf16>
    %cst_9 = arith.constant dense<0.000000e+00> : vector<16x18xf32>
    %9 = tpu.matmul %8, %1, %cst_9 {dimension_numbers = #tpu.dot_dimension_numbers<[1], [0], [0], [1], [0, 0, 1, 1], [], []>} : vector<16x8xbf16>, vector<8x18xf32>, vector<16x18xf32> -> vector<16x18xf32>
    %10 = arith.truncf %9 : vector<16x18xf32> to vector<16x18xbf16>
    %c0_10 = arith.constant 0 : index
    %c18 = arith.constant 18 : index
    %11 = vector.load %arg13[%c0_10, %c18] : memref<16x144xbf16, #tpu.memory_space<vmem>>, vector<16x18xbf16>
    tpu.vector_store %arg13[%c0_10, %c18], %10 {strides = array<i32>} : memref<16x144xbf16, #tpu.memory_space<vmem>>, vector<16x18xbf16>,
    %c0_11 = arith.constant 0 : index
    %c0_12 = arith.constant 0 : index
    %c31 = arith.constant 31 : index
    %12 = vector.load %arg1[%c0_11, %c0_12, %c31] : memref<1x16x100xbf16, #tpu.memory_space<vmem>>, vector<1x16x8xbf16>
    %13 = vector.shape_cast %12 : vector<1x16x8xbf16> to vector<16x8xbf16>
    %cst_13 = arith.constant dense<0.000000e+00> : vector<16x18xf32>
    %14 = tpu.matmul %13, %1, %cst_13 {dimension_numbers = #tpu.dot_dimension_numbers<[1], [0], [0], [1], [0, 0, 1, 1], [], []>} : vector<16x8xbf16>, vector<8x18xf32>, vector<16x18xf32> -> vector<16x18xf32>
    %15 = arith.truncf %14 : vector<16x18xf32> to vector<16x18xbf16>
    %c0_14 = arith.constant 0 : index
    %c36 = arith.constant 36 : index
    %16 = vector.load %arg13[%c0_14, %c36] : memref<16x144xbf16, #tpu.memory_space<vmem>>, vector<16x18xbf16>
    tpu.vector_store %arg13[%c0_14, %c36], %15 {strides = array<i32>} : memref<16x144xbf16, #tpu.memory_space<vmem>>, vector<16x18xbf16>,
    %c0_15 = arith.constant 0 : index
    %c0_16 = arith.constant 0 : index
    %c41 = arith.constant 41 : index
    %17 = vector.load %arg1[%c0_15, %c0_16, %c41] : memref<1x16x100xbf16, #tpu.memory_space<vmem>>, vector<1x16x8xbf16>
    %18 = vector.shape_cast %17 : vector<1x16x8xbf16> to vector<16x8xbf16>
    %cst_17 = arith.constant dense<0.000000e+00> : vector<16x18xf32>
    %19 = tpu.matmul %18, %1, %cst_17 {dimension_numbers = #tpu.dot_dimension_numbers<[1], [0], [0], [1], [0, 0, 1, 1], [], []>} : vector<16x8xbf16>, vector<8x18xf32>, vector<16x18xf32> -> vector<16x18xf32>
    %20 = arith.truncf %19 : vector<16x18xf32> to vector<16x18xbf16>
    %c0_18 = arith.constant 0 : index
    %c54 = arith.constant 54 : index
    %21 = vector.load %arg13[%c0_18, %c54] : memref<16x144xbf16, #tpu.memory_space<vmem>>, vector<16x18xbf16>
    tpu.vector_store %arg13[%c0_18, %c54], %20 {strides = array<i32>} : memref<16x144xbf16, #tpu.memory_space<vmem>>, vector<16x18xbf16>,
    %c0_19 = arith.constant 0 : index
    %c0_20 = arith.constant 0 : index
    %c51 = arith.constant 51 : index
    %22 = vector.load %arg1[%c0_19, %c0_20, %c51] : memref<1x16x100xbf16, #tpu.memory_space<vmem>>, vector<1x16x8xbf16>
    %23 = vector.shape_cast %22 : vector<1x16x8xbf16> to vector<16x8xbf16>
    %cst_21 = arith.constant dense<0.000000e+00> : vector<16x18xf32>
    %24 = tpu.matmul %23, %1, %cst_21 {dimension_numbers = #tpu.dot_dimension_numbers<[1], [0], [0], [1], [0, 0, 1, 1], [], []>} : vector<16x8xbf16>, vector<8x18xf32>, vector<16x18xf32> -> vector<16x18xf32>
    %25 = arith.truncf %24 : vector<16x18xf32> to vector<16x18xbf16>
    %c0_22 = arith.constant 0 : index
    %c72 = arith.constant 72 : index
    %26 = vector.load %arg13[%c0_22, %c72] : memref<16x144xbf16, #tpu.memory_space<vmem>>, vector<16x18xbf16>
    tpu.vector_store %arg13[%c0_22, %c72], %25 {strides = array<i32>} : memref<16x144xbf16, #tpu.memory_space<vmem>>, vector<16x18xbf16>,
    %c0_23 = arith.constant 0 : index
    %c0_24 = arith.constant 0 : index
    %c61 = arith.constant 61 : index
    %27 = vector.load %arg1[%c0_23, %c0_24, %c61] : memref<1x16x100xbf16, #tpu.memory_space<vmem>>, vector<1x16x8xbf16>
    %28 = vector.shape_cast %27 : vector<1x16x8xbf16> to vector<16x8xbf16>
    %cst_25 = arith.constant dense<0.000000e+00> : vector<16x18xf32>
    %29 = tpu.matmul %28, %1, %cst_25 {dimension_numbers = #tpu.dot_dimension_numbers<[1], [0], [0], [1], [0, 0, 1, 1], [], []>} : vector<16x8xbf16>, vector<8x18xf32>, vector<16x18xf32> -> vector<16x18xf32>
    %30 = arith.truncf %29 : vector<16x18xf32> to vector<16x18xbf16>
    %c0_26 = arith.constant 0 : index
    %c90 = arith.constant 90 : index
    %31 = vector.load %arg13[%c0_26, %c90] : memref<16x144xbf16, #tpu.memory_space<vmem>>, vector<16x18xbf16>
    tpu.vector_store %arg13[%c0_26, %c90], %30 {strides = array<i32>} : memref<16x144xbf16, #tpu.memory_space<vmem>>, vector<16x18xbf16>,
    %c0_27 = arith.constant 0 : index
    %c0_28 = arith.constant 0 : index
    %c71 = arith.constant 71 : index
    %32 = vector.load %arg1[%c0_27, %c0_28, %c71] : memref<1x16x100xbf16, #tpu.memory_space<vmem>>, vector<1x16x8xbf16>
    %33 = vector.shape_cast %32 : vector<1x16x8xbf16> to vector<16x8xbf16>
    %cst_29 = arith.constant dense<0.000000e+00> : vector<16x18xf32>
    %34 = tpu.matmul %33, %1, %cst_29 {dimension_numbers = #tpu.dot_dimension_numbers<[1], [0], [0], [1], [0, 0, 1, 1], [], []>} : vector<16x8xbf16>, vector<8x18xf32>, vector<16x18xf32> -> vector<16x18xf32>
    %35 = arith.truncf %34 : vector<16x18xf32> to vector<16x18xbf16>
    %c0_30 = arith.constant 0 : index
    %c108 = arith.constant 108 : index
    %36 = vector.load %arg13[%c0_30, %c108] : memref<16x144xbf16, #tpu.memory_space<vmem>>, vector<16x18xbf16>
    tpu.vector_store %arg13[%c0_30, %c108], %35 {strides = array<i32>} : memref<16x144xbf16, #tpu.memory_space<vmem>>, vector<16x18xbf16>,
    %c0_31 = arith.constant 0 : index
    %c0_32 = arith.constant 0 : index
    %c81 = arith.constant 81 : index
    %37 = vector.load %arg1[%c0_31, %c0_32, %c81] : memref<1x16x100xbf16, #tpu.memory_space<vmem>>, vector<1x16x8xbf16>
    %38 = vector.shape_cast %37 : vector<1x16x8xbf16> to vector<16x8xbf16>
    %cst_33 = arith.constant dense<0.000000e+00> : vector<16x18xf32>
    %39 = tpu.matmul %38, %1, %cst_33 {dimension_numbers = #tpu.dot_dimension_numbers<[1], [0], [0], [1], [0, 0, 1, 1], [], []>} : vector<16x8xbf16>, vector<8x18xf32>, vector<16x18xf32> -> vector<16x18xf32>
    %40 = arith.truncf %39 : vector<16x18xf32> to vector<16x18xbf16>
    %c0_34 = arith.constant 0 : index
    %c126 = arith.constant 126 : index
    %41 = vector.load %arg13[%c0_34, %c126] : memref<16x144xbf16, #tpu.memory_space<vmem>>, vector<16x18xbf16>
    tpu.vector_store %arg13[%c0_34, %c126], %40 {strides = array<i32>} : memref<16x144xbf16, #tpu.memory_space<vmem>>, vector<16x18xbf16>,
    %cst_35 = arith.constant 0.000000e+00 : bf16
    %42 = vector.broadcast %cst_35 : bf16 to vector<16x18xbf16>
    %c0_36 = arith.constant 0 : index
    %c0_37 = arith.constant 0 : index
    %43 = vector.load %arg12[%c0_36, %c0_37] : memref<16x324xbf16, #tpu.memory_space<vmem>>, vector<16x18xbf16>
    tpu.vector_store %arg12[%c0_36, %c0_37], %42 {strides = array<i32>} : memref<16x324xbf16, #tpu.memory_space<vmem>>, vector<16x18xbf16>,
    %cst_38 = arith.constant 0.000000e+00 : bf16
    %44 = vector.broadcast %cst_38 : bf16 to vector<16x18xbf16>
    %c0_39 = arith.constant 0 : index
    %c306 = arith.constant 306 : index
    %45 = vector.load %arg12[%c0_39, %c306] : memref<16x324xbf16, #tpu.memory_space<vmem>>, vector<16x18xbf16>
    tpu.vector_store %arg12[%c0_39, %c306], %44 {strides = array<i32>} : memref<16x324xbf16, #tpu.memory_space<vmem>>, vector<16x18xbf16>,
    %c0_40 = arith.constant 0 : index
    %c0_41 = arith.constant 0 : index
    %46 = vector.load %arg13[%c0_40, %c0_41] : memref<16x144xbf16, #tpu.memory_space<vmem>>, vector<16x18xbf16>
    %47 = arith.extf %46 : vector<16x18xbf16> to vector<16x18xf32>
    %c0_42 = arith.constant 0 : index
    %c18_43 = arith.constant 18 : index
    %48 = vector.load %arg13[%c0_42, %c18_43] : memref<16x144xbf16, #tpu.memory_space<vmem>>, vector<16x18xbf16>
    %49 = arith.extf %48 : vector<16x18xbf16> to vector<16x18xf32>
    %cst_44 = arith.constant 1.000000e+00 : f32
    %50 = vector.broadcast %cst_44 : f32 to vector<16x18xf32>
    %51 = arith.mulf %50, %47 : vector<16x18xf32>
    %cst_45 = arith.constant 0.000000e+00 : f32
    %52 = vector.broadcast %cst_45 : f32 to vector<16x18xf32>
    %53 = arith.mulf %52, %49 : vector<16x18xf32>
    %54 = arith.addf %51, %53 : vector<16x18xf32>
    %55 = arith.truncf %54 : vector<16x18xf32> to vector<16x18xbf16>
    %c0_46 = arith.constant 0 : index
    %c18_47 = arith.constant 18 : index
    %56 = vector.load %arg12[%c0_46, %c18_47] : memref<16x324xbf16, #tpu.memory_space<vmem>>, vector<16x18xbf16>
    tpu.vector_store %arg12[%c0_46, %c18_47], %55 {strides = array<i32>} : memref<16x324xbf16, #tpu.memory_space<vmem>>, vector<16x18xbf16>,
    %c0_48 = arith.constant 0 : index
    %c0_49 = arith.constant 0 : index
    %57 = vector.load %arg13[%c0_48, %c0_49] : memref<16x144xbf16, #tpu.memory_space<vmem>>, vector<16x18xbf16>
    %58 = arith.extf %57 : vector<16x18xbf16> to vector<16x18xf32>
    %c0_50 = arith.constant 0 : index
    %c18_51 = arith.constant 18 : index
    %59 = vector.load %arg13[%c0_50, %c18_51] : memref<16x144xbf16, #tpu.memory_space<vmem>>, vector<16x18xbf16>
    %60 = arith.extf %59 : vector<16x18xbf16> to vector<16x18xf32>
    %cst_52 = arith.constant 0.533333361 : f32
    %61 = vector.broadcast %cst_52 : f32 to vector<16x18xf32>
    %62 = arith.mulf %61, %58 : vector<16x18xf32>
    %cst_53 = arith.constant 0.466666669 : f32
    %63 = vector.broadcast %cst_53 : f32 to vector<16x18xf32>
    %64 = arith.mulf %63, %60 : vector<16x18xf32>
    %65 = arith.addf %62, %64 : vector<16x18xf32>
    %66 = arith.truncf %65 : vector<16x18xf32> to vector<16x18xbf16>
    %c0_54 = arith.constant 0 : index
    %c36_55 = arith.constant 36 : index
    %67 = vector.load %arg12[%c0_54, %c36_55] : memref<16x324xbf16, #tpu.memory_space<vmem>>, vector<16x18xbf16>
    tpu.vector_store %arg12[%c0_54, %c36_55], %66 {strides = array<i32>} : memref<16x324xbf16, #tpu.memory_space<vmem>>, vector<16x18xbf16>,
    %c0_56 = arith.constant 0 : index
    %c0_57 = arith.constant 0 : index
    %68 = vector.load %arg13[%c0_56, %c0_57] : memref<16x144xbf16, #tpu.memory_space<vmem>>, vector<16x18xbf16>
    %69 = arith.extf %68 : vector<16x18xbf16> to vector<16x18xf32>
    %c0_58 = arith.constant 0 : index
    %c18_59 = arith.constant 18 : index
    %70 = vector.load %arg13[%c0_58, %c18_59] : memref<16x144xbf16, #tpu.memory_space<vmem>>, vector<16x18xbf16>
    %71 = arith.extf %70 : vector<16x18xbf16> to vector<16x18xf32>
    %cst_60 = arith.constant 0.0666666701 : f32
    %72 = vector.broadcast %cst_60 : f32 to vector<16x18xf32>
    %73 = arith.mulf %72, %69 : vector<16x18xf32>
    %cst_61 = arith.constant 0.933333337 : f32
    %74 = vector.broadcast %cst_61 : f32 to vector<16x18xf32>
    %75 = arith.mulf %74, %71 : vector<16x18xf32>
    %76 = arith.addf %73, %75 : vector<16x18xf32>
    %77 = arith.truncf %76 : vector<16x18xf32> to vector<16x18xbf16>
    %c0_62 = arith.constant 0 : index
    %c54_63 = arith.constant 54 : index
    %78 = vector.load %arg12[%c0_62, %c54_63] : memref<16x324xbf16, #tpu.memory_space<vmem>>, vector<16x18xbf16>
    tpu.vector_store %arg12[%c0_62, %c54_63], %77 {strides = array<i32>} : memref<16x324xbf16, #tpu.memory_space<vmem>>, vector<16x18xbf16>,
    %c0_64 = arith.constant 0 : index
    %c18_65 = arith.constant 18 : index
    %79 = vector.load %arg13[%c0_64, %c18_65] : memref<16x144xbf16, #tpu.memory_space<vmem>>, vector<16x18xbf16>
    %80 = arith.extf %79 : vector<16x18xbf16> to vector<16x18xf32>
    %c0_66 = arith.constant 0 : index
    %c36_67 = arith.constant 36 : index
    %81 = vector.load %arg13[%c0_66, %c36_67] : memref<16x144xbf16, #tpu.memory_space<vmem>>, vector<16x18xbf16>
    %82 = arith.extf %81 : vector<16x18xbf16> to vector<16x18xf32>
    %cst_68 = arith.constant 6.000000e-01 : f32
    %83 = vector.broadcast %cst_68 : f32 to vector<16x18xf32>
    %84 = arith.mulf %83, %80 : vector<16x18xf32>
    %cst_69 = arith.constant 4.000000e-01 : f32
    %85 = vector.broadcast %cst_69 : f32 to vector<16x18xf32>
    %86 = arith.mulf %85, %82 : vector<16x18xf32>
    %87 = arith.addf %84, %86 : vector<16x18xf32>
    %88 = arith.truncf %87 : vector<16x18xf32> to vector<16x18xbf16>
    %c0_70 = arith.constant 0 : index
    %c72_71 = arith.constant 72 : index
    %89 = vector.load %arg12[%c0_70, %c72_71] : memref<16x324xbf16, #tpu.memory_space<vmem>>, vector<16x18xbf16>
    tpu.vector_store %arg12[%c0_70, %c72_71], %88 {strides = array<i32>} : memref<16x324xbf16, #tpu.memory_space<vmem>>, vector<16x18xbf16>,
    %c0_72 = arith.constant 0 : index
    %c18_73 = arith.constant 18 : index
    %90 = vector.load %arg13[%c0_72, %c18_73] : memref<16x144xbf16, #tpu.memory_space<vmem>>, vector<16x18xbf16>
    %91 = arith.extf %90 : vector<16x18xbf16> to vector<16x18xf32>
    %c0_74 = arith.constant 0 : index
    %c36_75 = arith.constant 36 : index
    %92 = vector.load %arg13[%c0_74, %c36_75] : memref<16x144xbf16, #tpu.memory_space<vmem>>, vector<16x18xbf16>
    %93 = arith.extf %92 : vector<16x18xbf16> to vector<16x18xf32>
    %cst_76 = arith.constant 0.13333334 : f32
    %94 = vector.broadcast %cst_76 : f32 to vector<16x18xf32>
    %95 = arith.mulf %94, %91 : vector<16x18xf32>
    %cst_77 = arith.constant 0.866666674 : f32
    %96 = vector.broadcast %cst_77 : f32 to vector<16x18xf32>
    %97 = arith.mulf %96, %93 : vector<16x18xf32>
    %98 = arith.addf %95, %97 : vector<16x18xf32>
    %99 = arith.truncf %98 : vector<16x18xf32> to vector<16x18xbf16>
    %c0_78 = arith.constant 0 : index
    %c90_79 = arith.constant 90 : index
    %100 = vector.load %arg12[%c0_78, %c90_79] : memref<16x324xbf16, #tpu.memory_space<vmem>>, vector<16x18xbf16>
    tpu.vector_store %arg12[%c0_78, %c90_79], %99 {strides = array<i32>} : memref<16x324xbf16, #tpu.memory_space<vmem>>, vector<16x18xbf16>,
    %c0_80 = arith.constant 0 : index
    %c36_81 = arith.constant 36 : index
    %101 = vector.load %arg13[%c0_80, %c36_81] : memref<16x144xbf16, #tpu.memory_space<vmem>>, vector<16x18xbf16>
    %102 = arith.extf %101 : vector<16x18xbf16> to vector<16x18xf32>
    %c0_82 = arith.constant 0 : index
    %c54_83 = arith.constant 54 : index
    %103 = vector.load %arg13[%c0_82, %c54_83] : memref<16x144xbf16, #tpu.memory_space<vmem>>, vector<16x18xbf16>
    %104 = arith.extf %103 : vector<16x18xbf16> to vector<16x18xf32>
    %cst_84 = arith.constant 0.666666686 : f32
    %105 = vector.broadcast %cst_84 : f32 to vector<16x18xf32>
    %106 = arith.mulf %105, %102 : vector<16x18xf32>
    %cst_85 = arith.constant 0.333333343 : f32
    %107 = vector.broadcast %cst_85 : f32 to vector<16x18xf32>
    %108 = arith.mulf %107, %104 : vector<16x18xf32>
    %109 = arith.addf %106, %108 : vector<16x18xf32>
    %110 = arith.truncf %109 : vector<16x18xf32> to vector<16x18xbf16>
    %c0_86 = arith.constant 0 : index
    %c108_87 = arith.constant 108 : index
    %111 = vector.load %arg12[%c0_86, %c108_87] : memref<16x324xbf16, #tpu.memory_space<vmem>>, vector<16x18xbf16>
    tpu.vector_store %arg12[%c0_86, %c108_87], %110 {strides = array<i32>} : memref<16x324xbf16, #tpu.memory_space<vmem>>, vector<16x18xbf16>,
    %c0_88 = arith.constant 0 : index
    %c36_89 = arith.constant 36 : index
    %112 = vector.load %arg13[%c0_88, %c36_89] : memref<16x144xbf16, #tpu.memory_space<vmem>>, vector<16x18xbf16>
    %113 = arith.extf %112 : vector<16x18xbf16> to vector<16x18xf32>
    %c0_90 = arith.constant 0 : index
    %c54_91 = arith.constant 54 : index
    %114 = vector.load %arg13[%c0_90, %c54_91] : memref<16x144xbf16, #tpu.memory_space<vmem>>, vector<16x18xbf16>
    %115 = arith.extf %114 : vector<16x18xbf16> to vector<16x18xf32>
    %cst_92 = arith.constant 2.000000e-01 : f32
    %116 = vector.broadcast %cst_92 : f32 to vector<16x18xf32>
    %117 = arith.mulf %116, %113 : vector<16x18xf32>
    %cst_93 = arith.constant 8.000000e-01 : f32
    %118 = vector.broadcast %cst_93 : f32 to vector<16x18xf32>
    %119 = arith.mulf %118, %115 : vector<16x18xf32>
    %120 = arith.addf %117, %119 : vector<16x18xf32>
    %121 = arith.truncf %120 : vector<16x18xf32> to vector<16x18xbf16>
    %c0_94 = arith.constant 0 : index
    %c126_95 = arith.constant 126 : index
    %122 = vector.load %arg12[%c0_94, %c126_95] : memref<16x324xbf16, #tpu.memory_space<vmem>>, vector<16x18xbf16>
    tpu.vector_store %arg12[%c0_94, %c126_95], %121 {strides = array<i32>} : memref<16x324xbf16, #tpu.memory_space<vmem>>, vector<16x18xbf16>,
    %c0_96 = arith.constant 0 : index
    %c54_97 = arith.constant 54 : index
    %123 = vector.load %arg13[%c0_96, %c54_97] : memref<16x144xbf16, #tpu.memory_space<vmem>>, vector<16x18xbf16>
    %124 = arith.extf %123 : vector<16x18xbf16> to vector<16x18xf32>
    %c0_98 = arith.constant 0 : index
    %c72_99 = arith.constant 72 : index
    %125 = vector.load %arg13[%c0_98, %c72_99] : memref<16x144xbf16, #tpu.memory_space<vmem>>, vector<16x18xbf16>
    %126 = arith.extf %125 : vector<16x18xbf16> to vector<16x18xf32>
    %cst_100 = arith.constant 0.733333349 : f32
    %127 = vector.broadcast %cst_100 : f32 to vector<16x18xf32>
    %128 = arith.mulf %127, %124 : vector<16x18xf32>
    %cst_101 = arith.constant 0.266666681 : f32
    %129 = vector.broadcast %cst_101 : f32 to vector<16x18xf32>
    %130 = arith.mulf %129, %126 : vector<16x18xf32>
    %131 = arith.addf %128, %130 : vector<16x18xf32>
    %132 = arith.truncf %131 : vector<16x18xf32> to vector<16x18xbf16>
    %c0_102 = arith.constant 0 : index
    %c144 = arith.constant 144 : index
    %133 = vector.load %arg12[%c0_102, %c144] : memref<16x324xbf16, #tpu.memory_space<vmem>>, vector<16x18xbf16>
    tpu.vector_store %arg12[%c0_102, %c144], %132 {strides = array<i32>} : memref<16x324xbf16, #tpu.memory_space<vmem>>, vector<16x18xbf16>,
    %c0_103 = arith.constant 0 : index
    %c54_104 = arith.constant 54 : index
    %134 = vector.load %arg13[%c0_103, %c54_104] : memref<16x144xbf16, #tpu.memory_space<vmem>>, vector<16x18xbf16>
    %135 = arith.extf %134 : vector<16x18xbf16> to vector<16x18xf32>
    %c0_105 = arith.constant 0 : index
    %c72_106 = arith.constant 72 : index
    %136 = vector.load %arg13[%c0_105, %c72_106] : memref<16x144xbf16, #tpu.memory_space<vmem>>, vector<16x18xbf16>
    %137 = arith.extf %136 : vector<16x18xbf16> to vector<16x18xf32>
    %cst_107 = arith.constant 0.266666681 : f32
    %138 = vector.broadcast %cst_107 : f32 to vector<16x18xf32>
    %139 = arith.mulf %138, %135 : vector<16x18xf32>
    %cst_108 = arith.constant 0.733333349 : f32
    %140 = vector.broadcast %cst_108 : f32 to vector<16x18xf32>
    %141 = arith.mulf %140, %137 : vector<16x18xf32>
    %142 = arith.addf %139, %141 : vector<16x18xf32>
    %143 = arith.truncf %142 : vector<16x18xf32> to vector<16x18xbf16>
    %c0_109 = arith.constant 0 : index
    %c162 = arith.constant 162 : index
    %144 = vector.load %arg12[%c0_109, %c162] : memref<16x324xbf16, #tpu.memory_space<vmem>>, vector<16x18xbf16>
    tpu.vector_store %arg12[%c0_109, %c162], %143 {strides = array<i32>} : memref<16x324xbf16, #tpu.memory_space<vmem>>, vector<16x18xbf16>,
    %c0_110 = arith.constant 0 : index
    %c72_111 = arith.constant 72 : index
    %145 = vector.load %arg13[%c0_110, %c72_111] : memref<16x144xbf16, #tpu.memory_space<vmem>>, vector<16x18xbf16>
    %146 = arith.extf %145 : vector<16x18xbf16> to vector<16x18xf32>
    %c0_112 = arith.constant 0 : index
    %c90_113 = arith.constant 90 : index
    %147 = vector.load %arg13[%c0_112, %c90_113] : memref<16x144xbf16, #tpu.memory_space<vmem>>, vector<16x18xbf16>
    %148 = arith.extf %147 : vector<16x18xbf16> to vector<16x18xf32>
    %cst_114 = arith.constant 8.000000e-01 : f32
    %149 = vector.broadcast %cst_114 : f32 to vector<16x18xf32>
    %150 = arith.mulf %149, %146 : vector<16x18xf32>
    %cst_115 = arith.constant 2.000000e-01 : f32
    %151 = vector.broadcast %cst_115 : f32 to vector<16x18xf32>
    %152 = arith.mulf %151, %148 : vector<16x18xf32>
    %153 = arith.addf %150, %152 : vector<16x18xf32>
    %154 = arith.truncf %153 : vector<16x18xf32> to vector<16x18xbf16>
    %c0_116 = arith.constant 0 : index
    %c180 = arith.constant 180 : index
    %155 = vector.load %arg12[%c0_116, %c180] : memref<16x324xbf16, #tpu.memory_space<vmem>>, vector<16x18xbf16>
    tpu.vector_store %arg12[%c0_116, %c180], %154 {strides = array<i32>} : memref<16x324xbf16, #tpu.memory_space<vmem>>, vector<16x18xbf16>,
    %c0_117 = arith.constant 0 : index
    %c72_118 = arith.constant 72 : index
    %156 = vector.load %arg13[%c0_117, %c72_118] : memref<16x144xbf16, #tpu.memory_space<vmem>>, vector<16x18xbf16>
    %157 = arith.extf %156 : vector<16x18xbf16> to vector<16x18xf32>
    %c0_119 = arith.constant 0 : index
    %c90_120 = arith.constant 90 : index
    %158 = vector.load %arg13[%c0_119, %c90_120] : memref<16x144xbf16, #tpu.memory_space<vmem>>, vector<16x18xbf16>
    %159 = arith.extf %158 : vector<16x18xbf16> to vector<16x18xf32>
    %cst_121 = arith.constant 0.333333343 : f32
    %160 = vector.broadcast %cst_121 : f32 to vector<16x18xf32>
    %161 = arith.mulf %160, %157 : vector<16x18xf32>
    %cst_122 = arith.constant 0.666666686 : f32
    %162 = vector.broadcast %cst_122 : f32 to vector<16x18xf32>
    %163 = arith.mulf %162, %159 : vector<16x18xf32>
    %164 = arith.addf %161, %163 : vector<16x18xf32>
    %165 = arith.truncf %164 : vector<16x18xf32> to vector<16x18xbf16>
    %c0_123 = arith.constant 0 : index
    %c198 = arith.constant 198 : index
    %166 = vector.load %arg12[%c0_123, %c198] : memref<16x324xbf16, #tpu.memory_space<vmem>>, vector<16x18xbf16>
    tpu.vector_store %arg12[%c0_123, %c198], %165 {strides = array<i32>} : memref<16x324xbf16, #tpu.memory_space<vmem>>, vector<16x18xbf16>,
    %c0_124 = arith.constant 0 : index
    %c90_125 = arith.constant 90 : index
    %167 = vector.load %arg13[%c0_124, %c90_125] : memref<16x144xbf16, #tpu.memory_space<vmem>>, vector<16x18xbf16>
    %168 = arith.extf %167 : vector<16x18xbf16> to vector<16x18xf32>
    %c0_126 = arith.constant 0 : index
    %c108_127 = arith.constant 108 : index
    %169 = vector.load %arg13[%c0_126, %c108_127] : memref<16x144xbf16, #tpu.memory_space<vmem>>, vector<16x18xbf16>
    %170 = arith.extf %169 : vector<16x18xbf16> to vector<16x18xf32>
    %cst_128 = arith.constant 0.866666674 : f32
    %171 = vector.broadcast %cst_128 : f32 to vector<16x18xf32>
    %172 = arith.mulf %171, %168 : vector<16x18xf32>
    %cst_129 = arith.constant 0.13333334 : f32
    %173 = vector.broadcast %cst_129 : f32 to vector<16x18xf32>
    %174 = arith.mulf %173, %170 : vector<16x18xf32>
    %175 = arith.addf %172, %174 : vector<16x18xf32>
    %176 = arith.truncf %175 : vector<16x18xf32> to vector<16x18xbf16>
    %c0_130 = arith.constant 0 : index
    %c216 = arith.constant 216 : index
    %177 = vector.load %arg12[%c0_130, %c216] : memref<16x324xbf16, #tpu.memory_space<vmem>>, vector<16x18xbf16>
    tpu.vector_store %arg12[%c0_130, %c216], %176 {strides = array<i32>} : memref<16x324xbf16, #tpu.memory_space<vmem>>, vector<16x18xbf16>,
    %c0_131 = arith.constant 0 : index
    %c90_132 = arith.constant 90 : index
    %178 = vector.load %arg13[%c0_131, %c90_132] : memref<16x144xbf16, #tpu.memory_space<vmem>>, vector<16x18xbf16>
    %179 = arith.extf %178 : vector<16x18xbf16> to vector<16x18xf32>
    %c0_133 = arith.constant 0 : index
    %c108_134 = arith.constant 108 : index
    %180 = vector.load %arg13[%c0_133, %c108_134] : memref<16x144xbf16, #tpu.memory_space<vmem>>, vector<16x18xbf16>
    %181 = arith.extf %180 : vector<16x18xbf16> to vector<16x18xf32>
    %cst_135 = arith.constant 4.000000e-01 : f32
    %182 = vector.broadcast %cst_135 : f32 to vector<16x18xf32>
    %183 = arith.mulf %182, %179 : vector<16x18xf32>
    %cst_136 = arith.constant 6.000000e-01 : f32
    %184 = vector.broadcast %cst_136 : f32 to vector<16x18xf32>
    %185 = arith.mulf %184, %181 : vector<16x18xf32>
    %186 = arith.addf %183, %185 : vector<16x18xf32>
    %187 = arith.truncf %186 : vector<16x18xf32> to vector<16x18xbf16>
    %c0_137 = arith.constant 0 : index
    %c234 = arith.constant 234 : index
    %188 = vector.load %arg12[%c0_137, %c234] : memref<16x324xbf16, #tpu.memory_space<vmem>>, vector<16x18xbf16>
    tpu.vector_store %arg12[%c0_137, %c234], %187 {strides = array<i32>} : memref<16x324xbf16, #tpu.memory_space<vmem>>, vector<16x18xbf16>,
    %c0_138 = arith.constant 0 : index
    %c108_139 = arith.constant 108 : index
    %189 = vector.load %arg13[%c0_138, %c108_139] : memref<16x144xbf16, #tpu.memory_space<vmem>>, vector<16x18xbf16>
    %190 = arith.extf %189 : vector<16x18xbf16> to vector<16x18xf32>
    %c0_140 = arith.constant 0 : index
    %c126_141 = arith.constant 126 : index
    %191 = vector.load %arg13[%c0_140, %c126_141] : memref<16x144xbf16, #tpu.memory_space<vmem>>, vector<16x18xbf16>
    %192 = arith.extf %191 : vector<16x18xbf16> to vector<16x18xf32>
    %cst_142 = arith.constant 0.933333337 : f32
    %193 = vector.broadcast %cst_142 : f32 to vector<16x18xf32>
    %194 = arith.mulf %193, %190 : vector<16x18xf32>
    %cst_143 = arith.constant 0.0666666701 : f32
    %195 = vector.broadcast %cst_143 : f32 to vector<16x18xf32>
    %196 = arith.mulf %195, %192 : vector<16x18xf32>
    %197 = arith.addf %194, %196 : vector<16x18xf32>
    %198 = arith.truncf %197 : vector<16x18xf32> to vector<16x18xbf16>
    %c0_144 = arith.constant 0 : index
    %c252 = arith.constant 252 : index
    %199 = vector.load %arg12[%c0_144, %c252] : memref<16x324xbf16, #tpu.memory_space<vmem>>, vector<16x18xbf16>
    tpu.vector_store %arg12[%c0_144, %c252], %198 {strides = array<i32>} : memref<16x324xbf16, #tpu.memory_space<vmem>>, vector<16x18xbf16>,
    %c0_145 = arith.constant 0 : index
    %c108_146 = arith.constant 108 : index
    %200 = vector.load %arg13[%c0_145, %c108_146] : memref<16x144xbf16, #tpu.memory_space<vmem>>, vector<16x18xbf16>
    %201 = arith.extf %200 : vector<16x18xbf16> to vector<16x18xf32>
    %c0_147 = arith.constant 0 : index
    %c126_148 = arith.constant 126 : index
    %202 = vector.load %arg13[%c0_147, %c126_148] : memref<16x144xbf16, #tpu.memory_space<vmem>>, vector<16x18xbf16>
    %203 = arith.extf %202 : vector<16x18xbf16> to vector<16x18xf32>
    %cst_149 = arith.constant 0.466666669 : f32
    %204 = vector.broadcast %cst_149 : f32 to vector<16x18xf32>
    %205 = arith.mulf %204, %201 : vector<16x18xf32>
    %cst_150 = arith.constant 0.533333361 : f32
    %206 = vector.broadcast %cst_150 : f32 to vector<16x18xf32>
    %207 = arith.mulf %206, %203 : vector<16x18xf32>
    %208 = arith.addf %205, %207 : vector<16x18xf32>
    %209 = arith.truncf %208 : vector<16x18xf32> to vector<16x18xbf16>
    %c0_151 = arith.constant 0 : index
    %c270 = arith.constant 270 : index
    %210 = vector.load %arg12[%c0_151, %c270] : memref<16x324xbf16, #tpu.memory_space<vmem>>, vector<16x18xbf16>
    tpu.vector_store %arg12[%c0_151, %c270], %209 {strides = array<i32>} : memref<16x324xbf16, #tpu.memory_space<vmem>>, vector<16x18xbf16>,
    %c0_152 = arith.constant 0 : index
    %c126_153 = arith.constant 126 : index
    %211 = vector.load %arg13[%c0_152, %c126_153] : memref<16x144xbf16, #tpu.memory_space<vmem>>, vector<16x18xbf16>
    %212 = arith.extf %211 : vector<16x18xbf16> to vector<16x18xf32>
    %c0_154 = arith.constant 0 : index
    %c126_155 = arith.constant 126 : index
    %213 = vector.load %arg13[%c0_154, %c126_155] : memref<16x144xbf16, #tpu.memory_space<vmem>>, vector<16x18xbf16>
    %214 = arith.extf %213 : vector<16x18xbf16> to vector<16x18xf32>
    %cst_156 = arith.constant 1.000000e+00 : f32
    %215 = vector.broadcast %cst_156 : f32 to vector<16x18xf32>
    %216 = arith.mulf %215, %212 : vector<16x18xf32>
    %cst_157 = arith.constant 0.000000e+00 : f32
    %217 = vector.broadcast %cst_157 : f32 to vector<16x18xf32>
    %218 = arith.mulf %217, %214 : vector<16x18xf32>
    %219 = arith.addf %216, %218 : vector<16x18xf32>
    %220 = arith.truncf %219 : vector<16x18xf32> to vector<16x18xbf16>
    %c0_158 = arith.constant 0 : index
    %c288 = arith.constant 288 : index
    %221 = vector.load %arg12[%c0_158, %c288] : memref<16x324xbf16, #tpu.memory_space<vmem>>, vector<16x18xbf16>
    tpu.vector_store %arg12[%c0_158, %c288], %220 {strides = array<i32>} : memref<16x324xbf16, #tpu.memory_space<vmem>>, vector<16x18xbf16>,
    %c0_159 = arith.constant 0 : index
    %c0_160 = arith.constant 0 : index
    %c0_161 = arith.constant 0 : index
    %222 = vector.load %arg5[%c0_159, %c0_160, %c0_161] : memref<3x8x72xbf16, #tpu.memory_space<vmem>>, vector<1x8x72xbf16>
    %223 = vector.shape_cast %222 : vector<1x8x72xbf16> to vector<8x72xbf16>
    %c0_162 = arith.constant 0 : index
    %c0_163 = arith.constant 0 : index
    %c0_164 = arith.constant 0 : index
    %224 = vector.load %arg2[%c0_162, %c0_163, %c0_164] : memref<1x8x324xbf16, #tpu.memory_space<vmem>>, vector<1x8x286xbf16>
    %225 = vector.shape_cast %224 : vector<1x8x286xbf16> to vector<8x286xbf16>
    %c0_165 = arith.constant 0 : index
    %c0_166 = arith.constant 0 : index
    %226 = vector.load %arg12[%c0_165, %c0_166] : memref<16x324xbf16, #tpu.memory_space<vmem>>, vector<16x286xbf16>
    %c0_167 = arith.constant 0 : index
    %c0_168 = arith.constant 0 : index
    %c1 = arith.constant 1 : index
    %227 = vector.load %arg2[%c0_167, %c0_168, %c1] : memref<1x8x324xbf16, #tpu.memory_space<vmem>>, vector<1x8x286xbf16>
    %228 = vector.shape_cast %227 : vector<1x8x286xbf16> to vector<8x286xbf16>
    %c0_169 = arith.constant 0 : index
    %c1_170 = arith.constant 1 : index
    %229 = vector.load %arg12[%c0_169, %c1_170] : memref<16x324xbf16, #tpu.memory_space<vmem>>, vector<16x286xbf16>
    %c0_171 = arith.constant 0 : index
    %c0_172 = arith.constant 0 : index
    %c2 = arith.constant 2 : index
    %230 = vector.load %arg2[%c0_171, %c0_172, %c2] : memref<1x8x324xbf16, #tpu.memory_space<vmem>>, vector<1x8x286xbf16>
    %231 = vector.shape_cast %230 : vector<1x8x286xbf16> to vector<8x286xbf16>
    %c0_173 = arith.constant 0 : index
    %c2_174 = arith.constant 2 : index
    %232 = vector.load %arg12[%c0_173, %c2_174] : memref<16x324xbf16, #tpu.memory_space<vmem>>, vector<16x286xbf16>
    %233 = tpu.concatenate %225, %226, %228, %229, %231, %232 in 0 : vector<8x286xbf16>, vector<16x286xbf16>, vector<8x286xbf16>, vector<16x286xbf16>, vector<8x286xbf16>, vector<16x286xbf16> -> vector<72x286xbf16>
    %cst_175 = arith.constant dense<0.000000e+00> : vector<8x286xf32>
    %234 = tpu.matmul %223, %233, %cst_175 {dimension_numbers = #tpu.dot_dimension_numbers<[1], [0], [0], [1], [0, 0, 1, 1], [], []>} : vector<8x72xbf16>, vector<72x286xbf16>, vector<8x286xf32> -> vector<8x286xf32>
    %c1_176 = arith.constant 1 : index
    %c0_177 = arith.constant 0 : index
    %c0_178 = arith.constant 0 : index
    %235 = vector.load %arg5[%c1_176, %c0_177, %c0_178] : memref<3x8x72xbf16, #tpu.memory_space<vmem>>, vector<1x8x72xbf16>
    %236 = vector.shape_cast %235 : vector<1x8x72xbf16> to vector<8x72xbf16>
    %c0_179 = arith.constant 0 : index
    %c0_180 = arith.constant 0 : index
    %c18_181 = arith.constant 18 : index
    %237 = vector.load %arg2[%c0_179, %c0_180, %c18_181] : memref<1x8x324xbf16, #tpu.memory_space<vmem>>, vector<1x8x286xbf16>
    %238 = vector.shape_cast %237 : vector<1x8x286xbf16> to vector<8x286xbf16>
    %c0_182 = arith.constant 0 : index
    %c18_183 = arith.constant 18 : index
    %239 = vector.load %arg12[%c0_182, %c18_183] : memref<16x324xbf16, #tpu.memory_space<vmem>>, vector<16x286xbf16>
    %c0_184 = arith.constant 0 : index
    %c0_185 = arith.constant 0 : index
    %c19 = arith.constant 19 : index
    %240 = vector.load %arg2[%c0_184, %c0_185, %c19] : memref<1x8x324xbf16, #tpu.memory_space<vmem>>, vector<1x8x286xbf16>
    %241 = vector.shape_cast %240 : vector<1x8x286xbf16> to vector<8x286xbf16>
    %c0_186 = arith.constant 0 : index
    %c19_187 = arith.constant 19 : index
    %242 = vector.load %arg12[%c0_186, %c19_187] : memref<16x324xbf16, #tpu.memory_space<vmem>>, vector<16x286xbf16>
    %c0_188 = arith.constant 0 : index
    %c0_189 = arith.constant 0 : index
    %c20 = arith.constant 20 : index
    %243 = vector.load %arg2[%c0_188, %c0_189, %c20] : memref<1x8x324xbf16, #tpu.memory_space<vmem>>, vector<1x8x286xbf16>
    %244 = vector.shape_cast %243 : vector<1x8x286xbf16> to vector<8x286xbf16>
    %c0_190 = arith.constant 0 : index
    %c20_191 = arith.constant 20 : index
    %245 = vector.load %arg12[%c0_190, %c20_191] : memref<16x324xbf16, #tpu.memory_space<vmem>>, vector<16x286xbf16>
    %246 = tpu.concatenate %238, %239, %241, %242, %244, %245 in 0 : vector<8x286xbf16>, vector<16x286xbf16>, vector<8x286xbf16>, vector<16x286xbf16>, vector<8x286xbf16>, vector<16x286xbf16> -> vector<72x286xbf16>
    %cst_192 = arith.constant dense<0.000000e+00> : vector<8x286xf32>
    %247 = tpu.matmul %236, %246, %cst_192 {dimension_numbers = #tpu.dot_dimension_numbers<[1], [0], [0], [1], [0, 0, 1, 1], [], []>} : vector<8x72xbf16>, vector<72x286xbf16>, vector<8x286xf32> -> vector<8x286xf32>
    %248 = arith.addf %234, %247 : vector<8x286xf32>
    %c2_193 = arith.constant 2 : index
    %c0_194 = arith.constant 0 : index
    %c0_195 = arith.constant 0 : index
    %249 = vector.load %arg5[%c2_193, %c0_194, %c0_195] : memref<3x8x72xbf16, #tpu.memory_space<vmem>>, vector<1x8x72xbf16>
    %250 = vector.shape_cast %249 : vector<1x8x72xbf16> to vector<8x72xbf16>
    %c0_196 = arith.constant 0 : index
    %c0_197 = arith.constant 0 : index
    %c36_198 = arith.constant 36 : index
    %251 = vector.load %arg2[%c0_196, %c0_197, %c36_198] : memref<1x8x324xbf16, #tpu.memory_space<vmem>>, vector<1x8x286xbf16>
    %252 = vector.shape_cast %251 : vector<1x8x286xbf16> to vector<8x286xbf16>
    %c0_199 = arith.constant 0 : index
    %c36_200 = arith.constant 36 : index
    %253 = vector.load %arg12[%c0_199, %c36_200] : memref<16x324xbf16, #tpu.memory_space<vmem>>, vector<16x286xbf16>
    %c0_201 = arith.constant 0 : index
    %c0_202 = arith.constant 0 : index
    %c37 = arith.constant 37 : index
    %254 = vector.load %arg2[%c0_201, %c0_202, %c37] : memref<1x8x324xbf16, #tpu.memory_space<vmem>>, vector<1x8x286xbf16>
    %255 = vector.shape_cast %254 : vector<1x8x286xbf16> to vector<8x286xbf16>
    %c0_203 = arith.constant 0 : index
    %c37_204 = arith.constant 37 : index
    %256 = vector.load %arg12[%c0_203, %c37_204] : memref<16x324xbf16, #tpu.memory_space<vmem>>, vector<16x286xbf16>
    %c0_205 = arith.constant 0 : index
    %c0_206 = arith.constant 0 : index
    %c38 = arith.constant 38 : index
    %257 = vector.load %arg2[%c0_205, %c0_206, %c38] : memref<1x8x324xbf16, #tpu.memory_space<vmem>>, vector<1x8x286xbf16>
    %258 = vector.shape_cast %257 : vector<1x8x286xbf16> to vector<8x286xbf16>
    %c0_207 = arith.constant 0 : index
    %c38_208 = arith.constant 38 : index
    %259 = vector.load %arg12[%c0_207, %c38_208] : memref<16x324xbf16, #tpu.memory_space<vmem>>, vector<16x286xbf16>
    %260 = tpu.concatenate %252, %253, %255, %256, %258, %259 in 0 : vector<8x286xbf16>, vector<16x286xbf16>, vector<8x286xbf16>, vector<16x286xbf16>, vector<8x286xbf16>, vector<16x286xbf16> -> vector<72x286xbf16>
    %cst_209 = arith.constant dense<0.000000e+00> : vector<8x286xf32>
    %261 = tpu.matmul %250, %260, %cst_209 {dimension_numbers = #tpu.dot_dimension_numbers<[1], [0], [0], [1], [0, 0, 1, 1], [], []>} : vector<8x72xbf16>, vector<72x286xbf16>, vector<8x286xf32> -> vector<8x286xf32>
    %262 = arith.addf %248, %261 : vector<8x286xf32>
    %c0_210 = arith.constant 0 : index
    %c0_211 = arith.constant 0 : index
    %263 = vector.load %arg6[%c0_210, %c0_211] : memref<8x1xf32, #tpu.memory_space<vmem>>, vector<8x1xf32>
    %264 = vector.broadcast %263 : vector<8x1xf32> to vector<8x286xf32>
    %265 = arith.addf %262, %264 : vector<8x286xf32>
    %cst_212 = arith.constant 0.000000e+00 : f32
    %266 = vector.broadcast %cst_212 : f32 to vector<8x286xf32>
    %267 = arith.maximumf %265, %266 : vector<8x286xf32>
    %268 = vector.broadcast %0 : vector<1x286xf32> to vector<8x286xf32>
    %269 = arith.mulf %267, %268 : vector<8x286xf32>
    %cst_213 = arith.constant 0.000000e+00 : bf16
    %270 = vector.broadcast %cst_213 : bf16 to vector<8x19xbf16>
    %c0_214 = arith.constant 0 : index
    %c0_215 = arith.constant 0 : index
    %271 = vector.load %arg14[%c0_214, %c0_215] : memref<8x324xbf16, #tpu.memory_space<vmem>>, vector<8x19xbf16>
    tpu.vector_store %arg14[%c0_214, %c0_215], %270 {strides = array<i32>} : memref<8x324xbf16, #tpu.memory_space<vmem>>, vector<8x19xbf16>,
    %cst_216 = arith.constant 0.000000e+00 : bf16
    %272 = vector.broadcast %cst_216 : bf16 to vector<8x19xbf16>
    %c0_217 = arith.constant 0 : index
    %c305 = arith.constant 305 : index
    %273 = vector.load %arg14[%c0_217, %c305] : memref<8x324xbf16, #tpu.memory_space<vmem>>, vector<8x19xbf16>
    tpu.vector_store %arg14[%c0_217, %c305], %272 {strides = array<i32>} : memref<8x324xbf16, #tpu.memory_space<vmem>>, vector<8x19xbf16>,
    %274 = arith.truncf %269 : vector<8x286xf32> to vector<8x286xbf16>
    %c0_218 = arith.constant 0 : index
    %c19_219 = arith.constant 19 : index
    %275 = vector.load %arg14[%c0_218, %c19_219] : memref<8x324xbf16, #tpu.memory_space<vmem>>, vector<8x286xbf16>
    tpu.vector_store %arg14[%c0_218, %c19_219], %274 {strides = array<i32>} : memref<8x324xbf16, #tpu.memory_space<vmem>>, vector<8x286xbf16>,
    %c0_220 = arith.constant 0 : index
    %c0_221 = arith.constant 0 : index
    %c0_222 = arith.constant 0 : index
    %276 = vector.load %arg7[%c0_220, %c0_221, %c0_222] : memref<3x8x24xbf16, #tpu.memory_space<vmem>>, vector<1x8x24xbf16>
    %277 = vector.shape_cast %276 : vector<1x8x24xbf16> to vector<8x24xbf16>
    %c0_223 = arith.constant 0 : index
    %c0_224 = arith.constant 0 : index
    %278 = vector.load %arg14[%c0_223, %c0_224] : memref<8x324xbf16, #tpu.memory_space<vmem>>, vector<8x286xbf16>
    %c0_225 = arith.constant 0 : index
    %c1_226 = arith.constant 1 : index
    %279 = vector.load %arg14[%c0_225, %c1_226] : memref<8x324xbf16, #tpu.memory_space<vmem>>, vector<8x286xbf16>
    %c0_227 = arith.constant 0 : index
    %c2_228 = arith.constant 2 : index
    %280 = vector.load %arg14[%c0_227, %c2_228] : memref<8x324xbf16, #tpu.memory_space<vmem>>, vector<8x286xbf16>
    %281 = tpu.concatenate %278, %279, %280 in 0 : vector<8x286xbf16>, vector<8x286xbf16>, vector<8x286xbf16> -> vector<24x286xbf16>
    %cst_229 = arith.constant dense<0.000000e+00> : vector<8x286xf32>
    %282 = tpu.matmul %277, %281, %cst_229 {dimension_numbers = #tpu.dot_dimension_numbers<[1], [0], [0], [1], [0, 0, 1, 1], [], []>} : vector<8x24xbf16>, vector<24x286xbf16>, vector<8x286xf32> -> vector<8x286xf32>
    %c1_230 = arith.constant 1 : index
    %c0_231 = arith.constant 0 : index
    %c0_232 = arith.constant 0 : index
    %283 = vector.load %arg7[%c1_230, %c0_231, %c0_232] : memref<3x8x24xbf16, #tpu.memory_space<vmem>>, vector<1x8x24xbf16>
    %284 = vector.shape_cast %283 : vector<1x8x24xbf16> to vector<8x24xbf16>
    %c0_233 = arith.constant 0 : index
    %c18_234 = arith.constant 18 : index
    %285 = vector.load %arg14[%c0_233, %c18_234] : memref<8x324xbf16, #tpu.memory_space<vmem>>, vector<8x286xbf16>
    %c0_235 = arith.constant 0 : index
    %c19_236 = arith.constant 19 : index
    %286 = vector.load %arg14[%c0_235, %c19_236] : memref<8x324xbf16, #tpu.memory_space<vmem>>, vector<8x286xbf16>
    %c0_237 = arith.constant 0 : index
    %c20_238 = arith.constant 20 : index
    %287 = vector.load %arg14[%c0_237, %c20_238] : memref<8x324xbf16, #tpu.memory_space<vmem>>, vector<8x286xbf16>
    %288 = tpu.concatenate %285, %286, %287 in 0 : vector<8x286xbf16>, vector<8x286xbf16>, vector<8x286xbf16> -> vector<24x286xbf16>
    %cst_239 = arith.constant dense<0.000000e+00> : vector<8x286xf32>
    %289 = tpu.matmul %284, %288, %cst_239 {dimension_numbers = #tpu.dot_dimension_numbers<[1], [0], [0], [1], [0, 0, 1, 1], [], []>} : vector<8x24xbf16>, vector<24x286xbf16>, vector<8x286xf32> -> vector<8x286xf32>
    %290 = arith.addf %282, %289 : vector<8x286xf32>
    %c2_240 = arith.constant 2 : index
    %c0_241 = arith.constant 0 : index
    %c0_242 = arith.constant 0 : index
    %291 = vector.load %arg7[%c2_240, %c0_241, %c0_242] : memref<3x8x24xbf16, #tpu.memory_space<vmem>>, vector<1x8x24xbf16>
    %292 = vector.shape_cast %291 : vector<1x8x24xbf16> to vector<8x24xbf16>
    %c0_243 = arith.constant 0 : index
    %c36_244 = arith.constant 36 : index
    %293 = vector.load %arg14[%c0_243, %c36_244] : memref<8x324xbf16, #tpu.memory_space<vmem>>, vector<8x286xbf16>
    %c0_245 = arith.constant 0 : index
    %c37_246 = arith.constant 37 : index
    %294 = vector.load %arg14[%c0_245, %c37_246] : memref<8x324xbf16, #tpu.memory_space<vmem>>, vector<8x286xbf16>
    %c0_247 = arith.constant 0 : index
    %c38_248 = arith.constant 38 : index
    %295 = vector.load %arg14[%c0_247, %c38_248] : memref<8x324xbf16, #tpu.memory_space<vmem>>, vector<8x286xbf16>
    %296 = tpu.concatenate %293, %294, %295 in 0 : vector<8x286xbf16>, vector<8x286xbf16>, vector<8x286xbf16> -> vector<24x286xbf16>
    %cst_249 = arith.constant dense<0.000000e+00> : vector<8x286xf32>
    %297 = tpu.matmul %292, %296, %cst_249 {dimension_numbers = #tpu.dot_dimension_numbers<[1], [0], [0], [1], [0, 0, 1, 1], [], []>} : vector<8x24xbf16>, vector<24x286xbf16>, vector<8x286xf32> -> vector<8x286xf32>
    %298 = arith.addf %290, %297 : vector<8x286xf32>
    %c0_250 = arith.constant 0 : index
    %c0_251 = arith.constant 0 : index
    %299 = vector.load %arg8[%c0_250, %c0_251] : memref<8x1xf32, #tpu.memory_space<vmem>>, vector<8x1xf32>
    %300 = vector.broadcast %299 : vector<8x1xf32> to vector<8x286xf32>
    %301 = arith.addf %298, %300 : vector<8x286xf32>
    %cst_252 = arith.constant 0.000000e+00 : f32
    %302 = vector.broadcast %cst_252 : f32 to vector<8x286xf32>
    %303 = arith.maximumf %301, %302 : vector<8x286xf32>
    %304 = vector.broadcast %0 : vector<1x286xf32> to vector<8x286xf32>
    %305 = arith.mulf %303, %304 : vector<8x286xf32>
    %cst_253 = arith.constant 0.000000e+00 : f32
    %306 = vector.broadcast %cst_253 : f32 to vector<1x19xf32>
    %c0_254 = arith.constant 0 : index
    %c0_255 = arith.constant 0 : index
    %c0_256 = arith.constant 0 : index
    %307 = vector.load %arg11[%c0_254, %c0_255, %c0_256] : memref<1x1x324xf32, #tpu.memory_space<vmem>>, vector<1x1x19xf32>
    %308 = vector.shape_cast %307 : vector<1x1x19xf32> to vector<1x19xf32>
    %309 = vector.shape_cast %306 : vector<1x19xf32> to vector<1x1x19xf32>
    tpu.vector_store %arg11[%c0_254, %c0_255, %c0_256], %309 {strides = array<i32>} : memref<1x1x324xf32, #tpu.memory_space<vmem>>, vector<1x1x19xf32>,
    %cst_257 = arith.constant 0.000000e+00 : f32
    %310 = vector.broadcast %cst_257 : f32 to vector<1x19xf32>
    %c0_258 = arith.constant 0 : index
    %c0_259 = arith.constant 0 : index
    %c305_260 = arith.constant 305 : index
    %311 = vector.load %arg11[%c0_258, %c0_259, %c305_260] : memref<1x1x324xf32, #tpu.memory_space<vmem>>, vector<1x1x19xf32>
    %312 = vector.shape_cast %311 : vector<1x1x19xf32> to vector<1x19xf32>
    %313 = vector.shape_cast %310 : vector<1x19xf32> to vector<1x1x19xf32>
    tpu.vector_store %arg11[%c0_258, %c0_259, %c305_260], %313 {strides = array<i32>} : memref<1x1x324xf32, #tpu.memory_space<vmem>>, vector<1x1x19xf32>,
    %c0_261 = arith.constant 0 : index
    %c0_262 = arith.constant 0 : index
    %c0_263 = arith.constant 0 : index
    %314 = vector.load %arg9[%c0_261, %c0_262, %c0_263] : memref<1x8x1xf32, #tpu.memory_space<vmem>>, vector<1x8x1xf32>
    %315 = vector.shape_cast %314 : vector<1x8x1xf32> to vector<8x1xf32>
    %316 = vector.broadcast %315 : vector<8x1xf32> to vector<8x286xf32>
    %317 = arith.mulf %316, %305 : vector<8x286xf32>
    %cst_264 = arith.constant dense<0.000000e+00> : vector<286xf32>
    %318 = vector.multi_reduction <add>, %317, %cst_264 [0] : vector<8x286xf32> to vector<286xf32>
    %319 = vector.shape_cast %318 : vector<286xf32> to vector<1x286xf32>
    %c0_265 = arith.constant 0 : index
    %c0_266 = arith.constant 0 : index
    %c0_267 = arith.constant 0 : index
    %320 = vector.load %arg10[%c0_265, %c0_266, %c0_267] : memref<1x1x1xf32, #tpu.memory_space<vmem>>, vector<1x1x1xf32>
    %321 = vector.shape_cast %320 : vector<1x1x1xf32> to vector<1x1xf32>
    %322 = vector.broadcast %321 : vector<1x1xf32> to vector<1x286xf32>
    %323 = arith.addf %319, %322 : vector<1x286xf32>
    %c0_268 = arith.constant 0 : index
    %c0_269 = arith.constant 0 : index
    %c19_270 = arith.constant 19 : index
    %324 = vector.load %arg11[%c0_268, %c0_269, %c19_270] : memref<1x1x324xf32, #tpu.memory_space<vmem>>, vector<1x1x286xf32>
    %325 = vector.shape_cast %324 : vector<1x1x286xf32> to vector<1x286xf32>
    %326 = vector.shape_cast %323 : vector<1x286xf32> to vector<1x1x286xf32>
    tpu.vector_store %arg11[%c0_268, %c0_269, %c19_270], %326 {strides = array<i32>} : memref<1x1x324xf32, #tpu.memory_space<vmem>>, vector<1x1x286xf32>,
    return
  }
  func.func @transform_0(%arg0: i32) -> (i32, i32, i32) {
    %c0_i32 = arith.constant 0 : i32
    %c0_i32_0 = arith.constant 0 : i32
    %c0_i32_1 = arith.constant 0 : i32
    return %arg0, %c0_i32, %c0_i32_0 : i32, i32, i32
  }
  func.func @transform_1(%arg0: i32) -> (i32, i32, i32) {
    %c0_i32 = arith.constant 0 : i32
    %c0_i32_0 = arith.constant 0 : i32
    %c0_i32_1 = arith.constant 0 : i32
    return %arg0, %c0_i32, %c0_i32_0 : i32, i32, i32
  }
  func.func @transform_2(%arg0: i32) -> (i32, i32) {
    %c0_i32 = arith.constant 0 : i32
    %c0_i32_0 = arith.constant 0 : i32
    %c0_i32_1 = arith.constant 0 : i32
    return %c0_i32, %c0_i32_0 : i32, i32
  }
  func.func @transform_3(%arg0: i32) -> (i32, i32) {
    %c0_i32 = arith.constant 0 : i32
    %c0_i32_0 = arith.constant 0 : i32
    %c0_i32_1 = arith.constant 0 : i32
    return %c0_i32, %c0_i32_0 : i32, i32
  }
  func.func @transform_4(%arg0: i32) -> (i32, i32, i32) {
    %c0_i32 = arith.constant 0 : i32
    %c0_i32_0 = arith.constant 0 : i32
    %c0_i32_1 = arith.constant 0 : i32
    %c0_i32_2 = arith.constant 0 : i32
    return %c0_i32, %c0_i32_0, %c0_i32_1 : i32, i32, i32
  }
  func.func @transform_5(%arg0: i32) -> (i32, i32) {
    %c0_i32 = arith.constant 0 : i32
    %c0_i32_0 = arith.constant 0 : i32
    %c0_i32_1 = arith.constant 0 : i32
    return %c0_i32, %c0_i32_0 : i32, i32
  }
  func.func @transform_6(%arg0: i32) -> (i32, i32, i32) {
    %c0_i32 = arith.constant 0 : i32
    %c0_i32_0 = arith.constant 0 : i32
    %c0_i32_1 = arith.constant 0 : i32
    %c0_i32_2 = arith.constant 0 : i32
    return %c0_i32, %c0_i32_0, %c0_i32_1 : i32, i32, i32
  }
  func.func @transform_7(%arg0: i32) -> (i32, i32) {
    %c0_i32 = arith.constant 0 : i32
    %c0_i32_0 = arith.constant 0 : i32
    %c0_i32_1 = arith.constant 0 : i32
    return %c0_i32, %c0_i32_0 : i32, i32
  }
  func.func @transform_8(%arg0: i32) -> (i32, i32, i32) {
    %c0_i32 = arith.constant 0 : i32
    %c0_i32_0 = arith.constant 0 : i32
    %c0_i32_1 = arith.constant 0 : i32
    %c0_i32_2 = arith.constant 0 : i32
    return %c0_i32, %c0_i32_0, %c0_i32_1 : i32, i32, i32
  }
  func.func @transform_9(%arg0: i32) -> (i32, i32, i32) {
    %c0_i32 = arith.constant 0 : i32
    %c0_i32_0 = arith.constant 0 : i32
    %c0_i32_1 = arith.constant 0 : i32
    %c0_i32_2 = arith.constant 0 : i32
    return %c0_i32, %c0_i32_0, %c0_i32_1 : i32, i32, i32
  }
  func.func @transform_10(%arg0: i32) -> (i32, i32, i32) {
    %c0_i32 = arith.constant 0 : i32
    %c0_i32_0 = arith.constant 0 : i32
    %c0_i32_1 = arith.constant 0 : i32
    return %arg0, %c0_i32, %c0_i32_0 : i32, i32, i32
  }
}

</mosaic_0001>

<bundles_post_ra>
// kernel: unet_forward.7
= control target key start
LH: loop header
LB: loop body
LE: loop exit
PB: predicated region body
PF: predicated region fallthrough
CT: control target
= control target key end

     0   :  { %11 = vsyncpa [#allocation4], 0  ;;  %s2146_s0 = inlined_call_operand.hbm [shape: bf16[2,16,36], index: 0, kind: input, shape index: {}]   ;;  %s2147_s1 = inlined_call_operand.hbm [shape: f32[1,22], index: 1, kind: input, shape index: {}]   ;;  %s2148_s2 = inlined_call_operand.hbm [shape: bf16[3,32,48], index: 2, kind: input, shape index: {}]   ;;  %s2149_s3 = inlined_call_operand.hbm [shape: f32[32,1], index: 3, kind: input, shape index: {}]   ;;  %s2150_s4 = inlined_call_operand.hbm [shape: bf16[3,32,96], index: 4, kind: input, shape index: {}]   ;;  %s2151_s5 = inlined_call_operand.hbm [shape: f32[32,1], index: 5, kind: input, shape index: {}]   ;;  %s2152_s6 = inlined_call_operand.hbm [shape: bf16[2,32,36], index: 6, kind: output, shape index: {}]  }
   0x1   :  { %13 = vsyncpa [#allocation4 + $0x1], 0 }
   0x2   :  { %14 = vsyncpa [#allocation7], 0 }
   0x3   :  { %15 = vsyncpa [#allocation10], 0 }
   0x4   :  { %16 = vsyncpa [#allocation13], 0 }
   0x5   :  { %17 = vsyncpa [#allocation5], 0 }
   0x6   :  { %19 = vsyncpa [#allocation5 + $0x1], 0  ;;  %s1747_s21 = smov 0   ;;  %s1749_s22 = smov 0  }
   0x7   :  { %s1751_s23 = smov 0   ;;  %s1753_s24 = smov 0  }
   0x8 LB: > { %s1693_s25 = smov [#allocation6]   ;;  %s1768_s27 = sadd.s32 4294967295, %s1691_s24   ;;  %s1691_s24 = sphi %s1753_s24, %s2181_s24   ;;  %s1687_s23 = sphi %s1751_s23, %s2180_s23   ;;  %s1683_s22 = sphi %s1749_s22, %s2179_s22   ;;  %s1679_s21 = sphi %s1747_s21, %s2178_s21  }
   0x9   : > { %s200_s26 = sshll.u32 %s1693_s25, 4  ;;  %p1127_p0 = scmp.ge.s32.totalorder %s1691_s24, 1  ;;  %s1773_s26 = int_to_ptr.vmem [resolvable:$true] %s200_s26 }
   0xa   : > { %p2155_p1 = scmp.eq.s32.totalorder %s1768_s27, 0  ;;  %p187_p2 = scmp.lt.s32.totalorder %s1691_s24, 3 }
   0xb   : > { %s1694_s29 = smov [#allocation9]   ;;  %s1695_s8 = smov [#allocation8]  }
   0xc   : > { %p1775_p3 = pnand %p1127_p0, %p187_p2  ;;  %s223_s30 = sshll.u32 %s1694_s29, 4  ;;  %s1782_s30 = int_to_ptr.vmem [resolvable:$true] %s223_s30 }
   0xd   : > { %s210_s9 = sshll.u32 %s1695_s8, 4  ;;  %s1443_s12 = scalar_lea.hbm %s2147_s1, 16  ;;  %s1790_s9 = int_to_ptr.vmem [resolvable:$true] %s210_s9 }
   0xe   : > { %s2158_s28 = scalar_select %p1775_p3, 1, 0 }
   0xf   : > { %p1343_p5 = pneg %p1775_p3  ;;  %p1444_p7 = scmp.ne.s32.totalorder %s2147_s1, %s1443_s12 }
  0x10   : > { %p1450_p11 = scmp.lt.u32.totalorder %s1443_s12, %s2147_s1 }
  0x11   : > { %p1786_p6 = pnand %p1343_p5, %p2155_p1 }
  0x13   : > { %p1800_p8 = pneg %p1786_p6 }
  0x15   : > { %p1446_p9 = pnand %p1800_p8, %p1444_p7 }
  0x17   : > { %p1447_p10 = pneg %p1446_p9 }
  0x19   : > { %p1452_p12 = pnand %p1450_p11, %p1447_p10 }
  0x1b   : > { %1455 = shalt.err (!%p1452_p12)
}
  0x1c   : > { %s1456_s18 = scalar_lea.vmem %s1773_s26, 16  ;;  %s1463_s19 = scalar_lea.vmem %s1773_s26, 32 }
  0x1d   : > { %p1457_p13 = scmp.ne.s32.totalorder %s1773_s26, %s1456_s18  ;;  %p1464_p5 = scmp.lt.s32.totalorder %s1773_s26, %s1773_s26 }
  0x1e   : > { %p1465_p7 = scmp.lt.s32.totalorder %s1463_s19, %s1456_s18 }
  0x1f   : > { %p1459_p0 = pnand %p1457_p13, %p1800_p8 }
  0x20   : > { %p1466_p9 = por %p1465_p7, %p1464_p5 }
  0x21   : > { %p1460_p2 = pneg %p1459_p0 }
  0x23   : > { %p1467_p4 = pnand %p1466_p9, %p1460_p2 }
  0x25   : > { %1470 = shalt.err (!%p1467_p4)
}
  0x26   : > { %1346 = dma.hbm_to_vmem [thread:$0]  (!%p1786_p6), %s2147_s1, 16, %s1773_s26, [#allocation7]  }
  0x27   : > { %s1471_s10 = scalar_lea.hbm %s2149_s3, 512 }
  0x28   : > { %p1472_p10 = scmp.ne.s32.totalorder %s2149_s3, %s1471_s10  ;;  %p1478_p4 = scmp.lt.u32.totalorder %s1471_s10, %s2149_s3 }
  0x2a   : > { %p1474_p11 = pnand %p1472_p10, %p1800_p8 }
  0x2c   : > { %p1475_p12 = pneg %p1474_p11 }
  0x2e   : > { %p1480_p13 = pnand %p1478_p4, %p1475_p12 }
  0x30   : > { %1483 = shalt.err (!%p1480_p13)
}
  0x31   : > { %s1484_s26 = scalar_lea.vmem %s1782_s30, 512  ;;  %p1492_p7 = scmp.lt.s32.totalorder %s1782_s30, %s1782_s30 }
  0x32   : > { %p1485_p0 = scmp.ne.s32.totalorder %s1782_s30, %s1484_s26  ;;  %p1493_p9 = scmp.lt.s32.totalorder %s1484_s26, %s1484_s26 }
  0x34   : > { %p1487_p2 = pnand %p1485_p0, %p1800_p8  ;;  %p1494_p10 = por %p1493_p9, %p1492_p7 }
  0x36   : > { %p1488_p5 = pneg %p1487_p2 }
  0x38   : > { %p1495_p11 = pnand %p1494_p10, %p1488_p5 }
  0x3a   : > { %1498 = shalt.err (!%p1495_p11)
}
  0x3b   : > { %s2153_s16 = smov 128   ;;  %s2154_s17 = smov 8  }
  0x3c   : > { %1352 = dma.hbm_to_vmem [thread:$0]  (!%p1786_p6), %s2149_s3, 512, %s1782_s30, [#allocation10], %s2153_s16, %s2153_s16, %s2154_s17  }
  0x3d   : > { %s1499_s29 = scalar_lea.hbm %s2148_s2, 768 }
  0x3e   : > { %p1500_p12 = scmp.ne.s32.totalorder %s2148_s2, %s1499_s29  ;;  %p1506_p0 = scmp.lt.u32.totalorder %s1499_s29, %s2148_s2 }
  0x40   : > { %p1502_p4 = pnand %p1500_p12, %p1800_p8 }
  0x42   : > { %p1503_p13 = pneg %p1502_p4 }
  0x44   : > { %p1508_p2 = pnand %p1506_p0, %p1503_p13 }
  0x46   : > { %1511 = shalt.err (!%p1508_p2)
}
  0x47   : > { %s1512_s30 = scalar_lea.vmem %s1790_s9, 768  ;;  %p1520_p10 = scmp.lt.s32.totalorder %s1790_s9, %s1790_s9 }
  0x48   : > { %p1513_p5 = scmp.ne.s32.totalorder %s1790_s9, %s1512_s30  ;;  %p1521_p11 = scmp.lt.s32.totalorder %s1512_s30, %s1512_s30 }
  0x4a   : > { %p1515_p7 = pnand %p1513_p5, %p1800_p8  ;;  %p1522_p12 = por %p1521_p11, %p1520_p10 }
  0x4c   : > { %p1516_p9 = pneg %p1515_p7 }
  0x4e   : > { %p1523_p4 = pnand %p1522_p12, %p1516_p9 }
  0x50   : > { %1526 = shalt.err (!%p1523_p4)
}
  0x51   : > { %s1698_s13 = smov 64   ;;  %s1699_s14 = smov 4  }
  0x52   : > { %1349 = dma.hbm_to_vmem [thread:$0]  (!%p1786_p6), %s2148_s2, 768, %s1790_s9, [#allocation7], %s1698_s13, %s1698_s13, %s1699_s14  }
  0x53   : > { %s1700_s19 = smov [#allocation11]   ;;  %s1701_s25 = smov [#allocation12]  }
  0x54   : > { %s236_s20 = sshll.u32 %s1700_s19, 4  ;;  %s249_s29 = sshll.u32 %s1701_s25, 4  ;;  %s237_s20 = int_to_ptr.vmem [resolvable:$true] %s236_s20  ;;  %s250_s29 = int_to_ptr.vmem [resolvable:$true] %s249_s29 }
  0x55   : > { %s1527_s11 = scalar_lea.hbm %s2150_s4, 768 }
  0x56   : > { %p1528_p13 = scmp.ne.s32.totalorder %s2150_s4, %s1527_s11  ;;  %p1534_p5 = scmp.lt.u32.totalorder %s1527_s11, %s2150_s4 }
  0x58   : > { %p1530_p0 = pnand %p1528_p13, %p1800_p8 }
  0x5a   : > { %p1531_p2 = pneg %p1530_p0 }
  0x5c   : > { %p1536_p7 = pnand %p1534_p5, %p1531_p2 }
  0x5e   : > { %1539 = shalt.err (!%p1536_p7)
}
  0x5f   : > { %s1540_s9 = scalar_lea.vmem %s237_s20, 768  ;;  %p1548_p12 = scmp.lt.s32.totalorder %s237_s20, %s237_s20 }
  0x60   : > { %p1541_p9 = scmp.ne.s32.totalorder %s237_s20, %s1540_s9  ;;  %p1549_p4 = scmp.lt.s32.totalorder %s1540_s9, %s1540_s9 }
  0x62   : > { %p1543_p10 = pnand %p1541_p9, %p1800_p8  ;;  %p1550_p1 = por %p1549_p4, %p1548_p12 }
  0x64   : > { %p1544_p11 = pneg %p1543_p10 }
  0x66   : > { %p1551_p3 = pnand %p1550_p1, %p1544_p11 }
  0x68   : > { %1554 = shalt.err (!%p1551_p3)
}
  0x69   : > { %1355 = dma.hbm_to_vmem [thread:$0]  (!%p1786_p6), %s2150_s4, 768, %s237_s20, [#allocation10], %s1698_s13, %s1698_s13, %s1699_s14  }
  0x6a   : > { %s1555_s19 = scalar_lea.hbm %s2151_s5, 512 }
  0x6b   : > { %p1556_p1 = scmp.ne.s32.totalorder %s2151_s5, %s1555_s19  ;;  %p1562_p0 = scmp.lt.u32.totalorder %s1555_s19, %s2151_s5 }
  0x6d   : > { %p1558_p3 = pnand %p1556_p1, %p1800_p8 }
  0x6f   : > { %p1559_p13 = pneg %p1558_p3 }
  0x71   : > { %p1564_p2 = pnand %p1562_p0, %p1559_p13 }
  0x73   : > { %1567 = shalt.err (!%p1564_p2)
}
  0x74   : > { %s1568_s12 = scalar_lea.vmem %s250_s29, 512  ;;  %p1576_p10 = scmp.lt.s32.totalorder %s250_s29, %s250_s29 }
  0x75   : > { %p1569_p5 = scmp.ne.s32.totalorder %s250_s29, %s1568_s12  ;;  %p1577_p11 = scmp.lt.s32.totalorder %s1568_s12, %s1568_s12 }
  0x77   : > { %p1571_p7 = pnand %p1569_p5, %p1800_p8  ;;  %p1578_p12 = por %p1577_p11, %p1576_p10 }
  0x79   : > { %p1572_p9 = pneg %p1571_p7 }
  0x7b   : > { %p1579_p4 = pnand %p1578_p12, %p1572_p9 }
  0x7d   : > { %1582 = shalt.err (!%p1579_p4)
}
  0x7e   : > { %s2161_s20 = smov 8   ;;  %s2162_s30 = smov 128  }
  0x7f   : > { %1358 = dma.hbm_to_vmem [thread:$0]  (!%p1786_p6), %s2151_s5, 512, %s250_s29, [#allocation13], %s2162_s30, %s2162_s30, %s2161_s20  }
  0x80   : > { %s1126_s7 = sadd.s32 4294967294, %s1691_s24   ;;  %s1918_s15 = sadd.s32 1, %s1691_s24  }
  0x81   : > { %s32_s17 = sadd.s32 1, %s1687_s23  ;;  %s29_s26 = ssub.s32 %s1691_s24, %s1918_s15 }
  0x82   : > { %p39_p8 = scmp.ne.s32.totalorder %s1687_s23, %s1683_s22  ;;  %p30_p1 = scmp.eq.s32.totalorder %s29_s26, 0 }
  0x83   : > { %p40_p3 = scmp.eq.s32.totalorder %s1691_s24, 0  ;;  %p45_p13 = scmp.ne.s32.totalorder %s1683_s22, %s1679_s21 }
  0x84   : > { %p174_p0 = scmp.eq.s32.totalorder %s1768_s27, 1  ;;  %p2163_p5 = scmp.eq.s32.totalorder %s1768_s27, 0 }
  0x85   : > { %s1930_s18 = scalar_select %p30_p1, %s1687_s23, %s32_s17  }
  0x86   : > { %p41_p2 = por %p40_p3, %p39_p8  ;;  %p1934_p7 = por %p2163_p5, %p45_p13 }
  0x87   : > { %p1938_p6 = por %p174_p0, %p39_p8  ;;  %p180_p9 = scmp.eq.s32.totalorder %s1126_s7, 1 }
  0x88   : > { %p1372_p10 = scmp.lt.s32.totalorder %s1691_s24, 2  ;;  %s263_s25 = sand.u32 1, %s1687_s23  }
  0x89   : > { %s2165_s29 = scalar_select %p1938_p6, 1, 0 }
  0x8a   : > { %p1944_p11 = por %p180_p9, %p45_p13  ;;  %s1134_s10 = sshll.u32 %s263_s25, 3 }
  0x8b   : > { %s1180_s11 = sshll.u32 %s1691_s24, 7  ;;  %s267_s9 = scalar_lea.vmem [#allocation3], %s1134_s10 }
  0x8c   : > { %s2166_s8 = scalar_select %p1944_p11, 1, 0 }
  0x8d   : > { %s1952_s30 = scalar_lea.hbm %s2146_s0, %s1180_s11  ;;  %s274_s16 = sshll.u32 %s267_s9, 4  ;;  %s1958_s16 = int_to_ptr.vmem [resolvable:$true] %s274_s16 }
  0x8e   : > { %p1954_p12 = pnand %p1372_p10, %p41_p2  ;;  %s1960_s17 = scalar_lea.sflag [#allocation4], %s263_s25 }
  0x8f   : > { %s1583_s26 = scalar_lea.hbm %s1952_s30, 128  ;;  %s1588_s12 = scalar_lea.hbm %s2146_s0, 256 }
  0x90   : > { %p1584_p4 = scmp.ne.s32.totalorder %s1952_s30, %s1583_s26  ;;  %p1585_p8 = pneg %p1954_p12 }
  0x91   : > { %p1589_p13 = scmp.lt.u32.totalorder %s1952_s30, %s2146_s0  ;;  %p1590_p0 = scmp.lt.u32.totalorder %s1588_s12, %s1583_s26 }
  0x92   : > { %p1586_p1 = pnand %p1585_p8, %p1584_p4  ;;  %p1592_p5 = scmp.lt.u32.totalorder %s1583_s26, %s1952_s30 }
  0x93   : > { %p1591_p2 = por %p1590_p0, %p1589_p13 }
  0x94   : > { %p1587_p3 = pneg %p1586_p1 }
  0x95   : > { %p1593_p9 = por %p1592_p5, %p1591_p2 }
  0x97   : > { %p1594_p10 = pnand %p1593_p9, %p1587_p3 }
  0x99   : > { %1597 = shalt.err (!%p1594_p10)
}
  0x9a   : > { %s1598_s25 = scalar_lea.vmem %s1958_s16, 128  ;;  %s1702_s10 = smov [#allocation3]  }
  0x9b   : > { %p1599_p4 = scmp.ne.s32.totalorder %s1958_s16, %s1598_s25  ;;  %s1603_s11 = sshll.u32 %s1702_s10, 4  ;;  %s1604_s11 = int_to_ptr.vmem [resolvable:$false] %s1603_s11 }
  0x9c   : > { %s1605_s20 = scalar_lea.vmem %s1604_s11, 256  ;;  %p1606_p6 = scmp.lt.s32.totalorder %s1958_s16, %s1604_s11 }
  0x9d   : > { %p1601_p1 = pnand %p1599_p4, %p1585_p8  ;;  %p1607_p13 = scmp.lt.s32.totalorder %s1605_s20, %s1598_s25 }
  0x9f   : > { %p1602_p11 = pneg %p1601_p1  ;;  %p1608_p0 = por %p1607_p13, %p1606_p6 }
  0xa1   : > { %p1609_p2 = pnand %p1608_p0, %p1602_p11 }
  0xa3   : > { %1612 = shalt.err (!%p1609_p2)
}
  0xa4   : > { %1362 = dma.hbm_to_vmem [thread:$0]  (!%p1954_p12), %s1952_s30, 128, %s1958_s16, %s1960_s17, %s1698_s13, %s1698_s13, %s1699_s14  }
  0xa5   : > { %p2168_p8 = scmp.ne.s32.totalorder %s2158_s28, 0 }
  0xa6   : > { %s1994_s26 = sand.u32 (!%p2168_p8), 1, %s1683_s22  }
  0xa7   : > { %286 = sbr.rel (%p2168_p8) target bundleno = 1399 (0x577), region = 44  ;;  %s1138_s12 = sshll.u32 (!%p2168_p8), %s1994_s26, 3 }
  0xa8   : > { %s289_s9 = scalar_lea.sflag (!%p2168_p8), [#allocation4], %s1994_s26  ;;  %s292_s25 = scalar_lea.vmem (!%p2168_p8), [#allocation3], %s1138_s12 }
  0xae   : > { %1658 = dma.done.wait (%p1934_p7), %s289_s9, 128  }
  0xaf   : > { %1660 = vsyncadd (%p1934_p7), %s289_s9, 4294967168  ;;  %p2169_p6 = scmp.eq.s32.totalorder %s1768_s27, 0 }
  0xb1   : > { %1662 = dma.done.wait (%p2169_p6), [#allocation7], 784   ;;  %p2170_p11 = pmov %p2169_p6 }
  0xb2   : > { %p2171_p12 = pmov %p2169_p6 }
  0xb3   : > { %1664 = vsyncadd (%p2170_p11), [#allocation7], 4294966512 }
  0xb4   : > { %1666 = dma.done.wait (%p2171_p12), [#allocation10], 1280   ;;  %p2172_p3 = pmov %p2169_p6 }
  0xb6   : > { %1668 = vsyncadd (%p2172_p3), [#allocation10], 4294966016  ;;  %p2173_p5 = pmov %p2172_p3 }
  0xb7   : > { %p2174_p9 = pmov %p2172_p3 }
  0xb8   : > { %1670 = dma.done.wait (%p2173_p5), [#allocation13], 512  }
  0xb9   : > { %1672 = vsyncadd (%p2174_p9), [#allocation13], 4294966784  ;;  %v1430_v0 = vld [vmem:[%s292_s25] sm:$0xff]   ;;  %s1703_s28 = smov 127   ;;  %s1704_s13 = smov 122   ;;  %vm385_vm0 = vcmask 392192  }
  0xba   : > { %355 = vrot.lane.b32.xlu0 %v1430_v0, %s1703_s28  ;;  %376 = vrot.lane.b32.xlu1 %v1430_v0, %s1704_s13  ;;  %s1705_s14 = smov 126   ;;  %v1431_v1 = vld [vmem:[#allocation8 + $0x10] sm:$0xff]   ;;  %s1706_s19 = smov 116   ;;  %v590_v5 = vld [vmem:[#allocation9 + $0x8] sm:$0xff]  ;;  %v1707_v7 = vmov 0   ;;  %v591_v8 = vld [vmem:[#allocation9 + $0x10] sm:$0xff] }
  0xbb   : > { %1231 = vmatprep.mubr.msk.bf16.mxu0 %vm385_vm0, %v1431_v1  ;;  %v589_v6 = vld [vmem:[#allocation9] sm:$0xff]  ;;  %1429 = vset.pattern.permute.xlu1 %v1707_v7  ;;  %v592_v9 = vld [vmem:[#allocation9 + $0x18] sm:$0xff]  ;;  %v1432_v12 = vld [vmem:[#allocation8 + $0x18] sm:$0xff]   ;;  %vm631_vm1 = vcmask 56320   ;;  %vm634_vm2 = vcmask 294120   ;;  %s1708_s30 = smov 7  }
  0xbc   : > { %1428 = vset.pattern.permute.xlu0 %v1707_v7  ;;  %v1433_v13 = vld [vmem:[#allocation8] sm:$0xff]   ;;  %v1434_v14 = vld [vmem:[#allocation8 + $0x8] sm:$0xff]   ;;  %633 = vst.msk [vmem:[#allocation2 + $0x8] sm:$0xff] %vm631_vm1, %v1707_v7  ;;  %632 = vst.msk [vmem:[#allocation2] sm:$0xff] %vm631_vm1, %v1707_v7  ;;  %vm647_vm3 = vcmask 236600   ;;  %vm703_vm4 = vcmask 785408  }
  0xbd   : > { %v1435_v16 = vld [vmem:[#allocation8 + $0x20] sm:$0xff]   ;;  %v1436_v19 = vld [vmem:[#allocation8 + $0x28] sm:$0xff]   ;;  %636 = vst.msk [vmem:[#allocation2 + $0x8] sm:$0xff] %vm634_vm2, %v1707_v7  ;;  %635 = vst.msk [vmem:[#allocation2] sm:$0xff] %vm634_vm2, %v1707_v7  ;;  %s1144_s16 = sshll.u32 %s1994_s26, 4  ;;  %vm954_vm5 = vcmask 52224  }
  0xbe   : > { %358 = vrot.lane.b32.xlu0 %v1430_v0, %s1705_s14  ;;  %v2034_v32 = vld [vmem:[#allocation6] ss:$0 sm:$0xff]  ;;  %v1437_v47 = vld [vmem:[#allocation11] sm:$0xff]   ;;  %v1439_v50 = vld [vmem:[#allocation11 + $0x10] sm:$0xff]   ;;  %vm959_vm6 = vcmask 290024   ;;  %s2065_s7 = scalar_lea.vmem [#allocation14], %s1144_s16 }
  0xbf   : > { %1283 = vmatprep.mubr.msk.bf16.mxu1 %vm703_vm4, %v1437_v47  ;;  %v917_v56 = vld [vmem:[#allocation12 + $0x8] sm:$0xff]  ;;  %v916_v57 = vld [vmem:[#allocation12] sm:$0xff]  ;;  %v1438_v58 = vld [vmem:[#allocation11 + $0x8] sm:$0xff]   ;;  %955 = vst.msk [vmem:[%s2065_s7] sm:$0xf] %vm954_vm5, %v1707_v7  ;;  %vm986_vm7 = vcmask 232504  }
  0xc0   : > { %v1440_v59 = vld [vmem:[#allocation11 + $0x20] sm:$0xff]   ;;  %v919_v60 = vld [vmem:[#allocation12 + $0x18] sm:$0xff]  ;;  %956 = vst.msk [vmem:[%s2065_s7 + $0x4] sm:$0xf] %vm954_vm5, %v1707_v7  ;;  %957 = vst.msk [vmem:[%s2065_s7 + $0x8] sm:$0xf] %vm954_vm5, %v1707_v7 }
  0xc1   : > { %v918_v61 = vld [vmem:[#allocation12 + $0x10] sm:$0xff]  ;;  %958 = vst.msk [vmem:[%s2065_s7 + $0xc] sm:$0xf] %vm954_vm5, %v1707_v7  ;;  %s1185_s17 = sshll.u32 %s1768_s27, 8  ;;  %s1005_s10 = sshll.u32 %s2065_s7, 4  ;;  %s2100_s10 = int_to_ptr.vmem [resolvable:$true] %s1005_s10 }
  0xc2   : > { %960 = vst.msk [vmem:[%s2065_s7] sm:$0xf] %vm959_vm6, %v1707_v7  ;;  %961 = vst.msk [vmem:[%s2065_s7 + $0x4] sm:$0xf] %vm959_vm6, %v1707_v7  ;;  %s2098_s12 = scalar_lea.hbm %s2152_s6, %s1185_s17  ;;  %s992_s9 = scalar_lea.sflag [#allocation5], %s1994_s26 }
  0xc3   : > { %962 = vst.msk [vmem:[%s2065_s7 + $0x8] sm:$0xf] %vm959_vm6, %v1707_v7  ;;  %963 = vst.msk [vmem:[%s2065_s7 + $0xc] sm:$0xf] %vm959_vm6, %v1707_v7  ;;  %s1613_s25 = scalar_lea.vmem %s2100_s10, 256  ;;  %p2175_p10 = scmp.ne.s32.totalorder %s2165_s29, 0 }
  0xc4   : > { %p1614_p7 = scmp.ne.s32.totalorder %s2100_s10, %s1613_s25  ;;  %s1709_s27 = smov [#allocation14]  }
  0xc6   : > { %p1615_p4 = pnand %p1614_p7, %p2175_p10 }
  0xc8   : > { %p1616_p1 = pneg %p1615_p4 }
 0x12c   : > { %v356_v2 = vpop.permute.xlu0 %355  ;;  %v377_v3 = vpop.permute.xlu1 %376 }
 0x12d   : > { %378 = vrot.lane.b32.xlu1 %v356_v2, %s1704_s13  ;;  %1225 = vmatprep.subr.bf16.mxu0 %v377_v3 }
 0x12e   : > { %1226 = vmatpush3.bf16.msra.mxu0 %v377_v3 }
 0x130   : > { %v359_v4 = vpop.permute.xlu0 %358 }
 0x131   : > { %521 = vrot.lane.b32.xlu1 %v1430_v0, %s1706_s19  ;;  %380 = vrot.lane.b32.xlu0 %v359_v4, %s1704_s13 }
 0x135   : > { %525 = vrot.lane.b32.xlu1 %v359_v4, %s1706_s19  ;;  %523 = vrot.lane.b32.xlu0 %v356_v2, %s1706_s19 }
 0x139   : > { %600 = vperm.xlu1 %1429, %v590_v5   ;;  %595 = vperm.xlu0 %1428, %v589_v6  }
 0x13d   : > { %605 = vperm.xlu1 %1429, %v591_v8   ;;  %610 = vperm.xlu0 %1428, %v592_v9   ;;  %v1441_v8 = vld [vmem:[#allocation11 + $0x18] sm:$0xff]   ;;  %v1442_v9 = vld [vmem:[#allocation11 + $0x28] sm:$0xff]  }
 0x19f   : > { %v379_v10 = vpop.permute.xlu1 %378 }
 0x1a0   : > { %1227 = vmatprep.subr.bf16.mxu0 %v379_v10 }
 0x1a1   : > { %1228 = vmatpush3.bf16.msra.mxu0 %v379_v10 }
 0x1a3   : > { %v381_v11 = vpop.permute.xlu0 %380  ;;  %v522_v15 = vpop.permute.xlu1 %521 }
 0x1a4   : > { %1229 = vmatprep.subr.bf16.mxu0 %v381_v11 }
 0x1a5   : > { %1230 = vmatpush3.bf16.msra.mxu0 %v381_v11 }
 0x1a6   : > { %1235 = vmatprep.subr.bf16.mxu0 %v1430_v0 }
 0x1a7   : > { %v524_v17 = vpop.permute.xlu0 %523  ;;  %v526_v18 = vpop.permute.xlu1 %525 }
 0x1a8   : > { %1232 = vmatmul.mubr.msk.bf16.vlgmr.msra.gmra.mrb[0].mxu0 %vm385_vm0, %v1432_v12 }
 0x1a9   : > { %1236 = vmatpush3.bf16.msra.mxu0 %v1430_v0  ;;  %1241 = vmatprep.mubr.msk.bf16.mxu0 %vm385_vm0, %v1433_v13 }
 0x1aa   : > { %1237 = vmatprep.subr.bf16.mxu0 %v356_v2 }
 0x1ad   : > { %1238 = vmatpush3.bf16.msra.mxu0 %v356_v2 }
 0x1ae   : > { %1239 = vmatprep.subr.bf16.mxu0 %v359_v4 }
 0x1b1   : > { %1240 = vmatpush3.bf16.msra.mxu0 %v359_v4 }
 0x1b2   : > { %1245 = vmatprep.subr.bf16.mxu0 %v522_v15 }
 0x1b4   : > { %1242 = vmatmul.mubr.msk.bf16.vlgmr.msra.gmra.mrb[0].mxu0 %vm385_vm0, %v1434_v14 }
 0x1b5   : > { %1246 = vmatpush3.bf16.msra.mxu0 %v522_v15  ;;  %1251 = vmatprep.mubr.msk.bf16.mxu0 %vm385_vm0, %v1435_v16 }
 0x1b6   : > { %1247 = vmatprep.subr.bf16.mxu0 %v524_v17 }
 0x1b8   : > { %v601_v20 = vpop.permute.xlu1 %600  ;;  %v596_v21 = vpop.permute.xlu0 %595 }
 0x1b9   : > { %1248 = vmatpush3.bf16.msra.mxu0 %v524_v17 }
 0x1ba   : > { %1249 = vmatprep.subr.bf16.mxu0 %v526_v18 }
 0x1bc   : > { %v606_v22 = vpop.permute.xlu1 %605  ;;  %v611_v24 = vpop.permute.xlu0 %610 }
 0x1bd   : > { %1250 = vmatpush3.bf16.msra.mxu0 %v526_v18 }
 0x1c0   : > { %1252 = vmatmul.mubr.msk.bf16.vlgmr.msra.gmra.mrb[0].mxu0 %vm385_vm0, %v1436_v19 }
 0x1c1   : > { %1267 = vmatprep.mubr.msk.bf16.mxu0 %vm703_vm4, %v1439_v50 }
 0x293   : > { %v1253_v23 = vpop.f32.mrb[0].mxu0 }
 0x294   : > { %v615_v25 = vadd.f32 %v1253_v23, %v606_v22  ;;  %v570_v26 = vpop.f32.mrb[1].mxu0 }
 0x295   : > { %v613_v27 = vadd.f32 %v596_v21, %v570_v26  ;;  %v1254_v28 = vpop.f32.mrb[2].mxu0 }
 0x296   : > { %v619_v29 = vmax.f32 %v615_v25, 0.0  ;;  %v616_v30 = vadd.f32 %v1254_v28, %v611_v24  ;;  %v573_v31 = vpop.f32.mrb[3].mxu0 }
 0x297   : > { %v617_v33 = vmax.f32 %v613_v27, 0.0  ;;  %v614_v34 = vadd.f32 %v601_v20, %v573_v31 }
 0x298   : > { %v620_v35 = vmax.f32 %v616_v30, 0.0  ;;  %v629_v37 = vmul.f32 %v2034_v32, %v619_v29 }
 0x299   : > { %v618_v36 = vmax.f32 %v614_v34, 0.0  ;;  %v627_v39 = vmul.f32 %v2034_v32, %v617_v33 }
 0x29a   : > { %v630_v38 = vmul.f32 %v2034_v32, %v620_v35 }
 0x29b   : > { %v628_v40 = vmul.f32 %v2034_v32, %v618_v36 }
 0x29c   : > { %v638_v41 = vpack.c.bf16 %v630_v38, %v629_v37 }
 0x29d   : > { %v637_v42 = vpack.c.bf16 %v628_v40, %v627_v39 }
 0x29e   : > { %643 = vrot.lane.b32.xlu0 %v638_v41, %s1708_s30 }
 0x29f   : > { %641 = vrot.lane.b32.xlu1 %v637_v42, %s1708_s30 }
 0x310   : > { %v644_v43 = vpop.permute.xlu0 %643 }
 0x311   : > { %649 = vst.msk [vmem:[#allocation2 + $0x8] sm:$0xff] %vm647_vm3, %v644_v43  ;;  %v642_v44 = vpop.permute.xlu1 %641 }
 0x312   : > { %648 = vst.msk [vmem:[#allocation2] sm:$0xff] %vm647_vm3, %v642_v44 }
 0x318   : > { %v655_v45 = vld [vmem:[#allocation2 + $0x8] sm:$0xff] }
 0x319   : > { %660 = vrot.lane.b32.xlu0 %v655_v45, %s1703_s28  ;;  %v654_v46 = vld [vmem:[#allocation2] sm:$0xff] }
 0x31a   : > { %658 = vrot.lane.b32.xlu1 %v654_v46, %s1703_s28  ;;  %1271 = vmatprep.subr.bf16.mxu1 %v654_v46  ;;  %s1617_s28 = sshll.u32 %s1709_s27, 4  ;;  %s1618_s28 = int_to_ptr.vmem [resolvable:$false] %s1617_s28 }
 0x31b   : > { %1272 = vmatpush3.bf16.msra.mxu1 %v654_v46  ;;  %p1620_p13 = scmp.lt.s32.totalorder %s2100_s10, %s1618_s28 }
 0x31c   : > { %1273 = vmatprep.subr.bf16.mxu1 %v655_v45 }
 0x31d   : > { %666 = vrot.lane.b32.xlu0 %v655_v45, %s1705_s14 }
 0x31e   : > { %664 = vrot.lane.b32.xlu1 %v654_v46, %s1705_s14 }
 0x31f   : > { %1274 = vmatpush3.bf16.msra.mxu1 %v655_v45 }
 0x321   : > { %839 = vrot.lane.b32.xlu0 %v654_v46, %s1706_s19 }
 0x322   : > { %685 = vrot.lane.b32.xlu1 %v654_v46, %s1704_s13 }
 0x325   : > { %841 = vrot.lane.b32.xlu0 %v655_v45, %s1706_s19 }
 0x326   : > { %687 = vrot.lane.b32.xlu1 %v655_v45, %s1704_s13 }
 0x38b   : > { %v661_v49 = vpop.permute.xlu0 %660 }
 0x38c   : > { %v659_v48 = vpop.permute.xlu1 %658 }
 0x38d   : > { %843 = vrot.lane.b32.xlu0 %v659_v48, %s1706_s19  ;;  %689 = vrot.lane.b32.xlu1 %v659_v48, %s1704_s13 }
 0x38e   : > { %1275 = vmatprep.subr.bf16.mxu1 %v659_v48 }
 0x38f   : > { %1276 = vmatpush3.bf16.msra.mxu1 %v659_v48  ;;  %v667_v52 = vpop.permute.xlu0 %666 }
 0x390   : > { %1277 = vmatprep.subr.bf16.mxu1 %v661_v49  ;;  %v665_v51 = vpop.permute.xlu1 %664 }
 0x391   : > { %845 = vrot.lane.b32.xlu0 %v661_v49, %s1706_s19  ;;  %691 = vrot.lane.b32.xlu1 %v661_v49, %s1704_s13 }
 0x393   : > { %1278 = vmatpush3.bf16.msra.mxu1 %v661_v49  ;;  %v840_v55 = vpop.permute.xlu0 %839 }
 0x394   : > { %1279 = vmatprep.subr.bf16.mxu1 %v665_v51  ;;  %v686_v53 = vpop.permute.xlu1 %685 }
 0x395   : > { %847 = vrot.lane.b32.xlu0 %v665_v51, %s1706_s19  ;;  %693 = vrot.lane.b32.xlu1 %v665_v51, %s1704_s13 }
 0x396   : > { %1255 = vmatprep.subr.bf16.mxu0 %v686_v53 }
 0x397   : > { %1256 = vmatpush3.bf16.msra.mxu0 %v686_v53  ;;  %1280 = vmatpush3.bf16.msra.mxu1 %v665_v51  ;;  %v842_v62 = vpop.permute.xlu0 %841 }
 0x398   : > { %1281 = vmatprep.subr.bf16.mxu1 %v667_v52  ;;  %v688_v54 = vpop.permute.xlu1 %687 }
 0x399   : > { %849 = vrot.lane.b32.xlu0 %v667_v52, %s1706_s19  ;;  %695 = vrot.lane.b32.xlu1 %v667_v52, %s1704_s13  ;;  %s1619_s13 = scalar_lea.vmem %s1618_s28, 512 }
 0x39a   : > { %1257 = vmatprep.subr.bf16.mxu0 %v688_v54  ;;  %p1621_p0 = scmp.lt.s32.totalorder %s1619_s13, %s1613_s25 }
 0x39b   : > { %1258 = vmatpush3.bf16.msra.mxu0 %v688_v54  ;;  %1282 = vmatpush3.bf16.msra.mxu1 %v667_v52 }
 0x39c   : > { %1287 = vmatprep.subr.bf16.mxu1 %v840_v55  ;;  %p1622_p2 = por %p1621_p0, %p1620_p13 }
 0x39d   : > { %927 = vperm.xlu0 %1428, %v917_v56   ;;  %922 = vperm.xlu1 %1429, %v916_v57  }
 0x39e   : > { %1284 = vmatmul.mubr.msk.bf16.vlgmr.msra.gmra.mrb[0].mxu1 %vm703_vm4, %v1438_v58  ;;  %p1623_p8 = pnand %p1622_p2, %p1616_p1 }
 0x39f   : > { %1288 = vmatpush3.bf16.msra.mxu1 %v840_v55  ;;  %1299 = vmatprep.mubr.msk.bf16.mxu1 %vm703_vm4, %v1440_v59 }
 0x3a0   : > { %1289 = vmatprep.subr.bf16.mxu1 %v842_v62 }
 0x3a1   : > { %937 = vperm.xlu0 %1428, %v919_v60   ;;  %932 = vperm.xlu1 %1429, %v918_v61  }
 0x3a3   : > { %1290 = vmatpush3.bf16.msra.mxu1 %v842_v62 }
 0x3ff   : > { %v844_v63 = vpop.permute.xlu0 %843  ;;  %v690_v0 = vpop.permute.xlu1 %689 }
 0x400   : > { %1259 = vmatprep.subr.bf16.mxu0 %v690_v0  ;;  %1291 = vmatprep.subr.bf16.mxu1 %v844_v63 }
 0x401   : > { %1260 = vmatpush3.bf16.msra.mxu0 %v690_v0  ;;  %1292 = vmatpush3.bf16.msra.mxu1 %v844_v63 }
 0x403   : > { %v846_v1 = vpop.permute.xlu0 %845  ;;  %v692_v2 = vpop.permute.xlu1 %691 }
 0x404   : > { %1261 = vmatprep.subr.bf16.mxu0 %v692_v2  ;;  %1293 = vmatprep.subr.bf16.mxu1 %v846_v1 }
 0x405   : > { %1262 = vmatpush3.bf16.msra.mxu0 %v692_v2  ;;  %1294 = vmatpush3.bf16.msra.mxu1 %v846_v1 }
 0x407   : > { %v848_v3 = vpop.permute.xlu0 %847  ;;  %v694_v4 = vpop.permute.xlu1 %693 }
 0x408   : > { %1263 = vmatprep.subr.bf16.mxu0 %v694_v4  ;;  %1295 = vmatprep.subr.bf16.mxu1 %v848_v3 }
 0x409   : > { %1264 = vmatpush3.bf16.msra.mxu0 %v694_v4  ;;  %1296 = vmatpush3.bf16.msra.mxu1 %v848_v3 }
 0x40b   : > { %v850_v5 = vpop.permute.xlu0 %849  ;;  %v696_v6 = vpop.permute.xlu1 %695 }
 0x40c   : > { %1265 = vmatprep.subr.bf16.mxu0 %v696_v6  ;;  %1297 = vmatprep.subr.bf16.mxu1 %v850_v5 }
 0x40d   : > { %1266 = vmatpush3.bf16.msra.mxu0 %v696_v6  ;;  %1298 = vmatpush3.bf16.msra.mxu1 %v850_v5 }
 0x410   : > { %1268 = vmatmul.mubr.msk.bf16.vlgmr.msra.gmra.mrb[4].mxu0 %vm703_vm4, %v1441_v8  ;;  %1300 = vmatmul.mubr.msk.bf16.vlgmr.msra.gmra.mrb[0].mxu1 %vm703_vm4, %v1442_v9 }
 0x41c   : > { %v923_v10 = vpop.permute.xlu1 %922  ;;  %v928_v11 = vpop.permute.xlu0 %927 }
 0x420   : > { %v933_v12 = vpop.permute.xlu1 %932  ;;  %v938_v25 = vpop.permute.xlu0 %937 }
 0x4e3   : > { %v1269_v13 = vpop.f32.mrb[4].mxu0  ;;  %v1301_v14 = vpop.f32.mrb[0].mxu1 }
 0x4e4   : > { %v1303_v15 = vadd.f32 %v1301_v14, %v1269_v13  ;;  %v744_v16 = vpop.f32.mrb[5].mxu0  ;;  %v897_v17 = vpop.f32.mrb[1].mxu1 }
 0x4e5   : > { %v1304_v18 = vadd.f32 %v897_v17, %v744_v16  ;;  %v1270_v19 = vpop.f32.mrb[6].mxu0  ;;  %v1302_v20 = vpop.f32.mrb[2].mxu1 }
 0x4e6   : > { %v942_v21 = vadd.f32 %v1303_v15, %v933_v12  ;;  %v1305_v22 = vadd.f32 %v1302_v20, %v1270_v19  ;;  %v747_v23 = vpop.f32.mrb[7].mxu0  ;;  %v900_v24 = vpop.f32.mrb[3].mxu1 }
 0x4e7   : > { %v940_v26 = vadd.f32 %v1304_v18, %v923_v10  ;;  %v1306_v27 = vadd.f32 %v900_v24, %v747_v23 }
 0x4e8   : > { %v943_v28 = vadd.f32 %v1305_v22, %v938_v25  ;;  %v946_v7 = vmax.f32 %v942_v21, 0.0 }
 0x4e9   : > { %v944_v29 = vmax.f32 %v940_v26, 0.0  ;;  %v941_v30 = vadd.f32 %v1306_v27, %v928_v11 }
 0x4ea   : > { %v947_v31 = vmax.f32 %v943_v28, 0.0  ;;  %v950_v37 = vmul.f32 %v2034_v32, %v946_v7 }
 0x4eb   : > { %v945_v33 = vmax.f32 %v941_v30, 0.0  ;;  %v948_v34 = vmul.f32 %v2034_v32, %v944_v29 }
 0x4ec   : > { %v951_v39 = vmul.f32 %v2034_v32, %v947_v31  ;;  %v1183_v40 = vpack.c.bf16 %v950_v37, %v950_v37 }
 0x4ed   : > { %v1181_v35 = vpack.c.bf16 %v948_v34, %v948_v34  ;;  %v949_v36 = vmul.f32 %v2034_v32, %v945_v33 }
 0x4ee   : > { %v1184_v41 = vpack.c.bf16 %v951_v39, %v951_v39 }
 0x4ef   : > { %974 = vrot.lane.b32.xlu1 %v1181_v35, %s1708_s30  ;;  %v1182_v38 = vpack.c.bf16 %v949_v36, %v949_v36 }
 0x4f1   : > { %976 = vrot.lane.b32.xlu0 %v1182_v38, %s1708_s30 }
 0x4f3   : > { %978 = vrot.lane.b32.xlu1 %v1183_v40, %s1708_s30 }
 0x4f5   : > { %980 = vrot.lane.b32.xlu0 %v1184_v41, %s1708_s30 }
 0x561   : > { %v975_v42 = vpop.permute.xlu1 %974 }
 0x562   : > { %987 = vst.msk [vmem:[%s2065_s7] sm:$0xf] %vm986_vm7, %v975_v42 }
 0x563   : > { %v977_v43 = vpop.permute.xlu0 %976 }
 0x564   : > { %988 = vst.msk [vmem:[%s2065_s7 + $0x4] sm:$0xf] %vm986_vm7, %v977_v43 }
 0x565   : > { %v979_v32 = vpop.permute.xlu1 %978 }
 0x566   : > { %989 = vst.msk [vmem:[%s2065_s7 + $0x8] sm:$0xf] %vm986_vm7, %v979_v32 }
 0x567   : > { %v981_v44 = vpop.permute.xlu0 %980 }
 0x568   : > { %990 = vst.msk [vmem:[%s2065_s7 + $0xc] sm:$0xf] %vm986_vm7, %v981_v44 }
 0x569   : > { %1626 = shalt.err (!%p1623_p8)
}
 0x56a   : > { %s1627_s14 = scalar_lea.hbm %s2098_s12, 256  ;;  %s1631_s16 = scalar_lea.hbm %s2152_s6, 512 }
 0x56b   : > { %p1628_p6 = scmp.ne.s32.totalorder %s2098_s12, %s1627_s14  ;;  %p1632_p3 = scmp.lt.u32.totalorder %s2098_s12, %s2152_s6 }
 0x56c   : > { %p1633_p5 = scmp.lt.u32.totalorder %s1631_s16, %s1627_s14  ;;  %p1635_p7 = scmp.lt.u32.totalorder %s1627_s14, %s2098_s12 }
 0x56d   : > { %p1629_p11 = pnand %p1628_p6, %p2175_p10 }
 0x56e   : > { %p1634_p9 = por %p1633_p5, %p1632_p3 }
 0x56f   : > { %p1630_p12 = pneg %p1629_p11 }
 0x570   : > { %p1636_p4 = por %p1635_p7, %p1634_p9 }
 0x572   : > { %p1637_p1 = pnand %p1636_p4, %p1630_p12 }
 0x574   : > { %1640 = shalt.err (!%p1637_p1)
}
 0x575   : > { %s1710_s11 = smov 64   ;;  %s1711_s20 = smov 4  }
 0x576   : > { %1341 = dma.vmem_to_hbm [thread:$0]  (%p2175_p10), %s2100_s10, 256, %s2098_s12, %s992_s9, %s1710_s11, %s1710_s11, %s1711_s20  }
 0x577 PF: > { %s1020_s25 = sand.u32 1, %s1679_s21   ;;  %p2176_p13 = scmp.ne.s32.totalorder %s2166_s8, 0 }
 0x578   : > { %p2177_p0 = scmp.ge.s32.totalorder %s1691_s24, 2  ;;  %s1021_s27 = scalar_lea.sflag [#allocation5], %s1020_s25 }
 0x57a   : > { %p1364_p2 = pnand %p2177_p0, %p2176_p13 }
 0x57c   : > { %1674 = dma.done.wait (!%p1364_p2), %s1021_s27, 256  }
 0x57d   : > { %1676 = vsyncadd (!%p1364_p2), %s1021_s27, 4294967040  ;;  %p22_p8 = scmp.ge.s32.totalorder %s1918_s15, 4   ;;  %s2178_s21 = smov %s1683_s22 }
 0x57e   : > { %s2179_s22 = smov %s1687_s23  ;;  %s2180_s23 = smov %s1930_s18 }
 0x57f   : > { %s2181_s24 = smov %s1918_s15  ;;  %24 = sbr.rel (!%p22_p8) target bundleno = 8 (0x8), region = 113 }
 0x586   :  { %1026 = vsyncpa [#allocation4], 1 }
 0x587   :  { %1028 = vsyncpa [#allocation4 + $0x1], 1 }
 0x588   :  { %1029 = vsyncpa [#allocation7], 1 }
 0x589   :  { %1030 = vsyncpa [#allocation10], 1 }
 0x58a   :  { %1031 = vsyncpa [#allocation13], 1 }
 0x58b   :  { %1032 = vsyncpa [#allocation5], 1 }
 0x58c   :  { %1034 = vsyncpa [#allocation5 + $0x1], 1 }

// kernel: unet_forward.6
= control target key start
LH: loop header
LB: loop body
LE: loop exit
PB: predicated region body
PF: predicated region fallthrough
CT: control target
= control target key end

     0   :  { %s2865_s0 = inlined_call_operand.hbm [shape: bf16[2,8,100], index: 0, kind: input, shape index: {}]   ;;  %s2866_s1 = inlined_call_operand.hbm [shape: f32[1,78], index: 1, kind: input, shape index: {}]   ;;  %s2867_s2 = inlined_call_operand.hbm [shape: bf16[3,16,24], index: 2, kind: input, shape index: {}]   ;;  %s2868_s3 = inlined_call_operand.hbm [shape: f32[16,1], index: 3, kind: input, shape index: {}]   ;;  %s2869_s4 = inlined_call_operand.hbm [shape: bf16[3,16,48], index: 4, kind: input, shape index: {}]   ;;  %s2870_s5 = inlined_call_operand.hbm [shape: f32[16,1], index: 5, kind: input, shape index: {}]   ;;  %s2871_s6 = inlined_call_operand.hbm [shape: bf16[8,4], index: 6, kind: input, shape index: {}]   ;;  %s2872_s7 = inlined_call_operand.hbm [shape: bf16[8,4], index: 7, kind: input, shape index: {}]   ;;  %s2873_s8 = inlined_call_operand.hbm [shape: bf16[2,16,100], index: 8, kind: output, shape index: {0}]   ;;  %s2874_s9 = inlined_call_operand.hbm [shape: bf16[2,16,36], index: 9, kind: output, shape index: {1}]  }
   0x1   :  { %2880 = sst [smem:[#allocation27_spill]] %s2866_s1 }
   0x2   :  { %15 = vsyncpa [#allocation4], 0 }
   0x3   :  { %17 = vsyncpa [#allocation4 + $0x1], 0 }
   0x4   :  { %18 = vsyncpa [#allocation7], 0 }
   0x5   :  { %19 = vsyncpa [#allocation10], 0 }
   0x6   :  { %20 = vsyncpa [#allocation13], 0 }
   0x7   :  { %21 = vsyncpa [#allocation16], 0 }
   0x8   :  { %22 = vsyncpa [#allocation5], 0 }
   0x9   :  { %24 = vsyncpa [#allocation5 + $0x1], 0 }
   0xa   :  { %25 = vsyncpa [#allocation19], 0 }
   0xb   :  { %27 = vsyncpa [#allocation19 + $0x1], 0  ;;  %s2331_s30 = smov 0   ;;  %s2333_s10 = smov 0  }
   0xc   :  { %s2335_s11 = smov 0   ;;  %s2337_s12 = smov 0  }
   0xd LB: > { %s2251_s13 = smov [#allocation6]   ;;  %s2352_s15 = sadd.s32 4294967295, %s2249_s12   ;;  %s2249_s12 = sphi %s2337_s12, %s2907_s12   ;;  %s2245_s11 = sphi %s2335_s11, %s2906_s11   ;;  %s2241_s10 = sphi %s2333_s10, %s2905_s10   ;;  %s2237_s30 = sphi %s2331_s30, %s2904_s30  }
   0xe   : > { %s276_s14 = sshll.u32 %s2251_s13, 4  ;;  %p1545_p0 = scmp.ge.s32.totalorder %s2249_s12, 1  ;;  %s2357_s14 = int_to_ptr.vmem [resolvable:$true] %s276_s14 }
   0xf   : > { %p2875_p1 = scmp.eq.s32.totalorder %s2352_s15, 0  ;;  %p263_p2 = scmp.lt.s32.totalorder %s2249_s12, 3 }
  0x10   : > { %s2252_s17 = smov [#allocation9]   ;;  %s2253_s20 = smov [#allocation12]  }
  0x11   : > { %p2359_p3 = pnand %p1545_p0, %p263_p2  ;;  %s299_s18 = sshll.u32 %s2252_s17, 4  ;;  %s2366_s18 = int_to_ptr.vmem [resolvable:$true] %s299_s18 }
  0x12   : > { %s325_s21 = sshll.u32 %s2253_s20, 4  ;;  %s2883_s1 = sld [smem:[#allocation27_spill]]  ;;  %s2374_s21 = int_to_ptr.vmem [resolvable:$true] %s325_s21 }
  0x13   : > { %s2881_s16 = scalar_select %p2359_p3, 1, 0 }
  0x14   : > { %p1792_p5 = pneg %p2359_p3 }
  0x16   : > { %p2370_p6 = pnand %p1792_p5, %p2875_p1 }
  0x18   : > { %s1909_s24 = scalar_lea.hbm %s2883_s1, 16  ;;  %p2384_p8 = pneg %p2370_p6 }
  0x19   : > { %p1910_p7 = scmp.ne.s32.totalorder %s2883_s1, %s1909_s24  ;;  %p1916_p11 = scmp.lt.u32.totalorder %s1909_s24, %s2883_s1 }
  0x1b   : > { %p1912_p9 = pnand %p2384_p8, %p1910_p7 }
  0x1d   : > { %p1913_p10 = pneg %p1912_p9 }
  0x1f   : > { %p1918_p12 = pnand %p1916_p11, %p1913_p10 }
  0x21   : > { %1921 = shalt.err (!%p1918_p12)
}
  0x22   : > { %s1922_s13 = scalar_lea.vmem %s2357_s14, 16  ;;  %s1929_s17 = scalar_lea.vmem %s2357_s14, 32 }
  0x23   : > { %p1923_p13 = scmp.ne.s32.totalorder %s2357_s14, %s1922_s13  ;;  %p1930_p5 = scmp.lt.s32.totalorder %s2357_s14, %s2357_s14 }
  0x24   : > { %p1931_p7 = scmp.lt.s32.totalorder %s1929_s17, %s1922_s13 }
  0x25   : > { %p1925_p0 = pnand %p1923_p13, %p2384_p8 }
  0x26   : > { %p1932_p9 = por %p1931_p7, %p1930_p5 }
  0x27   : > { %p1926_p2 = pneg %p1925_p0 }
  0x29   : > { %p1933_p4 = pnand %p1932_p9, %p1926_p2 }
  0x2b   : > { %1936 = shalt.err (!%p1933_p4)
}
  0x2c   : > { %1795 = dma.hbm_to_vmem [thread:$0]  (!%p2370_p6), %s2883_s1, 16, %s2357_s14, [#allocation7]  }
  0x2d   : > { %s1937_s25 = scalar_lea.hbm %s2868_s3, 256 }
  0x2e   : > { %p1938_p10 = scmp.ne.s32.totalorder %s2868_s3, %s1937_s25  ;;  %p1944_p4 = scmp.lt.u32.totalorder %s1937_s25, %s2868_s3 }
  0x30   : > { %p1940_p11 = pnand %p1938_p10, %p2384_p8 }
  0x32   : > { %p1941_p12 = pneg %p1940_p11 }
  0x34   : > { %p1946_p13 = pnand %p1944_p4, %p1941_p12 }
  0x36   : > { %1949 = shalt.err (!%p1946_p13)
}
  0x37   : > { %s1950_s14 = scalar_lea.vmem %s2366_s18, 256  ;;  %p1958_p7 = scmp.lt.s32.totalorder %s2366_s18, %s2366_s18 }
  0x38   : > { %p1951_p0 = scmp.ne.s32.totalorder %s2366_s18, %s1950_s14  ;;  %p1959_p9 = scmp.lt.s32.totalorder %s1950_s14, %s1950_s14 }
  0x3a   : > { %p1953_p2 = pnand %p1951_p0, %p2384_p8  ;;  %p1960_p10 = por %p1959_p9, %p1958_p7 }
  0x3c   : > { %p1954_p5 = pneg %p1953_p2 }
  0x3e   : > { %p1961_p11 = pnand %p1960_p10, %p1954_p5 }
  0x40   : > { %1964 = shalt.err (!%p1961_p11)
}
  0x41   : > { %s2254_s17 = smov 128   ;;  %s2255_s20 = smov 8  }
  0x42   : > { %1801 = dma.hbm_to_vmem [thread:$0]  (!%p2370_p6), %s2868_s3, 256, %s2366_s18, [#allocation10], %s2254_s17, %s2254_s17, %s2255_s20  }
  0x43   : > { %s1965_s26 = scalar_lea.hbm %s2870_s5, 256 }
  0x44   : > { %p1966_p12 = scmp.ne.s32.totalorder %s2870_s5, %s1965_s26  ;;  %p1972_p0 = scmp.lt.u32.totalorder %s1965_s26, %s2870_s5 }
  0x46   : > { %p1968_p4 = pnand %p1966_p12, %p2384_p8 }
  0x48   : > { %p1969_p13 = pneg %p1968_p4 }
  0x4a   : > { %p1974_p2 = pnand %p1972_p0, %p1969_p13 }
  0x4c   : > { %1977 = shalt.err (!%p1974_p2)
}
  0x4d   : > { %s1978_s18 = scalar_lea.vmem %s2374_s21, 256  ;;  %p1986_p10 = scmp.lt.s32.totalorder %s2374_s21, %s2374_s21 }
  0x4e   : > { %p1979_p5 = scmp.ne.s32.totalorder %s2374_s21, %s1978_s18  ;;  %p1987_p11 = scmp.lt.s32.totalorder %s1978_s18, %s1978_s18 }
  0x50   : > { %p1981_p7 = pnand %p1979_p5, %p2384_p8  ;;  %p1988_p12 = por %p1987_p11, %p1986_p10 }
  0x52   : > { %p1982_p9 = pneg %p1981_p7 }
  0x54   : > { %p1989_p4 = pnand %p1988_p12, %p1982_p9 }
  0x56   : > { %1992 = shalt.err (!%p1989_p4)
}
  0x57   : > { %1807 = dma.hbm_to_vmem [thread:$0]  (!%p2370_p6), %s2870_s5, 256, %s2374_s21, [#allocation13], %s2254_s17, %s2254_s17, %s2255_s20  }
  0x58   : > { %s2256_s24 = smov [#allocation8]   ;;  %s1993_s29 = scalar_lea.hbm %s2867_s2, 384 }
  0x59   : > { %s286_s25 = sshll.u32 %s2256_s24, 4  ;;  %p1994_p13 = scmp.ne.s32.totalorder %s2867_s2, %s1993_s29  ;;  %s287_s25 = int_to_ptr.vmem [resolvable:$true] %s286_s25 }
  0x5a   : > { %p2000_p5 = scmp.lt.u32.totalorder %s1993_s29, %s2867_s2 }
  0x5b   : > { %p1996_p0 = pnand %p1994_p13, %p2384_p8 }
  0x5d   : > { %p1997_p2 = pneg %p1996_p0 }
  0x5f   : > { %p2002_p7 = pnand %p2000_p5, %p1997_p2 }
  0x61   : > { %2005 = shalt.err (!%p2002_p7)
}
  0x62   : > { %s2006_s21 = scalar_lea.vmem %s287_s25, 384  ;;  %p2014_p12 = scmp.lt.s32.totalorder %s287_s25, %s287_s25 }
  0x63   : > { %p2007_p9 = scmp.ne.s32.totalorder %s287_s25, %s2006_s21  ;;  %p2015_p4 = scmp.lt.s32.totalorder %s2006_s21, %s2006_s21 }
  0x65   : > { %p2009_p10 = pnand %p2007_p9, %p2384_p8  ;;  %p2016_p1 = por %p2015_p4, %p2014_p12 }
  0x67   : > { %p2010_p11 = pneg %p2009_p10 }
  0x69   : > { %p2017_p3 = pnand %p2016_p1, %p2010_p11 }
  0x6b   : > { %2020 = shalt.err (!%p2017_p3)
}
  0x6c   : > { %s2257_s17 = smov 64   ;;  %s2258_s20 = smov 4  }
  0x6d   : > { %1798 = dma.hbm_to_vmem [thread:$0]  (!%p2370_p6), %s2867_s2, 384, %s287_s25, [#allocation7], %s2257_s17, %s2257_s17, %s2258_s20  }
  0x6e   : > { %s2259_s23 = smov [#allocation11]   ;;  %s2260_s26 = smov [#allocation14]  }
  0x6f   : > { %s312_s24 = sshll.u32 %s2259_s23, 4  ;;  %s339_s28 = sshll.u32 %s2260_s26, 4  ;;  %s313_s24 = int_to_ptr.vmem [resolvable:$true] %s312_s24  ;;  %s2470_s28 = int_to_ptr.vmem [resolvable:$true] %s339_s28 }
  0x70   : > { %s2021_s14 = scalar_lea.hbm %s2869_s4, 384 }
  0x71   : > { %p2022_p1 = scmp.ne.s32.totalorder %s2869_s4, %s2021_s14  ;;  %p2028_p0 = scmp.lt.u32.totalorder %s2021_s14, %s2869_s4 }
  0x73   : > { %p2024_p3 = pnand %p2022_p1, %p2384_p8 }
  0x75   : > { %p2025_p13 = pneg %p2024_p3 }
  0x77   : > { %p2030_p2 = pnand %p2028_p0, %p2025_p13 }
  0x79   : > { %2033 = shalt.err (!%p2030_p2)
}
  0x7a   : > { %s2034_s22 = scalar_lea.vmem %s313_s24, 384  ;;  %p2042_p10 = scmp.lt.s32.totalorder %s313_s24, %s313_s24 }
  0x7b   : > { %p2035_p5 = scmp.ne.s32.totalorder %s313_s24, %s2034_s22  ;;  %p2043_p11 = scmp.lt.s32.totalorder %s2034_s22, %s2034_s22 }
  0x7d   : > { %p2037_p7 = pnand %p2035_p5, %p2384_p8  ;;  %p2044_p12 = por %p2043_p11, %p2042_p10 }
  0x7f   : > { %p2038_p9 = pneg %p2037_p7 }
  0x81   : > { %p2045_p4 = pnand %p2044_p12, %p2038_p9 }
  0x83   : > { %2048 = shalt.err (!%p2045_p4)
}
  0x84   : > { %1804 = dma.hbm_to_vmem [thread:$0]  (!%p2370_p6), %s2869_s4, 384, %s313_s24, [#allocation10], %s2257_s17, %s2257_s17, %s2258_s20  }
  0x85   : > { %s2049_s14 = scalar_lea.hbm %s2871_s6, 64 }
  0x86   : > { %p2050_p1 = scmp.ne.s32.totalorder %s2871_s6, %s2049_s14  ;;  %p2056_p0 = scmp.lt.u32.totalorder %s2049_s14, %s2871_s6 }
  0x88   : > { %p2052_p3 = pnand %p2050_p1, %p2384_p8 }
  0x8a   : > { %p2053_p13 = pneg %p2052_p3 }
  0x8c   : > { %p2058_p2 = pnand %p2056_p0, %p2053_p13 }
  0x8e   : > { %2061 = shalt.err (!%p2058_p2)
}
  0x8f   : > { %s2062_s17 = scalar_lea.vmem %s2470_s28, 64  ;;  %p2070_p10 = scmp.lt.s32.totalorder %s2470_s28, %s2470_s28 }
  0x90   : > { %p2063_p5 = scmp.ne.s32.totalorder %s2470_s28, %s2062_s17  ;;  %p2071_p11 = scmp.lt.s32.totalorder %s2062_s17, %s2062_s17 }
  0x92   : > { %p2065_p7 = pnand %p2063_p5, %p2384_p8  ;;  %p2072_p12 = por %p2071_p11, %p2070_p10 }
  0x94   : > { %p2066_p9 = pneg %p2065_p7 }
  0x96   : > { %p2073_p4 = pnand %p2072_p12, %p2066_p9 }
  0x98   : > { %2076 = shalt.err (!%p2073_p4)
}
  0x99   : > { %1810 = dma.hbm_to_vmem [thread:$0]  (!%p2370_p6), %s2871_s6, 64, %s2470_s28, [#allocation13]  }
  0x9a   : > { %s2261_s22 = smov [#allocation15]   ;;  %s2077_s13 = scalar_lea.hbm %s2872_s7, 64 }
  0x9b   : > { %s350_s23 = sshll.u32 %s2261_s22, 4  ;;  %p2078_p1 = scmp.ne.s32.totalorder %s2872_s7, %s2077_s13  ;;  %s351_s23 = int_to_ptr.vmem [resolvable:$true] %s350_s23 }
  0x9c   : > { %p2084_p0 = scmp.lt.u32.totalorder %s2077_s13, %s2872_s7 }
  0x9d   : > { %p2080_p3 = pnand %p2078_p1, %p2384_p8 }
  0x9f   : > { %p2081_p13 = pneg %p2080_p3 }
  0xa1   : > { %p2086_p2 = pnand %p2084_p0, %p2081_p13 }
  0xa3   : > { %2089 = shalt.err (!%p2086_p2)
}
  0xa4   : > { %s2090_s28 = scalar_lea.vmem %s351_s23, 64  ;;  %p2098_p10 = scmp.lt.s32.totalorder %s351_s23, %s351_s23 }
  0xa5   : > { %p2091_p5 = scmp.ne.s32.totalorder %s351_s23, %s2090_s28  ;;  %p2099_p11 = scmp.lt.s32.totalorder %s2090_s28, %s2090_s28 }
  0xa7   : > { %p2093_p7 = pnand %p2091_p5, %p2384_p8  ;;  %p2100_p12 = por %p2099_p11, %p2098_p10 }
  0xa9   : > { %p2094_p9 = pneg %p2093_p7 }
  0xab   : > { %p2101_p4 = pnand %p2100_p12, %p2094_p9 }
  0xad   : > { %2104 = shalt.err (!%p2101_p4)
}
  0xae   : > { %1813 = dma.hbm_to_vmem [thread:$0]  (!%p2370_p6), %s2872_s7, 64, %s351_s23, [#allocation16]  }
  0xaf   : > { %s1544_s27 = sadd.s32 4294967294, %s2249_s12   ;;  %s2533_s19 = sadd.s32 1, %s2249_s12  }
  0xb0   : > { %s40_s20 = sadd.s32 1, %s2245_s11  ;;  %s37_s24 = ssub.s32 %s2249_s12, %s2533_s19 }
  0xb1   : > { %p47_p8 = scmp.ne.s32.totalorder %s2245_s11, %s2241_s10  ;;  %p38_p1 = scmp.eq.s32.totalorder %s37_s24, 0 }
  0xb2   : > { %p48_p3 = scmp.eq.s32.totalorder %s2249_s12, 0  ;;  %p53_p13 = scmp.ne.s32.totalorder %s2241_s10, %s2237_s30 }
  0xb3   : > { %p224_p0 = scmp.eq.s32.totalorder %s2352_s15, 1  ;;  %p2885_p5 = scmp.eq.s32.totalorder %s2352_s15, 0 }
  0xb4   : > { %s2545_s22 = scalar_select %p38_p1, %s2245_s11, %s40_s20  }
  0xb5   : > { %p49_p2 = por %p48_p3, %p47_p8  ;;  %p2549_p7 = por %p2885_p5, %p53_p13 }
  0xb6   : > { %p2553_p6 = por %p224_p0, %p47_p8  ;;  %p230_p9 = scmp.eq.s32.totalorder %s1544_s27, 1 }
  0xb7   : > { %p1832_p10 = scmp.lt.s32.totalorder %s2249_s12, 2  ;;  %s361_s29 = sand.u32 1, %s2245_s11  }
  0xb8   : > { %s2887_s23 = scalar_select %p2553_p6, 1, 0 }
  0xb9   : > { %p2559_p11 = por %p230_p9, %p53_p13  ;;  %s1554_s14 = sshll.u32 %s361_s29, 2 }
  0xba   : > { %s1555_s18 = sshll.u32 %s2249_s12, 6  ;;  %s365_s25 = scalar_lea.vmem [#allocation3], %s1554_s14 }
  0xbb   : > { %s2888_s13 = scalar_select %p2559_p11, 1, 0 }
  0xbc   : > { %s2567_s28 = scalar_lea.hbm %s2865_s0, %s1555_s18  ;;  %s372_s17 = sshll.u32 %s365_s25, 4  ;;  %s2573_s17 = int_to_ptr.vmem [resolvable:$true] %s372_s17 }
  0xbd   : > { %p2569_p12 = pnand %p1832_p10, %p49_p2  ;;  %s362_s20 = scalar_lea.sflag [#allocation4], %s361_s29 }
  0xbe   : > { %s2105_s24 = scalar_lea.hbm %s2567_s28, 64  ;;  %s2110_s21 = scalar_lea.hbm %s2865_s0, 128 }
  0xbf   : > { %p2106_p4 = scmp.ne.s32.totalorder %s2567_s28, %s2105_s24  ;;  %p2107_p8 = pneg %p2569_p12 }
  0xc0   : > { %p2111_p13 = scmp.lt.u32.totalorder %s2567_s28, %s2865_s0  ;;  %p2112_p0 = scmp.lt.u32.totalorder %s2110_s21, %s2105_s24 }
  0xc1   : > { %p2108_p1 = pnand %p2107_p8, %p2106_p4  ;;  %p2114_p5 = scmp.lt.u32.totalorder %s2105_s24, %s2567_s28 }
  0xc2   : > { %p2113_p2 = por %p2112_p0, %p2111_p13 }
  0xc3   : > { %p2109_p3 = pneg %p2108_p1 }
  0xc4   : > { %p2115_p9 = por %p2114_p5, %p2113_p2 }
  0xc6   : > { %p2116_p10 = pnand %p2115_p9, %p2109_p3 }
  0xc8   : > { %2119 = shalt.err (!%p2116_p10)
}
  0xc9   : > { %s2120_s29 = scalar_lea.vmem %s2573_s17, 64  ;;  %s2262_s18 = smov [#allocation3]  }
  0xca   : > { %p2121_p4 = scmp.ne.s32.totalorder %s2573_s17, %s2120_s29  ;;  %s2125_s14 = sshll.u32 %s2262_s18, 4  ;;  %s2126_s14 = int_to_ptr.vmem [resolvable:$false] %s2125_s14 }
  0xcb   : > { %s2127_s1 = scalar_lea.vmem %s2126_s14, 128  ;;  %p2128_p6 = scmp.lt.s32.totalorder %s2573_s17, %s2126_s14 }
  0xcc   : > { %p2123_p1 = pnand %p2121_p4, %p2107_p8  ;;  %p2129_p13 = scmp.lt.s32.totalorder %s2127_s1, %s2120_s29 }
  0xce   : > { %p2124_p11 = pneg %p2123_p1  ;;  %p2130_p0 = por %p2129_p13, %p2128_p6 }
  0xd0   : > { %p2131_p2 = pnand %p2130_p0, %p2124_p11 }
  0xd2   : > { %2134 = shalt.err (!%p2131_p2)
}
  0xd3   : > { %1817 = dma.hbm_to_vmem [thread:$0]  (!%p2569_p12), %s2567_s28, 64, %s2573_s17, %s362_s20  }
  0xd4   : > { %p2890_p3 = scmp.ne.s32.totalorder %s2881_s16, 0 }
  0xd5   : > { %s2603_s24 = sand.u32 (!%p2890_p3), 1, %s2241_s10  }
  0xd6   : > { %381 = sbr.rel (%p2890_p3) target bundleno = 1910 (0x776), region = 52  ;;  %s1557_s21 = sshll.u32 (!%p2890_p3), %s2603_s24, 2 }
  0xd7   : > { %s384_s25 = scalar_lea.sflag (!%p2890_p3), [#allocation4], %s2603_s24  ;;  %s387_s29 = scalar_lea.vmem (!%p2890_p3), [#allocation3], %s1557_s21 }
  0xdd   : > { %2208 = dma.done.wait (%p2549_p7), %s384_s25, 64  }
  0xde   : > { %2210 = vsyncadd (%p2549_p7), %s384_s25, 4294967232  ;;  %p2891_p6 = scmp.eq.s32.totalorder %s2352_s15, 0 }
  0xe0   : > { %2212 = dma.done.wait (%p2891_p6), [#allocation7], 400   ;;  %p2892_p11 = pmov %p2891_p6 }
  0xe1   : > { %p2893_p12 = pmov %p2891_p6 }
  0xe2   : > { %2214 = vsyncadd (%p2892_p11), [#allocation7], 4294966896 }
  0xe3   : > { %2216 = dma.done.wait (%p2893_p12), [#allocation10], 640   ;;  %p2894_p8 = pmov %p2891_p6 }
  0xe4   : > { %p2895_p5 = pmov %p2891_p6 }
  0xe5   : > { %2218 = vsyncadd (%p2894_p8), [#allocation10], 4294966656 }
  0xe6   : > { %2220 = dma.done.wait (%p2895_p5), [#allocation13], 320   ;;  %p2896_p9 = pmov %p2895_p5 }
  0xe7   : > { %p2897_p7 = pmov %p2895_p5 }
  0xe8   : > { %2222 = vsyncadd (%p2896_p9), [#allocation13], 4294966976 }
  0xe9   : > { %2224 = dma.done.wait (%p2897_p7), [#allocation16], 64   ;;  %p2898_p10 = pmov %p2895_p5 }
  0xea   : > { %v2263_v0 = vmov 0.0   ;;  %v459_v1 = vld [vmem:[%s387_s29] sm:$0xf]  ;;  %s2264_s16 = smov 127   ;;  %s2265_s26 = smov 126   ;;  %vm2266_vm0 = vmmov 0  }
  0xeb   : > { %2226 = vsyncadd (%p2898_p10), [#allocation16], 4294967232  ;;  %1664 = vmatprep.subr.bf16.mxu1 %v2263_v0  ;;  %1656 = vmatprep.subr.bf16.mxu0 %v2263_v0  ;;  %v1567_v2 = vcombine.low %v459_v1, %v459_v1  ;;  %vm467_vm1 = vcmask 1043456   ;;  %s2267_s28 = smov 108   ;;  %s2268_s17 = smov 118   ;;  %v648_v7 = vld [vmem:[#allocation9] sm:$0xff] }
  0xec   : > { %1660 = vmatprep.mubr.msk.bf16.mxu0 %vm2266_vm0, %v2263_v0  ;;  %1668 = vmatprep.mubr.msk.bf16.mxu1 %vm2266_vm0, %v2263_v0  ;;  %v1904_v8 = vld [vmem:[#allocation8] sm:$0xff]   ;;  %v2269_v9 = vmov 0   ;;  %vm486_vm2 = vcmask 195584   ;;  %v1903_v14 = vld [vmem:[#allocation8 + $0x8] sm:$0xff]   ;;  %v1905_v18 = vld [vmem:[#allocation8 + $0x10] sm:$0xff]   ;;  %vm672_vm3 = vcmask 89088  }
  0xed   : > { %463 = vrot.lane.b32.xlu0 %v1567_v2, %s2264_s16  ;;  %1901 = vset.pattern.permute.xlu1 %v2269_v9  ;;  %v649_v10 = vld [vmem:[#allocation9 + $0x8] sm:$0xff]  ;;  %vm674_vm4 = vcmask 818888   ;;  %673 = vst.msk [vmem:[#allocation2] sm:$0xff] %vm672_vm3, %v2269_v9  ;;  %v2662_v40 = vld [vmem:[#allocation6] ss:$0 sm:$0xff]  ;;  %s2270_s27 = smov 11  }
  0xee   : > { %1900 = vset.pattern.permute.xlu0 %v2269_v9  ;;  %675 = vst.msk [vmem:[#allocation2] sm:$0xff] %vm674_vm4, %v2269_v9  ;;  %vm681_vm5 = vcmask 728152   ;;  %v867_v50 = vld [vmem:[#allocation12] sm:$0xff]  ;;  %v1907_v51 = vld [vmem:[#allocation11] sm:$0xff]   ;;  %vm710_vm6 = vcmask 392192   ;;  %v1906_v55 = vld [vmem:[#allocation11 + $0x8] sm:$0xff]  }
  0xef   : > { %v868_v52 = vld [vmem:[#allocation12 + $0x8] sm:$0xff]  ;;  %v1908_v59 = vld [vmem:[#allocation11 + $0x10] sm:$0xff]   ;;  %s1565_s20 = sshll.u32 %s2603_s24, 3  ;;  %vm886_vm7 = vcmask 84992   ;;  %vm889_vm8 = vcmask 814792   ;;  %vm915_vm9 = vcmask 64512  }
  0xf0   : > { %s2709_s18 = scalar_lea.vmem [#allocation17], %s1565_s20  ;;  %s2271_s14 = smov 88   ;;  %vm903_vm10 = vcmask 724056   ;;  %vm908_vm11 = vcmask 289792   ;;  %vm1021_vm12 = vcmask 85048  }
  0xf1   : > { %465 = vrot.lane.b32.xlu0 %v1567_v2, %s2265_s26  ;;  %v907_v2 = vld [vmem:[#allocation15] sm:$0xf]  ;;  %887 = vst.msk [vmem:[%s2709_s18] sm:$0xf] %vm886_vm7, %v2269_v9  ;;  %888 = vst.msk [vmem:[%s2709_s18 + $0x4] sm:$0xf] %vm886_vm7, %v2269_v9 }
  0xf2   : > { %890 = vst.msk [vmem:[%s2709_s18] sm:$0xf] %vm889_vm8, %v2269_v9  ;;  %891 = vst.msk [vmem:[%s2709_s18 + $0x4] sm:$0xf] %vm889_vm8, %v2269_v9  ;;  %s2272_s1 = smov 68   ;;  %s2756_s21 = scalar_lea.vmem [#allocation18], %s1565_s20 }
  0xf3   : > { %909 = vst.msk [vmem:[%s2756_s21] sm:$0xf] %vm908_vm11, %v2269_v9  ;;  %910 = vst.msk [vmem:[%s2756_s21 + $0x4] sm:$0xf] %vm908_vm11, %v2269_v9  ;;  %s2273_s25 = smov 7   ;;  %s2274_s29 = smov 13  }
  0xf4   : > { %s2879_s20 = smov 19   ;;  %p2899_p1 = scmp.ne.s32.totalorder %s2887_s23, 0 }
 0x15f   : > { %v464_v3 = vpop.permute.xlu0 %463 }
 0x160   : > { %v470_v4 = vsel %vm467_vm1, %v459_v1, %v464_v3  ;;  %v906_v1 = vld [vmem:[#allocation14] sm:$0xf] }
 0x161   : > { %594 = vrot.lane.b32.xlu0 %v470_v4, %s2267_s28  ;;  %481 = vrot.lane.b32.xlu1 %v470_v4, %s2268_s17  ;;  %v2694_v3 = vsel %vm467_vm1, %v906_v1, 0 }
 0x162   : > { %1665 = vmatpush3.bf16.msra.mxu1 %v470_v4  ;;  %v2697_v4 = vsel %vm467_vm1, %v907_v2, 0 }
 0x163   : > { %v466_v5 = vpop.permute.xlu0 %465  ;;  %1666 = vmatprep.subr.bf16.mxu1 %v2263_v0 }
 0x164   : > { %v543_v6 = vsel %vm467_vm1, %v466_v5, 0 }
 0x165   : > { %483 = vrot.lane.b32.xlu1 %v466_v5, %s2268_s17  ;;  %652 = vperm.xlu0 %1900, %v648_v7  }
 0x166   : > { %1667 = vmatpush3.bf16.msra.mxu1 %v543_v6 }
 0x167   : > { %1680 = vmatprep.subr.bf16.mxu1 %v2263_v0 }
 0x169   : > { %596 = vrot.lane.b32.xlu1 %v466_v5, %s2267_s28  ;;  %1669 = vmatmul.mubr.msk.bf16.vlgmr.msra.gmra.mrb[0].mxu1 %vm486_vm2, %v1904_v8 }
 0x16a   : > { %1686 = vmatprep.mubr.msk.bf16.mxu1 %vm2266_vm0, %v2263_v0 }
 0x16d   : > { %657 = vperm.xlu1 %1901, %v649_v10  }
 0x1d3   : > { %v482_v11 = vpop.permute.xlu1 %481  ;;  %v595_v15 = vpop.permute.xlu0 %594 }
 0x1d4   : > { %1657 = vmatpush3.bf16.msra.mxu0 %v482_v11 }
 0x1d5   : > { %1658 = vmatprep.subr.bf16.mxu0 %v2263_v0 }
 0x1d7   : > { %v484_v12 = vpop.permute.xlu1 %483 }
 0x1d8   : > { %v491_v13 = vsel %vm467_vm1, %v484_v12, 0 }
 0x1d9   : > { %1659 = vmatpush3.bf16.msra.mxu0 %v491_v13 }
 0x1da   : > { %1672 = vmatprep.subr.bf16.mxu0 %v2263_v0 }
 0x1db   : > { %v597_v16 = vpop.permute.xlu1 %596 }
 0x1dc   : > { %1661 = vmatmul.mubr.msk.bf16.vlgmr.msra.gmra.mrb[0].mxu0 %vm486_vm2, %v1903_v14  ;;  %v603_v17 = vsel %vm467_vm1, %v597_v16, 0 }
 0x1dd   : > { %1673 = vmatpush3.bf16.msra.mxu0 %v595_v15  ;;  %1676 = vmatprep.mubr.msk.bf16.mxu0 %vm2266_vm0, %v2263_v0 }
 0x1de   : > { %1674 = vmatprep.subr.bf16.mxu0 %v2263_v0 }
 0x1e1   : > { %1675 = vmatpush3.bf16.msra.mxu0 %v603_v17 }
 0x1e2   : > { %1690 = vmatprep.subr.bf16.mxu0 %v2263_v0 }
 0x1e4   : > { %1677 = vmatmul.mubr.msk.bf16.vlgmr.msra.gmra.mrb[4].mxu0 %vm486_vm2, %v1905_v18  ;;  %v653_v30 = vpop.permute.xlu0 %652 }
 0x1e5   : > { %1696 = vmatprep.mubr.msk.bf16.mxu0 %vm2266_vm0, %v2263_v0 }
 0x1ec   : > { %v658_v34 = vpop.permute.xlu1 %657 }
 0x23c   : > { %v579_v19 = vpop.f32.mrb[0].mxu1 }
 0x23d   : > { %v1670_v20 = vpop.f32.mrb[1].mxu1 }
 0x23e   : > { %v582_v21 = vpop.f32.mrb[2].mxu1 }
 0x23f   : > { %v1671_v22 = vpop.f32.mrb[3].mxu1 }
 0x2af   : > { %v527_v23 = vpop.f32.mrb[0].mxu0 }
 0x2b0   : > { %v580_v24 = vadd.f32 %v579_v19, %v527_v23  ;;  %v1662_v25 = vpop.f32.mrb[1].mxu0 }
 0x2b1   : > { %v530_v26 = vpop.f32.mrb[2].mxu0 }
 0x2b2   : > { %v583_v27 = vadd.f32 %v582_v21, %v530_v26  ;;  %v1663_v28 = vpop.f32.mrb[3].mxu0 }
 0x2b7   : > { %v639_v29 = vpop.f32.mrb[4].mxu0 }
 0x2b8   : > { %v646_v31 = vadd.f32 %v639_v29, %v580_v24  ;;  %v1678_v32 = vpop.f32.mrb[5].mxu0 }
 0x2b9   : > { %v642_v33 = vpop.f32.mrb[6].mxu0 }
 0x2ba   : > { %v660_v35 = vadd.f32 %v653_v30, %v646_v31  ;;  %v647_v36 = vadd.f32 %v642_v33, %v583_v27  ;;  %v1679_v37 = vpop.f32.mrb[7].mxu0 }
 0x2bc   : > { %v662_v38 = vmax.f32 %v660_v35, 0.0  ;;  %v661_v39 = vadd.f32 %v658_v34, %v647_v36 }
 0x2be   : > { %v663_v41 = vmax.f32 %v661_v39, 0.0  ;;  %v670_v42 = vmul.f32 %v2662_v40, %v662_v38 }
 0x2c0   : > { %v671_v43 = vmul.f32 %v2662_v40, %v663_v41 }
 0x2c2   : > { %v676_v44 = vpack.c.bf16 %v671_v43, %v670_v42 }
 0x2c4   : > { %678 = vrot.lane.b32.xlu1 %v676_v44, %s2270_s27 }
 0x336   : > { %v679_v45 = vpop.permute.xlu1 %678 }
 0x337   : > { %682 = vst.msk [vmem:[#allocation2] sm:$0xff] %vm681_vm5, %v679_v45 }
 0x33e   : > { %v685_v46 = vld [vmem:[#allocation2] sm:$0xff] }
 0x33f   : > { %690 = vrot.lane.b32.xlu1 %v685_v46, %s2265_s26  ;;  %687 = vrot.lane.b32.xlu0 %v685_v46, %s2264_s16  ;;  %s2878_s16 = sshll.u32 %s2352_s15, 7 }
 0x340   : > { %1691 = vmatpush3.bf16.msra.mxu0 %v685_v46 }
 0x341   : > { %1692 = vmatprep.subr.bf16.mxu0 %v2263_v0 }
 0x343   : > { %701 = vrot.lane.b32.xlu0 %v685_v46, %s2268_s17 }
 0x3b1   : > { %v691_v47 = vpop.permute.xlu1 %690  ;;  %v688_v48 = vpop.permute.xlu0 %687 }
 0x3b2   : > { %705 = vrot.lane.b32.xlu0 %v691_v47, %s2268_s17  ;;  %703 = vrot.lane.b32.xlu1 %v688_v48, %s2268_s17 }
 0x3b3   : > { %1693 = vmatpush3.bf16.msra.mxu0 %v688_v48 }
 0x3b4   : > { %1694 = vmatprep.subr.bf16.mxu0 %v2263_v0 }
 0x3b5   : > { %v702_v49 = vpop.permute.xlu0 %701 }
 0x3b6   : > { %814 = vrot.lane.b32.xlu0 %v688_v48, %s2267_s28  ;;  %812 = vrot.lane.b32.xlu1 %v685_v46, %s2267_s28 }
 0x3b7   : > { %1681 = vmatpush3.bf16.msra.mxu1 %v702_v49  ;;  %1695 = vmatpush3.bf16.msra.mxu0 %v691_v47 }
 0x3b8   : > { %1682 = vmatprep.subr.bf16.mxu1 %v2263_v0  ;;  %1710 = vmatprep.subr.bf16.mxu0 %v2263_v0 }
 0x3ba   : > { %871 = vperm.xlu0 %1900, %v867_v50   ;;  %816 = vrot.lane.b32.xlu1 %v691_v47, %s2267_s28 }
 0x3bb   : > { %1697 = vmatmul.mubr.msk.bf16.vlgmr.msra.gmra.mrb[8].mxu0 %vm710_vm6, %v1907_v51 }
 0x3bc   : > { %1712 = vmatprep.mubr.msk.bf16.mxu0 %vm2266_vm0, %v2263_v0  ;;  %1711 = vmatpush3.bf16.msra.mxu0 %v2694_v3 }
 0x3bd   : > { %1722 = vmatprep.subr.bf16.mxu0 %v2263_v0 }
 0x3be   : > { %876 = vperm.xlu1 %1901, %v868_v52  }
 0x424   : > { %v704_v53 = vpop.permute.xlu1 %703  ;;  %v706_v54 = vpop.permute.xlu0 %705 }
 0x425   : > { %1683 = vmatpush3.bf16.msra.mxu1 %v704_v53 }
 0x426   : > { %1684 = vmatprep.subr.bf16.mxu1 %v2263_v0 }
 0x428   : > { %v813_v56 = vpop.permute.xlu1 %812  ;;  %v815_v57 = vpop.permute.xlu0 %814 }
 0x429   : > { %1685 = vmatpush3.bf16.msra.mxu1 %v706_v54 }
 0x42a   : > { %1700 = vmatprep.subr.bf16.mxu1 %v2263_v0 }
 0x42c   : > { %1687 = vmatmul.mubr.msk.bf16.vlgmr.msra.gmra.mrb[4].mxu1 %vm710_vm6, %v1906_v55  ;;  %v817_v58 = vpop.permute.xlu1 %816 }
 0x42d   : > { %1701 = vmatpush3.bf16.msra.mxu1 %v813_v56  ;;  %1706 = vmatprep.mubr.msk.bf16.mxu1 %vm2266_vm0, %v2263_v0 }
 0x42e   : > { %1702 = vmatprep.subr.bf16.mxu1 %v2263_v0 }
 0x431   : > { %1703 = vmatpush3.bf16.msra.mxu1 %v815_v57 }
 0x432   : > { %1704 = vmatprep.subr.bf16.mxu1 %v2263_v0 }
 0x435   : > { %1705 = vmatpush3.bf16.msra.mxu1 %v817_v58 }
 0x436   : > { %1716 = vmatprep.subr.bf16.mxu1 %v2263_v0 }
 0x438   : > { %1707 = vmatmul.mubr.msk.bf16.vlgmr.msra.gmra.mrb[8].mxu1 %vm710_vm6, %v1908_v59 }
 0x439   : > { %1718 = vmatprep.mubr.msk.bf16.mxu1 %vm2266_vm0, %v2263_v0  ;;  %1717 = vmatpush3.bf16.msra.mxu1 %v2697_v4  ;;  %v872_v15 = vpop.permute.xlu0 %871 }
 0x43a   : > { %1728 = vmatprep.subr.bf16.mxu1 %v2263_v0 }
 0x43d   : > { %v877_v20 = vpop.permute.xlu1 %876 }
 0x48e   : > { %v797_v60 = vpop.f32.mrb[8].mxu0 }
 0x48f   : > { %v1698_v61 = vpop.f32.mrb[9].mxu0 }
 0x490   : > { %v800_v62 = vpop.f32.mrb[10].mxu0 }
 0x491   : > { %v1699_v63 = vpop.f32.mrb[11].mxu0 }
 0x4ff   : > { %v748_v5 = vpop.f32.mrb[4].mxu1 }
 0x500   : > { %v798_v6 = vadd.f32 %v797_v60, %v748_v5  ;;  %v1688_v7 = vpop.f32.mrb[5].mxu1 }
 0x501   : > { %v751_v8 = vpop.f32.mrb[6].mxu1 }
 0x502   : > { %v801_v10 = vadd.f32 %v800_v62, %v751_v8  ;;  %v1689_v11 = vpop.f32.mrb[7].mxu1 }
 0x50b   : > { %v858_v12 = vpop.f32.mrb[8].mxu1 }
 0x50c   : > { %v865_v13 = vadd.f32 %v858_v12, %v798_v6  ;;  %v1708_v14 = vpop.f32.mrb[9].mxu1 }
 0x50d   : > { %v861_v16 = vpop.f32.mrb[10].mxu1 }
 0x50e   : > { %v879_v17 = vadd.f32 %v872_v15, %v865_v13  ;;  %v866_v18 = vadd.f32 %v861_v16, %v801_v10  ;;  %v1709_v19 = vpop.f32.mrb[11].mxu1 }
 0x510   : > { %v881_v21 = vmax.f32 %v879_v17, 0.0  ;;  %v880_v22 = vadd.f32 %v877_v20, %v866_v18 }
 0x512   : > { %v882_v23 = vmax.f32 %v880_v22, 0.0  ;;  %v883_v24 = vmul.f32 %v2662_v40, %v881_v21 }
 0x514   : > { %v884_v25 = vmul.f32 %v2662_v40, %v882_v23  ;;  %v1607_v29 = vpack.c.bf16 %v883_v24, %v883_v24 }
 0x516   : > { %v885_v26 = vpack.c.bf16 %v884_v25, %v883_v24  ;;  %v1608_v30 = vpack.c.bf16 %v884_v25, %v884_v25 }
 0x518   : > { %911 = vrot.lane.b32.xlu0 %v885_v26, %s2268_s17  ;;  %s2770_s17 = scalar_lea.hbm %s2873_s8, %s2878_s16 }
 0x58a   : > { %v912_v27 = vpop.permute.xlu0 %911 }
 0x58b   : > { %v914_v28 = vmax.bf16 %v912_v27, %v885_v26 }
 0x58d   : > { %1129 = vrot.lane.b32.xlu0 %v914_v28, %s2271_s14  ;;  %1025 = vrot.lane.b32.xlu1 %v914_v28, %s2267_s28  ;;  %s1338_s14 = scalar_lea.sflag [#allocation5], %s2603_s24 }
 0x58e   : > { %1713 = vmatmul.mubr.msk.bf16.vlgmr.msra.gmra.mrb[12].mxu0 %vm915_vm9, %v914_v28  ;;  %1719 = vmatmul.mubr.msk.bf16.vlgmr.msra.gmra.mrb[12].mxu1 %vm915_vm9, %v914_v28 }
 0x58f   : > { %1723 = vmatpush3.bf16.msra.mxu0 %v2694_v3  ;;  %1729 = vmatpush3.bf16.msra.mxu1 %v2697_v4 }
 0x590   : > { %1724 = vmatprep.mubr.msk.bf16.mxu0 %vm2266_vm0, %v2263_v0  ;;  %1730 = vmatprep.mubr.msk.bf16.mxu1 %vm2266_vm0, %v2263_v0 }
 0x591   : > { %897 = vrot.lane.b32.xlu0 %v1607_v29, %s2270_s27  ;;  %1233 = vrot.lane.b32.xlu1 %v914_v28, %s2272_s1 }
 0x592   : > { %1734 = vmatprep.subr.bf16.mxu0 %v2263_v0  ;;  %1740 = vmatprep.subr.bf16.mxu1 %v2263_v0 }
 0x595   : > { %899 = vrot.lane.b32.xlu1 %v1608_v30, %s2270_s27  ;;  %s1356_s27 = sshll.u32 %s2709_s18, 4  ;;  %s2773_s27 = int_to_ptr.vmem [resolvable:$true] %s1356_s27 }
 0x596   : > { %s2135_s1 = scalar_lea.vmem %s2773_s27, 128 }
 0x597   : > { %p2136_p4 = scmp.ne.s32.totalorder %s2773_s27, %s2135_s1 }
 0x599   : > { %p2137_p13 = pnand %p2136_p4, %p2899_p1 }
 0x59b   : > { %p2138_p0 = pneg %p2137_p13 }
 0x5ff   : > { %v1130_v31 = vpop.permute.xlu0 %1129  ;;  %v1026_v32 = vpop.permute.xlu1 %1025 }
 0x600   : > { %1725 = vmatmul.mubr.msk.bf16.vlgmr.msra.gmra.mrb[16].mxu0 %vm915_vm9, %v1026_v32  ;;  %1731 = vmatmul.mubr.msk.bf16.vlgmr.msra.gmra.mrb[16].mxu1 %vm915_vm9, %v1026_v32 }
 0x601   : > { %1735 = vmatpush3.bf16.msra.mxu0 %v2694_v3  ;;  %1741 = vmatpush3.bf16.msra.mxu1 %v2697_v4 }
 0x602   : > { %1736 = vmatprep.mubr.msk.bf16.mxu0 %vm2266_vm0, %v2263_v0  ;;  %1742 = vmatprep.mubr.msk.bf16.mxu1 %vm2266_vm0, %v2263_v0 }
 0x603   : > { %v898_v33 = vpop.permute.xlu0 %897  ;;  %v1234_v34 = vpop.permute.xlu1 %1233  ;;  %1746 = vmatprep.subr.bf16.mxu0 %v2263_v0  ;;  %1752 = vmatprep.subr.bf16.mxu1 %v2263_v0 }
 0x604   : > { %904 = vst.msk [vmem:[%s2709_s18] sm:$0xf] %vm903_vm10, %v898_v33 }
 0x607   : > { %v900_v35 = vpop.permute.xlu1 %899 }
 0x608   : > { %905 = vst.msk [vmem:[%s2709_s18 + $0x4] sm:$0xf] %vm903_vm10, %v900_v35  ;;  %1737 = vmatmul.mubr.msk.bf16.vlgmr.msra.gmra.mrb[20].mxu0 %vm915_vm9, %v1130_v31  ;;  %1743 = vmatmul.mubr.msk.bf16.vlgmr.msra.gmra.mrb[20].mxu1 %vm915_vm9, %v1130_v31 }
 0x609   : > { %1747 = vmatpush3.bf16.msra.mxu0 %v2694_v3  ;;  %1753 = vmatpush3.bf16.msra.mxu1 %v2697_v4 }
 0x60a   : > { %1748 = vmatprep.mubr.msk.bf16.mxu0 %vm2266_vm0, %v2263_v0  ;;  %1754 = vmatprep.mubr.msk.bf16.mxu1 %vm2266_vm0, %v2263_v0 }
 0x610   : > { %1749 = vmatmul.mubr.msk.bf16.vlgmr.msra.gmra.mrb[24].mxu0 %vm915_vm9, %v1234_v34  ;;  %1755 = vmatmul.mubr.msk.bf16.vlgmr.msra.gmra.mrb[24].mxu1 %vm915_vm9, %v1234_v34 }
 0x661   : > { %v956_v36 = vpop.f32.mrb[12].mxu0  ;;  %v1000_v37 = vpop.f32.mrb[12].mxu1 }
 0x662   : > { %v1007_v38 = vmax.f32 %v956_v36, %v1000_v37  ;;  %v1714_v39 = vpop.f32.mrb[13].mxu0  ;;  %v1720_v40 = vpop.f32.mrb[13].mxu1 }
 0x663   : > { %v959_v0 = vpop.f32.mrb[14].mxu0  ;;  %v1003_v41 = vpop.f32.mrb[14].mxu1 }
 0x664   : > { %v1609_v42 = vpack.c.bf16 %v1007_v38, %v1007_v38  ;;  %v1008_v43 = vmax.f32 %v959_v0, %v1003_v41  ;;  %v1715_v44 = vpop.f32.mrb[15].mxu0  ;;  %v1721_v45 = vpop.f32.mrb[15].mxu1 }
 0x666   : > { %v1610_v46 = vpack.c.bf16 %v1008_v43, %v1008_v43  ;;  %1015 = vrot.lane.b32.xlu0 %v1609_v42, %s2273_s25 }
 0x668   : > { %1017 = vrot.lane.b32.xlu1 %v1610_v46, %s2273_s25  ;;  %s2276_s25 = smov [#allocation17]  }
 0x6d3   : > { %v1064_v47 = vpop.f32.mrb[16].mxu0  ;;  %v1105_v48 = vpop.f32.mrb[16].mxu1 }
 0x6d4   : > { %v1112_v49 = vmax.f32 %v1064_v47, %v1105_v48  ;;  %v1726_v9 = vpop.f32.mrb[17].mxu0  ;;  %v1732_v50 = vpop.f32.mrb[17].mxu1 }
 0x6d5   : > { %v1067_v51 = vpop.f32.mrb[18].mxu0  ;;  %v1108_v52 = vpop.f32.mrb[18].mxu1 }
 0x6d6   : > { %v1611_v53 = vpack.c.bf16 %v1112_v49, %v1112_v49  ;;  %v1113_v54 = vmax.f32 %v1067_v51, %v1108_v52  ;;  %v1727_v55 = vpop.f32.mrb[19].mxu0  ;;  %v1733_v56 = vpop.f32.mrb[19].mxu1 }
 0x6d8   : > { %v1612_v57 = vpack.c.bf16 %v1113_v54, %v1113_v54  ;;  %v1016_v58 = vpop.permute.xlu0 %1015  ;;  %1120 = vrot.lane.b32.xlu0 %v1611_v53, %s2274_s29 }
 0x6d9   : > { %1022 = vst.msk [vmem:[%s2756_s21] sm:$0xf] %vm1021_vm12, %v1016_v58 }
 0x6da   : > { %v1018_v59 = vpop.permute.xlu1 %1017  ;;  %1122 = vrot.lane.b32.xlu1 %v1612_v57, %s2274_s29  ;;  %s2139_s29 = sshll.u32 %s2276_s25, 4  ;;  %s2140_s29 = int_to_ptr.vmem [resolvable:$false] %s2139_s29 }
 0x6db   : > { %1023 = vst.msk [vmem:[%s2756_s21 + $0x4] sm:$0xf] %vm1021_vm12, %v1018_v59  ;;  %v1168_v60 = vpop.f32.mrb[20].mxu0  ;;  %v1209_v61 = vpop.f32.mrb[20].mxu1  ;;  %s2141_s26 = scalar_lea.vmem %s2140_s29, 256  ;;  %p2142_p2 = scmp.lt.s32.totalorder %s2773_s27, %s2140_s29 }
 0x6dc   : > { %v1216_v62 = vmax.f32 %v1168_v60, %v1209_v61  ;;  %v1738_v63 = vpop.f32.mrb[21].mxu0  ;;  %v1744_v1 = vpop.f32.mrb[21].mxu1  ;;  %p2143_p3 = scmp.lt.s32.totalorder %s2141_s26, %s2135_s1 }
 0x6dd   : > { %v1171_v2 = vpop.f32.mrb[22].mxu0  ;;  %v1212_v3 = vpop.f32.mrb[22].mxu1 }
 0x6de   : > { %v1613_v4 = vpack.c.bf16 %v1216_v62, %v1216_v62  ;;  %v1217_v5 = vmax.f32 %v1171_v2, %v1212_v3  ;;  %v1739_v6 = vpop.f32.mrb[23].mxu0  ;;  %v1745_v7 = vpop.f32.mrb[23].mxu1  ;;  %p2144_p6 = por %p2143_p3, %p2142_p2 }
 0x6e0   : > { %v1614_v8 = vpack.c.bf16 %v1217_v5, %v1217_v5  ;;  %1224 = vrot.lane.b32.xlu0 %v1613_v4, %s2879_s20  ;;  %p2145_p11 = pnand %p2144_p6, %p2138_p0 }
 0x6e2   : > { %2148 = shalt.err (!%p2145_p11)
}
 0x6e3   : > { %s2149_s18 = scalar_lea.hbm %s2770_s17, 128  ;;  %s2153_s25 = scalar_lea.hbm %s2873_s8, 256 }
 0x6e4   : > { %p2150_p12 = scmp.ne.s32.totalorder %s2770_s17, %s2149_s18  ;;  %p2154_p9 = scmp.lt.u32.totalorder %s2770_s17, %s2873_s8 }
 0x6e5   : > { %p2155_p7 = scmp.lt.u32.totalorder %s2153_s25, %s2149_s18  ;;  %p2157_p4 = scmp.lt.u32.totalorder %s2149_s18, %s2770_s17 }
 0x6e6   : > { %p2151_p8 = pnand %p2150_p12, %p2899_p1 }
 0x6e7   : > { %p2156_p10 = por %p2155_p7, %p2154_p9 }
 0x6e8   : > { %p2152_p5 = pneg %p2151_p8 }
 0x6e9   : > { %p2158_p13 = por %p2157_p4, %p2156_p10 }
 0x6eb   : > { %p2159_p0 = pnand %p2158_p13, %p2152_p5 }
 0x6ed   : > { %2162 = shalt.err (!%p2159_p0)
}
 0x6ee   : > { %s2277_s1 = smov 64   ;;  %s2278_s26 = smov 4   ;;  %v1272_v10 = vpop.f32.mrb[24].mxu0  ;;  %v1313_v11 = vpop.f32.mrb[24].mxu1  ;;  %vm1126_vm13 = vcmask 134248   ;;  %vm1230_vm14 = vcmask 183448  }
 0x6ef   : > { %1788 = dma.vmem_to_hbm [thread:$0]  (%p2899_p1), %s2773_s27, 128, %s2770_s17, %s1338_s14, %s2277_s1, %s2277_s1, %s2278_s26   ;;  %v1320_v12 = vmax.f32 %v1272_v10, %v1313_v11  ;;  %v1750_v13 = vpop.f32.mrb[25].mxu0  ;;  %v1756_v14 = vpop.f32.mrb[25].mxu1  ;;  %vm1334_vm15 = vcmask 232648  }
 0x6f0   : > { %s2900_s16 = smov 19   ;;  %v1275_v15 = vpop.f32.mrb[26].mxu0  ;;  %v1316_v16 = vpop.f32.mrb[26].mxu1  ;;  %s2279_s17 = smov 25  }
 0x6f1   : > { %1226 = vrot.lane.b32.xlu1 %v1614_v8, %s2900_s16  ;;  %v1615_v17 = vpack.c.bf16 %v1320_v12, %v1320_v12  ;;  %v1321_v18 = vmax.f32 %v1275_v15, %v1316_v16  ;;  %v1751_v19 = vpop.f32.mrb[27].mxu0  ;;  %v1757_v20 = vpop.f32.mrb[27].mxu1  ;;  %s1372_s27 = sshll.u32 %s2756_s21, 4  ;;  %s2901_s20 = sshll.u32 %s2352_s15, 7  ;;  %s2817_s27 = int_to_ptr.vmem [resolvable:$true] %s1372_s27 }
 0x6f2   : > { %s2815_s28 = scalar_lea.hbm %s2874_s9, %s2901_s20  ;;  %s1343_s25 = scalar_lea.sflag [#allocation19], %s2603_s24 }
 0x6f3   : > { %v1616_v21 = vpack.c.bf16 %v1321_v18, %v1321_v18  ;;  %1328 = vrot.lane.b32.xlu0 %v1615_v17, %s2279_s17  ;;  %s2163_s29 = scalar_lea.vmem %s2817_s27, 128  ;;  %s2280_s16 = smov [#allocation18]  }
 0x6f4   : > { %p2164_p2 = scmp.ne.s32.totalorder %s2817_s27, %s2163_s29  ;;  %s2167_s15 = sshll.u32 %s2280_s16, 4  ;;  %s2168_s15 = int_to_ptr.vmem [resolvable:$false] %s2167_s15 }
 0x6f5   : > { %1330 = vrot.lane.b32.xlu1 %v1616_v21, %s2279_s17  ;;  %s2169_s17 = scalar_lea.vmem %s2168_s15, 256  ;;  %p2170_p11 = scmp.lt.s32.totalorder %s2817_s27, %s2168_s15 }
 0x6f6   : > { %p2165_p3 = pnand %p2164_p2, %p2899_p1  ;;  %p2171_p12 = scmp.lt.s32.totalorder %s2169_s17, %s2163_s29 }
 0x6f8   : > { %p2166_p6 = pneg %p2165_p3  ;;  %p2172_p8 = por %p2171_p12, %p2170_p11 }
 0x6fa   : > { %p2173_p5 = pnand %p2172_p8, %p2166_p6 }
 0x74a   : > { %v1121_v22 = vpop.permute.xlu0 %1120 }
 0x74b   : > { %1127 = vst.msk [vmem:[%s2756_s21] sm:$0xf] %vm1126_vm13, %v1121_v22 }
 0x74c   : > { %v1123_v23 = vpop.permute.xlu1 %1122 }
 0x74d   : > { %1128 = vst.msk [vmem:[%s2756_s21 + $0x4] sm:$0xf] %vm1126_vm13, %v1123_v23 }
 0x752   : > { %v1225_v24 = vpop.permute.xlu0 %1224 }
 0x753   : > { %1231 = vst.msk [vmem:[%s2756_s21] sm:$0xf] %vm1230_vm14, %v1225_v24 }
 0x763   : > { %v1227_v25 = vpop.permute.xlu1 %1226 }
 0x764   : > { %1232 = vst.msk [vmem:[%s2756_s21 + $0x4] sm:$0xf] %vm1230_vm14, %v1227_v25 }
 0x765   : > { %v1329_v26 = vpop.permute.xlu0 %1328 }
 0x766   : > { %1335 = vst.msk [vmem:[%s2756_s21] sm:$0xf] %vm1334_vm15, %v1329_v26 }
 0x767   : > { %v1331_v27 = vpop.permute.xlu1 %1330 }
 0x768   : > { %1336 = vst.msk [vmem:[%s2756_s21 + $0x4] sm:$0xf] %vm1334_vm15, %v1331_v27 }
 0x769   : > { %2176 = shalt.err (!%p2173_p5)
}
 0x76a   : > { %s2177_s21 = scalar_lea.hbm %s2815_s28, 128  ;;  %s2181_s18 = scalar_lea.hbm %s2874_s9, 256 }
 0x76b   : > { %p2178_p9 = scmp.ne.s32.totalorder %s2815_s28, %s2177_s21  ;;  %p2182_p4 = scmp.lt.u32.totalorder %s2815_s28, %s2874_s9 }
 0x76c   : > { %p2183_p13 = scmp.lt.u32.totalorder %s2181_s18, %s2177_s21  ;;  %p2185_p2 = scmp.lt.u32.totalorder %s2177_s21, %s2815_s28 }
 0x76d   : > { %p2179_p7 = pnand %p2178_p9, %p2899_p1 }
 0x76e   : > { %p2184_p0 = por %p2183_p13, %p2182_p4 }
 0x76f   : > { %p2180_p10 = pneg %p2179_p7 }
 0x770   : > { %p2186_p3 = por %p2185_p2, %p2184_p0 }
 0x772   : > { %p2187_p6 = pnand %p2186_p3, %p2180_p10 }
 0x774   : > { %2190 = shalt.err (!%p2187_p6)
}
 0x775   : > { %1789 = dma.vmem_to_hbm [thread:$0]  (%p2899_p1), %s2817_s27, 128, %s2815_s28, %s1343_s25, %s2277_s1, %s2277_s1, %s2278_s26  }
 0x776 PF: > { %s1387_s29 = sand.u32 1, %s2237_s30   ;;  %p2902_p11 = scmp.ne.s32.totalorder %s2888_s13, 0 }
 0x777   : > { %p2903_p12 = scmp.ge.s32.totalorder %s2249_s12, 2  ;;  %s1388_s17 = scalar_lea.sflag [#allocation5], %s1387_s29 }
 0x779   : > { %p1819_p8 = pnand %p2903_p12, %p2902_p11 }
 0x77b   : > { %2228 = dma.done.wait (!%p1819_p8), %s1388_s17, 128  }
 0x77c   : > { %2230 = vsyncadd (!%p1819_p8), %s1388_s17, 4294967168  ;;  %s1397_s23 = scalar_lea.sflag [#allocation19], %s1387_s29 }
 0x77d   : > { %2232 = dma.done.wait (!%p1819_p8), %s1397_s23, 128  }
 0x77e   : > { %2234 = vsyncadd (!%p1819_p8), %s1397_s23, 4294967168  ;;  %p30_p1 = scmp.ge.s32.totalorder %s2533_s19, 4   ;;  %s2904_s30 = smov %s2241_s10 }
 0x77f   : > { %s2905_s10 = smov %s2245_s11  ;;  %s2906_s11 = smov %s2545_s22 }
 0x780   : > { %s2907_s12 = smov %s2533_s19  ;;  %32 = sbr.rel (!%p30_p1) target bundleno = 13 (0xd), region = 146 }
 0x787   :  { %1402 = vsyncpa [#allocation4], 1 }
 0x788   :  { %1404 = vsyncpa [#allocation4 + $0x1], 1 }
 0x789   :  { %1405 = vsyncpa [#allocation7], 1 }
 0x78a   :  { %1406 = vsyncpa [#allocation10], 1 }
 0x78b   :  { %1407 = vsyncpa [#allocation13], 1 }
 0x78c   :  { %1408 = vsyncpa [#allocation16], 1 }
 0x78d   :  { %1409 = vsyncpa [#allocation5], 1 }
 0x78e   :  { %1411 = vsyncpa [#allocation5 + $0x1], 1 }
 0x78f   :  { %1412 = vsyncpa [#allocation19], 1 }
 0x790   :  { %1414 = vsyncpa [#allocation19 + $0x1], 1 }

// kernel: unet_forward.5
= control target key start
LH: loop header
LB: loop body
LE: loop exit
PB: predicated region body
PF: predicated region fallthrough
CT: control target
= control target key end

     0   :  { %s3724_s0 = inlined_call_operand.hbm [shape: bf16[2,1,324], index: 0, kind: input, shape index: {}]   ;;  %s3725_s1 = inlined_call_operand.hbm [shape: f32[1,286], index: 1, kind: input, shape index: {}]   ;;  %s3726_s2 = inlined_call_operand.hbm [shape: bf16[3,8,3], index: 2, kind: input, shape index: {}]   ;;  %s3727_s3 = inlined_call_operand.hbm [shape: f32[8,1], index: 3, kind: input, shape index: {}]   ;;  %s3728_s4 = inlined_call_operand.hbm [shape: bf16[3,8,24], index: 4, kind: input, shape index: {}]   ;;  %s3729_s5 = inlined_call_operand.hbm [shape: f32[8,1], index: 5, kind: input, shape index: {}]   ;;  %s3730_s6 = inlined_call_operand.hbm [shape: bf16[16,8], index: 6, kind: input, shape index: {}]   ;;  %s3731_s7 = inlined_call_operand.hbm [shape: bf16[16,8], index: 7, kind: input, shape index: {}]   ;;  %s3732_s8 = inlined_call_operand.hbm [shape: bf16[2,8,324], index: 8, kind: output, shape index: {0}]   ;;  %s3733_s9 = inlined_call_operand.hbm [shape: bf16[2,8,100], index: 9, kind: output, shape index: {1}]  }
   0x1   :  { %3737 = sst [smem:[#allocation27_spill]] %s3725_s1 }
   0x2   :  { %3738 = sst [smem:[#allocation28_spill]] %s3726_s2 }
   0x3   :  { %3739 = sst [smem:[#allocation29_spill]] %s3727_s3 }
   0x4   :  { %15 = vsyncpa [#allocation4], 0 }
   0x5   :  { %17 = vsyncpa [#allocation4 + $0x1], 0 }
   0x6   :  { %18 = vsyncpa [#allocation7], 0 }
   0x7   :  { %19 = vsyncpa [#allocation10], 0 }
   0x8   :  { %20 = vsyncpa [#allocation13], 0 }
   0x9   :  { %21 = vsyncpa [#allocation16], 0 }
   0xa   :  { %22 = vsyncpa [#allocation5], 0 }
   0xb   :  { %24 = vsyncpa [#allocation5 + $0x1], 0 }
   0xc   :  { %25 = vsyncpa [#allocation19], 0 }
   0xd   :  { %27 = vsyncpa [#allocation19 + $0x1], 0  ;;  %s3027_s30 = smov 0   ;;  %s3029_s10 = smov 0  }
   0xe   :  { %s3031_s11 = smov 0   ;;  %s3033_s12 = smov 0  }
   0xf LB: > { %s2941_s13 = smov [#allocation6]   ;;  %s3048_s15 = sadd.s32 4294967295, %s2939_s12   ;;  %s2939_s12 = sphi %s3033_s12, %s3768_s12   ;;  %s2935_s11 = sphi %s3031_s11, %s3767_s11   ;;  %s2931_s10 = sphi %s3029_s10, %s3766_s10   ;;  %s2927_s30 = sphi %s3027_s30, %s3765_s30  }
  0x10   : > { %s276_s14 = sshll.u32 %s2941_s13, 4  ;;  %p2180_p0 = scmp.ge.s32.totalorder %s2939_s12, 1  ;;  %s3053_s14 = int_to_ptr.vmem [resolvable:$true] %s276_s14 }
  0x11   : > { %p3734_p1 = scmp.eq.s32.totalorder %s3048_s15, 0  ;;  %p263_p2 = scmp.lt.s32.totalorder %s2939_s12, 3 }
  0x12   : > { %s2942_s17 = smov [#allocation9]   ;;  %s2943_s19 = smov [#allocation12]  }
  0x13   : > { %p3055_p3 = pnand %p2180_p0, %p263_p2  ;;  %s300_s18 = sshll.u32 %s2942_s17, 4  ;;  %s3062_s18 = int_to_ptr.vmem [resolvable:$true] %s300_s18 }
  0x14   : > { %s324_s20 = sshll.u32 %s2943_s19, 4  ;;  %s2944_s22 = smov [#allocation8]   ;;  %s3070_s20 = int_to_ptr.vmem [resolvable:$true] %s324_s20 }
  0x15   : > { %s3740_s16 = scalar_select %p3055_p3, 1, 0 }
  0x16   : > { %p2458_p5 = pneg %p3055_p3  ;;  %s3072_s23 = sshll.u32 %s2944_s22, 4  ;;  %s287_s23 = int_to_ptr.vmem [resolvable:$true] %s3072_s23 }
  0x17   : > { %s3742_s1 = sld [smem:[#allocation27_spill]] }
  0x18   : > { %p3066_p6 = pnand %p2458_p5, %p3734_p1 }
  0x1a   : > { %p3082_p8 = pneg %p3066_p6 }
  0x1d   : > { %s2599_s26 = scalar_lea.hbm %s3742_s1, 48 }
  0x1e   : > { %p2600_p7 = scmp.ne.s32.totalorder %s3742_s1, %s2599_s26  ;;  %p2606_p11 = scmp.lt.u32.totalorder %s2599_s26, %s3742_s1 }
  0x20   : > { %p2602_p9 = pnand %p3082_p8, %p2600_p7 }
  0x22   : > { %p2603_p10 = pneg %p2602_p9 }
  0x24   : > { %p2608_p12 = pnand %p2606_p11, %p2603_p10 }
  0x26   : > { %2611 = shalt.err (!%p2608_p12)
}
  0x27   : > { %s2612_s19 = scalar_lea.vmem %s3053_s14, 48  ;;  %s2619_s22 = scalar_lea.vmem %s3053_s14, 64 }
  0x28   : > { %p2613_p13 = scmp.ne.s32.totalorder %s3053_s14, %s2612_s19  ;;  %p2620_p5 = scmp.lt.s32.totalorder %s3053_s14, %s3053_s14 }
  0x29   : > { %p2621_p7 = scmp.lt.s32.totalorder %s2619_s22, %s2612_s19 }
  0x2a   : > { %p2615_p0 = pnand %p2613_p13, %p3082_p8 }
  0x2b   : > { %p2622_p9 = por %p2621_p7, %p2620_p5 }
  0x2c   : > { %p2616_p2 = pneg %p2615_p0 }
  0x2e   : > { %p2623_p4 = pnand %p2622_p9, %p2616_p2 }
  0x30   : > { %2626 = shalt.err (!%p2623_p4)
}
  0x31   : > { %2461 = dma.hbm_to_vmem [thread:$0]  (!%p3066_p6), %s3742_s1, 48, %s3053_s14, [#allocation7]  }
  0x32   : > { %s3744_s3 = sld [smem:[#allocation29_spill]] }
  0x38   : > { %s2627_s28 = scalar_lea.hbm %s3744_s3, 128 }
  0x39   : > { %p2628_p10 = scmp.ne.s32.totalorder %s3744_s3, %s2627_s28  ;;  %p2634_p4 = scmp.lt.u32.totalorder %s2627_s28, %s3744_s3 }
  0x3b   : > { %p2630_p11 = pnand %p2628_p10, %p3082_p8 }
  0x3d   : > { %p2631_p12 = pneg %p2630_p11 }
  0x3f   : > { %p2636_p13 = pnand %p2634_p4, %p2631_p12 }
  0x41   : > { %2639 = shalt.err (!%p2636_p13)
}
  0x42   : > { %s2640_s14 = scalar_lea.vmem %s3062_s18, 128  ;;  %p2648_p7 = scmp.lt.s32.totalorder %s3062_s18, %s3062_s18 }
  0x43   : > { %p2641_p0 = scmp.ne.s32.totalorder %s3062_s18, %s2640_s14  ;;  %p2649_p9 = scmp.lt.s32.totalorder %s2640_s14, %s2640_s14 }
  0x45   : > { %p2643_p2 = pnand %p2641_p0, %p3082_p8  ;;  %p2650_p10 = por %p2649_p9, %p2648_p7 }
  0x47   : > { %p2644_p5 = pneg %p2643_p2 }
  0x49   : > { %p2651_p11 = pnand %p2650_p10, %p2644_p5 }
  0x4b   : > { %2654 = shalt.err (!%p2651_p11)
}
  0x4c   : > { %2467 = dma.hbm_to_vmem [thread:$0]  (!%p3066_p6), %s3744_s3, 128, %s3062_s18, [#allocation10]  }
  0x4d   : > { %s2655_s28 = scalar_lea.hbm %s3729_s5, 128 }
  0x4e   : > { %p2656_p12 = scmp.ne.s32.totalorder %s3729_s5, %s2655_s28  ;;  %p2662_p0 = scmp.lt.u32.totalorder %s2655_s28, %s3729_s5 }
  0x50   : > { %p2658_p4 = pnand %p2656_p12, %p3082_p8 }
  0x52   : > { %p2659_p13 = pneg %p2658_p4 }
  0x54   : > { %p2664_p2 = pnand %p2662_p0, %p2659_p13 }
  0x56   : > { %2667 = shalt.err (!%p2664_p2)
}
  0x57   : > { %s2668_s18 = scalar_lea.vmem %s3070_s20, 128  ;;  %p2676_p10 = scmp.lt.s32.totalorder %s3070_s20, %s3070_s20 }
  0x58   : > { %p2669_p5 = scmp.ne.s32.totalorder %s3070_s20, %s2668_s18  ;;  %p2677_p11 = scmp.lt.s32.totalorder %s2668_s18, %s2668_s18 }
  0x5a   : > { %p2671_p7 = pnand %p2669_p5, %p3082_p8  ;;  %p2678_p12 = por %p2677_p11, %p2676_p10 }
  0x5c   : > { %p2672_p9 = pneg %p2671_p7 }
  0x5e   : > { %p2679_p4 = pnand %p2678_p12, %p2672_p9 }
  0x60   : > { %2682 = shalt.err (!%p2679_p4)
}
  0x61   : > { %2473 = dma.hbm_to_vmem [thread:$0]  (!%p3066_p6), %s3729_s5, 128, %s3070_s20, [#allocation13]  }
  0x62   : > { %s3745_s2 = sld [smem:[#allocation28_spill]] }
  0x68   : > { %s2683_s27 = scalar_lea.hbm %s3745_s2, 192 }
  0x69   : > { %p2684_p13 = scmp.ne.s32.totalorder %s3745_s2, %s2683_s27  ;;  %p2690_p5 = scmp.lt.u32.totalorder %s2683_s27, %s3745_s2 }
  0x6b   : > { %p2686_p0 = pnand %p2684_p13, %p3082_p8 }
  0x6d   : > { %p2687_p2 = pneg %p2686_p0 }
  0x6f   : > { %p2692_p7 = pnand %p2690_p5, %p2687_p2 }
  0x71   : > { %2695 = shalt.err (!%p2692_p7)
}
  0x72   : > { %s2696_s22 = scalar_lea.vmem %s287_s23, 192  ;;  %p2704_p12 = scmp.lt.s32.totalorder %s287_s23, %s287_s23 }
  0x73   : > { %p2697_p9 = scmp.ne.s32.totalorder %s287_s23, %s2696_s22  ;;  %p2705_p4 = scmp.lt.s32.totalorder %s2696_s22, %s2696_s22 }
  0x75   : > { %p2699_p10 = pnand %p2697_p9, %p3082_p8  ;;  %p2706_p1 = por %p2705_p4, %p2704_p12 }
  0x77   : > { %p2700_p11 = pneg %p2699_p10 }
  0x79   : > { %p2707_p3 = pnand %p2706_p1, %p2700_p11 }
  0x7b   : > { %2710 = shalt.err (!%p2707_p3)
}
  0x7c   : > { %s2945_s20 = smov 64   ;;  %s2946_s18 = smov 4  }
  0x7d   : > { %2464 = dma.hbm_to_vmem [thread:$0]  (!%p3066_p6), %s3745_s2, 192, %s287_s23, [#allocation7], %s2945_s20, %s2945_s20, %s2946_s18  }
  0x7e   : > { %s2947_s25 = smov [#allocation11]   ;;  %s2948_s27 = smov [#allocation14]  }
  0x7f   : > { %s310_s26 = sshll.u32 %s2947_s25, 4  ;;  %s334_s28 = sshll.u32 %s2948_s27, 4  ;;  %s311_s26 = int_to_ptr.vmem [resolvable:$true] %s310_s26  ;;  %s3172_s28 = int_to_ptr.vmem [resolvable:$true] %s334_s28 }
  0x80   : > { %s2711_s19 = scalar_lea.hbm %s3728_s4, 192 }
  0x81   : > { %p2712_p1 = scmp.ne.s32.totalorder %s3728_s4, %s2711_s19  ;;  %p2718_p0 = scmp.lt.u32.totalorder %s2711_s19, %s3728_s4 }
  0x83   : > { %p2714_p3 = pnand %p2712_p1, %p3082_p8 }
  0x85   : > { %p2715_p13 = pneg %p2714_p3 }
  0x87   : > { %p2720_p2 = pnand %p2718_p0, %p2715_p13 }
  0x89   : > { %2723 = shalt.err (!%p2720_p2)
}
  0x8a   : > { %s2724_s24 = scalar_lea.vmem %s311_s26, 192  ;;  %p2732_p10 = scmp.lt.s32.totalorder %s311_s26, %s311_s26 }
  0x8b   : > { %p2725_p5 = scmp.ne.s32.totalorder %s311_s26, %s2724_s24  ;;  %p2733_p11 = scmp.lt.s32.totalorder %s2724_s24, %s2724_s24 }
  0x8d   : > { %p2727_p7 = pnand %p2725_p5, %p3082_p8  ;;  %p2734_p12 = por %p2733_p11, %p2732_p10 }
  0x8f   : > { %p2728_p9 = pneg %p2727_p7 }
  0x91   : > { %p2735_p4 = pnand %p2734_p12, %p2728_p9 }
  0x93   : > { %2738 = shalt.err (!%p2735_p4)
}
  0x94   : > { %2470 = dma.hbm_to_vmem [thread:$0]  (!%p3066_p6), %s3728_s4, 192, %s311_s26, [#allocation10], %s2945_s20, %s2945_s20, %s2946_s18  }
  0x95   : > { %s2739_s17 = scalar_lea.hbm %s3730_s6, 128 }
  0x96   : > { %p2740_p1 = scmp.ne.s32.totalorder %s3730_s6, %s2739_s17  ;;  %p2746_p0 = scmp.lt.u32.totalorder %s2739_s17, %s3730_s6 }
  0x98   : > { %p2742_p3 = pnand %p2740_p1, %p3082_p8 }
  0x9a   : > { %p2743_p13 = pneg %p2742_p3 }
  0x9c   : > { %p2748_p2 = pnand %p2746_p0, %p2743_p13 }
  0x9e   : > { %2751 = shalt.err (!%p2748_p2)
}
  0x9f   : > { %s2752_s26 = scalar_lea.vmem %s3172_s28, 128  ;;  %p2760_p10 = scmp.lt.s32.totalorder %s3172_s28, %s3172_s28 }
  0xa0   : > { %p2753_p5 = scmp.ne.s32.totalorder %s3172_s28, %s2752_s26  ;;  %p2761_p11 = scmp.lt.s32.totalorder %s2752_s26, %s2752_s26 }
  0xa2   : > { %p2755_p7 = pnand %p2753_p5, %p3082_p8  ;;  %p2762_p12 = por %p2761_p11, %p2760_p10 }
  0xa4   : > { %p2756_p9 = pneg %p2755_p7 }
  0xa6   : > { %p2763_p4 = pnand %p2762_p12, %p2756_p9 }
  0xa8   : > { %2766 = shalt.err (!%p2763_p4)
}
  0xa9   : > { %2476 = dma.hbm_to_vmem [thread:$0]  (!%p3066_p6), %s3730_s6, 128, %s3172_s28, [#allocation13], %s2945_s20, %s2945_s20, %s2946_s18  }
  0xaa   : > { %s2949_s25 = smov [#allocation15]   ;;  %s2767_s19 = scalar_lea.hbm %s3731_s7, 128 }
  0xab   : > { %s347_s27 = sshll.u32 %s2949_s25, 4  ;;  %p2768_p1 = scmp.ne.s32.totalorder %s3731_s7, %s2767_s19  ;;  %s348_s27 = int_to_ptr.vmem [resolvable:$true] %s347_s27 }
  0xac   : > { %p2774_p0 = scmp.lt.u32.totalorder %s2767_s19, %s3731_s7 }
  0xad   : > { %p2770_p3 = pnand %p2768_p1, %p3082_p8 }
  0xaf   : > { %p2771_p13 = pneg %p2770_p3 }
  0xb1   : > { %p2776_p2 = pnand %p2774_p0, %p2771_p13 }
  0xb3   : > { %2779 = shalt.err (!%p2776_p2)
}
  0xb4   : > { %s2780_s28 = scalar_lea.vmem %s348_s27, 128  ;;  %p2788_p10 = scmp.lt.s32.totalorder %s348_s27, %s348_s27 }
  0xb5   : > { %p2781_p5 = scmp.ne.s32.totalorder %s348_s27, %s2780_s28  ;;  %p2789_p11 = scmp.lt.s32.totalorder %s2780_s28, %s2780_s28 }
  0xb7   : > { %p2783_p7 = pnand %p2781_p5, %p3082_p8  ;;  %p2790_p12 = por %p2789_p11, %p2788_p10 }
  0xb9   : > { %p2784_p9 = pneg %p2783_p7 }
  0xbb   : > { %p2791_p4 = pnand %p2790_p12, %p2784_p9 }
  0xbd   : > { %2794 = shalt.err (!%p2791_p4)
}
  0xbe   : > { %2479 = dma.hbm_to_vmem [thread:$0]  (!%p3066_p6), %s3731_s7, 128, %s348_s27, [#allocation16], %s2945_s20, %s2945_s20, %s2946_s18  }
  0xbf   : > { %s2179_s21 = sadd.s32 4294967294, %s2939_s12   ;;  %s3244_s29 = sadd.s32 1, %s2939_s12  }
  0xc0   : > { %s40_s25 = sadd.s32 1, %s2935_s11  ;;  %s37_s13 = ssub.s32 %s2939_s12, %s3244_s29 }
  0xc1   : > { %p47_p8 = scmp.ne.s32.totalorder %s2935_s11, %s2931_s10  ;;  %p38_p1 = scmp.eq.s32.totalorder %s37_s13, 0 }
  0xc2   : > { %p48_p3 = scmp.eq.s32.totalorder %s2939_s12, 0  ;;  %p53_p13 = scmp.ne.s32.totalorder %s2931_s10, %s2927_s30 }
  0xc3   : > { %p224_p0 = scmp.eq.s32.totalorder %s3048_s15, 1  ;;  %p3746_p5 = scmp.eq.s32.totalorder %s3048_s15, 0 }
  0xc4   : > { %s3256_s17 = scalar_select %p38_p1, %s2935_s11, %s40_s25  }
  0xc5   : > { %p49_p2 = por %p48_p3, %p47_p8  ;;  %p3260_p7 = por %p3746_p5, %p53_p13 }
  0xc6   : > { %p3264_p6 = por %p224_p0, %p47_p8  ;;  %p230_p9 = scmp.eq.s32.totalorder %s2179_s21, 1 }
  0xc7   : > { %p2498_p10 = scmp.lt.s32.totalorder %s2939_s12, 2  ;;  %s361_s18 = sand.u32 1, %s2935_s11  }
  0xc8   : > { %s3748_s20 = scalar_select %p3264_p6, 1, 0 }
  0xc9   : > { %p3270_p11 = por %p230_p9, %p53_p13  ;;  %s2419_s22 = smul.u32 3, %s361_s18 }
  0xca   : > { %p3274_p12 = pnand %p2498_p10, %p49_p2  ;;  %s2420_s23 = smul.u32 48, %s2939_s12 }
  0xcb   : > { %s3749_s27 = scalar_select %p3270_p11, 1, 0 }
  0xcc   : > { %s3282_s24 = scalar_lea.hbm %s3724_s0, %s2420_s23  ;;  %s365_s1 = scalar_lea.vmem [#allocation3], %s2419_s22 }
  0xcd   : > { %s373_s21 = sshll.u32 %s365_s1, 4  ;;  %s362_s25 = scalar_lea.sflag [#allocation4], %s361_s18  ;;  %s3284_s21 = int_to_ptr.vmem [resolvable:$true] %s373_s21 }
  0xce   : > { %s2795_s13 = scalar_lea.hbm %s3282_s24, 48  ;;  %p2797_p8 = pneg %p3274_p12 }
  0xcf   : > { %p2796_p4 = scmp.ne.s32.totalorder %s3282_s24, %s2795_s13  ;;  %s2800_s28 = scalar_lea.hbm %s3724_s0, 96 }
  0xd0   : > { %p2801_p13 = scmp.lt.u32.totalorder %s3282_s24, %s3724_s0  ;;  %p2802_p0 = scmp.lt.u32.totalorder %s2800_s28, %s2795_s13 }
  0xd1   : > { %p2798_p1 = pnand %p2797_p8, %p2796_p4  ;;  %p2804_p5 = scmp.lt.u32.totalorder %s2795_s13, %s3282_s24 }
  0xd2   : > { %p2803_p2 = por %p2802_p0, %p2801_p13 }
  0xd3   : > { %p2799_p3 = pneg %p2798_p1 }
  0xd4   : > { %p2805_p9 = por %p2804_p5, %p2803_p2 }
  0xd6   : > { %p2806_p10 = pnand %p2805_p9, %p2799_p3 }
  0xd8   : > { %2809 = shalt.err (!%p2806_p10)
}
  0xd9   : > { %s2810_s18 = scalar_lea.vmem %s3284_s21, 48  ;;  %s2950_s22 = smov [#allocation3]  }
  0xda   : > { %p2811_p4 = scmp.ne.s32.totalorder %s3284_s21, %s2810_s18  ;;  %s2815_s1 = sshll.u32 %s2950_s22, 4  ;;  %s2816_s1 = int_to_ptr.vmem [resolvable:$false] %s2815_s1 }
  0xdb   : > { %s2817_s2 = scalar_lea.vmem %s2816_s1, 96  ;;  %p2818_p6 = scmp.lt.s32.totalorder %s3284_s21, %s2816_s1 }
  0xdc   : > { %p2813_p1 = pnand %p2811_p4, %p2797_p8  ;;  %p2819_p13 = scmp.lt.s32.totalorder %s2817_s2, %s2810_s18 }
  0xde   : > { %p2814_p11 = pneg %p2813_p1  ;;  %p2820_p0 = por %p2819_p13, %p2818_p6 }
  0xe0   : > { %p2821_p2 = pnand %p2820_p0, %p2814_p11 }
  0xe2   : > { %2824 = shalt.err (!%p2821_p2)
}
  0xe3   : > { %2483 = dma.hbm_to_vmem [thread:$0]  (!%p3274_p12), %s3282_s24, 48, %s3284_s21, %s362_s25  }
  0xe4   : > { %p3751_p3 = scmp.ne.s32.totalorder %s3740_s16, 0 }
  0xe5   : > { %s3314_s3 = sand.u32 (!%p3751_p3), 1, %s2931_s10  }
  0xe6   : > { %382 = sbr.rel (%p3751_p3) target bundleno = 1902 (0x76e), region = 52  ;;  %s385_s26 = scalar_lea.sflag (!%p3751_p3), [#allocation4], %s3314_s3 }
  0xe7   : > { %s2421_s13 = smul.u32 (!%p3751_p3), 3, %s3314_s3 }
  0xe9   : > { %s3318_s23 = scalar_lea.vmem (!%p3751_p3), [#allocation3], %s2421_s13 }
  0xed   : > { %2898 = dma.done.wait (%p3260_p7), %s385_s26, 48  }
  0xee   : > { %2900 = vsyncadd (%p3260_p7), %s385_s26, 4294967248  ;;  %p3752_p6 = scmp.eq.s32.totalorder %s3048_s15, 0 }
  0xf0   : > { %2902 = dma.done.wait (%p3752_p6), [#allocation7], 240   ;;  %p3753_p11 = pmov %p3752_p6 }
  0xf1   : > { %p3754_p12 = pmov %p3752_p6 }
  0xf2   : > { %2904 = vsyncadd (%p3753_p11), [#allocation7], 4294967056 }
  0xf3   : > { %2906 = dma.done.wait (%p3754_p12), [#allocation10], 320   ;;  %p3755_p8 = pmov %p3752_p6 }
  0xf4   : > { %p3756_p5 = pmov %p3752_p6 }
  0xf5   : > { %2908 = vsyncadd (%p3755_p8), [#allocation10], 4294966976 }
  0xf6   : > { %2910 = dma.done.wait (%p3756_p5), [#allocation13], 256   ;;  %p3757_p9 = pmov %p3756_p5 }
  0xf7   : > { %p3758_p7 = pmov %p3756_p5 }
  0xf8   : > { %2912 = vsyncadd (%p3757_p9), [#allocation13], 4294967040 }
  0xf9   : > { %2914 = dma.done.wait (%p3758_p7), [#allocation16], 128   ;;  %p3759_p10 = pmov %p3756_p5 }
  0xfa   : > { %v2951_v0 = vmov 1   ;;  %v2952_v1 = vmov 0   ;;  %v549_v2 = vld [vmem:[#allocation8 + $0x4] sm:$0xff]   ;;  %v458_v3 = vld [vmem:[#allocation8] sm:$0xf]  ;;  %v2953_v8 = vmov 2   ;;  %v468_v9 = vlaneseq }
  0xfb   : > { %2916 = vsyncadd (%p3759_p10), [#allocation16], 4294967168  ;;  %2572 = vset.pattern.permute.xlu0 %v2951_v0  ;;  %2584 = vset.pattern.permute.xlu1 %v2951_v0  ;;  %v550_v4 = vunpack.c.l.bf16 %v549_v2  ;;  %v627_v5 = vunpack.c.h.bf16 %v549_v2  ;;  %v461_v6 = vunpack.c.l.bf16 %v458_v3  ;;  %v459_v11 = vld [vmem:[%s3318_s23] sm:$0x7]  ;;  %s2954_s16 = smov 127   ;;  %s2955_s19 = smov 126  }
  0xfc   : > { %876 = vmatprep.mubr.bf16.mxu0 %v2952_v1  ;;  %v3344_v10 = vshrl.u32 %v468_v9, 7  ;;  %v460_v12 = vunpack.c.l.bf16 %v459_v11  ;;  %v702_v43 = vld [vmem:[#allocation9] sm:$0xff]  ;;  %vm514_vm0 = vcmask 1039360   ;;  %vm539_vm1 = vcmask 1031168   ;;  %s2956_s14 = smov 110   ;;  %s2957_s24 = smov 92  }
  0xfd   : > { %v2573_v7 = vpack.i.bf16 %v627_v5, %v550_v4  ;;  %499 = vperm.xlu1 %2584, %v461_v6   ;;  %vm616_vm2 = vcmask 900096   ;;  %vm693_vm3 = vcmask 752640   ;;  %vm733_vm4 = vcmask 150528   ;;  %s2958_s21 = smov 19   ;;  %s2422_s25 = smul.u32 12, %s3314_s3 }
  0xfe   : > { %v3348_v13 = vsub.s32 0, %v3344_v10  ;;  %v474_v14 = vsub.s32 2, %v3344_v10  ;;  %v478_v17 = vsub.s32 4, %v3344_v10  ;;  %vm735_vm5 = vcmask 552328   ;;  %734 = vst.msk [vmem:[#allocation2] sm:$0xf] %vm733_vm4, %v2952_v1 }
  0xff   : > { %2574 = vperm.xlu0 %2572, %v2573_v7   ;;  %736 = vst.msk [vmem:[#allocation2 + $0x8] sm:$0xf] %vm735_vm5, %v2952_v1  ;;  %vm758_vm6 = vcmask 1043608   ;;  %vm759_vm7 = vcmask 1047556   ;;  %vm753_vm8 = vcmask 154624   ;;  %vm762_vm10 = vcmask 396288  }
 0x100   : > { %v471_v15 = vrot.slane %v460_v12, %v3348_v13  ;;  %v475_v16 = vrot.slane %v460_v12, %v474_v14  ;;  %v479_v20 = vrot.slane %v460_v12, %v478_v17  ;;  %vm3450_vm9 = vmor %vm759_vm7, %vm758_vm6  ;;  %vm793_vm11 = vcmask 1043456   ;;  %s2961_s28 = smov 56   ;;  %s3548_s18 = scalar_lea.vmem [#allocation17], %s2422_s25 }
 0x101   : > { %2585 = vset.pattern.permute.xlu1 %v2952_v1  ;;  %vm2960_vm12 = vmmov 0   ;;  %vm831_vm13 = vcmask 195584   ;;  %vm1191_vm14 = vcmask 130048   ;;  %1154 = vst.msk [vmem:[%s3548_s18] sm:$0xf] %vm733_vm4, %v2952_v1  ;;  %s2962_s22 = smov 112  }
 0x102   : > { %2587 = vperm.xlu1 %2585, %v2573_v7   ;;  %v3356_v18 = vrot.slane %v471_v15, %v3348_v13  ;;  %v3359_v19 = vrot.slane %v475_v16, %v3348_v13  ;;  %v3364_v25 = vrot.slane %v479_v20, %v3348_v13  ;;  %1155 = vst.msk [vmem:[%s3548_s18 + $0x8] sm:$0xf] %vm735_vm5, %v2952_v1  ;;  %s2963_s1 = smov 20   ;;  %s2964_s2 = smov 40   ;;  %vm1882_vm15 = vcmask 31744  }
 0x103   : > { %2578 = vset.pattern.permute.xlu0 %v2953_v8  ;;  %s2965_s13 = smov 76   ;;  %s2966_s26 = smov 4  }
 0x104   : > { %2580 = vperm.xlu0 %2578, %v2573_v7   ;;  %s2198_s23 = sshll.u32 %s3314_s3, 2  ;;  %s2971_s25 = smov 51  }
 0x105   : > { %p3762_p1 = scmp.ne.s32.totalorder %s3748_s20, 0 }
 0x106   : > { %2591 = vset.pattern.permute.xlu1 %v2953_v8 }
 0x107   : > { %524 = vperm.xlu1 %2591, %v461_v6  }
 0x108   : > { %2592 = vset.pattern.permute.xlu0 %v2952_v1 }
 0x10b   : > { %2593 = vset.pattern.permute.xlu1 %v2952_v1 }
 0x17c   : > { %v500_v37 = vpop.permute.xlu1 %499 }
 0x17d   : > { %v502_v42 = vmul.f32 %v500_v37, %v3356_v18  ;;  %v503_v44 = vmul.f32 %v500_v37, %v3359_v19  ;;  %v504_v46 = vmul.f32 %v500_v37, %v3364_v25 }
 0x17e   : > { %v2575_v21 = vpop.permute.xlu0 %2574 }
 0x17f   : > { %v2576_v22 = vunpack.i.l.bf16 %v2575_v21  ;;  %v2577_v32 = vunpack.i.h.bf16 %v2575_v21 }
 0x181   : > { %v563_v23 = vmul.f32 %v2576_v22, %v3356_v18  ;;  %v564_v24 = vmul.f32 %v2576_v22, %v3359_v19  ;;  %v565_v28 = vmul.f32 %v2576_v22, %v3364_v25  ;;  %v640_v33 = vmul.f32 %v2577_v32, %v3356_v18  ;;  %v2588_v41 = vpop.permute.xlu1 %2587 }
 0x182   : > { %v641_v35 = vmul.f32 %v2577_v32, %v3359_v19  ;;  %v642_v36 = vmul.f32 %v2577_v32, %v3364_v25  ;;  %v2589_v52 = vunpack.i.l.bf16 %v2588_v41  ;;  %v2590_v8 = vunpack.i.h.bf16 %v2588_v41 }
 0x183   : > { %v2581_v26 = vpop.permute.xlu0 %2580  ;;  %569 = vrot.lane.b32.xlu0 %v563_v23, %s2954_s16  ;;  %571 = vrot.lane.b32.xlu1 %v564_v24, %s2954_s16 }
 0x184   : > { %v2582_v27 = vunpack.i.l.bf16 %v2581_v26  ;;  %v2583_v34 = vunpack.i.h.bf16 %v2581_v26  ;;  %v558_v55 = vmul.f32 %v2589_v52, %v3364_v25  ;;  %v557_v57 = vmul.f32 %v2589_v52, %v3359_v19 }
 0x185   : > { %v556_v63 = vmul.f32 %v2589_v52, %v3356_v18  ;;  %v633_v16 = vmul.f32 %v2590_v8, %v3356_v18  ;;  %v634_v20 = vmul.f32 %v2590_v8, %v3359_v19 }
 0x186   : > { %v587_v29 = vmul.f32 %v2582_v27, %v3356_v18  ;;  %v588_v30 = vmul.f32 %v2582_v27, %v3359_v19  ;;  %v589_v31 = vmul.f32 %v2582_v27, %v3364_v25  ;;  %v664_v38 = vmul.f32 %v2583_v34, %v3356_v18  ;;  %v525_v45 = vpop.permute.xlu1 %524 }
 0x187   : > { %573 = vrot.lane.b32.xlu0 %v565_v28, %s2954_s16  ;;  %v665_v39 = vmul.f32 %v2583_v34, %v3359_v19  ;;  %v666_v40 = vmul.f32 %v2583_v34, %v3364_v25  ;;  %v527_v47 = vmul.f32 %v525_v45, %v3356_v18  ;;  %v528_v48 = vmul.f32 %v525_v45, %v3359_v19 }
 0x188   : > { %593 = vrot.lane.b32.xlu1 %v587_v29, %s2955_s19  ;;  %v529_v49 = vmul.f32 %v525_v45, %v3364_v25  ;;  %v635_v27 = vmul.f32 %v2590_v8, %v3364_v25 }
 0x18b   : > { %595 = vrot.lane.b32.xlu0 %v588_v30, %s2955_s19 }
 0x18c   : > { %597 = vrot.lane.b32.xlu1 %v589_v31, %s2955_s19 }
 0x18f   : > { %646 = vrot.lane.b32.xlu0 %v640_v33, %s2954_s16 }
 0x190   : > { %648 = vrot.lane.b32.xlu1 %v641_v35, %s2954_s16 }
 0x193   : > { %650 = vrot.lane.b32.xlu0 %v642_v36, %s2954_s16 }
 0x194   : > { %670 = vrot.lane.b32.xlu1 %v664_v38, %s2955_s19 }
 0x197   : > { %672 = vrot.lane.b32.xlu0 %v665_v39, %s2955_s19 }
 0x198   : > { %674 = vrot.lane.b32.xlu1 %v666_v40, %s2955_s19 }
 0x19b   : > { %464 = vperm.xlu0 %2592, %v461_v6  }
 0x19c   : > { %508 = vrot.lane.b32.xlu1 %v502_v42, %s2954_s16 }
 0x19f   : > { %705 = vperm.xlu0 %2592, %v702_v43  }
 0x1a0   : > { %510 = vrot.lane.b32.xlu1 %v503_v44, %s2954_s16 }
 0x1a3   : > { %512 = vrot.lane.b32.xlu0 %v504_v46, %s2954_s16 }
 0x1a4   : > { %533 = vrot.lane.b32.xlu1 %v527_v47, %s2955_s19 }
 0x1a7   : > { %535 = vrot.lane.b32.xlu0 %v528_v48, %s2955_s19 }
 0x1a8   : > { %537 = vrot.lane.b32.xlu1 %v529_v49, %s2955_s19 }
 0x1f5   : > { %v570_v50 = vpop.permute.xlu0 %569  ;;  %v572_v51 = vpop.permute.xlu1 %571 }
 0x1f6   : > { %v575_v60 = vsel %vm514_vm0, %v570_v50, %v572_v51 }
 0x1f7   : > { %v580_v5 = vadd.f32 %v575_v60, %v556_v63 }
 0x1f9   : > { %v574_v53 = vpop.permute.xlu0 %573 }
 0x1fa   : > { %v594_v54 = vpop.permute.xlu1 %593  ;;  %v576_v56 = vsel %vm514_vm0, %v572_v51, %v574_v53  ;;  %v582_v58 = vadd.f32 %v574_v53, %v558_v55 }
 0x1fb   : > { %v581_v61 = vadd.f32 %v576_v56, %v557_v57 }
 0x1fd   : > { %v596_v59 = vpop.permute.xlu0 %595 }
 0x1fe   : > { %v598_v62 = vpop.permute.xlu1 %597  ;;  %v599_v3 = vsel %vm539_vm1, %v594_v54, %v596_v59 }
 0x1ff   : > { %v600_v0 = vsel %vm539_vm1, %v596_v59, %v598_v62  ;;  %v606_v2 = vadd.f32 %v598_v62, %v582_v58  ;;  %v604_v9 = vadd.f32 %v599_v3, %v580_v5  ;;  %v457_v5 = vld [vmem:[#allocation6] sm:$0x7] }
 0x200   : > { %v605_v4 = vadd.f32 %v600_v0, %v581_v61  ;;  %v721_v0 = vsub.s32 1, %v3344_v10  ;;  %v3438_v8 = vrot.slane %v457_v5, %v474_v14 }
 0x201   : > { %v647_v6 = vpop.permute.xlu0 %646  ;;  %614 = vrot.lane.b32.xlu1 %v606_v2, %s2956_s14 }
 0x202   : > { %v649_v7 = vpop.permute.xlu1 %648  ;;  %612 = vrot.lane.b32.xlu0 %v605_v4, %s2956_s14 }
 0x203   : > { %v652_v12 = vsel %vm514_vm0, %v647_v6, %v649_v7 }
 0x204   : > { %v657_v21 = vadd.f32 %v652_v12, %v633_v16  ;;  %v3441_v12 = vrot.slane %v457_v5, %v3348_v13 }
 0x205   : > { %v651_v11 = vpop.permute.xlu0 %650  ;;  %610 = vrot.lane.b32.xlu1 %v604_v9, %s2956_s14 }
 0x206   : > { %v671_v15 = vpop.permute.xlu1 %670  ;;  %v653_v17 = vsel %vm514_vm0, %v649_v7, %v651_v11  ;;  %v659_v31 = vadd.f32 %v651_v11, %v635_v27 }
 0x207   : > { %v658_v23 = vadd.f32 %v653_v17, %v634_v20 }
 0x209   : > { %v673_v22 = vpop.permute.xlu0 %672 }
 0x20a   : > { %v676_v24 = vsel %vm539_vm1, %v671_v15, %v673_v22  ;;  %v675_v26 = vpop.permute.xlu1 %674  ;;  %v3443_v15 = vrot.slane %v457_v5, %v721_v0  ;;  %v764_v0 = vld [vmem:[#allocation11] sm:$0xf] }
 0x20b   : > { %v681_v28 = vadd.f32 %v676_v24, %v657_v21  ;;  %v677_v29 = vsel %vm539_vm1, %v673_v22, %v675_v26  ;;  %v683_v32 = vadd.f32 %v675_v26, %v659_v31 }
 0x20c   : > { %v682_v30 = vadd.f32 %v677_v29, %v658_v23 }
 0x20d   : > { %687 = vrot.lane.b32.xlu0 %v681_v28, %s2957_s24 }
 0x20e   : > { %689 = vrot.lane.b32.xlu1 %v682_v30, %s2957_s24  ;;  %v509_v33 = vpop.permute.xlu1 %508 }
 0x211   : > { %691 = vrot.lane.b32.xlu0 %v683_v32, %s2957_s24 }
 0x212   : > { %v511_v34 = vpop.permute.xlu1 %510 }
 0x213   : > { %v515_v43 = vsel %vm514_vm0, %v509_v33, %v511_v34  ;;  %v2959_v33 = vmov 0.0  }
 0x214   : > { %2299 = vmatprep.subr.bf16.mxu1 %v2959_v33  ;;  %2303 = vmatprep.mubr.msk.bf16.mxu1 %vm2960_vm12, %v2959_v33 }
 0x216   : > { %v534_v36 = vpop.permute.xlu1 %533 }
 0x21a   : > { %v465_v35 = vpop.permute.xlu0 %464  ;;  %v538_v38 = vpop.permute.xlu1 %537 }
 0x21b   : > { %v495_v41 = vmul.f32 %v3356_v18, %v465_v35  ;;  %v497_v42 = vmul.f32 %v3364_v25, %v465_v35  ;;  %v496_v45 = vmul.f32 %v3359_v19, %v465_v35 }
 0x21d   : > { %v520_v46 = vadd.f32 %v515_v43, %v495_v41 }
 0x21e   : > { %v706_v37 = vpop.permute.xlu0 %705 }
 0x222   : > { %v513_v39 = vpop.permute.xlu0 %512 }
 0x223   : > { %v516_v47 = vsel %vm514_vm0, %v511_v34, %v513_v39  ;;  %v522_v49 = vadd.f32 %v513_v39, %v497_v42 }
 0x224   : > { %v521_v52 = vadd.f32 %v516_v47, %v496_v45  ;;  %v1136_v47 = vld [vmem:[#allocation12] sm:$0xff] }
 0x225   : > { %v547_v54 = vadd.f32 %v538_v38, %v522_v49 }
 0x226   : > { %v536_v44 = vpop.permute.xlu0 %535 }
 0x227   : > { %v540_v50 = vsel %vm539_vm1, %v534_v36, %v536_v44  ;;  %v541_v25 = vsel %vm539_vm1, %v536_v44, %v538_v38 }
 0x228   : > { %v545_v18 = vadd.f32 %v540_v50, %v520_v46  ;;  %v546_v58 = vadd.f32 %v541_v25, %v521_v52 }
 0x273   : > { %v615_v40 = vpop.permute.xlu1 %614 }
 0x274   : > { %v613_v51 = vpop.permute.xlu0 %612  ;;  %v624_v60 = vadd.f32 %v615_v40, %v547_v54 }
 0x275   : > { %v618_v19 = vsel %vm616_vm2, %v613_v51, %v615_v40 }
 0x276   : > { %v623_v62 = vadd.f32 %v618_v19, %v546_v58  ;;  %v807_v58 = vld [vmem:[#allocation11 + $0x4] sm:$0xf] }
 0x277   : > { %v611_v48 = vpop.permute.xlu1 %610 }
 0x278   : > { %v617_v53 = vsel %vm616_vm2, %v611_v48, %v613_v51 }
 0x279   : > { %v622_v56 = vadd.f32 %v617_v53, %v545_v18 }
 0x27f   : > { %v688_v55 = vpop.permute.xlu0 %687 }
 0x280   : > { %v690_v57 = vpop.permute.xlu1 %689 }
 0x281   : > { %v694_v59 = vsel %vm693_vm3, %v688_v55, %v690_v57 }
 0x282   : > { %v699_v61 = vadd.f32 %v694_v59, %v622_v56 }
 0x283   : > { %v692_v63 = vpop.permute.xlu0 %691 }
 0x284   : > { %v708_v2 = vadd.f32 %v706_v37, %v699_v61  ;;  %v695_v3 = vsel %vm693_vm3, %v690_v57, %v692_v63  ;;  %v701_v4 = vadd.f32 %v692_v63, %v624_v60 }
 0x285   : > { %v700_v6 = vadd.f32 %v695_v3, %v623_v62 }
 0x286   : > { %v710_v7 = vadd.f32 %v706_v37, %v701_v4  ;;  %v711_v9 = vmax.f32 %v708_v2, 0.0 }
 0x287   : > { %v709_v11 = vadd.f32 %v706_v37, %v700_v6 }
 0x288   : > { %v713_v16 = vmax.f32 %v710_v7, 0.0  ;;  %v730_v21 = vmul.f32 %v3441_v12, %v711_v9 }
 0x289   : > { %v712_v17 = vmax.f32 %v709_v11, 0.0 }
 0x28a   : > { %v732_v20 = vmul.f32 %v3438_v8, %v713_v16  ;;  %v1019_v16 = vld [vmem:[#allocation11 + $0x8] sm:$0xf] }
 0x28b   : > { %v731_v22 = vmul.f32 %v3443_v15, %v712_v17  ;;  %v3527_v17 = vld [vmem:[#allocation14] sm:$0xff]  }
 0x28c   : > { %v2247_v23 = vpack.c.bf16 %v732_v20, %v732_v20  ;;  %v3529_v20 = vld [vmem:[#allocation15] sm:$0xff]  }
 0x28d   : > { %v2246_v24 = vpack.c.bf16 %v731_v22, %v730_v21 }
 0x28e   : > { %750 = vrot.lane.b32.xlu0 %v2247_v23, %s2958_s21 }
 0x28f   : > { %748 = vrot.lane.b32.xlu1 %v2246_v24, %s2958_s21 }
 0x300   : > { %v751_v26 = vpop.permute.xlu0 %750 }
 0x301   : > { %v749_v10 = vpop.permute.xlu1 %748 }
 0x302   : > { %v752_v14 = vrot.slane %v749_v10, 4 }
 0x304   : > { %v754_v27 = vsel %vm753_vm8, %v752_v14, %v749_v10  ;;  %v755_v28 = vsel %vm753_vm8, %v752_v14, %v751_v26 }
 0x305   : > { %761 = vst.msk [vmem:[#allocation2] sm:$0xff] %vm3450_vm9, %v754_v27 }
 0x306   : > { %763 = vst.msk [vmem:[#allocation2 + $0x8] sm:$0xf] %vm762_vm10, %v755_v28 }
 0x30c   : > { %v765_v30 = vld [vmem:[#allocation2] sm:$0xff] }
 0x30d   : > { %v2594_v29 = vld [vmem:[#allocation2 + $0x8] ss:$0 sps:$4 sm:$0xff]   ;;  %v2202_v31 = vcombine.high %v765_v30, %v765_v30  ;;  %v2201_v32 = vcombine.low %v765_v30, %v765_v30 }
 0x30e   : > { %779 = vrot.lane.b32.xlu0 %v2594_v29, %s2954_s16 }
 0x30f   : > { %777 = vrot.lane.b32.xlu1 %v2202_v31, %s2954_s16 }
 0x312   : > { %784 = vrot.lane.b32.xlu0 %v2201_v32, %s2955_s19 }
 0x313   : > { %775 = vrot.lane.b32.xlu1 %v2201_v32, %s2954_s16  ;;  %s3632_s16 = scalar_lea.vmem [#allocation18], %s2198_s23  ;;  %s1978_s23 = scalar_lea.sflag [#allocation5], %s3314_s3 }
 0x316   : > { %788 = vrot.lane.b32.xlu0 %v2594_v29, %s2955_s19 }
 0x317   : > { %786 = vrot.lane.b32.xlu1 %v2202_v31, %s2955_s19  ;;  %s2967_s19 = smov 11  }
 0x380   : > { %v780_v34 = vpop.permute.xlu0 %779 }
 0x381   : > { %v778_v35 = vpop.permute.xlu1 %777  ;;  %v804_v36 = vsel %vm793_vm11, %v2594_v29, %v780_v34 }
 0x382   : > { %v783_v37 = vsel %vm514_vm0, %v778_v35, %v780_v34  ;;  %815 = vrot.lane.b32.xlu0 %v804_v36, %s2956_s14 }
 0x383   : > { %v800_v38 = vsel %vm793_vm11, %v2202_v31, %v783_v37 }
 0x384   : > { %813 = vrot.lane.b32.xlu1 %v800_v38, %s2956_s14  ;;  %v785_v39 = vpop.permute.xlu0 %784 }
 0x385   : > { %v776_v40 = vpop.permute.xlu1 %775 }
 0x386   : > { %v782_v41 = vsel %vm514_vm0, %v776_v40, %v778_v35  ;;  %vm1179_vm0 = vcmask 814080  }
 0x387   : > { %v796_v42 = vsel %vm793_vm11, %v2201_v32, %v782_v41  ;;  %1180 = vst.msk [vmem:[%s3632_s16] sm:$0xf] %vm1179_vm0, %v2952_v1 }
 0x388   : > { %811 = vrot.lane.b32.xlu1 %v796_v42, %s2956_s14  ;;  %v789_v43 = vpop.permute.xlu0 %788 }
 0x389   : > { %v787_v44 = vpop.permute.xlu1 %786  ;;  %v935_v62 = vsel %vm793_vm11, %v789_v43, 0 }
 0x38a   : > { %v791_v45 = vsel %vm539_vm1, %v785_v39, %v787_v44  ;;  %v792_v46 = vsel %vm539_vm1, %v787_v44, %v789_v43  ;;  %vm1289_vm1 = vcmask 150616  }
 0x38b   : > { %817 = vrot.lane.b32.xlu0 %v791_v45, %s2956_s14  ;;  %v929_v63 = vsel %vm793_vm11, %v791_v45, 0 }
 0x38c   : > { %819 = vrot.lane.b32.xlu1 %v792_v46, %s2956_s14 }
 0x38f   : > { %821 = vrot.lane.b32.xlu0 %v789_v43, %s2956_s14 }
 0x390   : > { %1022 = vrot.lane.b32.xlu1 %v800_v38, %s2957_s24 }
 0x393   : > { %1024 = vrot.lane.b32.xlu0 %v804_v36, %s2957_s24 }
 0x394   : > { %1020 = vrot.lane.b32.xlu1 %v796_v42, %s2957_s24 }
 0x397   : > { %1026 = vrot.lane.b32.xlu0 %v791_v45, %s2957_s24 }
 0x398   : > { %1028 = vrot.lane.b32.xlu1 %v792_v46, %s2957_s24 }
 0x39b   : > { %1030 = vrot.lane.b32.xlu0 %v789_v43, %s2957_s24 }
 0x39c   : > { %1139 = vperm.xlu1 %2593, %v1136_v47  }
 0x3f4   : > { %v816_v48 = vpop.permute.xlu0 %815 }
 0x3f5   : > { %2300 = vmatpush3.bf16.msra.mxu1 %v816_v48 }
 0x3f6   : > { %v814_v49 = vpop.permute.xlu1 %813  ;;  %2301 = vmatprep.subr.bf16.mxu1 %v2959_v33 }
 0x3f7   : > { %v825_v50 = vsel %vm616_vm2, %v814_v49, %v816_v48 }
 0x3f8   : > { %844 = vmatprep.subr.bf16.mxu0 %v825_v50 }
 0x3fa   : > { %v812_v51 = vpop.permute.xlu1 %811 }
 0x3fb   : > { %v824_v52 = vsel %vm616_vm2, %v812_v51, %v814_v49 }
 0x3fc   : > { %845 = vmatpush1.bf16.msra.mxu0 %v824_v52 }
 0x3fd   : > { %v818_v53 = vpop.permute.xlu0 %817 }
 0x3fe   : > { %v820_v18 = vpop.permute.xlu1 %819 }
 0x3ff   : > { %v826_v25 = vsel %vm616_vm2, %v818_v53, %v820_v18 }
 0x400   : > { %v836_v57 = vsel %vm793_vm11, %v826_v25, 0 }
 0x401   : > { %v822_v54 = vpop.permute.xlu0 %821 }
 0x402   : > { %v827_v55 = vsel %vm616_vm2, %v820_v18, %v822_v54  ;;  %v1023_v19 = vpop.permute.xlu1 %1022  ;;  %v842_v56 = vsel %vm793_vm11, %v822_v54, 0 }
 0x403   : > { %2204 = vmatprep.subr.msk.bf16.mxu0 %vm793_vm11, %v827_v55  ;;  %2302 = vmatpush3.bf16.msra.mxu1 %v842_v56 }
 0x404   : > { %847 = vmatpush1.bf16.msra.mxu0 %v836_v57  ;;  %2307 = vmatprep.subr.bf16.mxu1 %v2959_v33 }
 0x405   : > { %v1025_v59 = vpop.permute.xlu0 %1024  ;;  %937 = vmatprep.subr.bf16.mxu0 %v800_v38 }
 0x406   : > { %2304 = vmatmul.mubr.msk.bf16.vlgmr.msra.gmra.mrb[0].mxu1 %vm831_vm13, %v807_v58  ;;  %v1021_v60 = vpop.permute.xlu1 %1020  ;;  %v1034_v2 = vsel %vm693_vm3, %v1023_v19, %v1025_v59 }
 0x407   : > { %2205 = vmatmul.mubr.msk.bf16.vlgmr.msra.gmra.mrb[0].mxu0 %vm831_vm13, %v807_v58  ;;  %2308 = vmatpush3.bf16.msra.mxu1 %v804_v36  ;;  %v1033_v5 = vsel %vm693_vm3, %v1021_v60, %v1023_v19 }
 0x408   : > { %938 = vmatpush1.bf16.msra.mxu0 %v796_v42  ;;  %2309 = vmatprep.subr.bf16.mxu1 %v2959_v33 }
 0x409   : > { %v1027_v61 = vpop.permute.xlu0 %1026  ;;  %2207 = vmatprep.subr.msk.bf16.mxu0 %vm793_vm11, %v792_v46  ;;  %969 = vmatprep.mubr.bf16.mxu0 %v2952_v1 }
 0x40a   : > { %2311 = vmatprep.mubr.msk.bf16.mxu1 %vm2960_vm12, %v2959_v33  ;;  %v1029_v3 = vpop.permute.xlu1 %1028 }
 0x40b   : > { %2310 = vmatpush3.bf16.msra.mxu1 %v935_v62  ;;  %v1035_v6 = vsel %vm693_vm3, %v1027_v61, %v1029_v3 }
 0x40c   : > { %940 = vmatpush1.bf16.msra.mxu0 %v929_v63  ;;  %2315 = vmatprep.subr.bf16.mxu1 %v2959_v33  ;;  %v1044_v11 = vsel %vm793_vm11, %v1035_v6, 0 }
 0x40d   : > { %v1031_v4 = vpop.permute.xlu0 %1030  ;;  %1052 = vmatprep.subr.bf16.mxu0 %v1034_v2 }
 0x40e   : > { %2312 = vmatmul.mubr.msk.bf16.vlgmr.msra.gmra.mrb[4].mxu1 %vm831_vm13, %v764_v0  ;;  %v1036_v7 = vsel %vm693_vm3, %v1029_v3, %v1031_v4  ;;  %v1050_v9 = vsel %vm793_vm11, %v1031_v4, 0 }
 0x40f   : > { %2208 = vmatmul.mubr.msk.bf16.vlgmr.msra.gmra.mrb[4].mxu0 %vm831_vm13, %v764_v0  ;;  %2316 = vmatpush3.bf16.msra.mxu1 %v1025_v59 }
 0x410   : > { %1053 = vmatpush1.bf16.msra.mxu0 %v1033_v5  ;;  %2317 = vmatprep.subr.bf16.mxu1 %v2959_v33 }
 0x411   : > { %2210 = vmatprep.subr.msk.bf16.mxu0 %vm793_vm11, %v1036_v7  ;;  %1084 = vmatprep.mubr.bf16.mxu0 %v2952_v1 }
 0x412   : > { %2319 = vmatprep.mubr.msk.bf16.mxu1 %vm2960_vm12, %v2959_v33 }
 0x413   : > { %2318 = vmatpush3.bf16.msra.mxu1 %v1050_v9 }
 0x414   : > { %1055 = vmatpush1.bf16.msra.mxu0 %v1044_v11  ;;  %2329 = vmatprep.subr.bf16.mxu1 %v2959_v33 }
 0x415   : > { %2323 = vmatprep.subr.bf16.mxu0 %v2959_v33 }
 0x416   : > { %2320 = vmatmul.mubr.msk.bf16.vlgmr.msra.gmra.mrb[8].mxu1 %vm831_vm13, %v1019_v16 }
 0x417   : > { %2211 = vmatmul.mubr.msk.bf16.vlgmr.msra.gmra.mrb[8].mxu0 %vm831_vm13, %v1019_v16  ;;  %2331 = vmatprep.mubr.msk.bf16.mxu1 %vm2960_vm12, %v2959_v33 }
 0x418   : > { %2325 = vmatprep.mubr.msk.bf16.mxu0 %vm2960_vm12, %v2959_v33  ;;  %2324 = vmatpush3.bf16.msra.mxu0 %v3527_v17 }
 0x419   : > { %2330 = vmatpush3.bf16.msra.mxu1 %v3529_v20  ;;  %2335 = vmatprep.subr.bf16.mxu0 %v2959_v33 }
 0x41a   : > { %2341 = vmatprep.subr.bf16.mxu1 %v2959_v33 }
 0x41b   : > { %v1140_v41 = vpop.permute.xlu1 %1139 }
 0x4d9   : > { %v919_v21 = vpop.f32.mrb[0].mxu1 }
 0x4da   : > { %v878_v22 = vpop.f32.mrb[0].mxu0  ;;  %v2305_v23 = vpop.f32.mrb[1].mxu1 }
 0x4db   : > { %v880_v24 = vpop.f32.mrb[1].mxu0  ;;  %v922_v10 = vpop.f32.mrb[2].mxu1 }
 0x4dc   : > { %v882_v14 = vpop.f32.mrb[2].mxu0  ;;  %v2306_v26 = vpop.f32.mrb[3].mxu1 }
 0x4dd   : > { %v883_v27 = vpop.f32.mrb[3].mxu0 }
 0x4e1   : > { %v1012_v28 = vpop.f32.mrb[4].mxu1 }
 0x4e2   : > { %v971_v29 = vpop.f32.mrb[4].mxu0  ;;  %v1013_v30 = vadd.f32 %v1012_v28, %v919_v21  ;;  %v2313_v31 = vpop.f32.mrb[5].mxu1 }
 0x4e3   : > { %v972_v32 = vadd.f32 %v971_v29, %v878_v22  ;;  %v973_v34 = vpop.f32.mrb[5].mxu0  ;;  %v1015_v35 = vpop.f32.mrb[6].mxu1 }
 0x4e4   : > { %v974_v36 = vadd.f32 %v973_v34, %v880_v24  ;;  %v975_v37 = vpop.f32.mrb[6].mxu0  ;;  %v2314_v38 = vpop.f32.mrb[7].mxu1 }
 0x4e5   : > { %v976_v39 = vpop.f32.mrb[7].mxu0 }
 0x4e9   : > { %v1127_v40 = vpop.f32.mrb[8].mxu1 }
 0x4ea   : > { %v1086_v42 = vpop.f32.mrb[8].mxu0  ;;  %v1135_v43 = vadd.f32 %v1127_v40, %v1013_v30  ;;  %v2321_v44 = vpop.f32.mrb[9].mxu1 }
 0x4eb   : > { %v1133_v45 = vadd.f32 %v1086_v42, %v972_v32  ;;  %v1088_v46 = vpop.f32.mrb[9].mxu0  ;;  %v1130_v47 = vpop.f32.mrb[10].mxu1 }
 0x4ec   : > { %v1134_v48 = vadd.f32 %v1088_v46, %v974_v36  ;;  %v1090_v49 = vpop.f32.mrb[10].mxu0  ;;  %v1144_v50 = vadd.f32 %v1140_v41, %v1135_v43  ;;  %v2322_v51 = vpop.f32.mrb[11].mxu1 }
 0x4ed   : > { %v1142_v52 = vadd.f32 %v1140_v41, %v1133_v45  ;;  %v1091_v53 = vpop.f32.mrb[11].mxu0 }
 0x4ee   : > { %v1143_v18 = vadd.f32 %v1140_v41, %v1134_v48  ;;  %v1147_v54 = vmax.f32 %v1144_v50, 0.0 }
 0x4ef   : > { %v1145_v25 = vmax.f32 %v1142_v52, 0.0 }
 0x4f0   : > { %v1146_v55 = vmax.f32 %v1143_v18, 0.0  ;;  %v1150_v58 = vmul.f32 %v1147_v54, %v3438_v8 }
 0x4f1   : > { %v1148_v19 = vmul.f32 %v1145_v25, %v3441_v12 }
 0x4f2   : > { %v1149_v56 = vmul.f32 %v1146_v55, %v3443_v15  ;;  %v1153_v61 = vpack.c.bf16 %v1150_v58, %v1150_v58 }
 0x4f3   : > { %v1151_v57 = vpack.c.bf16 %v1148_v19, %v1148_v19 }
 0x4f4   : > { %v1152_v59 = vpack.c.bf16 %v1149_v56, %v1149_v56  ;;  %v2248_v60 = vpack.c.bf16 %v1149_v56, %v1148_v19 }
 0x4f5   : > { %1181 = vrot.lane.b32.xlu0 %v1151_v57, %s2956_s14 }
 0x4f6   : > { %1482 = vrot.lane.b32.xlu1 %v1152_v59, %s2956_s14 }
 0x4f9   : > { %1871 = vrot.lane.b32.xlu0 %v1153_v61, %s2956_s14  ;;  %s2968_s14 = smov 21  }
 0x567   : > { %v1182_v62 = vpop.permute.xlu0 %1181 }
 0x568   : > { %v1184_v63 = vmax.bf16 %v1182_v62, %v1151_v57  ;;  %v1483_v0 = vpop.permute.xlu1 %1482 }
 0x569   : > { %v1484_v12 = vsel %vm616_vm2, %v1182_v62, %v1483_v0  ;;  %v1584_v15 = vmax.bf16 %v1483_v0, %v1152_v59 }
 0x56a   : > { %1387 = vrot.lane.b32.xlu0 %v1184_v63, %s2961_s28  ;;  %1292 = vrot.lane.b32.xlu1 %v1184_v63, %s2957_s24  ;;  %v1486_v8 = vmax.bf16 %v1484_v12, %v1151_v57  ;;  %s2969_s24 = smov 31   ;;  %s2972_s28 = smov 61  }
 0x56b   : > { %2326 = vmatmul.mubr.msk.bf16.vlgmr.msra.gmra.mrb[12].mxu0 %vm1191_vm14, %v1184_v63  ;;  %2332 = vmatmul.mubr.msk.bf16.vlgmr.msra.gmra.mrb[12].mxu1 %vm1191_vm14, %v1184_v63  ;;  %v1872_v2 = vpop.permute.xlu0 %1871 }
 0x56c   : > { %2336 = vmatpush3.bf16.msra.mxu0 %v3527_v17  ;;  %2342 = vmatpush3.bf16.msra.mxu1 %v3529_v20  ;;  %v1874_v3 = vmax.bf16 %v1872_v2, %v1152_v59  ;;  %v1875_v4 = vmax.bf16 %v1872_v2, %v1153_v61 }
 0x56d   : > { %2337 = vmatprep.mubr.msk.bf16.mxu0 %vm2960_vm12, %v2959_v33  ;;  %2343 = vmatprep.mubr.msk.bf16.mxu1 %vm2960_vm12, %v2959_v33 }
 0x56e   : > { %1586 = vrot.lane.b32.xlu0 %v1584_v15, %s2962_s22  ;;  %1488 = vrot.lane.b32.xlu1 %v1486_v8, %s2963_s1  ;;  %s2423_s22 = smul.u32 192, %s3048_s15  ;;  %s1997_s1 = sshll.u32 %s3548_s18, 4  ;;  %s3644_s1 = int_to_ptr.vmem [resolvable:$true] %s1997_s1 }
 0x56f   : > { %2347 = vmatprep.subr.bf16.mxu0 %v2959_v33  ;;  %2353 = vmatprep.subr.bf16.mxu1 %v2959_v33 }
 0x572   : > { %1776 = vrot.lane.b32.xlu0 %v1584_v15, %s2964_s2  ;;  %1681 = vrot.lane.b32.xlu1 %v1584_v15, %s2965_s13 }
 0x576   : > { %1880 = vrot.lane.b32.xlu0 %v1875_v4, %s2966_s26  ;;  %1878 = vrot.lane.b32.xlu1 %v1874_v3, %s2966_s26  ;;  %s3642_s26 = scalar_lea.hbm %s3732_s8, %s2423_s22 }
 0x57a   : > { %1166 = vrot.lane.b32.xlu0 %v1153_v61, %s2958_s21  ;;  %1164 = vrot.lane.b32.xlu1 %v2248_v60, %s2958_s21  ;;  %s2970_s21 = smov 41  }
 0x5dc   : > { %v1293_v5 = vpop.permute.xlu1 %1292  ;;  %v1388_v6 = vpop.permute.xlu0 %1387 }
 0x5dd   : > { %2338 = vmatmul.mubr.msk.bf16.vlgmr.msra.gmra.mrb[16].mxu0 %vm1191_vm14, %v1293_v5  ;;  %2344 = vmatmul.mubr.msk.bf16.vlgmr.msra.gmra.mrb[16].mxu1 %vm1191_vm14, %v1293_v5 }
 0x5de   : > { %2348 = vmatpush3.bf16.msra.mxu0 %v3527_v17  ;;  %2354 = vmatpush3.bf16.msra.mxu1 %v3529_v20 }
 0x5df   : > { %2349 = vmatprep.mubr.msk.bf16.mxu0 %vm2960_vm12, %v2959_v33  ;;  %2355 = vmatprep.mubr.msk.bf16.mxu1 %vm2960_vm12, %v2959_v33 }
 0x5e0   : > { %v1489_v7 = vpop.permute.xlu1 %1488  ;;  %v1587_v9 = vpop.permute.xlu0 %1586  ;;  %2359 = vmatprep.subr.bf16.mxu0 %v2959_v33  ;;  %2365 = vmatprep.subr.bf16.mxu1 %v2959_v33 }
 0x5e4   : > { %v1682_v11 = vpop.permute.xlu1 %1681  ;;  %v1777_v16 = vpop.permute.xlu0 %1776 }
 0x5e5   : > { %2350 = vmatmul.mubr.msk.bf16.vlgmr.msra.gmra.mrb[20].mxu0 %vm1191_vm14, %v1388_v6  ;;  %2356 = vmatmul.mubr.msk.bf16.vlgmr.msra.gmra.mrb[20].mxu1 %vm1191_vm14, %v1388_v6 }
 0x5e6   : > { %2360 = vmatpush3.bf16.msra.mxu0 %v3527_v17  ;;  %2366 = vmatpush3.bf16.msra.mxu1 %v3529_v20 }
 0x5e7   : > { %2361 = vmatprep.mubr.msk.bf16.mxu0 %vm2960_vm12, %v2959_v33  ;;  %2367 = vmatprep.mubr.msk.bf16.mxu1 %vm2960_vm12, %v2959_v33 }
 0x5e8   : > { %v1879_v21 = vpop.permute.xlu1 %1878  ;;  %v1881_v22 = vpop.permute.xlu0 %1880  ;;  %2371 = vmatprep.subr.bf16.mxu0 %v2959_v33  ;;  %2377 = vmatprep.subr.bf16.mxu1 %v2959_v33 }
 0x5e9   : > { %v1883_v13 = vsel %vm1882_vm15, %v1879_v21, %v1881_v22 }
 0x5ec   : > { %v1165_v23 = vpop.permute.xlu1 %1164  ;;  %v1167_v10 = vpop.permute.xlu0 %1166 }
 0x5ed   : > { %v1168_v24 = vrot.slane %v1165_v23, 4  ;;  %2362 = vmatmul.mubr.msk.bf16.vlgmr.msra.gmra.mrb[24].mxu0 %vm1191_vm14, %v1489_v7  ;;  %2368 = vmatmul.mubr.msk.bf16.vlgmr.msra.gmra.mrb[24].mxu1 %vm1191_vm14, %v1489_v7 }
 0x5ee   : > { %2372 = vmatpush3.bf16.msra.mxu0 %v3527_v17  ;;  %2378 = vmatpush3.bf16.msra.mxu1 %v3529_v20 }
 0x5ef   : > { %v1169_v14 = vsel %vm753_vm8, %v1168_v24, %v1165_v23  ;;  %v1170_v26 = vsel %vm753_vm8, %v1168_v24, %v1167_v10  ;;  %2373 = vmatprep.mubr.msk.bf16.mxu0 %vm2960_vm12, %v2959_v33  ;;  %2379 = vmatprep.mubr.msk.bf16.mxu1 %vm2960_vm12, %v2959_v33 }
 0x5f0   : > { %1173 = vst.msk [vmem:[%s3548_s18] sm:$0xff] %vm3450_vm9, %v1169_v14  ;;  %2383 = vmatprep.subr.bf16.mxu0 %v2959_v33  ;;  %2389 = vmatprep.subr.bf16.mxu1 %v2959_v33 }
 0x5f1   : > { %1174 = vst.msk [vmem:[%s3548_s18 + $0x8] sm:$0xf] %vm762_vm10, %v1170_v26  ;;  %s2973_s18 = smov [#allocation17]  }
 0x5f5   : > { %2374 = vmatmul.mubr.msk.bf16.vlgmr.msra.gmra.mrb[28].mxu0 %vm1191_vm14, %v1587_v9  ;;  %2380 = vmatmul.mubr.msk.bf16.vlgmr.msra.gmra.mrb[28].mxu1 %vm1191_vm14, %v1587_v9 }
 0x5f6   : > { %2384 = vmatpush3.bf16.msra.mxu0 %v3527_v17  ;;  %2390 = vmatpush3.bf16.msra.mxu1 %v3529_v20 }
 0x5f7   : > { %2385 = vmatprep.mubr.msk.bf16.mxu0 %vm2960_vm12, %v2959_v33  ;;  %2391 = vmatprep.mubr.msk.bf16.mxu1 %vm2960_vm12, %v2959_v33 }
 0x5f8   : > { %2395 = vmatprep.subr.bf16.mxu0 %v2959_v33  ;;  %2401 = vmatprep.subr.bf16.mxu1 %v2959_v33 }
 0x5fd   : > { %2386 = vmatmul.mubr.msk.bf16.vlgmr.msra.gmra.mrb[32].mxu0 %vm1191_vm14, %v1682_v11  ;;  %2392 = vmatmul.mubr.msk.bf16.vlgmr.msra.gmra.mrb[32].mxu1 %vm1191_vm14, %v1682_v11 }
 0x5fe   : > { %2396 = vmatpush3.bf16.msra.mxu0 %v3527_v17  ;;  %2402 = vmatpush3.bf16.msra.mxu1 %v3529_v20 }
 0x5ff   : > { %2397 = vmatprep.mubr.msk.bf16.mxu0 %vm2960_vm12, %v2959_v33  ;;  %2403 = vmatprep.mubr.msk.bf16.mxu1 %vm2960_vm12, %v2959_v33 }
 0x600   : > { %2407 = vmatprep.subr.bf16.mxu0 %v2959_v33  ;;  %2413 = vmatprep.subr.bf16.mxu1 %v2959_v33 }
 0x605   : > { %2398 = vmatmul.mubr.msk.bf16.vlgmr.msra.gmra.mrb[36].mxu0 %vm1191_vm14, %v1777_v16  ;;  %2404 = vmatmul.mubr.msk.bf16.vlgmr.msra.gmra.mrb[36].mxu1 %vm1191_vm14, %v1777_v16 }
 0x606   : > { %2408 = vmatpush3.bf16.msra.mxu0 %v3527_v17  ;;  %2414 = vmatpush3.bf16.msra.mxu1 %v3529_v20 }
 0x607   : > { %2409 = vmatprep.mubr.msk.bf16.mxu0 %vm2960_vm12, %v2959_v33  ;;  %2415 = vmatprep.mubr.msk.bf16.mxu1 %vm2960_vm12, %v2959_v33 }
 0x60d   : > { %2410 = vmatmul.mubr.msk.bf16.vlgmr.msra.gmra.mrb[40].mxu0 %vm1191_vm14, %v1883_v13  ;;  %2416 = vmatmul.mubr.msk.bf16.vlgmr.msra.gmra.mrb[40].mxu1 %vm1191_vm14, %v1883_v13 }
 0x63e   : > { %v1229_v17 = vpop.f32.mrb[12].mxu0  ;;  %v1275_v20 = vpop.f32.mrb[12].mxu1 }
 0x63f   : > { %v1281_v27 = vmax.f32 %v1229_v17, %v1275_v20  ;;  %v2327_v28 = vpop.f32.mrb[13].mxu0  ;;  %v2333_v29 = vpop.f32.mrb[13].mxu1 }
 0x640   : > { %v1232_v30 = vpop.f32.mrb[14].mxu0  ;;  %v1278_v33 = vpop.f32.mrb[14].mxu1 }
 0x641   : > { %v2250_v31 = vpack.c.bf16 %v1281_v27, %v1281_v27  ;;  %v2328_v32 = vpop.f32.mrb[15].mxu0  ;;  %v2334_v34 = vpop.f32.mrb[15].mxu1 }
 0x643   : > { %1286 = vrot.lane.b32.xlu1 %v2250_v31, %s2967_s19  ;;  %s2825_s19 = scalar_lea.vmem %s3644_s1, 192 }
 0x644   : > { %p2826_p4 = scmp.ne.s32.totalorder %s3644_s1, %s2825_s19 }
 0x646   : > { %p2827_p13 = pnand %p2826_p4, %p3762_p1 }
 0x648   : > { %p2828_p0 = pneg %p2827_p13 }
 0x6b0   : > { %v1331_v35 = vpop.f32.mrb[16].mxu0  ;;  %v1371_v36 = vpop.f32.mrb[16].mxu1 }
 0x6b1   : > { %v1377_v37 = vmax.f32 %v1331_v35, %v1371_v36  ;;  %v2339_v38 = vpop.f32.mrb[17].mxu0  ;;  %v2345_v39 = vpop.f32.mrb[17].mxu1 }
 0x6b2   : > { %v1334_v40 = vpop.f32.mrb[18].mxu0  ;;  %v1374_v1 = vpop.f32.mrb[18].mxu1 }
 0x6b3   : > { %v2251_v41 = vpack.c.bf16 %v1377_v37, %v1377_v37  ;;  %v2340_v42 = vpop.f32.mrb[19].mxu0  ;;  %v2346_v43 = vpop.f32.mrb[19].mxu1 }
 0x6b5   : > { %v1287_v44 = vpop.permute.xlu1 %1286  ;;  %1382 = vrot.lane.b32.xlu0 %v2251_v41, %s2968_s14  ;;  %s2829_s14 = sshll.u32 %s2973_s18, 4  ;;  %s2830_s14 = int_to_ptr.vmem [resolvable:$false] %s2829_s14 }
 0x6b6   : > { %1290 = vst.msk [vmem:[%s3632_s16] sm:$0xf] %vm1289_vm1, %v1287_v44  ;;  %p2832_p2 = scmp.lt.s32.totalorder %s3644_s1, %s2830_s14 }
 0x6b8   : > { %v1426_v45 = vpop.f32.mrb[20].mxu0  ;;  %v1466_v46 = vpop.f32.mrb[20].mxu1 }
 0x6b9   : > { %v1472_v47 = vmax.f32 %v1426_v45, %v1466_v46  ;;  %v2351_v48 = vpop.f32.mrb[21].mxu0  ;;  %v2357_v49 = vpop.f32.mrb[21].mxu1 }
 0x6ba   : > { %v1429_v50 = vpop.f32.mrb[22].mxu0  ;;  %v1469_v51 = vpop.f32.mrb[22].mxu1 }
 0x6bb   : > { %v2252_v52 = vpack.c.bf16 %v1472_v47, %v1472_v47  ;;  %v2352_v53 = vpop.f32.mrb[23].mxu0  ;;  %v2358_v18 = vpop.f32.mrb[23].mxu1 }
 0x6bd   : > { %1477 = vrot.lane.b32.xlu1 %v2252_v52, %s2969_s24  ;;  %s2831_s24 = scalar_lea.vmem %s2830_s14, 384 }
 0x6be   : > { %p2833_p3 = scmp.lt.s32.totalorder %s2831_s24, %s2825_s19 }
 0x6c0   : > { %v1527_v25 = vpop.f32.mrb[24].mxu0  ;;  %v1567_v54 = vpop.f32.mrb[24].mxu1  ;;  %p2834_p6 = por %p2833_p3, %p2832_p2 }
 0x6c1   : > { %v1573_v55 = vmax.f32 %v1527_v25, %v1567_v54  ;;  %v2363_v19 = vpop.f32.mrb[25].mxu0  ;;  %v2369_v56 = vpop.f32.mrb[25].mxu1 }
 0x6c2   : > { %v1530_v57 = vpop.f32.mrb[26].mxu0  ;;  %v1570_v58 = vpop.f32.mrb[26].mxu1  ;;  %p2835_p11 = pnand %p2834_p6, %p2828_p0 }
 0x6c3   : > { %v2253_v59 = vpack.c.bf16 %v1573_v55, %v1573_v55  ;;  %v2364_v60 = vpop.f32.mrb[27].mxu0  ;;  %v2370_v61 = vpop.f32.mrb[27].mxu1 }
 0x6c5   : > { %1578 = vrot.lane.b32.xlu0 %v2253_v59, %s2970_s21 }
 0x6c8   : > { %v1625_v62 = vpop.f32.mrb[28].mxu0  ;;  %v1665_v63 = vpop.f32.mrb[28].mxu1 }
 0x6c9   : > { %v1671_v0 = vmax.f32 %v1625_v62, %v1665_v63  ;;  %v2375_v12 = vpop.f32.mrb[29].mxu0  ;;  %v2381_v8 = vpop.f32.mrb[29].mxu1 }
 0x6ca   : > { %v1628_v15 = vpop.f32.mrb[30].mxu0  ;;  %v1668_v2 = vpop.f32.mrb[30].mxu1 }
 0x6cb   : > { %v2254_v3 = vpack.c.bf16 %v1671_v0, %v1671_v0  ;;  %v2376_v4 = vpop.f32.mrb[31].mxu0  ;;  %v2382_v5 = vpop.f32.mrb[31].mxu1 }
 0x6cd   : > { %1676 = vrot.lane.b32.xlu0 %v2254_v3, %s2971_s25 }
 0x6d0   : > { %v1720_v6 = vpop.f32.mrb[32].mxu0  ;;  %v1760_v7 = vpop.f32.mrb[32].mxu1 }
 0x6d1   : > { %v1766_v9 = vmax.f32 %v1720_v6, %v1760_v7  ;;  %v2387_v11 = vpop.f32.mrb[33].mxu0  ;;  %v2393_v16 = vpop.f32.mrb[33].mxu1 }
 0x6d2   : > { %v1723_v21 = vpop.f32.mrb[34].mxu0  ;;  %v1763_v22 = vpop.f32.mrb[34].mxu1 }
 0x6d3   : > { %v2255_v23 = vpack.c.bf16 %v1766_v9, %v1766_v9  ;;  %v2388_v24 = vpop.f32.mrb[35].mxu0  ;;  %v2394_v10 = vpop.f32.mrb[35].mxu1 }
 0x6d5   : > { %1771 = vrot.lane.b32.xlu1 %v2255_v23, %s2972_s28 }
 0x6d8   : > { %v1815_v14 = vpop.f32.mrb[36].mxu0  ;;  %v1855_v26 = vpop.f32.mrb[36].mxu1 }
 0x6d9   : > { %v1861_v13 = vmax.f32 %v1815_v14, %v1855_v26  ;;  %v2399_v17 = vpop.f32.mrb[37].mxu0  ;;  %v2405_v20 = vpop.f32.mrb[37].mxu1 }
 0x6da   : > { %v1818_v27 = vpop.f32.mrb[38].mxu0  ;;  %v1858_v28 = vpop.f32.mrb[38].mxu1 }
 0x6db   : > { %2838 = shalt.err (!%p2835_p11)
}
 0x6dc   : > { %s2839_s21 = scalar_lea.hbm %s3642_s26, 192  ;;  %s2843_s22 = scalar_lea.hbm %s3732_s8, 384 }
 0x6dd   : > { %p2840_p12 = scmp.ne.s32.totalorder %s3642_s26, %s2839_s21  ;;  %p2844_p9 = scmp.lt.u32.totalorder %s3642_s26, %s3732_s8 }
 0x6de   : > { %p2845_p7 = scmp.lt.u32.totalorder %s2843_s22, %s2839_s21  ;;  %p2847_p4 = scmp.lt.u32.totalorder %s2839_s21, %s3642_s26 }
 0x6df   : > { %p2841_p8 = pnand %p2840_p12, %p3762_p1 }
 0x6e0   : > { %p2846_p10 = por %p2845_p7, %p2844_p9 }
 0x6e1   : > { %p2842_p5 = pneg %p2841_p8 }
 0x6e2   : > { %p2848_p13 = por %p2847_p4, %p2846_p10 }
 0x6e4   : > { %p2849_p0 = pnand %p2848_p13, %p2842_p5 }
 0x6e6   : > { %2852 = shalt.err (!%p2849_p0)
}
 0x6e7   : > { %2454 = dma.vmem_to_hbm [thread:$0]  (%p3762_p1), %s3644_s1, 192, %s3642_s26, %s1978_s23   ;;  %v2256_v29 = vpack.c.bf16 %v1861_v13, %v1861_v13  ;;  %v2400_v30 = vpop.f32.mrb[39].mxu0  ;;  %v2406_v33 = vpop.f32.mrb[39].mxu1  ;;  %vm1385_vm2 = vcmask 232616   ;;  %vm1480_vm3 = vcmask 314616   ;;  %vm1581_vm4 = vcmask 396616  }
 0x6e8   : > { %s2974_s19 = smov 71   ;;  %v1921_v31 = vpop.f32.mrb[40].mxu0  ;;  %v1961_v32 = vpop.f32.mrb[40].mxu1  ;;  %s2975_s1 = smov 81   ;;  %vm1679_vm5 = vcmask 478616   ;;  %vm1774_vm6 = vcmask 560616  }
 0x6e9   : > { %1866 = vrot.lane.b32.xlu1 %v2256_v29, %s2974_s19  ;;  %v1967_v34 = vmax.f32 %v1921_v31, %v1961_v32  ;;  %v2411_v35 = vpop.f32.mrb[41].mxu0  ;;  %v2417_v36 = vpop.f32.mrb[41].mxu1  ;;  %vm1869_vm7 = vcmask 642616   ;;  %s2243_s26 = sshll.u32 %s3048_s15, 6  ;;  %s2010_s23 = sshll.u32 %s3632_s16, 4  ;;  %vm1975_vm8 = vcmask 724616   ;;  %s3681_s23 = int_to_ptr.vmem [resolvable:$true] %s2010_s23 }
 0x6ea   : > { %v1924_v37 = vpop.f32.mrb[42].mxu0  ;;  %v1964_v38 = vpop.f32.mrb[42].mxu1  ;;  %s3679_s24 = scalar_lea.hbm %s3733_s9, %s2243_s26  ;;  %s1983_s21 = scalar_lea.sflag [#allocation19], %s3314_s3 }
 0x6eb   : > { %v2257_v39 = vpack.c.bf16 %v1967_v34, %v1967_v34  ;;  %v2412_v40 = vpop.f32.mrb[43].mxu0  ;;  %v2418_v1 = vpop.f32.mrb[43].mxu1  ;;  %s2853_s25 = scalar_lea.vmem %s3681_s23, 64  ;;  %s2976_s15 = smov [#allocation18]  }
 0x6ec   : > { %p2854_p2 = scmp.ne.s32.totalorder %s3681_s23, %s2853_s25  ;;  %s2857_s28 = sshll.u32 %s2976_s15, 4  ;;  %s2858_s28 = int_to_ptr.vmem [resolvable:$false] %s2857_s28 }
 0x6ed   : > { %1972 = vrot.lane.b32.xlu0 %v2257_v39, %s2975_s1  ;;  %s2859_s22 = scalar_lea.vmem %s2858_s28, 128  ;;  %p2860_p11 = scmp.lt.s32.totalorder %s3681_s23, %s2858_s28 }
 0x6ee   : > { %p2855_p3 = pnand %p2854_p2, %p3762_p1  ;;  %p2861_p12 = scmp.lt.s32.totalorder %s2859_s22, %s2853_s25 }
 0x6f0   : > { %p2856_p6 = pneg %p2855_p3  ;;  %p2862_p8 = por %p2861_p12, %p2860_p11 }
 0x6f2   : > { %p2863_p5 = pnand %p2862_p8, %p2856_p6 }
 0x727   : > { %v1383_v41 = vpop.permute.xlu0 %1382 }
 0x728   : > { %1386 = vst.msk [vmem:[%s3632_s16] sm:$0xf] %vm1385_vm2, %v1383_v41 }
 0x72f   : > { %v1478_v42 = vpop.permute.xlu1 %1477 }
 0x730   : > { %1481 = vst.msk [vmem:[%s3632_s16] sm:$0xf] %vm1480_vm3, %v1478_v42 }
 0x737   : > { %v1579_v43 = vpop.permute.xlu0 %1578 }
 0x738   : > { %1582 = vst.msk [vmem:[%s3632_s16] sm:$0xf] %vm1581_vm4, %v1579_v43 }
 0x73f   : > { %v1677_v44 = vpop.permute.xlu0 %1676 }
 0x740   : > { %1680 = vst.msk [vmem:[%s3632_s16] sm:$0xf] %vm1679_vm5, %v1677_v44 }
 0x747   : > { %v1772_v45 = vpop.permute.xlu1 %1771 }
 0x748   : > { %1775 = vst.msk [vmem:[%s3632_s16] sm:$0xf] %vm1774_vm6, %v1772_v45 }
 0x75b   : > { %v1867_v46 = vpop.permute.xlu1 %1866 }
 0x75c   : > { %1870 = vst.msk [vmem:[%s3632_s16] sm:$0xf] %vm1869_vm7, %v1867_v46 }
 0x75f   : > { %v1973_v47 = vpop.permute.xlu0 %1972 }
 0x760   : > { %1976 = vst.msk [vmem:[%s3632_s16] sm:$0xf] %vm1975_vm8, %v1973_v47 }
 0x761   : > { %2866 = shalt.err (!%p2863_p5)
}
 0x762   : > { %s2867_s3 = scalar_lea.hbm %s3679_s24, 64  ;;  %s2871_s13 = scalar_lea.hbm %s3733_s9, 128 }
 0x763   : > { %p2868_p9 = scmp.ne.s32.totalorder %s3679_s24, %s2867_s3  ;;  %p2872_p4 = scmp.lt.u32.totalorder %s3679_s24, %s3733_s9 }
 0x764   : > { %p2873_p13 = scmp.lt.u32.totalorder %s2871_s13, %s2867_s3  ;;  %p2875_p2 = scmp.lt.u32.totalorder %s2867_s3, %s3679_s24 }
 0x765   : > { %p2869_p7 = pnand %p2868_p9, %p3762_p1 }
 0x766   : > { %p2874_p0 = por %p2873_p13, %p2872_p4 }
 0x767   : > { %p2870_p10 = pneg %p2869_p7 }
 0x768   : > { %p2876_p3 = por %p2875_p2, %p2874_p0 }
 0x76a   : > { %p2877_p6 = pnand %p2876_p3, %p2870_p10 }
 0x76c   : > { %2880 = shalt.err (!%p2877_p6)
}
 0x76d   : > { %2455 = dma.vmem_to_hbm [thread:$0]  (%p3762_p1), %s3681_s23, 64, %s3679_s24, %s1983_s21  }
 0x76e PF: > { %s2022_s26 = sand.u32 1, %s2927_s30   ;;  %p3763_p11 = scmp.ne.s32.totalorder %s3749_s27, 0 }
 0x76f   : > { %p3764_p12 = scmp.ge.s32.totalorder %s2939_s12, 2  ;;  %s2023_s18 = scalar_lea.sflag [#allocation5], %s2022_s26 }
 0x771   : > { %p2485_p8 = pnand %p3764_p12, %p3763_p11 }
 0x773   : > { %2918 = dma.done.wait (!%p2485_p8), %s2023_s18, 192  }
 0x774   : > { %2920 = vsyncadd (!%p2485_p8), %s2023_s18, 4294967104  ;;  %s2032_s14 = scalar_lea.sflag [#allocation19], %s2022_s26 }
 0x775   : > { %2922 = dma.done.wait (!%p2485_p8), %s2032_s14, 64  }
 0x776   : > { %2924 = vsyncadd (!%p2485_p8), %s2032_s14, 4294967232  ;;  %p30_p1 = scmp.ge.s32.totalorder %s3244_s29, 4   ;;  %s3765_s30 = smov %s2931_s10 }
 0x777   : > { %s3766_s10 = smov %s2935_s11  ;;  %s3767_s11 = smov %s3256_s17 }
 0x778   : > { %s3768_s12 = smov %s3244_s29  ;;  %32 = sbr.rel (!%p30_p1) target bundleno = 15 (0xf), region = 146 }
 0x77f   :  { %2037 = vsyncpa [#allocation4], 1 }
 0x780   :  { %2039 = vsyncpa [#allocation4 + $0x1], 1 }
 0x781   :  { %2040 = vsyncpa [#allocation7], 1 }
 0x782   :  { %2041 = vsyncpa [#allocation10], 1 }
 0x783   :  { %2042 = vsyncpa [#allocation13], 1 }
 0x784   :  { %2043 = vsyncpa [#allocation16], 1 }
 0x785   :  { %2044 = vsyncpa [#allocation5], 1 }
 0x786   :  { %2046 = vsyncpa [#allocation5 + $0x1], 1 }
 0x787   :  { %2047 = vsyncpa [#allocation19], 1 }
 0x788   :  { %2049 = vsyncpa [#allocation19 + $0x1], 1 }

// kernel: unet_forward.8
= control target key start
LH: loop header
LB: loop body
LE: loop exit
PB: predicated region body
PF: predicated region fallthrough
CT: control target
= control target key end

     0   :  { %s3385_s0 = inlined_call_operand.hbm [shape: bf16[2,32,36], index: 0, kind: input, shape index: {}]   ;;  %s3386_s1 = inlined_call_operand.hbm [shape: bf16[2,16,100], index: 1, kind: input, shape index: {}]   ;;  %s3387_s2 = inlined_call_operand.hbm [shape: f32[1,78], index: 2, kind: input, shape index: {}]   ;;  %s3388_s3 = inlined_call_operand.hbm [shape: f32[4,10], index: 3, kind: input, shape index: {}]   ;;  %s3389_s4 = inlined_call_operand.hbm [shape: bf16[3,16,144], index: 4, kind: input, shape index: {}]   ;;  %s3390_s5 = inlined_call_operand.hbm [shape: f32[16,1], index: 5, kind: input, shape index: {}]   ;;  %s3391_s6 = inlined_call_operand.hbm [shape: bf16[3,16,48], index: 6, kind: input, shape index: {}]   ;;  %s3392_s7 = inlined_call_operand.hbm [shape: f32[16,1], index: 7, kind: input, shape index: {}]   ;;  %s3393_s8 = inlined_call_operand.hbm [shape: bf16[2,16,100], index: 8, kind: output, shape index: {}]  }
   0x1   :  { %3401 = sst [smem:[#allocation27_spill]] %s3385_s0 }
   0x2   :  { %3402 = sst [smem:[#allocation28_spill]] %s3387_s2 }
   0x3   :  { %3403 = sst [smem:[#allocation29_spill]] %s3388_s3 }
   0x4   :  { %3404 = sst [smem:[#allocation30_spill]] %s3389_s4 }
   0x5   :  { %3405 = sst [smem:[#allocation31_spill]] %s3390_s5 }
   0x6   :  { %3406 = sst [smem:[#allocation32_spill]] %s3391_s6 }
   0x7   :  { %13 = vsyncpa [#allocation6], 0 }
   0x8   :  { %15 = vsyncpa [#allocation6 + $0x1], 0 }
   0x9   :  { %16 = vsyncpa [#allocation9], 0 }
   0xa   :  { %18 = vsyncpa [#allocation9 + $0x1], 0 }
   0xb   :  { %19 = vsyncpa [#allocation12], 0 }
   0xc   :  { %20 = vsyncpa [#allocation15], 0 }
   0xd   :  { %21 = vsyncpa [#allocation18], 0 }
   0xe   :  { %22 = vsyncpa [#allocation7], 0 }
   0xf   :  { %24 = vsyncpa [#allocation7 + $0x1], 0  ;;  %s2655_s27 = smov 0   ;;  %s2657_s28 = smov 0  }
  0x10   :  { %s2659_s29 = smov 0   ;;  %s2661_s30 = smov 0  }
  0x11 LB: > { %s2578_s9 = smov [#allocation10]   ;;  %s2676_s11 = sadd.s32 4294967295, %s2576_s30   ;;  %s2576_s30 = sphi %s2661_s30, %s3440_s30   ;;  %s2572_s29 = sphi %s2659_s29, %s3439_s29   ;;  %s2568_s28 = sphi %s2657_s28, %s3438_s28   ;;  %s2564_s27 = sphi %s2655_s27, %s3437_s27  }
  0x12   : > { %s252_s10 = sshll.u32 %s2578_s9, 4  ;;  %p1953_p0 = scmp.ge.s32.totalorder %s2576_s30, 1  ;;  %s2681_s10 = int_to_ptr.vmem [resolvable:$true] %s252_s10 }
  0x13   : > { %p3394_p1 = scmp.eq.s32.totalorder %s2676_s11, 0  ;;  %p239_p2 = scmp.lt.s32.totalorder %s2576_s30, 3 }
  0x14   : > { %s2579_s13 = smov [#allocation11]   ;;  %s2580_s16 = smov [#allocation14]  }
  0x15   : > { %p2683_p3 = pnand %p1953_p0, %p239_p2  ;;  %s263_s14 = sshll.u32 %s2579_s13, 4  ;;  %s2690_s14 = int_to_ptr.vmem [resolvable:$true] %s263_s14 }
  0x16   : > { %s286_s17 = sshll.u32 %s2580_s16, 4  ;;  %s3409_s2 = sld [smem:[#allocation28_spill]]  ;;  %s2698_s17 = int_to_ptr.vmem [resolvable:$true] %s286_s17 }
  0x17   : > { %s3407_s12 = scalar_select %p2683_p3, 1, 0 }
  0x18   : > { %p2134_p5 = pneg %p2683_p3 }
  0x1a   : > { %p2694_p6 = pnand %p2134_p5, %p3394_p1 }
  0x1c   : > { %s2262_s20 = scalar_lea.hbm %s3409_s2, 16  ;;  %p2708_p8 = pneg %p2694_p6 }
  0x1d   : > { %p2263_p7 = scmp.ne.s32.totalorder %s3409_s2, %s2262_s20  ;;  %p2269_p11 = scmp.lt.u32.totalorder %s2262_s20, %s3409_s2 }
  0x1f   : > { %p2265_p9 = pnand %p2708_p8, %p2263_p7 }
  0x21   : > { %p2266_p10 = pneg %p2265_p9 }
  0x23   : > { %p2271_p12 = pnand %p2269_p11, %p2266_p10 }
  0x25   : > { %2274 = shalt.err (!%p2271_p12)
}
  0x26   : > { %s2275_s26 = scalar_lea.vmem %s2681_s10, 16  ;;  %s2282_s9 = scalar_lea.vmem %s2681_s10, 32 }
  0x27   : > { %p2276_p13 = scmp.ne.s32.totalorder %s2681_s10, %s2275_s26  ;;  %p2283_p5 = scmp.lt.s32.totalorder %s2681_s10, %s2681_s10 }
  0x28   : > { %p2284_p7 = scmp.lt.s32.totalorder %s2282_s9, %s2275_s26 }
  0x29   : > { %p2278_p0 = pnand %p2276_p13, %p2708_p8 }
  0x2a   : > { %p2285_p9 = por %p2284_p7, %p2283_p5 }
  0x2b   : > { %p2279_p2 = pneg %p2278_p0 }
  0x2d   : > { %p2286_p4 = pnand %p2285_p9, %p2279_p2 }
  0x2f   : > { %2289 = shalt.err (!%p2286_p4)
}
  0x30   : > { %2137 = dma.hbm_to_vmem [thread:$0]  (!%p2694_p6), %s3409_s2, 16, %s2681_s10, [#allocation9]  }
  0x31   : > { %s3411_s3 = sld [smem:[#allocation29_spill]] }
  0x37   : > { %s2290_s20 = scalar_lea.hbm %s3411_s3, 64 }
  0x38   : > { %p2291_p10 = scmp.ne.s32.totalorder %s3411_s3, %s2290_s20  ;;  %p2297_p4 = scmp.lt.u32.totalorder %s2290_s20, %s3411_s3 }
  0x3a   : > { %p2293_p11 = pnand %p2291_p10, %p2708_p8 }
  0x3c   : > { %p2294_p12 = pneg %p2293_p11 }
  0x3e   : > { %p2299_p13 = pnand %p2297_p4, %p2294_p12 }
  0x40   : > { %2302 = shalt.err (!%p2299_p13)
}
  0x41   : > { %s2303_s10 = scalar_lea.vmem %s2690_s14, 64  ;;  %p2311_p7 = scmp.lt.s32.totalorder %s2690_s14, %s2690_s14 }
  0x42   : > { %p2304_p0 = scmp.ne.s32.totalorder %s2690_s14, %s2303_s10  ;;  %p2312_p9 = scmp.lt.s32.totalorder %s2303_s10, %s2303_s10 }
  0x44   : > { %p2306_p2 = pnand %p2304_p0, %p2708_p8  ;;  %p2313_p10 = por %p2312_p9, %p2311_p7 }
  0x46   : > { %p2307_p5 = pneg %p2306_p2 }
  0x48   : > { %p2314_p11 = pnand %p2313_p10, %p2307_p5 }
  0x4a   : > { %2317 = shalt.err (!%p2314_p11)
}
  0x4b   : > { %2140 = dma.hbm_to_vmem [thread:$0]  (!%p2694_p6), %s3411_s3, 64, %s2690_s14, [#allocation12]  }
  0x4c   : > { %s3412_s5 = sld [smem:[#allocation31_spill]] }
  0x52   : > { %s2318_s18 = scalar_lea.hbm %s3412_s5, 256 }
  0x53   : > { %p2319_p12 = scmp.ne.s32.totalorder %s3412_s5, %s2318_s18  ;;  %p2325_p0 = scmp.lt.u32.totalorder %s2318_s18, %s3412_s5 }
  0x55   : > { %p2321_p4 = pnand %p2319_p12, %p2708_p8 }
  0x57   : > { %p2322_p13 = pneg %p2321_p4 }
  0x59   : > { %p2327_p2 = pnand %p2325_p0, %p2322_p13 }
  0x5b   : > { %2330 = shalt.err (!%p2327_p2)
}
  0x5c   : > { %s2331_s14 = scalar_lea.vmem %s2698_s17, 256  ;;  %p2339_p10 = scmp.lt.s32.totalorder %s2698_s17, %s2698_s17 }
  0x5d   : > { %p2332_p5 = scmp.ne.s32.totalorder %s2698_s17, %s2331_s14  ;;  %p2340_p11 = scmp.lt.s32.totalorder %s2331_s14, %s2331_s14 }
  0x5f   : > { %p2334_p7 = pnand %p2332_p5, %p2708_p8  ;;  %p2341_p12 = por %p2340_p11, %p2339_p10 }
  0x61   : > { %p2335_p9 = pneg %p2334_p7 }
  0x63   : > { %p2342_p4 = pnand %p2341_p12, %p2335_p9 }
  0x65   : > { %2345 = shalt.err (!%p2342_p4)
}
  0x66   : > { %s2581_s24 = smov 128   ;;  %s2582_s25 = smov 8  }
  0x67   : > { %2146 = dma.hbm_to_vmem [thread:$0]  (!%p2694_p6), %s3412_s5, 256, %s2698_s17, [#allocation15], %s2581_s24, %s2581_s24, %s2582_s25  }
  0x68   : > { %s2583_s9 = smov [#allocation13]   ;;  %s2584_s16 = smov [#allocation16]  }
  0x69   : > { %s273_s13 = sshll.u32 %s2583_s9, 4  ;;  %s299_s18 = sshll.u32 %s2584_s16, 4  ;;  %s274_s13 = int_to_ptr.vmem [resolvable:$true] %s273_s13  ;;  %s300_s18 = int_to_ptr.vmem [resolvable:$true] %s299_s18 }
  0x6a   : > { %s3413_s4 = sld [smem:[#allocation30_spill]] }
  0x70   : > { %s2346_s21 = scalar_lea.hbm %s3413_s4, 768 }
  0x71   : > { %p2347_p13 = scmp.ne.s32.totalorder %s3413_s4, %s2346_s21  ;;  %p2353_p5 = scmp.lt.u32.totalorder %s2346_s21, %s3413_s4 }
  0x73   : > { %p2349_p0 = pnand %p2347_p13, %p2708_p8 }
  0x75   : > { %p2350_p2 = pneg %p2349_p0 }
  0x77   : > { %p2355_p7 = pnand %p2353_p5, %p2350_p2 }
  0x79   : > { %2358 = shalt.err (!%p2355_p7)
}
  0x7a   : > { %s2359_s17 = scalar_lea.vmem %s274_s13, 768  ;;  %p2367_p12 = scmp.lt.s32.totalorder %s274_s13, %s274_s13 }
  0x7b   : > { %p2360_p9 = scmp.ne.s32.totalorder %s274_s13, %s2359_s17  ;;  %p2368_p4 = scmp.lt.s32.totalorder %s2359_s17, %s2359_s17 }
  0x7d   : > { %p2362_p10 = pnand %p2360_p9, %p2708_p8  ;;  %p2369_p1 = por %p2368_p4, %p2367_p12 }
  0x7f   : > { %p2363_p11 = pneg %p2362_p10 }
  0x81   : > { %p2370_p3 = pnand %p2369_p1, %p2363_p11 }
  0x83   : > { %2373 = shalt.err (!%p2370_p3)
}
  0x84   : > { %2143 = dma.hbm_to_vmem [thread:$0]  (!%p2694_p6), %s3413_s4, 768, %s274_s13, [#allocation12], %s2581_s24, %s2581_s24, %s2582_s25  }
  0x85   : > { %s3414_s6 = sld [smem:[#allocation32_spill]] }
  0x8b   : > { %s2374_s9 = scalar_lea.hbm %s3414_s6, 384 }
  0x8c   : > { %p2375_p1 = scmp.ne.s32.totalorder %s3414_s6, %s2374_s9  ;;  %p2381_p0 = scmp.lt.u32.totalorder %s2374_s9, %s3414_s6 }
  0x8e   : > { %p2377_p3 = pnand %p2375_p1, %p2708_p8 }
  0x90   : > { %p2378_p13 = pneg %p2377_p3 }
  0x92   : > { %p2383_p2 = pnand %p2381_p0, %p2378_p13 }
  0x94   : > { %2386 = shalt.err (!%p2383_p2)
}
  0x95   : > { %s2387_s22 = scalar_lea.vmem %s300_s18, 384  ;;  %p2395_p10 = scmp.lt.s32.totalorder %s300_s18, %s300_s18 }
  0x96   : > { %p2388_p5 = scmp.ne.s32.totalorder %s300_s18, %s2387_s22  ;;  %p2396_p11 = scmp.lt.s32.totalorder %s2387_s22, %s2387_s22 }
  0x98   : > { %p2390_p7 = pnand %p2388_p5, %p2708_p8  ;;  %p2397_p12 = por %p2396_p11, %p2395_p10 }
  0x9a   : > { %p2391_p9 = pneg %p2390_p7 }
  0x9c   : > { %p2398_p4 = pnand %p2397_p12, %p2391_p9 }
  0x9e   : > { %2401 = shalt.err (!%p2398_p4)
}
  0x9f   : > { %s3396_s13 = smov 64   ;;  %s3398_s14 = smov 4  }
  0xa0   : > { %2149 = dma.hbm_to_vmem [thread:$0]  (!%p2694_p6), %s3414_s6, 384, %s300_s18, [#allocation15], %s3396_s13, %s3396_s13, %s3398_s14  }
  0xa1   : > { %s2587_s3 = smov [#allocation17]   ;;  %s2402_s16 = scalar_lea.hbm %s3392_s7, 256 }
  0xa2   : > { %s312_s10 = sshll.u32 %s2587_s3, 4  ;;  %p2403_p1 = scmp.ne.s32.totalorder %s3392_s7, %s2402_s16  ;;  %s313_s10 = int_to_ptr.vmem [resolvable:$true] %s312_s10 }
  0xa3   : > { %p2409_p0 = scmp.lt.u32.totalorder %s2402_s16, %s3392_s7 }
  0xa4   : > { %p2405_p3 = pnand %p2403_p1, %p2708_p8 }
  0xa6   : > { %p2406_p13 = pneg %p2405_p3 }
  0xa8   : > { %p2411_p2 = pnand %p2409_p0, %p2406_p13 }
  0xaa   : > { %2414 = shalt.err (!%p2411_p2)
}
  0xab   : > { %s2415_s18 = scalar_lea.vmem %s313_s10, 256  ;;  %p2423_p10 = scmp.lt.s32.totalorder %s313_s10, %s313_s10 }
  0xac   : > { %p2416_p5 = scmp.ne.s32.totalorder %s313_s10, %s2415_s18  ;;  %p2424_p11 = scmp.lt.s32.totalorder %s2415_s18, %s2415_s18 }
  0xae   : > { %p2418_p7 = pnand %p2416_p5, %p2708_p8  ;;  %p2425_p12 = por %p2424_p11, %p2423_p10 }
  0xb0   : > { %p2419_p9 = pneg %p2418_p7 }
  0xb2   : > { %p2426_p4 = pnand %p2425_p12, %p2419_p9 }
  0xb4   : > { %2429 = shalt.err (!%p2426_p4)
}
  0xb5   : > { %2152 = dma.hbm_to_vmem [thread:$0]  (!%p2694_p6), %s3392_s7, 256, %s313_s10, [#allocation18], %s2581_s24, %s2581_s24, %s2582_s25  }
  0xb6   : > { %s1952_s15 = sadd.s32 4294967294, %s2576_s30   ;;  %s2844_s23 = sadd.s32 1, %s2576_s30  }
  0xb7   : > { %s34_s3 = ssub.s32 %s2576_s30, %s2844_s23  ;;  %s37_s26 = sadd.s32 1, %s2572_s29 }
  0xb8   : > { %p35_p8 = scmp.eq.s32.totalorder %s34_s3, 0  ;;  %p44_p1 = scmp.ne.s32.totalorder %s2572_s29, %s2568_s28 }
  0xb9   : > { %p45_p3 = scmp.eq.s32.totalorder %s2576_s30, 0  ;;  %p50_p13 = scmp.ne.s32.totalorder %s2568_s28, %s2564_s27 }
  0xba   : > { %s2855_s9 = scalar_select %p35_p8, %s2572_s29, %s37_s26  }
  0xbb   : > { %p2857_p0 = por %p45_p3, %p44_p1  ;;  %p3416_p2 = scmp.eq.s32.totalorder %s2676_s11, 0 }
  0xbc   : > { %p226_p5 = scmp.eq.s32.totalorder %s2676_s11, 1  ;;  %p232_p7 = scmp.eq.s32.totalorder %s1952_s15, 1 }
  0xbd   : > { %p2863_p6 = por %p3416_p2, %p50_p13  ;;  %p2170_p9 = scmp.lt.s32.totalorder %s2576_s30, 2 }
  0xbe   : > { %s2870_s25 = sand.u32 1, %s2572_s29   ;;  %p2872_p10 = por %p226_p5, %p44_p1 }
  0xbf   : > { %p2876_p11 = por %p232_p7, %p50_p13  ;;  %s1961_s20 = sshll.u32 %s2870_s25, 4 }
  0xc0   : > { %s3418_s10 = scalar_select %p2872_p10, 1, 0 }
  0xc1   : > { %s3419_s19 = scalar_select %p2876_p11, 1, 0 }
  0xc2   : > { %s2021_s21 = sshll.u32 %s2576_s30, 8  ;;  %s3420_s0 = sld [smem:[#allocation27_spill]] }
  0xc3   : > { %s330_s2 = scalar_lea.vmem [#allocation5], %s1961_s20  ;;  %p2891_p12 = pnand %p2170_p9, %p2857_p0 }
  0xc4   : > { %s337_s15 = sshll.u32 %s330_s2, 4  ;;  %s1964_s13 = sshll.u32 %s2870_s25, 3  ;;  %s2887_s15 = int_to_ptr.vmem [resolvable:$true] %s337_s15 }
  0xc5   : > { %s327_s22 = scalar_lea.sflag [#allocation6], %s2870_s25  ;;  %p2432_p8 = pneg %p2891_p12 }
  0xc8   : > { %s2885_s17 = scalar_lea.hbm %s3420_s0, %s2021_s21  ;;  %s2435_s16 = scalar_lea.hbm %s3420_s0, 512 }
  0xc9   : > { %s2430_s21 = scalar_lea.hbm %s2885_s17, 256  ;;  %p2436_p13 = scmp.lt.u32.totalorder %s2885_s17, %s3420_s0 }
  0xca   : > { %p2431_p4 = scmp.ne.s32.totalorder %s2885_s17, %s2430_s21  ;;  %p2437_p0 = scmp.lt.u32.totalorder %s2435_s16, %s2430_s21 }
  0xcb   : > { %p2439_p5 = scmp.lt.u32.totalorder %s2430_s21, %s2885_s17 }
  0xcc   : > { %p2433_p1 = pnand %p2432_p8, %p2431_p4  ;;  %p2438_p2 = por %p2437_p0, %p2436_p13 }
  0xce   : > { %p2434_p3 = pneg %p2433_p1  ;;  %p2440_p7 = por %p2439_p5, %p2438_p2 }
  0xd0   : > { %p2441_p9 = pnand %p2440_p7, %p2434_p3 }
  0xd2   : > { %2444 = shalt.err (!%p2441_p9)
}
  0xd3   : > { %s2445_s26 = scalar_lea.vmem %s2887_s15, 256  ;;  %s2588_s20 = smov [#allocation5]  }
  0xd4   : > { %p2446_p4 = scmp.ne.s32.totalorder %s2887_s15, %s2445_s26  ;;  %s2450_s18 = sshll.u32 %s2588_s20, 4  ;;  %s2451_s18 = int_to_ptr.vmem [resolvable:$false] %s2450_s18 }
  0xd5   : > { %s2452_s14 = scalar_lea.vmem %s2451_s18, 512  ;;  %p2453_p10 = scmp.lt.s32.totalorder %s2887_s15, %s2451_s18 }
  0xd6   : > { %p2448_p1 = pnand %p2446_p4, %p2432_p8  ;;  %p2454_p13 = scmp.lt.s32.totalorder %s2452_s14, %s2445_s26 }
  0xd8   : > { %p2449_p11 = pneg %p2448_p1  ;;  %p2455_p0 = por %p2454_p13, %p2453_p10 }
  0xda   : > { %p2456_p2 = pnand %p2455_p0, %p2449_p11 }
  0xdc   : > { %2459 = shalt.err (!%p2456_p2)
}
  0xdd   : > { %s3422_s21 = smov 4   ;;  %s3423_s16 = smov 64  }
  0xde   : > { %2156 = dma.hbm_to_vmem [thread:$0]  (!%p2891_p12), %s2885_s17, 256, %s2887_s15, %s327_s22, %s3423_s16, %s3423_s16, %s3422_s21  }
  0xdf   : > { %s2022_s2 = sshll.u32 %s2576_s30, 7  ;;  %s351_s14 = scalar_lea.vmem [#allocation8], %s1964_s13 }
  0xe0   : > { %s2932_s18 = scalar_lea.hbm %s3386_s1, %s2022_s2  ;;  %s358_s0 = sshll.u32 %s351_s14, 4  ;;  %s2936_s0 = int_to_ptr.vmem [resolvable:$true] %s358_s0 }
  0xe1   : > { %s3424_s4 = sand.u32 1, %s2576_s30   ;;  %s2460_s6 = scalar_lea.hbm %s2932_s18, 128 }
  0xe2   : > { %s2940_s5 = scalar_lea.sflag [#allocation9], %s3424_s4  ;;  %p2461_p10 = scmp.ne.s32.totalorder %s2932_s18, %s2460_s6 }
  0xe3   : > { %s2465_s25 = scalar_lea.hbm %s3386_s1, 256  ;;  %p2466_p5 = scmp.lt.u32.totalorder %s2932_s18, %s3386_s1 }
  0xe4   : > { %p2463_p11 = pnand %p2461_p10, %p2432_p8  ;;  %p2467_p7 = scmp.lt.u32.totalorder %s2465_s25, %s2460_s6 }
  0xe5   : > { %p2469_p4 = scmp.lt.u32.totalorder %s2460_s6, %s2932_s18 }
  0xe6   : > { %p2464_p3 = pneg %p2463_p11  ;;  %p2468_p9 = por %p2467_p7, %p2466_p5 }
  0xe8   : > { %p2470_p1 = por %p2469_p4, %p2468_p9 }
  0xea   : > { %p2471_p13 = pnand %p2470_p1, %p2464_p3 }
  0xec   : > { %2474 = shalt.err (!%p2471_p13)
}
  0xed   : > { %s2475_s4 = scalar_lea.vmem %s2936_s0, 128  ;;  %s2589_s13 = smov [#allocation8]  }
  0xee   : > { %p2476_p0 = scmp.ne.s32.totalorder %s2936_s0, %s2475_s4  ;;  %s2480_s20 = sshll.u32 %s2589_s13, 4  ;;  %s2481_s20 = int_to_ptr.vmem [resolvable:$false] %s2480_s20 }
  0xef   : > { %s2482_s26 = scalar_lea.vmem %s2481_s20, 256  ;;  %p2483_p11 = scmp.lt.s32.totalorder %s2936_s0, %s2481_s20 }
  0xf0   : > { %p2478_p2 = pnand %p2476_p0, %p2432_p8  ;;  %p2484_p5 = scmp.lt.s32.totalorder %s2482_s26, %s2475_s4 }
  0xf2   : > { %p2479_p10 = pneg %p2478_p2  ;;  %p2485_p7 = por %p2484_p5, %p2483_p11 }
  0xf4   : > { %p2486_p9 = pnand %p2485_p7, %p2479_p10 }
  0xf6   : > { %2489 = shalt.err (!%p2486_p9)
}
  0xf7   : > { %2159 = dma.hbm_to_vmem [thread:$0]  (!%p2891_p12), %s2932_s18, 128, %s2936_s0, %s2940_s5, %s3423_s16, %s3423_s16, %s3422_s21  }
  0xf8   : > { %p3425_p8 = scmp.ne.s32.totalorder %s3407_s12, 0 }
  0xf9   : > { %s2972_s6 = sand.u32 (!%p3425_p8), 1, %s2568_s28  }
  0xfa   : > { %370 = sbr.rel (%p3425_p8) target bundleno = 2296 (0x8f8), region = 52  ;;  %s1968_s14 = sshll.u32 (!%p3425_p8), %s2972_s6, 4 }
  0xfb   : > { %s373_s17 = scalar_lea.sflag (!%p3425_p8), [#allocation6], %s2972_s6  ;;  %s2976_s15 = scalar_lea.vmem (!%p3425_p8), [#allocation5], %s1968_s14 }
 0x101   : > { %2535 = dma.done.wait (%p2863_p6), %s373_s17, 256  }
 0x102   : > { %2537 = vsyncadd (%p2863_p6), %s373_s17, 4294967040  ;;  %s381_s0 = sand.u32 1, %s2676_s11   ;;  %s1969_s5 = sshll.u32 %s2972_s6, 3 }
 0x103   : > { %s382_s12 = scalar_lea.sflag [#allocation9], %s381_s0  ;;  %s2986_s3 = scalar_lea.vmem [#allocation8], %s1969_s5 }
 0x104   : > { %2539 = dma.done.wait (%p2863_p6), %s382_s12, 128  }
 0x105   : > { %2541 = vsyncadd (%p2863_p6), %s382_s12, 4294967168  ;;  %p3426_p12 = scmp.eq.s32.totalorder %s2676_s11, 0 }
 0x107   : > { %2543 = dma.done.wait (%p3426_p12), [#allocation9], 16   ;;  %p3427_p3 = pmov %p3426_p12 }
 0x109   : > { %2545 = vsyncadd (%p3427_p3), [#allocation9], 4294967280  ;;  %p3428_p4 = pmov %p3427_p3 }
 0x10a   : > { %p3429_p1 = pmov %p3427_p3 }
 0x10b   : > { %2547 = dma.done.wait (%p3428_p4), [#allocation12], 832  }
 0x10c   : > { %2549 = vsyncadd (%p3429_p1), [#allocation12], 4294966464  ;;  %p3430_p13 = pmov %p3429_p1 }
 0x10d   : > { %p3431_p0 = pmov %p3429_p1 }
 0x10e   : > { %2551 = dma.done.wait (%p3430_p13), [#allocation15], 640  }
 0x10f   : > { %2553 = vsyncadd (%p3431_p0), [#allocation15], 4294966656  ;;  %p3432_p6 = pmov %p3431_p0 }
 0x110   : > { %p3433_p2 = pmov %p3431_p0 }
 0x111   : > { %2555 = dma.done.wait (%p3432_p6), [#allocation18], 256  }
 0x112   : > { %2557 = vsyncadd (%p3433_p2), [#allocation18], 4294967040  ;;  %v2241_v0 = vld [vmem:[%s2976_s15] sm:$0xff]   ;;  %s2590_s24 = smov 115   ;;  %v2243_v2 = vld [vmem:[%s2976_s15 + $0x8] sm:$0xff]   ;;  %s2591_s21 = smov 121  }
 0x113   : > { %v2242_v1 = vld [vmem:[%s2976_s15] sm:$0xff]   ;;  %579 = vrot.lane.b32.xlu1 %v2241_v0, %s2590_s24  ;;  %v2244_v3 = vld [vmem:[%s2976_s15 + $0x8] sm:$0xff]   ;;  %vm475_vm0 = vcmask 1043456   ;;  %s2592_s16 = smov 109   ;;  %s2593_s18 = smov 103   ;;  %vm468_vm1 = vcmask 31744  }
 0x114   : > { %464 = vrot.lane.b32.xlu0 %v2242_v1, %s2591_s21  ;;  %v2246_v4 = vld [vmem:[%s2976_s15 + $0x8] sm:$0xff]   ;;  %v2245_v5 = vld [vmem:[%s2976_s15] sm:$0xff]   ;;  %vm562_vm2 = vcmask 80896   ;;  %s2594_s25 = smov 10   ;;  %s2595_s22 = smov 20   ;;  %vm680_vm3 = vcmask 162896  }
 0x115   : > { %v2248_v6 = vld [vmem:[%s2976_s15 + $0x8] sm:$0xff]   ;;  %v449_v7 = vld [vmem:[#allocation11] sm:$0xf]  ;;  %s2596_s2 = smov 30   ;;  %vm798_vm4 = vcmask 244896   ;;  %vm916_vm5 = vcmask 326896  }
 0x116   : > { %v2247_v8 = vld [vmem:[%s2976_s15] sm:$0xff]   ;;  %2050 = vmatprep.subr.msk.mxu0 %vm475_vm0, %v449_v7  ;;  %2056 = vmatprep.subr.msk.mxu1 %vm475_vm0, %v449_v7  ;;  %s2597_s4 = smov 118   ;;  %vm921_vm6 = vcmask 818896   ;;  %s2599_s13 = smov 50   ;;  %vm1102_vm7 = vcmask 408896   ;;  %vm1149_vm8 = vcmask 490896  }
 0x117   : > { %581 = vrot.lane.b32.xlu1 %v2243_v2, %s2590_s24  ;;  %2051 = vmatpush3.msk.msra.mxu0 %vm475_vm0, %v449_v7  ;;  %s2600_s20 = smov 40   ;;  %s2601_s26 = smov 127   ;;  %vm1196_vm9 = vcmask 572896   ;;  %vm1243_vm10 = vcmask 654896   ;;  %vm1270_vm11 = vcmask 736896   ;;  %vm1344_vm12 = vcmask 130048  }
 0x118   : > { %466 = vrot.lane.b32.xlu0 %v2244_v3, %s2591_s21  ;;  %2057 = vmatpush3.msk.msra.mxu1 %vm475_vm0, %v449_v7  ;;  %s2602_s14 = smov 126   ;;  %s2603_s17 = smov 108   ;;  %vm1551_vm13 = vcmask 89088   ;;  %vm1553_vm14 = vcmask 818888   ;;  %vm1560_vm15 = vcmask 728152  }
 0x119   : > { %2062 = vmatprep.subr.msk.mxu0 %vm475_vm0, %v449_v7  ;;  %2068 = vmatprep.subr.msk.mxu1 %vm475_vm0, %v449_v7  ;;  %s2604_s15 = smov 11   ;;  %s3318_s0 = scalar_lea.vmem [#allocation19], %s1969_s5 }
 0x11a   : > { %s2025_s5 = sshll.u32 %s2676_s11, 7  ;;  %s1799_s12 = sshll.u32 %s3318_s0, 4  ;;  %s3339_s12 = int_to_ptr.vmem [resolvable:$true] %s1799_s12 }
 0x11b   : > { %699 = vrot.lane.b32.xlu1 %v2246_v4, %s2592_s16  ;;  %s3337_s21 = scalar_lea.hbm %s3393_s8, %s2025_s5  ;;  %p3434_p11 = scmp.ne.s32.totalorder %s3418_s10, 0 }
 0x11c   : > { %697 = vrot.lane.b32.xlu0 %v2245_v5, %s2592_s16  ;;  %s1786_s16 = scalar_lea.sflag [#allocation7], %s2972_s6  ;;  %s2607_s11 = smov [#allocation19]  }
 0x11f   : > { %817 = vrot.lane.b32.xlu1 %v2248_v6, %s2593_s18 }
 0x120   : > { %815 = vrot.lane.b32.xlu0 %v2247_v8, %s2593_s18  ;;  %s2490_s18 = scalar_lea.vmem %s3339_s12, 128 }
 0x121   : > { %p2491_p10 = scmp.ne.s32.totalorder %s3339_s12, %s2490_s18 }
 0x123   : > { %p2492_p5 = pnand %p2491_p10, %p3434_p11 }
 0x125   : > { %p2493_p7 = pneg %p2492_p5 }
 0x185   : > { %v580_v9 = vpop.permute.xlu1 %579 }
 0x186   : > { %v465_v10 = vpop.permute.xlu0 %464  ;;  %2058 = vmatprep.mubr.msk.bf16.mxu1 %vm468_vm1, %v580_v9 }
 0x187   : > { %2052 = vmatprep.mubr.msk.bf16.mxu0 %vm468_vm1, %v465_v10 }
 0x189   : > { %v582_v11 = vpop.permute.xlu1 %581 }
 0x18a   : > { %v467_v12 = vpop.permute.xlu0 %466  ;;  %2059 = vmatmul.mubr.msk.bf16.vlgmr.msra.gmra.mrb[0].mxu1 %vm468_vm1, %v582_v11 }
 0x18b   : > { %2053 = vmatmul.mubr.msk.bf16.vlgmr.msra.gmra.mrb[0].mxu0 %vm468_vm1, %v467_v12  ;;  %2069 = vmatpush3.msk.msra.mxu1 %vm475_vm0, %v449_v7 }
 0x18c   : > { %2063 = vmatpush3.msk.msra.mxu0 %vm475_vm0, %v449_v7  ;;  %vm2606_vm0 = vmmov 0  }
 0x18d   : > { %v700_v13 = vpop.permute.xlu1 %699 }
 0x18e   : > { %v698_v14 = vpop.permute.xlu0 %697 }
 0x18f   : > { %2064 = vmatprep.mubr.msk.bf16.mxu0 %vm468_vm1, %v698_v14 }
 0x191   : > { %v818_v15 = vpop.permute.xlu1 %817 }
 0x192   : > { %v816_v16 = vpop.permute.xlu0 %815 }
 0x193   : > { %2065 = vmatmul.mubr.msk.bf16.vlgmr.msra.gmra.mrb[4].mxu0 %vm468_vm1, %v700_v13  ;;  %2070 = vmatprep.mubr.msk.bf16.mxu1 %vm468_vm1, %v816_v16 }
 0x194   : > { %2071 = vmatmul.mubr.msk.bf16.vlgmr.msra.gmra.mrb[4].mxu1 %vm468_vm1, %v818_v15  ;;  %vm1589_vm1 = vcmask 392192  }
 0x25d   : > { %v2060_v17 = vpop.f32.mrb[0].mxu1 }
 0x25e   : > { %v2054_v18 = vpop.f32.mrb[0].mxu0  ;;  %v655_v19 = vpop.f32.mrb[1].mxu1 }
 0x25f   : > { %v545_v20 = vpop.f32.mrb[1].mxu0  ;;  %v2061_v21 = vpop.f32.mrb[2].mxu1 }
 0x260   : > { %v2055_v22 = vpop.f32.mrb[2].mxu0  ;;  %v671_v23 = vpack.c.bf16 %v2061_v21, %v2060_v17  ;;  %v658_v24 = vpop.f32.mrb[3].mxu1 }
 0x261   : > { %v561_v25 = vpack.c.bf16 %v2055_v22, %v2054_v18  ;;  %v548_v26 = vpop.f32.mrb[3].mxu0  ;;  %v670_v27 = vpack.c.bf16 %v658_v24, %v655_v19  ;;  %v2598_v18 = vmov 0  }
 0x262   : > { %v560_v28 = vpack.c.bf16 %v548_v26, %v545_v20  ;;  %920 = vst.msk [vmem:[#allocation2 + $0x8] sm:$0xff] %vm562_vm2, %v2598_v18  ;;  %919 = vst.msk [vmem:[#allocation2] sm:$0xff] %vm562_vm2, %v2598_v18  ;;  %1401 = vmatprep.subr.bf16.mxu1 %v2598_v18  ;;  %1348 = vmatprep.subr.bf16.mxu0 %v2598_v18 }
 0x263   : > { %564 = vst.msk [vmem:[#allocation3 + $0x8] sm:$0xff] %vm562_vm2, %v561_v25  ;;  %674 = vrot.lane.b32.xlu0 %v670_v27, %s2594_s25  ;;  %2240 = vset.pattern.permute.xlu1 %v2598_v18 }
 0x264   : > { %563 = vst.msk [vmem:[#allocation3] sm:$0xff] %vm562_vm2, %v560_v28  ;;  %2239 = vset.pattern.permute.xlu0 %v2598_v18  ;;  %vm1764_vm2 = vcmask 84992  }
 0x265   : > { %923 = vst.msk [vmem:[#allocation2 + $0x8] sm:$0xff] %vm921_vm6, %v2598_v18  ;;  %922 = vst.msk [vmem:[#allocation2] sm:$0xff] %vm921_vm6, %v2598_v18 }
 0x266   : > { %v2066_v29 = vpop.f32.mrb[4].mxu0  ;;  %1552 = vst.msk [vmem:[#allocation4] sm:$0xff] %vm1551_vm13, %v2598_v18 }
 0x267   : > { %v773_v30 = vpop.f32.mrb[5].mxu0  ;;  %v2072_v31 = vpop.f32.mrb[4].mxu1  ;;  %1554 = vst.msk [vmem:[#allocation4] sm:$0xff] %vm1553_vm14, %v2598_v18 }
 0x268   : > { %v2067_v32 = vpop.f32.mrb[6].mxu0  ;;  %v891_v33 = vpop.f32.mrb[5].mxu1  ;;  %1765 = vst.msk [vmem:[%s3318_s0] sm:$0xf] %vm1764_vm2, %v2598_v18  ;;  %1766 = vst.msk [vmem:[%s3318_s0 + $0x4] sm:$0xf] %vm1764_vm2, %v2598_v18 }
 0x269   : > { %v789_v34 = vpack.c.bf16 %v2067_v32, %v2066_v29  ;;  %v776_v35 = vpop.f32.mrb[7].mxu0  ;;  %v2073_v36 = vpop.f32.mrb[6].mxu1 }
 0x26a   : > { %v788_v37 = vpack.c.bf16 %v776_v35, %v773_v30  ;;  %v907_v38 = vpack.c.bf16 %v2073_v36, %v2072_v31  ;;  %v894_v39 = vpop.f32.mrb[7].mxu1 }
 0x26b   : > { %v906_v40 = vpack.c.bf16 %v894_v39, %v891_v33 }
 0x26c   : > { %792 = vrot.lane.b32.xlu1 %v788_v37, %s2595_s22 }
 0x26d   : > { %910 = vrot.lane.b32.xlu0 %v906_v40, %s2596_s2 }
 0x270   : > { %676 = vrot.lane.b32.xlu1 %v671_v23, %s2594_s25 }
 0x271   : > { %794 = vrot.lane.b32.xlu0 %v789_v34, %s2595_s22 }
 0x274   : > { %912 = vrot.lane.b32.xlu1 %v907_v38, %s2596_s2 }
 0x2d5   : > { %v675_v41 = vpop.permute.xlu0 %674 }
 0x2d6   : > { %681 = vst.msk [vmem:[#allocation3] sm:$0xff] %vm680_vm3, %v675_v41 }
 0x2de   : > { %v793_v42 = vpop.permute.xlu1 %792 }
 0x2df   : > { %799 = vst.msk [vmem:[#allocation3] sm:$0xff] %vm798_vm4, %v793_v42  ;;  %v911_v43 = vpop.permute.xlu0 %910 }
 0x2e0   : > { %917 = vst.msk [vmem:[#allocation3] sm:$0xff] %vm916_vm5, %v911_v43 }
 0x2e2   : > { %v677_v44 = vpop.permute.xlu1 %676 }
 0x2e3   : > { %682 = vst.msk [vmem:[#allocation3 + $0x8] sm:$0xff] %vm680_vm3, %v677_v44  ;;  %v795_v45 = vpop.permute.xlu0 %794 }
 0x2e4   : > { %800 = vst.msk [vmem:[#allocation3 + $0x8] sm:$0xff] %vm798_vm4, %v795_v45 }
 0x2e6   : > { %v913_v46 = vpop.permute.xlu1 %912 }
 0x2e7   : > { %918 = vst.msk [vmem:[#allocation3 + $0x8] sm:$0xff] %vm916_vm5, %v913_v46  ;;  %v924_v63 = vld [vmem:[#allocation3] sm:$0xff] }
 0x2e8   : > { %v3108_v2 = vunpack.c.h.bf16 %v924_v63  ;;  %v3110_v3 = vunpack.c.l.bf16 %v924_v63 }
 0x2ea   : > { %v931_v4 = vmul.f32 0.0, %v3108_v2  ;;  %v930_v5 = vmul.f32 0.0, %v3110_v3  ;;  %v3121_v6 = vmul.f32 0.42857143, %v3108_v2  ;;  %v3124_v7 = vmul.f32 0.42857143, %v3110_v3 }
 0x2eb   : > { %v3131_v8 = vmul.f32 0.85714287, %v3108_v2  ;;  %v3134_v9 = vmul.f32 0.85714287, %v3110_v3  ;;  %v3141_v10 = vmul.f32 0.2857143, %v3108_v2 }
 0x2ec   : > { %v3144_v11 = vmul.f32 0.2857143, %v3110_v3  ;;  %v3151_v12 = vmul.f32 0.71428573, %v3108_v2  ;;  %v3154_v13 = vmul.f32 0.71428573, %v3110_v3  ;;  %v1256_v21 = vadd.f32 %v930_v5, %v3110_v3 }
 0x2ed   : > { %v3161_v14 = vmul.f32 0.14285715, %v3108_v2  ;;  %v3164_v15 = vmul.f32 0.14285715, %v3110_v3  ;;  %v1210_v16 = vmul.f32 0.5714286, %v3108_v2  ;;  %v1257_v22 = vadd.f32 %v931_v4, %v3108_v2 }
 0x2ee   : > { %v925_v47 = vld [vmem:[#allocation3 + $0x8] sm:$0xff]  ;;  %v1209_v17 = vmul.f32 0.5714286, %v3110_v3 }
 0x2ef   : > { %v3046_v48 = vunpack.c.h.bf16 %v925_v47  ;;  %v3048_v49 = vunpack.c.l.bf16 %v925_v47  ;;  %v1260_v23 = vpack.c.bf16 %v1257_v22, %v1256_v21 }
 0x2f1   : > { %v933_v50 = vmul.f32 0.0, %v3046_v48  ;;  %v932_v51 = vmul.f32 0.0, %v3048_v49  ;;  %v3061_v54 = vmul.f32 0.42857143, %v3046_v48  ;;  %v3064_v55 = vmul.f32 0.42857143, %v3048_v49 }
 0x2f2   : > { %v3073_v57 = vmul.f32 0.85714287, %v3046_v48  ;;  %v3076_v58 = vmul.f32 0.85714287, %v3048_v49  ;;  %v3083_v59 = vmul.f32 0.2857143, %v3046_v48 }
 0x2f3   : > { %944 = vrot.lane.b32.xlu1 %v933_v50, %s2597_s4  ;;  %942 = vrot.lane.b32.xlu0 %v932_v51, %s2597_s4  ;;  %v3055_v52 = vadd.f32 %v932_v51, %v3048_v49  ;;  %v3058_v53 = vadd.f32 %v933_v50, %v3046_v48  ;;  %v3086_v60 = vmul.f32 0.2857143, %v3048_v49  ;;  %v3093_v61 = vmul.f32 0.71428573, %v3046_v48 }
 0x2f4   : > { %v3096_v62 = vmul.f32 0.71428573, %v3048_v49  ;;  %v3103_v0 = vmul.f32 0.14285715, %v3046_v48  ;;  %v3106_v1 = vmul.f32 0.14285715, %v3048_v49 }
 0x2f5   : > { %v1261_v56 = vpack.c.bf16 %v3058_v53, %v3055_v52  ;;  %v1212_v19 = vmul.f32 0.5714286, %v3046_v48  ;;  %v1211_v20 = vmul.f32 0.5714286, %v3048_v49 }
 0x2f7   : > { %990 = vrot.lane.b32.xlu1 %v3061_v54, %s2597_s4  ;;  %988 = vrot.lane.b32.xlu0 %v3064_v55, %s2597_s4 }
 0x2fb   : > { %1036 = vrot.lane.b32.xlu1 %v3073_v57, %s2597_s4  ;;  %1034 = vrot.lane.b32.xlu0 %v3076_v58, %s2597_s4 }
 0x2ff   : > { %1082 = vrot.lane.b32.xlu1 %v3083_v59, %s2597_s4  ;;  %1080 = vrot.lane.b32.xlu0 %v3086_v60, %s2597_s4 }
 0x303   : > { %1129 = vrot.lane.b32.xlu1 %v3093_v61, %s2597_s4  ;;  %1127 = vrot.lane.b32.xlu0 %v3096_v62, %s2597_s4 }
 0x307   : > { %1176 = vrot.lane.b32.xlu1 %v3103_v0, %s2597_s4  ;;  %1174 = vrot.lane.b32.xlu0 %v3106_v1, %s2597_s4 }
 0x30b   : > { %940 = vrot.lane.b32.xlu1 %v931_v4, %s2597_s4  ;;  %938 = vrot.lane.b32.xlu0 %v930_v5, %s2597_s4 }
 0x30f   : > { %986 = vrot.lane.b32.xlu1 %v3121_v6, %s2597_s4  ;;  %984 = vrot.lane.b32.xlu0 %v3124_v7, %s2597_s4 }
 0x313   : > { %1032 = vrot.lane.b32.xlu1 %v3131_v8, %s2597_s4  ;;  %1030 = vrot.lane.b32.xlu0 %v3134_v9, %s2597_s4 }
 0x317   : > { %1078 = vrot.lane.b32.xlu1 %v3141_v10, %s2597_s4  ;;  %1076 = vrot.lane.b32.xlu0 %v3144_v11, %s2597_s4 }
 0x31b   : > { %1125 = vrot.lane.b32.xlu1 %v3151_v12, %s2597_s4  ;;  %1123 = vrot.lane.b32.xlu0 %v3154_v13, %s2597_s4 }
 0x31f   : > { %1172 = vrot.lane.b32.xlu1 %v3161_v14, %s2597_s4  ;;  %1170 = vrot.lane.b32.xlu0 %v3164_v15, %s2597_s4 }
 0x323   : > { %1219 = vrot.lane.b32.xlu1 %v1210_v16, %s2597_s4  ;;  %1217 = vrot.lane.b32.xlu0 %v1209_v17, %s2597_s4 }
 0x327   : > { %1223 = vrot.lane.b32.xlu1 %v1212_v19, %s2597_s4  ;;  %1221 = vrot.lane.b32.xlu0 %v1211_v20, %s2597_s4 }
 0x32b   : > { %1264 = vrot.lane.b32.xlu1 %v1260_v23, %s2599_s13 }
 0x365   : > { %v945_v24 = vpop.permute.xlu1 %944  ;;  %v943_v25 = vpop.permute.xlu0 %942 }
 0x366   : > { %v953_v26 = vadd.f32 %v945_v24, %v3046_v48  ;;  %v952_v27 = vadd.f32 %v943_v25, %v3048_v49 }
 0x368   : > { %v955_v28 = vpack.c.bf16 %v953_v26, %v952_v27 }
 0x369   : > { %v991_v29 = vpop.permute.xlu1 %990  ;;  %v989_v30 = vpop.permute.xlu0 %988 }
 0x36a   : > { %v999_v31 = vadd.f32 %v1212_v19, %v991_v29  ;;  %v998_v32 = vadd.f32 %v1211_v20, %v989_v30  ;;  %960 = vrot.lane.b32.xlu0 %v955_v28, %s2594_s25  ;;  %v3218_v30 = vld [vmem:[%s2986_s3] sm:$0xff]  }
 0x36b   : > { %1402 = vmatpush1.bf16.msra.mxu1 %v3218_v30 }
 0x36c   : > { %v1001_v33 = vpack.c.bf16 %v999_v31, %v998_v32  ;;  %1403 = vmatprep.subr.bf16.mxu1 %v2598_v18 }
 0x36d   : > { %v1037_v34 = vpop.permute.xlu1 %1036  ;;  %v1035_v35 = vpop.permute.xlu0 %1034 }
 0x36e   : > { %v1045_v36 = vadd.f32 %v3103_v0, %v1037_v34  ;;  %v1044_v37 = vadd.f32 %v3106_v1, %v1035_v35  ;;  %1006 = vrot.lane.b32.xlu0 %v1001_v33, %s2595_s22 }
 0x370   : > { %v1047_v38 = vpack.c.bf16 %v1045_v36, %v1044_v37 }
 0x371   : > { %v1083_v39 = vpop.permute.xlu1 %1082  ;;  %v1081_v40 = vpop.permute.xlu0 %1080 }
 0x372   : > { %v1091_v41 = vadd.f32 %v3093_v61, %v1083_v39  ;;  %v1090_v42 = vadd.f32 %v3096_v62, %v1081_v40  ;;  %1052 = vrot.lane.b32.xlu0 %v1047_v38, %s2596_s2 }
 0x374   : > { %v1093_v43 = vpack.c.bf16 %v1091_v41, %v1090_v42 }
 0x375   : > { %v1130_v44 = vpop.permute.xlu1 %1129  ;;  %v1128_v45 = vpop.permute.xlu0 %1127 }
 0x376   : > { %1098 = vrot.lane.b32.xlu0 %v1093_v43, %s2596_s2 }
 0x379   : > { %v1177_v46 = vpop.permute.xlu1 %1176  ;;  %v1175_v47 = vpop.permute.xlu0 %1174 }
 0x37a   : > { %v1185_v34 = vadd.f32 %v1177_v46, %v3073_v57 }
 0x37d   : > { %v941_v48 = vpop.permute.xlu1 %940  ;;  %v939_v49 = vpop.permute.xlu0 %938 }
 0x37e   : > { %v951_v50 = vadd.f32 %v941_v48, %v3108_v2  ;;  %v950_v51 = vadd.f32 %v939_v49, %v3110_v3  ;;  %v1138_v2 = vadd.f32 %v1130_v44, %v3083_v59  ;;  %v1137_v3 = vadd.f32 %v1128_v45, %v3086_v60 }
 0x380   : > { %v954_v63 = vpack.c.bf16 %v951_v50, %v950_v51  ;;  %v1140_v25 = vpack.c.bf16 %v1138_v2, %v1137_v3  ;;  %v1527_v3 = vld [vmem:[#allocation14] sm:$0xff] }
 0x381   : > { %v987_v0 = vpop.permute.xlu1 %986  ;;  %v985_v61 = vpop.permute.xlu0 %984 }
 0x382   : > { %v997_v1 = vadd.f32 %v1210_v16, %v987_v0  ;;  %v996_v62 = vadd.f32 %v1209_v17, %v985_v61  ;;  %958 = vrot.lane.b32.xlu0 %v954_v63, %s2594_s25  ;;  %v2250_v61 = vld [vmem:[#allocation13 + $0x14] ss:$8 sps:$4 sm:$0xff]   ;;  %s2494_s25 = sshll.u32 %s2607_s11, 4  ;;  %s2495_s25 = int_to_ptr.vmem [resolvable:$false] %s2494_s25 }
 0x383   : > { %2000 = vmatprep.mubr.msk.bf16.mxu0 %vm1344_vm12, %v2250_v61  ;;  %p2497_p9 = scmp.lt.s32.totalorder %s3339_s12, %s2495_s25 }
 0x384   : > { %v1000_v4 = vpack.c.bf16 %v997_v1, %v996_v62  ;;  %v2252_v1 = vld [vmem:[#allocation13 + $0x4] ss:$8 sps:$4 sm:$0xff]  }
 0x385   : > { %v1033_v5 = vpop.permute.xlu1 %1032  ;;  %v1031_v19 = vpop.permute.xlu0 %1030  ;;  %2003 = vmatprep.mubr.msk.bf16.mxu1 %vm1344_vm12, %v2252_v1  ;;  %v2259_v1 = vld [vmem:[#allocation16 + $0x8] sm:$0xff]  }
 0x386   : > { %v1043_v20 = vadd.f32 %v3161_v14, %v1033_v5  ;;  %v1042_v21 = vadd.f32 %v3164_v15, %v1031_v19  ;;  %1004 = vrot.lane.b32.xlu1 %v1000_v4, %s2595_s22  ;;  %v2254_v19 = vld [vmem:[#allocation13] ss:$8 sps:$4 sm:$0xff]   ;;  %s2496_s22 = scalar_lea.vmem %s2495_s25, 256 }
 0x387   : > { %p2498_p8 = scmp.lt.s32.totalorder %s2496_s22, %s2490_s18 }
 0x388   : > { %v1046_v22 = vpack.c.bf16 %v1043_v20, %v1042_v21 }
 0x389   : > { %v1079_v23 = vpop.permute.xlu1 %1078  ;;  %v1077_v24 = vpop.permute.xlu0 %1076  ;;  %p2499_p12 = por %p2498_p8, %p2497_p9 }
 0x38a   : > { %v1089_v16 = vadd.f32 %v3151_v12, %v1079_v23  ;;  %v1088_v17 = vadd.f32 %v3154_v13, %v1077_v24  ;;  %1050 = vrot.lane.b32.xlu0 %v1046_v22, %s2596_s2  ;;  %v1528_v22 = vld [vmem:[#allocation14 + $0x8] sm:$0xff] }
 0x38b   : > { %p2500_p3 = pnand %p2499_p12, %p2493_p7 }
 0x38c   : > { %v1092_v14 = vpack.c.bf16 %v1089_v16, %v1088_v17 }
 0x38d   : > { %v1126_v26 = vpop.permute.xlu1 %1125  ;;  %v1124_v15 = vpop.permute.xlu0 %1123 }
 0x38e   : > { %v1136_v27 = vadd.f32 %v1126_v26, %v3141_v10  ;;  %v1135_v59 = vadd.f32 %v1124_v15, %v3144_v11  ;;  %1145 = vrot.lane.b32.xlu0 %v1140_v25, %s2600_s20  ;;  %1096 = vrot.lane.b32.xlu1 %v1092_v14, %s2596_s2  ;;  %v2255_v14 = vld [vmem:[#allocation13 + $0x10] ss:$8 sps:$4 sm:$0xff]   ;;  %v2256_v26 = vld [vmem:[#allocation13 + $0x24] ss:$8 sps:$4 sm:$0xff]  }
 0x390   : > { %v1139_v60 = vpack.c.bf16 %v1136_v27, %v1135_v59 }
 0x391   : > { %v1173_v28 = vpop.permute.xlu1 %1172  ;;  %v1171_v12 = vpop.permute.xlu0 %1170 }
 0x392   : > { %v1183_v13 = vadd.f32 %v1173_v28, %v3131_v8  ;;  %v1182_v29 = vadd.f32 %v1171_v12, %v3134_v9  ;;  %1143 = vrot.lane.b32.xlu1 %v1139_v60, %s2600_s20  ;;  %v1184_v8 = vadd.f32 %v1175_v47, %v3076_v58 }
 0x394   : > { %v1186_v31 = vpack.c.bf16 %v1183_v13, %v1182_v29  ;;  %v1187_v39 = vpack.c.bf16 %v1185_v34, %v1184_v8 }
 0x395   : > { %v1220_v10 = vpop.permute.xlu1 %1219  ;;  %v1218_v32 = vpop.permute.xlu0 %1217 }
 0x396   : > { %v1230_v11 = vadd.f32 %v1220_v10, %v3121_v6  ;;  %v1229_v33 = vadd.f32 %v1218_v32, %v3124_v7  ;;  %1190 = vrot.lane.b32.xlu1 %v1186_v31, %s2600_s20  ;;  %v2258_v31 = vld [vmem:[#allocation13 + $0x20] ss:$8 sps:$4 sm:$0xff]  }
 0x398   : > { %v1233_v9 = vpack.c.bf16 %v1230_v11, %v1229_v33 }
 0x399   : > { %v1224_v35 = vpop.permute.xlu1 %1223  ;;  %v1222_v36 = vpop.permute.xlu0 %1221 }
 0x39a   : > { %v1232_v37 = vadd.f32 %v1224_v35, %v3061_v54  ;;  %v1231_v38 = vadd.f32 %v1222_v36, %v3064_v55  ;;  %1237 = vrot.lane.b32.xlu1 %v1233_v9, %s2599_s13 }
 0x39c   : > { %v1234_v40 = vpack.c.bf16 %v1232_v37, %v1231_v38 }
 0x39d   : > { %v1265_v6 = vpop.permute.xlu1 %1264 }
 0x39e   : > { %1192 = vrot.lane.b32.xlu1 %v1187_v39, %s2600_s20  ;;  %1239 = vrot.lane.b32.xlu0 %v1234_v40, %s2599_s13 }
 0x3a2   : > { %1266 = vrot.lane.b32.xlu1 %v1261_v56, %s2599_s13  ;;  %1285 = vrot.lane.b32.xlu0 %v3218_v30, %s2601_s26 }
 0x3dc   : > { %v961_v57 = vpop.permute.xlu0 %960 }
 0x3dd   : > { %965 = vst.msk [vmem:[#allocation2 + $0x8] sm:$0xff] %vm680_vm3, %v961_v57 }
 0x3e0   : > { %v1007_v54 = vpop.permute.xlu0 %1006 }
 0x3e1   : > { %1011 = vst.msk [vmem:[#allocation2 + $0x8] sm:$0xff] %vm798_vm4, %v1007_v54 }
 0x3e4   : > { %v1053_v55 = vpop.permute.xlu0 %1052 }
 0x3e5   : > { %1057 = vst.msk [vmem:[#allocation2 + $0x8] sm:$0xff] %vm916_vm5, %v1053_v55 }
 0x3e8   : > { %v1099_v58 = vpop.permute.xlu0 %1098 }
 0x3e9   : > { %1104 = vst.msk [vmem:[#allocation2 + $0x8] sm:$0xff] %vm1102_vm7, %v1099_v58 }
 0x3f4   : > { %v959_v7 = vpop.permute.xlu0 %958 }
 0x3f5   : > { %964 = vst.msk [vmem:[#allocation2] sm:$0xff] %vm680_vm3, %v959_v7  ;;  %vm1767_vm3 = vcmask 814792  }
 0x3f6   : > { %1768 = vst.msk [vmem:[%s3318_s0] sm:$0xf] %vm1767_vm3, %v2598_v18  ;;  %1769 = vst.msk [vmem:[%s3318_s0 + $0x4] sm:$0xf] %vm1767_vm3, %v2598_v18 }
 0x3f8   : > { %v1005_v52 = vpop.permute.xlu1 %1004 }
 0x3f9   : > { %1010 = vst.msk [vmem:[#allocation2] sm:$0xff] %vm798_vm4, %v1005_v52  ;;  %vm1782_vm4 = vcmask 724056  }
 0x3fc   : > { %v1051_v53 = vpop.permute.xlu0 %1050 }
 0x3fd   : > { %1056 = vst.msk [vmem:[#allocation2] sm:$0xff] %vm916_vm5, %v1051_v53 }
 0x400   : > { %v1097_v56 = vpop.permute.xlu1 %1096  ;;  %v1146_v41 = vpop.permute.xlu0 %1145 }
 0x401   : > { %1103 = vst.msk [vmem:[#allocation2] sm:$0xff] %vm1102_vm7, %v1097_v56  ;;  %v3297_v56 = vld [vmem:[#allocation10] ss:$0 sm:$0xff] }
 0x402   : > { %1151 = vst.msk [vmem:[#allocation2 + $0x8] sm:$0xff] %vm1149_vm8, %v1146_v41 }
 0x404   : > { %v1144_v42 = vpop.permute.xlu1 %1143 }
 0x405   : > { %1150 = vst.msk [vmem:[#allocation2] sm:$0xff] %vm1149_vm8, %v1144_v42 }
 0x408   : > { %v1191_v43 = vpop.permute.xlu1 %1190 }
 0x409   : > { %1197 = vst.msk [vmem:[#allocation2] sm:$0xff] %vm1196_vm9, %v1191_v43 }
 0x40c   : > { %v1238_v44 = vpop.permute.xlu1 %1237 }
 0x40d   : > { %1244 = vst.msk [vmem:[#allocation2] sm:$0xff] %vm1243_vm10, %v1238_v44 }
 0x40e   : > { %1271 = vst.msk [vmem:[#allocation2] sm:$0xff] %vm1270_vm11, %v1265_v6 }
 0x410   : > { %v1193_v45 = vpop.permute.xlu1 %1192  ;;  %v1240_v46 = vpop.permute.xlu0 %1239 }
 0x411   : > { %1198 = vst.msk [vmem:[#allocation2 + $0x8] sm:$0xff] %vm1196_vm9, %v1193_v45  ;;  %v2605_v45 = vmov 0.0  }
 0x412   : > { %1245 = vst.msk [vmem:[#allocation2 + $0x8] sm:$0xff] %vm1243_vm10, %v1240_v46 }
 0x414   : > { %v1267_v47 = vpop.permute.xlu1 %1266  ;;  %v1286_v50 = vpop.permute.xlu0 %1285 }
 0x415   : > { %1272 = vst.msk [vmem:[#allocation2 + $0x8] sm:$0xff] %vm1270_vm11, %v1267_v47  ;;  %v1277_v48 = vld [vmem:[#allocation2] sm:$0xff] }
 0x416   : > { %1290 = vrot.lane.b32.xlu1 %v1277_v48, %s2601_s26  ;;  %1404 = vmatpush1.bf16.msra.mxu1 %v1277_v48 }
 0x417   : > { %1405 = vmatprep.subr.bf16.mxu1 %v2598_v18 }
 0x41a   : > { %1296 = vrot.lane.b32.xlu1 %v3218_v30, %s2602_s14 }
 0x41c   : > { %v1278_v49 = vld [vmem:[#allocation2 + $0x8] sm:$0xff] }
 0x41d   : > { %1292 = vrot.lane.b32.xlu0 %v1278_v49, %s2601_s26  ;;  %1406 = vmatpush1.bf16.msra.mxu1 %v1278_v49 }
 0x41e   : > { %1301 = vrot.lane.b32.xlu1 %v1278_v49, %s2602_s14  ;;  %1407 = vmatprep.subr.bf16.mxu1 %v2598_v18 }
 0x421   : > { %1299 = vrot.lane.b32.xlu0 %v1277_v48, %s2602_s14  ;;  %1408 = vmatpush1.bf16.msra.mxu1 %v1286_v50 }
 0x422   : > { %1319 = vrot.lane.b32.xlu1 %v1277_v48, %s2597_s4  ;;  %1409 = vmatprep.subr.bf16.mxu1 %v2598_v18 }
 0x425   : > { %1317 = vrot.lane.b32.xlu0 %v3218_v30, %s2597_s4 }
 0x426   : > { %1323 = vrot.lane.b32.xlu1 %v1286_v50, %s2597_s4 }
 0x429   : > { %1321 = vrot.lane.b32.xlu0 %v1278_v49, %s2597_s4 }
 0x488   : > { %v1291_v51 = vpop.permute.xlu1 %1290 }
 0x489   : > { %1325 = vrot.lane.b32.xlu0 %v1291_v51, %s2597_s4  ;;  %1410 = vmatpush1.bf16.msra.mxu1 %v1291_v51 }
 0x48a   : > { %1411 = vmatprep.subr.bf16.mxu1 %v2598_v18 }
 0x48c   : > { %v1297_v63 = vpop.permute.xlu1 %1296 }
 0x48d   : > { %1329 = vrot.lane.b32.xlu0 %v1297_v63, %s2597_s4 }
 0x48f   : > { %v1293_v0 = vpop.permute.xlu0 %1292 }
 0x490   : > { %v1302_v62 = vpop.permute.xlu1 %1301  ;;  %1412 = vmatpush1.bf16.msra.mxu1 %v1293_v0  ;;  %1327 = vrot.lane.b32.xlu1 %v1293_v0, %s2597_s4 }
 0x491   : > { %1333 = vrot.lane.b32.xlu0 %v1302_v62, %s2597_s4  ;;  %1413 = vmatprep.subr.bf16.mxu1 %v2598_v18 }
 0x493   : > { %v1300_v4 = vpop.permute.xlu0 %1299 }
 0x494   : > { %1414 = vmatpush1.bf16.msra.mxu1 %v1297_v63  ;;  %1331 = vrot.lane.b32.xlu1 %v1300_v4, %s2597_s4  ;;  %v1320_v20 = vpop.permute.xlu1 %1319 }
 0x495   : > { %1456 = vrot.lane.b32.xlu0 %v1277_v48, %s2603_s17  ;;  %1415 = vmatprep.subr.bf16.mxu1 %v2598_v18 }
 0x497   : > { %v1318_v5 = vpop.permute.xlu0 %1317 }
 0x498   : > { %1416 = vmatpush1.bf16.msra.mxu1 %v1300_v4  ;;  %1454 = vrot.lane.b32.xlu1 %v3218_v30, %s2603_s17  ;;  %v1324_v2 = vpop.permute.xlu1 %1323 }
 0x499   : > { %1349 = vmatpush1.bf16.msra.mxu0 %v1318_v5  ;;  %1460 = vrot.lane.b32.xlu0 %v1286_v50, %s2603_s17 }
 0x49a   : > { %1350 = vmatprep.subr.bf16.mxu0 %v2598_v18  ;;  %1417 = vmatprep.subr.bf16.mxu1 %v2598_v18 }
 0x49b   : > { %v1322_v21 = vpop.permute.xlu0 %1321 }
 0x49c   : > { %1418 = vmatpush1.bf16.msra.mxu1 %v1302_v62  ;;  %1458 = vrot.lane.b32.xlu1 %v1278_v49, %s2603_s17 }
 0x49d   : > { %1351 = vmatpush1.bf16.msra.mxu0 %v1320_v20  ;;  %1464 = vrot.lane.b32.xlu0 %v1293_v0, %s2603_s17  ;;  %v2261_v20 = vld [vmem:[#allocation16 + $0x10] sm:$0xff]  }
 0x49e   : > { %1352 = vmatprep.subr.bf16.mxu0 %v2598_v18  ;;  %2074 = vmatprep.subr.bf16.mxu1 %v2605_v45 }
 0x49f   : > { %1434 = vmatmul.mubr.bf16.vlgmr.msra.gmra.mrb[8].mxu1 %v2254_v19 }
 0x4a0   : > { %1462 = vrot.lane.b32.xlu1 %v1291_v51, %s2603_s17  ;;  %2080 = vmatprep.mubr.msk.bf16.mxu1 %vm2606_vm0, %v2605_v45  ;;  %v1746_v51 = vld [vmem:[#allocation17] sm:$0xff] }
 0x4a1   : > { %1353 = vmatpush1.bf16.msra.mxu0 %v1322_v21  ;;  %1468 = vrot.lane.b32.xlu0 %v1300_v4, %s2603_s17 }
 0x4a2   : > { %1354 = vmatprep.subr.bf16.mxu0 %v2598_v18 }
 0x4a4   : > { %1466 = vrot.lane.b32.xlu1 %v1297_v63, %s2603_s17  ;;  %v1747_v63 = vld [vmem:[#allocation17 + $0x8] sm:$0xff] }
 0x4a5   : > { %1355 = vmatpush1.bf16.msra.mxu0 %v1324_v2  ;;  %1531 = vperm.xlu0 %2239, %v1527_v3  }
 0x4a6   : > { %1356 = vmatprep.subr.bf16.mxu0 %v2598_v18 }
 0x4a8   : > { %1470 = vrot.lane.b32.xlu1 %v1302_v62, %s2603_s17  ;;  %v2260_v62 = vld [vmem:[#allocation16] sm:$0xff]  }
 0x4ac   : > { %1536 = vperm.xlu1 %2240, %v1528_v22  }
 0x4fb   : > { %v1326_v23 = vpop.permute.xlu0 %1325 }
 0x4fc   : > { %1357 = vmatpush1.bf16.msra.mxu0 %v1326_v23 }
 0x4fd   : > { %1358 = vmatprep.subr.bf16.mxu0 %v2598_v18 }
 0x4ff   : > { %v1330_v16 = vpop.permute.xlu0 %1329 }
 0x502   : > { %v1328_v24 = vpop.permute.xlu1 %1327 }
 0x503   : > { %1359 = vmatpush1.bf16.msra.mxu0 %v1328_v24  ;;  %v1334_v25 = vpop.permute.xlu0 %1333 }
 0x504   : > { %1360 = vmatprep.subr.bf16.mxu0 %v2598_v18 }
 0x506   : > { %v1332_v17 = vpop.permute.xlu1 %1331 }
 0x507   : > { %1361 = vmatpush1.bf16.msra.mxu0 %v1330_v16  ;;  %v1457_v27 = vpop.permute.xlu0 %1456 }
 0x508   : > { %1362 = vmatprep.subr.bf16.mxu0 %v2598_v18 }
 0x50a   : > { %v1455_v15 = vpop.permute.xlu1 %1454 }
 0x50b   : > { %1363 = vmatpush1.bf16.msra.mxu0 %v1332_v17  ;;  %v1461_v60 = vpop.permute.xlu0 %1460 }
 0x50c   : > { %1364 = vmatprep.subr.bf16.mxu0 %v2598_v18 }
 0x50e   : > { %v1459_v59 = vpop.permute.xlu1 %1458 }
 0x50f   : > { %1365 = vmatpush1.bf16.msra.mxu0 %v1334_v25  ;;  %v1465_v12 = vpop.permute.xlu0 %1464 }
 0x510   : > { %1484 = vmatprep.subr.bf16.mxu0 %v2598_v18 }
 0x512   : > { %1381 = vmatmul.mubr.bf16.vlgmr.msra.gmra.mrb[8].mxu0 %v2255_v14  ;;  %v1463_v28 = vpop.permute.xlu1 %1462 }
 0x513   : > { %1485 = vmatpush1.bf16.msra.mxu0 %v1455_v15  ;;  %2006 = vmatprep.mubr.msk.bf16.mxu0 %vm1344_vm12, %v2256_v26  ;;  %v1469_v29 = vpop.permute.xlu0 %1468 }
 0x514   : > { %1486 = vmatprep.subr.bf16.mxu0 %v2598_v18 }
 0x516   : > { %v1467_v13 = vpop.permute.xlu1 %1466 }
 0x517   : > { %1487 = vmatpush1.bf16.msra.mxu0 %v1457_v27 }
 0x518   : > { %1488 = vmatprep.subr.bf16.mxu0 %v2598_v18 }
 0x51a   : > { %v1471_v30 = vpop.permute.xlu1 %1470 }
 0x51b   : > { %1489 = vmatpush1.bf16.msra.mxu0 %v1459_v59 }
 0x51c   : > { %1490 = vmatprep.subr.bf16.mxu0 %v2598_v18 }
 0x51f   : > { %1491 = vmatpush1.bf16.msra.mxu0 %v1461_v60 }
 0x520   : > { %1492 = vmatprep.subr.bf16.mxu0 %v2598_v18 }
 0x523   : > { %1493 = vmatpush1.bf16.msra.mxu0 %v1463_v28 }
 0x524   : > { %1494 = vmatprep.subr.bf16.mxu0 %v2598_v18  ;;  %v1532_v39 = vpop.permute.xlu0 %1531 }
 0x527   : > { %1495 = vmatpush1.bf16.msra.mxu0 %v1465_v12 }
 0x528   : > { %1496 = vmatprep.subr.bf16.mxu0 %v2598_v18 }
 0x52b   : > { %1497 = vmatpush1.bf16.msra.mxu0 %v1467_v13  ;;  %v1537_v55 = vpop.permute.xlu1 %1536 }
 0x52c   : > { %1498 = vmatprep.subr.bf16.mxu0 %v2598_v18 }
 0x52f   : > { %1499 = vmatpush1.bf16.msra.mxu0 %v1469_v29 }
 0x530   : > { %1500 = vmatprep.subr.bf16.mxu0 %v2598_v18 }
 0x533   : > { %1501 = vmatpush1.bf16.msra.mxu0 %v1471_v30 }
 0x536   : > { %1517 = vmatmul.mubr.bf16.vlgmr.msra.gmra.mrb[12].mxu0 %v2258_v31 }
 0x572   : > { %v1435_v10 = vpop.f32.mrb[8].mxu1 }
 0x573   : > { %v1437_v32 = vpop.f32.mrb[9].mxu1 }
 0x574   : > { %v1438_v11 = vpop.f32.mrb[10].mxu1 }
 0x575   : > { %v1440_v33 = vpop.f32.mrb[11].mxu1 }
 0x5e5   : > { %v1382_v34 = vpop.f32.mrb[8].mxu0 }
 0x5e6   : > { %v1436_v8 = vadd.f32 %v1435_v10, %v1382_v34  ;;  %v1384_v9 = vpop.f32.mrb[9].mxu0 }
 0x5e7   : > { %v1385_v35 = vpop.f32.mrb[10].mxu0 }
 0x5e8   : > { %v1439_v36 = vadd.f32 %v1438_v11, %v1385_v35  ;;  %v1387_v37 = vpop.f32.mrb[11].mxu0 }
 0x609   : > { %v1518_v38 = vpop.f32.mrb[12].mxu0 }
 0x60a   : > { %v1525_v40 = vadd.f32 %v1518_v38, %v1436_v8  ;;  %v1520_v57 = vpop.f32.mrb[13].mxu0 }
 0x60b   : > { %v1521_v54 = vpop.f32.mrb[14].mxu0 }
 0x60c   : > { %v1526_v58 = vadd.f32 %v1521_v54, %v1439_v36  ;;  %v1539_v6 = vadd.f32 %v1532_v39, %v1525_v40  ;;  %v1523_v7 = vpop.f32.mrb[15].mxu0 }
 0x60e   : > { %v1541_v52 = vmax.f32 %v1539_v6, 0.0  ;;  %v1540_v53 = vadd.f32 %v1537_v55, %v1526_v58 }
 0x610   : > { %v1542_v41 = vmax.f32 %v1540_v53, 0.0  ;;  %v1549_v42 = vmul.f32 %v3297_v56, %v1541_v52 }
 0x612   : > { %v1550_v43 = vmul.f32 %v3297_v56, %v1542_v41 }
 0x614   : > { %v1555_v44 = vpack.c.bf16 %v1550_v43, %v1549_v42 }
 0x616   : > { %1557 = vrot.lane.b32.xlu1 %v1555_v44, %s2604_s15 }
 0x688   : > { %v1558_v46 = vpop.permute.xlu1 %1557 }
 0x689   : > { %1561 = vst.msk [vmem:[#allocation4] sm:$0xff] %vm1560_vm15, %v1558_v46 }
 0x690   : > { %v1564_v47 = vld [vmem:[#allocation4] sm:$0xff] }
 0x691   : > { %1569 = vrot.lane.b32.xlu1 %v1564_v47, %s2602_s14  ;;  %1566 = vrot.lane.b32.xlu0 %v1564_v47, %s2601_s26 }
 0x695   : > { %1580 = vrot.lane.b32.xlu0 %v1564_v47, %s2597_s4 }
 0x703   : > { %v1570_v48 = vpop.permute.xlu1 %1569  ;;  %v1567_v49 = vpop.permute.xlu0 %1566 }
 0x704   : > { %1584 = vrot.lane.b32.xlu0 %v1570_v48, %s2597_s4  ;;  %1582 = vrot.lane.b32.xlu1 %v1567_v49, %s2597_s4 }
 0x707   : > { %v1581_v50 = vpop.permute.xlu0 %1580 }
 0x708   : > { %1693 = vrot.lane.b32.xlu0 %v1567_v49, %s2603_s17  ;;  %1691 = vrot.lane.b32.xlu1 %v1564_v47, %s2603_s17 }
 0x709   : > { %2075 = vmatpush3.bf16.msra.mxu1 %v1581_v50 }
 0x70a   : > { %2076 = vmatprep.subr.bf16.mxu1 %v2605_v45 }
 0x70c   : > { %1750 = vperm.xlu0 %2239, %v1746_v51   ;;  %1695 = vrot.lane.b32.xlu1 %v1570_v48, %s2603_s17 }
 0x710   : > { %1755 = vperm.xlu1 %2240, %v1747_v63  }
 0x776   : > { %v1583_v0 = vpop.permute.xlu1 %1582  ;;  %v1585_v61 = vpop.permute.xlu0 %1584 }
 0x777   : > { %2077 = vmatpush3.bf16.msra.mxu1 %v1583_v0 }
 0x778   : > { %2078 = vmatprep.subr.bf16.mxu1 %v2605_v45 }
 0x77a   : > { %v1692_v4 = vpop.permute.xlu1 %1691  ;;  %v1694_v5 = vpop.permute.xlu0 %1693 }
 0x77b   : > { %2079 = vmatpush3.bf16.msra.mxu1 %v1585_v61 }
 0x77c   : > { %2084 = vmatprep.subr.bf16.mxu1 %v2605_v45 }
 0x77e   : > { %2081 = vmatmul.mubr.msk.bf16.vlgmr.msra.gmra.mrb[12].mxu1 %vm1589_vm1, %v2259_v1  ;;  %v1696_v19 = vpop.permute.xlu1 %1695 }
 0x77f   : > { %2085 = vmatpush3.bf16.msra.mxu1 %v1564_v47  ;;  %2090 = vmatprep.mubr.msk.bf16.mxu1 %vm2606_vm0, %v2605_v45 }
 0x780   : > { %2086 = vmatprep.subr.bf16.mxu1 %v2605_v45 }
 0x783   : > { %2087 = vmatpush3.bf16.msra.mxu1 %v1567_v49 }
 0x784   : > { %2088 = vmatprep.subr.bf16.mxu1 %v2605_v45 }
 0x787   : > { %2089 = vmatpush3.bf16.msra.mxu1 %v1570_v48 }
 0x788   : > { %2094 = vmatprep.subr.bf16.mxu1 %v2605_v45 }
 0x78a   : > { %2091 = vmatmul.mubr.msk.bf16.vlgmr.msra.gmra.mrb[16].mxu1 %vm1589_vm1, %v2260_v62 }
 0x78b   : > { %2095 = vmatpush3.bf16.msra.mxu1 %v1692_v4  ;;  %2100 = vmatprep.mubr.msk.bf16.mxu1 %vm2606_vm0, %v2605_v45  ;;  %v1751_v59 = vpop.permute.xlu0 %1750 }
 0x78c   : > { %2096 = vmatprep.subr.bf16.mxu1 %v2605_v45 }
 0x78f   : > { %2097 = vmatpush3.bf16.msra.mxu1 %v1694_v5  ;;  %v1756_v13 = vpop.permute.xlu1 %1755 }
 0x790   : > { %2098 = vmatprep.subr.bf16.mxu1 %v2605_v45 }
 0x793   : > { %2099 = vmatpush3.bf16.msra.mxu1 %v1696_v19 }
 0x796   : > { %2101 = vmatmul.mubr.msk.bf16.vlgmr.msra.gmra.mrb[20].mxu1 %vm1589_vm1, %v2261_v20 }
 0x851   : > { %v1627_v21 = vpop.f32.mrb[12].mxu1 }
 0x852   : > { %v2082_v2 = vpop.f32.mrb[13].mxu1 }
 0x853   : > { %v1630_v3 = vpop.f32.mrb[14].mxu1 }
 0x854   : > { %v2083_v22 = vpop.f32.mrb[15].mxu1 }
 0x85d   : > { %v1676_v23 = vpop.f32.mrb[16].mxu1 }
 0x85e   : > { %v1677_v24 = vadd.f32 %v1676_v23, %v1627_v21  ;;  %v2092_v16 = vpop.f32.mrb[17].mxu1 }
 0x85f   : > { %v1679_v17 = vpop.f32.mrb[18].mxu1 }
 0x860   : > { %v1680_v25 = vadd.f32 %v1679_v17, %v1630_v3  ;;  %v2093_v14 = vpop.f32.mrb[19].mxu1 }
 0x869   : > { %v1737_v26 = vpop.f32.mrb[20].mxu1 }
 0x86a   : > { %v1744_v15 = vadd.f32 %v1737_v26, %v1677_v24  ;;  %v2102_v27 = vpop.f32.mrb[21].mxu1 }
 0x86b   : > { %v1740_v60 = vpop.f32.mrb[22].mxu1 }
 0x86c   : > { %v1758_v28 = vadd.f32 %v1751_v59, %v1744_v15  ;;  %v1745_v12 = vadd.f32 %v1740_v60, %v1680_v25  ;;  %v2103_v18 = vpop.f32.mrb[23].mxu1 }
 0x86e   : > { %v1760_v29 = vmax.f32 %v1758_v28, 0.0  ;;  %v1759_v30 = vadd.f32 %v1756_v13, %v1745_v12 }
 0x870   : > { %v1761_v31 = vmax.f32 %v1759_v30, 0.0  ;;  %v1762_v10 = vmul.f32 %v3297_v56, %v1760_v29 }
 0x872   : > { %v2023_v32 = vpack.c.bf16 %v1762_v10, %v1762_v10  ;;  %v1763_v11 = vmul.f32 %v3297_v56, %v1761_v31 }
 0x874   : > { %1776 = vrot.lane.b32.xlu0 %v2023_v32, %s2604_s15  ;;  %v2024_v33 = vpack.c.bf16 %v1763_v11, %v1763_v11 }
 0x876   : > { %1778 = vrot.lane.b32.xlu1 %v2024_v33, %s2604_s15 }
 0x8e6   : > { %v1777_v34 = vpop.permute.xlu0 %1776 }
 0x8e7   : > { %1783 = vst.msk [vmem:[%s3318_s0] sm:$0xf] %vm1782_vm4, %v1777_v34 }
 0x8e8   : > { %v1779_v8 = vpop.permute.xlu1 %1778 }
 0x8e9   : > { %1784 = vst.msk [vmem:[%s3318_s0 + $0x4] sm:$0xf] %vm1782_vm4, %v1779_v8 }
 0x8ea   : > { %2503 = shalt.err (!%p2500_p3)
}
 0x8eb   : > { %s2504_s2 = scalar_lea.hbm %s3337_s21, 128  ;;  %s2508_s20 = scalar_lea.hbm %s3393_s8, 256 }
 0x8ec   : > { %p2505_p4 = scmp.ne.s32.totalorder %s3337_s21, %s2504_s2  ;;  %p2509_p0 = scmp.lt.u32.totalorder %s3337_s21, %s3393_s8 }
 0x8ed   : > { %p2510_p6 = scmp.lt.u32.totalorder %s2508_s20, %s2504_s2  ;;  %p2512_p10 = scmp.lt.u32.totalorder %s2504_s2, %s3337_s21 }
 0x8ee   : > { %p2506_p1 = pnand %p2505_p4, %p3434_p11 }
 0x8ef   : > { %p2511_p2 = por %p2510_p6, %p2509_p0 }
 0x8f0   : > { %p2507_p13 = pneg %p2506_p1 }
 0x8f1   : > { %p2513_p5 = por %p2512_p10, %p2511_p2 }
 0x8f3   : > { %p2514_p7 = pnand %p2513_p5, %p2507_p13 }
 0x8f5   : > { %2517 = shalt.err (!%p2514_p7)
}
 0x8f6   : > { %s2608_s17 = smov 64   ;;  %s2609_s15 = smov 4  }
 0x8f7   : > { %2132 = dma.vmem_to_hbm [thread:$0]  (%p3434_p11), %s3339_s12, 128, %s3337_s21, %s1786_s16, %s2608_s17, %s2608_s17, %s2609_s15  }
 0x8f8 PF: > { %s1814_s0 = sand.u32 1, %s2564_s27   ;;  %p3435_p9 = scmp.ne.s32.totalorder %s3419_s19, 0 }
 0x8f9   : > { %p3436_p8 = scmp.ge.s32.totalorder %s2576_s30, 2  ;;  %s1815_s5 = scalar_lea.sflag [#allocation7], %s1814_s0 }
 0x8fb   : > { %p2161_p12 = pnand %p3436_p8, %p3435_p9 }
 0x8fd   : > { %2559 = dma.done.wait (!%p2161_p12), %s1815_s5, 128  }
 0x8fe   : > { %2561 = vsyncadd (!%p2161_p12), %s1815_s5, 4294967168  ;;  %p27_p3 = scmp.ge.s32.totalorder %s2844_s23, 4   ;;  %s3437_s27 = smov %s2568_s28 }
 0x8ff   : > { %s3438_s28 = smov %s2572_s29  ;;  %s3439_s29 = smov %s2855_s9 }
 0x900   : > { %s3440_s30 = smov %s2844_s23  ;;  %29 = sbr.rel (!%p27_p3) target bundleno = 17 (0x11), region = 138 }
 0x907   :  { %1820 = vsyncpa [#allocation6], 1 }
 0x908   :  { %1822 = vsyncpa [#allocation6 + $0x1], 1 }
 0x909   :  { %1823 = vsyncpa [#allocation9], 1 }
 0x90a   :  { %1825 = vsyncpa [#allocation9 + $0x1], 1 }
 0x90b   :  { %1826 = vsyncpa [#allocation12], 1 }
 0x90c   :  { %1827 = vsyncpa [#allocation15], 1 }
 0x90d   :  { %1828 = vsyncpa [#allocation18], 1 }
 0x90e   :  { %1829 = vsyncpa [#allocation7], 1 }
 0x90f   :  { %1831 = vsyncpa [#allocation7 + $0x1], 1 }

// kernel: unet_forward.9
= control target key start
LH: loop header
LB: loop body
LE: loop exit
PB: predicated region body
PF: predicated region fallthrough
CT: control target
= control target key end

     0   :  { %s4686_s0 = inlined_call_operand.hbm [shape: bf16[2,16,100], index: 0, kind: input, shape index: {}]   ;;  %s4687_s1 = inlined_call_operand.hbm [shape: bf16[2,8,324], index: 1, kind: input, shape index: {}]   ;;  %s4688_s2 = inlined_call_operand.hbm [shape: f32[1,286], index: 2, kind: input, shape index: {}]   ;;  %s4689_s3 = inlined_call_operand.hbm [shape: f32[8,18], index: 3, kind: input, shape index: {}]   ;;  %s4690_s4 = inlined_call_operand.hbm [shape: bf16[3,8,72], index: 4, kind: input, shape index: {}]   ;;  %s4691_s5 = inlined_call_operand.hbm [shape: f32[8,1], index: 5, kind: input, shape index: {}]   ;;  %s4692_s6 = inlined_call_operand.hbm [shape: bf16[3,8,24], index: 6, kind: input, shape index: {}]   ;;  %s4693_s7 = inlined_call_operand.hbm [shape: f32[8,1], index: 7, kind: input, shape index: {}]   ;;  %s4694_s8 = inlined_call_operand.hbm [shape: f32[1,8,1], index: 8, kind: input, shape index: {}]   ;;  %s4695_s9 = inlined_call_operand.<no memory space> [shape: f32[1,1,1], index: 9, kind: input, shape index: {}]   ;;  %s4696_s10 = inlined_call_operand.hbm [shape: f32[2,1,324], index: 10, kind: output, shape index: {}]  }
   0x1   :  { %4702 = sst [smem:[#allocation29_spill]] %s4686_s0  ;;  %v15_v0 = vstv %s4695_s9 }
   0x2   :  { %4703 = sst [smem:[#allocation30_spill]] %s4688_s2  ;;  %16 = vst [vmem:[#allocation5] sm:$0x1] %v15_v0 }
   0x3   :  { %4704 = sst [smem:[#allocation31_spill]] %s4689_s3 }
   0x4   :  { %4705 = sst [smem:[#allocation32_spill]] %s4690_s4 }
   0x5   :  { %4706 = sst [smem:[#allocation33_spill]] %s4691_s5 }
   0x6   :  { %4707 = sst [smem:[#allocation34_spill]] %s4692_s6 }
   0x7   :  { %4708 = sst [smem:[#allocation35_spill]] %s4693_s7 }
   0x8   :  { %17 = vsyncpa [#allocation7], 0 }
   0x9   :  { %19 = vsyncpa [#allocation7 + $0x1], 0 }
   0xa   :  { %20 = vsyncpa [#allocation10], 0 }
   0xb   :  { %22 = vsyncpa [#allocation10 + $0x1], 0 }
   0xc   :  { %23 = vsyncpa [#allocation13], 0 }
   0xd   :  { %24 = vsyncpa [#allocation16], 0 }
   0xe   :  { %25 = vsyncpa [#allocation19], 0 }
   0xf   :  { %26 = vsyncpa [#allocation8], 0 }
  0x10   :  { %28 = vsyncpa [#allocation8 + $0x1], 0  ;;  %s3690_s15 = smov 0   ;;  %s3692_s16 = smov 0  }
  0x11   :  { %s3694_s17 = smov 0   ;;  %s3696_s18 = smov 0  }
  0x12 LB: > { %s3595_s9 = smov [#allocation11]   ;;  %s3711_s20 = sadd.s32 4294967295, %s3593_s18   ;;  %s3593_s18 = sphi %s3696_s18, %s4742_s18   ;;  %s3589_s17 = sphi %s3694_s17, %s4741_s17   ;;  %s3585_s16 = sphi %s3692_s16, %s4740_s16   ;;  %s3581_s15 = sphi %s3690_s15, %s4739_s15  }
  0x13   : > { %s298_s19 = sshll.u32 %s3595_s9, 4  ;;  %p2854_p0 = scmp.ge.s32.totalorder %s3593_s18, 1  ;;  %s3716_s19 = int_to_ptr.vmem [resolvable:$true] %s298_s19 }
  0x14   : > { %p4697_p1 = scmp.eq.s32.totalorder %s3711_s20, 0  ;;  %p285_p2 = scmp.lt.s32.totalorder %s3593_s18, 3 }
  0x15   : > { %s3596_s22 = smov [#allocation12]   ;;  %s3597_s24 = smov [#allocation15]  }
  0x16   : > { %p3718_p3 = pnand %p2854_p0, %p285_p2  ;;  %s309_s23 = sshll.u32 %s3596_s22, 4  ;;  %s3725_s23 = int_to_ptr.vmem [resolvable:$true] %s309_s23 }
  0x17   : > { %s333_s25 = sshll.u32 %s3597_s24, 4  ;;  %s3598_s27 = smov [#allocation18]   ;;  %s3733_s25 = int_to_ptr.vmem [resolvable:$true] %s333_s25 }
  0x18   : > { %s4709_s21 = scalar_select %p3718_p3, 1, 0 }
  0x19   : > { %p3120_p5 = pneg %p3718_p3  ;;  %s3735_s28 = sshll.u32 %s3598_s27, 4  ;;  %s358_s28 = int_to_ptr.vmem [resolvable:$true] %s3735_s28 }
  0x1a   : > { %s4711_s2 = sld [smem:[#allocation30_spill]] }
  0x1b   : > { %p3729_p6 = pnand %p3120_p5, %p4697_p1 }
  0x1d   : > { %p3745_p8 = pneg %p3729_p6 }
  0x20   : > { %s3251_s11 = scalar_lea.hbm %s4711_s2, 48 }
  0x21   : > { %p3252_p7 = scmp.ne.s32.totalorder %s4711_s2, %s3251_s11  ;;  %p3258_p11 = scmp.lt.u32.totalorder %s3251_s11, %s4711_s2 }
  0x23   : > { %p3254_p9 = pnand %p3745_p8, %p3252_p7 }
  0x25   : > { %p3255_p10 = pneg %p3254_p9 }
  0x27   : > { %p3260_p12 = pnand %p3258_p11, %p3255_p10 }
  0x29   : > { %3263 = shalt.err (!%p3260_p12)
}
  0x2a   : > { %s3264_s24 = scalar_lea.vmem %s3716_s19, 48  ;;  %s3271_s27 = scalar_lea.vmem %s3716_s19, 64 }
  0x2b   : > { %p3265_p13 = scmp.ne.s32.totalorder %s3716_s19, %s3264_s24  ;;  %p3272_p5 = scmp.lt.s32.totalorder %s3716_s19, %s3716_s19 }
  0x2c   : > { %p3273_p7 = scmp.lt.s32.totalorder %s3271_s27, %s3264_s24 }
  0x2d   : > { %p3267_p0 = pnand %p3265_p13, %p3745_p8 }
  0x2e   : > { %p3274_p9 = por %p3273_p7, %p3272_p5 }
  0x2f   : > { %p3268_p2 = pneg %p3267_p0 }
  0x31   : > { %p3275_p4 = pnand %p3274_p9, %p3268_p2 }
  0x33   : > { %3278 = shalt.err (!%p3275_p4)
}
  0x34   : > { %3123 = dma.hbm_to_vmem [thread:$0]  (!%p3729_p6), %s4711_s2, 48, %s3716_s19, [#allocation10]  }
  0x35   : > { %s4713_s3 = sld [smem:[#allocation31_spill]] }
  0x3b   : > { %s3279_s13 = scalar_lea.hbm %s4713_s3, 128 }
  0x3c   : > { %p3280_p10 = scmp.ne.s32.totalorder %s4713_s3, %s3279_s13  ;;  %p3286_p4 = scmp.lt.u32.totalorder %s3279_s13, %s4713_s3 }
  0x3e   : > { %p3282_p11 = pnand %p3280_p10, %p3745_p8 }
  0x40   : > { %p3283_p12 = pneg %p3282_p11 }
  0x42   : > { %p3288_p13 = pnand %p3286_p4, %p3283_p12 }
  0x44   : > { %3291 = shalt.err (!%p3288_p13)
}
  0x45   : > { %s3292_s19 = scalar_lea.vmem %s3725_s23, 128  ;;  %p3300_p7 = scmp.lt.s32.totalorder %s3725_s23, %s3725_s23 }
  0x46   : > { %p3293_p0 = scmp.ne.s32.totalorder %s3725_s23, %s3292_s19  ;;  %p3301_p9 = scmp.lt.s32.totalorder %s3292_s19, %s3292_s19 }
  0x48   : > { %p3295_p2 = pnand %p3293_p0, %p3745_p8  ;;  %p3302_p10 = por %p3301_p9, %p3300_p7 }
  0x4a   : > { %p3296_p5 = pneg %p3295_p2 }
  0x4c   : > { %p3303_p11 = pnand %p3302_p10, %p3296_p5 }
  0x4e   : > { %3306 = shalt.err (!%p3303_p11)
}
  0x4f   : > { %3126 = dma.hbm_to_vmem [thread:$0]  (!%p3729_p6), %s4713_s3, 128, %s3725_s23, [#allocation13]  }
  0x50   : > { %s4714_s5 = sld [smem:[#allocation33_spill]] }
  0x56   : > { %s3307_s13 = scalar_lea.hbm %s4714_s5, 128 }
  0x57   : > { %p3308_p12 = scmp.ne.s32.totalorder %s4714_s5, %s3307_s13  ;;  %p3314_p0 = scmp.lt.u32.totalorder %s3307_s13, %s4714_s5 }
  0x59   : > { %p3310_p4 = pnand %p3308_p12, %p3745_p8 }
  0x5b   : > { %p3311_p13 = pneg %p3310_p4 }
  0x5d   : > { %p3316_p2 = pnand %p3314_p0, %p3311_p13 }
  0x5f   : > { %3319 = shalt.err (!%p3316_p2)
}
  0x60   : > { %s3320_s23 = scalar_lea.vmem %s3733_s25, 128  ;;  %p3328_p10 = scmp.lt.s32.totalorder %s3733_s25, %s3733_s25 }
  0x61   : > { %p3321_p5 = scmp.ne.s32.totalorder %s3733_s25, %s3320_s23  ;;  %p3329_p11 = scmp.lt.s32.totalorder %s3320_s23, %s3320_s23 }
  0x63   : > { %p3323_p7 = pnand %p3321_p5, %p3745_p8  ;;  %p3330_p12 = por %p3329_p11, %p3328_p10 }
  0x65   : > { %p3324_p9 = pneg %p3323_p7 }
  0x67   : > { %p3331_p4 = pnand %p3330_p12, %p3324_p9 }
  0x69   : > { %3334 = shalt.err (!%p3331_p4)
}
  0x6a   : > { %3132 = dma.hbm_to_vmem [thread:$0]  (!%p3729_p6), %s4714_s5, 128, %s3733_s25, [#allocation16]  }
  0x6b   : > { %s3599_s30 = smov [#allocation14]   ;;  %s4715_s7 = sld [smem:[#allocation35_spill]] }
  0x6c   : > { %s319_s11 = sshll.u32 %s3599_s30, 4  ;;  %s320_s11 = int_to_ptr.vmem [resolvable:$true] %s319_s11 }
  0x71   : > { %s3335_s9 = scalar_lea.hbm %s4715_s7, 128 }
  0x72   : > { %p3336_p13 = scmp.ne.s32.totalorder %s4715_s7, %s3335_s9  ;;  %p3342_p5 = scmp.lt.u32.totalorder %s3335_s9, %s4715_s7 }
  0x74   : > { %p3338_p0 = pnand %p3336_p13, %p3745_p8 }
  0x76   : > { %p3339_p2 = pneg %p3338_p0 }
  0x78   : > { %p3344_p7 = pnand %p3342_p5, %p3339_p2 }
  0x7a   : > { %3347 = shalt.err (!%p3344_p7)
}
  0x7b   : > { %s3348_s25 = scalar_lea.vmem %s358_s28, 128  ;;  %p3356_p12 = scmp.lt.s32.totalorder %s358_s28, %s358_s28 }
  0x7c   : > { %p3349_p9 = scmp.ne.s32.totalorder %s358_s28, %s3348_s25  ;;  %p3357_p4 = scmp.lt.s32.totalorder %s3348_s25, %s3348_s25 }
  0x7e   : > { %p3351_p10 = pnand %p3349_p9, %p3745_p8  ;;  %p3358_p1 = por %p3357_p4, %p3356_p12 }
  0x80   : > { %p3352_p11 = pneg %p3351_p10 }
  0x82   : > { %p3359_p3 = pnand %p3358_p1, %p3352_p11 }
  0x84   : > { %3362 = shalt.err (!%p3359_p3)
}
  0x85   : > { %3138 = dma.hbm_to_vmem [thread:$0]  (!%p3729_p6), %s4715_s7, 128, %s358_s28, [#allocation19]  }
  0x86   : > { %s4716_s4 = sld [smem:[#allocation32_spill]] }
  0x8c   : > { %s3363_s13 = scalar_lea.hbm %s4716_s4, 192 }
  0x8d   : > { %p3364_p13 = scmp.ne.s32.totalorder %s4716_s4, %s3363_s13  ;;  %p3370_p3 = scmp.lt.u32.totalorder %s3363_s13, %s4716_s4 }
  0x8f   : > { %p3366_p0 = pnand %p3364_p13, %p3745_p8 }
  0x91   : > { %p3367_p1 = pneg %p3366_p0 }
  0x93   : > { %p3372_p2 = pnand %p3370_p3, %p3367_p1 }
  0x95   : > { %3375 = shalt.err (!%p3372_p2)
}
  0x96   : > { %s3376_s23 = scalar_lea.vmem %s320_s11, 192  ;;  %p3384_p10 = scmp.lt.s32.totalorder %s320_s11, %s320_s11 }
  0x97   : > { %p3377_p5 = scmp.ne.s32.totalorder %s320_s11, %s3376_s23  ;;  %p3385_p11 = scmp.lt.s32.totalorder %s3376_s23, %s3376_s23 }
  0x99   : > { %p3379_p7 = pnand %p3377_p5, %p3745_p8  ;;  %p3386_p12 = por %p3385_p11, %p3384_p10 }
  0x9b   : > { %p3380_p9 = pneg %p3379_p7 }
  0x9d   : > { %p3387_p4 = pnand %p3386_p12, %p3380_p9 }
  0x9f   : > { %3390 = shalt.err (!%p3387_p4)
}
  0xa0   : > { %s4699_s28 = smov 64   ;;  %s3601_s25 = smov 4  }
  0xa1   : > { %3129 = dma.hbm_to_vmem [thread:$0]  (!%p3729_p6), %s4716_s4, 192, %s320_s11, [#allocation13], %s4699_s28, %s4699_s28, %s3601_s25  }
  0xa2   : > { %s3602_s30 = smov [#allocation17]   ;;  %s3603_s13 = smov [#allocation20]  }
  0xa3   : > { %s343_s12 = sshll.u32 %s3602_s30, 4  ;;  %s368_s9 = sshll.u32 %s3603_s13, 4  ;;  %s344_s12 = int_to_ptr.vmem [resolvable:$true] %s343_s12  ;;  %s369_s9 = int_to_ptr.vmem [resolvable:$true] %s368_s9 }
  0xa4   : > { %s4717_s6 = sld [smem:[#allocation34_spill]] }
  0xaa   : > { %s3391_s27 = scalar_lea.hbm %s4717_s6, 192 }
  0xab   : > { %p3392_p13 = scmp.ne.s32.totalorder %s4717_s6, %s3391_s27  ;;  %p3398_p3 = scmp.lt.u32.totalorder %s3391_s27, %s4717_s6 }
  0xad   : > { %p3394_p0 = pnand %p3392_p13, %p3745_p8 }
  0xaf   : > { %p3395_p1 = pneg %p3394_p0 }
  0xb1   : > { %p3400_p2 = pnand %p3398_p3, %p3395_p1 }
  0xb3   : > { %3403 = shalt.err (!%p3400_p2)
}
  0xb4   : > { %s3404_s11 = scalar_lea.vmem %s344_s12, 192  ;;  %p3412_p10 = scmp.lt.s32.totalorder %s344_s12, %s344_s12 }
  0xb5   : > { %p3405_p5 = scmp.ne.s32.totalorder %s344_s12, %s3404_s11  ;;  %p3413_p11 = scmp.lt.s32.totalorder %s3404_s11, %s3404_s11 }
  0xb7   : > { %p3407_p7 = pnand %p3405_p5, %p3745_p8  ;;  %p3414_p12 = por %p3413_p11, %p3412_p10 }
  0xb9   : > { %p3408_p9 = pneg %p3407_p7 }
  0xbb   : > { %p3415_p4 = pnand %p3414_p12, %p3408_p9 }
  0xbd   : > { %3418 = shalt.err (!%p3415_p4)
}
  0xbe   : > { %3135 = dma.hbm_to_vmem [thread:$0]  (!%p3729_p6), %s4717_s6, 192, %s344_s12, [#allocation16], %s4699_s28, %s4699_s28, %s3601_s25  }
  0xbf   : > { %s3419_s29 = scalar_lea.hbm %s4694_s8, 128 }
  0xc0   : > { %p3420_p13 = scmp.ne.s32.totalorder %s4694_s8, %s3419_s29  ;;  %p3426_p3 = scmp.lt.u32.totalorder %s3419_s29, %s4694_s8 }
  0xc2   : > { %p3422_p0 = pnand %p3420_p13, %p3745_p8 }
  0xc4   : > { %p3423_p1 = pneg %p3422_p0 }
  0xc6   : > { %p3428_p2 = pnand %p3426_p3, %p3423_p1 }
  0xc8   : > { %3431 = shalt.err (!%p3428_p2)
}
  0xc9   : > { %s3432_s27 = scalar_lea.vmem %s369_s9, 128  ;;  %p3440_p10 = scmp.lt.s32.totalorder %s369_s9, %s369_s9 }
  0xca   : > { %p3433_p5 = scmp.ne.s32.totalorder %s369_s9, %s3432_s27  ;;  %p3441_p11 = scmp.lt.s32.totalorder %s3432_s27, %s3432_s27 }
  0xcc   : > { %p3435_p7 = pnand %p3433_p5, %p3745_p8  ;;  %p3442_p12 = por %p3441_p11, %p3440_p10 }
  0xce   : > { %p3436_p9 = pneg %p3435_p7 }
  0xd0   : > { %p3443_p4 = pnand %p3442_p12, %p3436_p9 }
  0xd2   : > { %3446 = shalt.err (!%p3443_p4)
}
  0xd3   : > { %3141 = dma.hbm_to_vmem [thread:$0]  (!%p3729_p6), %s4694_s8, 128, %s369_s9, [#allocation19]  }
  0xd4   : > { %s2853_s14 = sadd.s32 4294967294, %s3593_s18   ;;  %s3894_s26 = sadd.s32 1, %s3593_s18  }
  0xd5   : > { %s41_s11 = sadd.s32 1, %s3589_s17  ;;  %s38_s2 = ssub.s32 %s3593_s18, %s3894_s26 }
  0xd6   : > { %p48_p8 = scmp.ne.s32.totalorder %s3589_s17, %s3585_s16  ;;  %p39_p13 = scmp.eq.s32.totalorder %s38_s2, 0 }
  0xd7   : > { %p49_p0 = scmp.eq.s32.totalorder %s3593_s18, 0  ;;  %p54_p1 = scmp.ne.s32.totalorder %s3585_s16, %s3581_s15 }
  0xd8   : > { %p272_p3 = scmp.eq.s32.totalorder %s3711_s20, 1  ;;  %p4718_p5 = scmp.eq.s32.totalorder %s3711_s20, 0 }
  0xd9   : > { %s3906_s3 = scalar_select %p39_p13, %s3589_s17, %s41_s11  }
  0xda   : > { %p50_p2 = por %p49_p0, %p48_p8  ;;  %p3910_p7 = por %p4718_p5, %p54_p1 }
  0xdb   : > { %p3914_p6 = por %p272_p3, %p48_p8  ;;  %p278_p9 = scmp.eq.s32.totalorder %s2853_s14, 1 }
  0xdc   : > { %s4719_s9 = scalar_select %p3910_p7, 1, 0 }
  0xdd   : > { %s4720_s5 = scalar_select %p3914_p6, 1, 0 }
  0xde   : > { %p3160_p10 = scmp.lt.s32.totalorder %s3593_s18, 2  ;;  %s3920_s19 = sand.u32 1, %s3589_s17  }
  0xdf   : > { %p3922_p11 = por %p278_p9, %p54_p1  ;;  %s2863_s30 = sshll.u32 %s3920_s19, 3 }
  0xe0   : > { %s2921_s13 = sshll.u32 %s3593_s18, 7  ;;  %s4722_s0 = sld [smem:[#allocation29_spill]] }
  0xe1   : > { %s4721_s29 = scalar_select %p3922_p11, 1, 0 }
  0xe2   : > { %s386_s12 = scalar_lea.vmem [#allocation6], %s2863_s30  ;;  %p3933_p12 = pnand %p3160_p10, %p50_p2 }
  0xe3   : > { %s393_s23 = sshll.u32 %s386_s12, 4  ;;  %s383_s2 = scalar_lea.sflag [#allocation7], %s3920_s19  ;;  %s3937_s23 = int_to_ptr.vmem [resolvable:$true] %s393_s23 }
  0xe4   : > { %p3449_p8 = pneg %p3933_p12 }
  0xe6   : > { %s3931_s27 = scalar_lea.hbm %s4722_s0, %s2921_s13  ;;  %s3452_s22 = scalar_lea.hbm %s4722_s0, 256 }
  0xe7   : > { %s3447_s28 = scalar_lea.hbm %s3931_s27, 128  ;;  %p3453_p1 = scmp.lt.u32.totalorder %s3931_s27, %s4722_s0 }
  0xe8   : > { %p3448_p4 = scmp.ne.s32.totalorder %s3931_s27, %s3447_s28  ;;  %p3454_p3 = scmp.lt.u32.totalorder %s3452_s22, %s3447_s28 }
  0xe9   : > { %p3456_p5 = scmp.lt.u32.totalorder %s3447_s28, %s3931_s27 }
  0xea   : > { %p3450_p13 = pnand %p3449_p8, %p3448_p4  ;;  %p3455_p2 = por %p3454_p3, %p3453_p1 }
  0xec   : > { %p3451_p0 = pneg %p3450_p13  ;;  %p3457_p9 = por %p3456_p5, %p3455_p2 }
  0xee   : > { %p3458_p10 = pnand %p3457_p9, %p3451_p0 }
  0xf0   : > { %3461 = shalt.err (!%p3458_p10)
}
  0xf1   : > { %s3462_s11 = scalar_lea.vmem %s3937_s23, 128  ;;  %s3604_s30 = smov [#allocation6]  }
  0xf2   : > { %p3463_p4 = scmp.ne.s32.totalorder %s3937_s23, %s3462_s11  ;;  %s3467_s13 = sshll.u32 %s3604_s30, 4  ;;  %s3468_s13 = int_to_ptr.vmem [resolvable:$false] %s3467_s13 }
  0xf3   : > { %s3469_s24 = scalar_lea.vmem %s3468_s13, 256  ;;  %p3470_p6 = scmp.lt.s32.totalorder %s3937_s23, %s3468_s13 }
  0xf4   : > { %p3465_p13 = pnand %p3463_p4, %p3449_p8  ;;  %p3471_p1 = scmp.lt.s32.totalorder %s3469_s24, %s3462_s11 }
  0xf6   : > { %p3466_p11 = pneg %p3465_p13  ;;  %p3472_p3 = por %p3471_p1, %p3470_p6 }
  0xf8   : > { %p3473_p2 = pnand %p3472_p3, %p3466_p11 }
  0xfa   : > { %3476 = shalt.err (!%p3473_p2)
}
  0xfb   : > { %s4724_s28 = smov 64   ;;  %s3081_s22 = smul.u32 12, %s3920_s19 }
  0xfc   : > { %3145 = dma.hbm_to_vmem [thread:$0]  (!%p3933_p12), %s3931_s27, 128, %s3937_s23, %s383_s2, %s4724_s28, %s4724_s28, %s3601_s25  }
  0xfd   : > { %s3082_s12 = smul.u32 192, %s3593_s18  ;;  %s407_s24 = scalar_lea.vmem [#allocation9], %s3081_s22 }
  0xfe   : > { %s415_s0 = sshll.u32 %s407_s24, 4  ;;  %s4725_s4 = sand.u32 1, %s3593_s18   ;;  %s416_s0 = int_to_ptr.vmem [resolvable:$true] %s415_s0 }
  0xff   : > { %s3976_s13 = scalar_lea.hbm %s4687_s1, %s3082_s12  ;;  %s404_s6 = scalar_lea.sflag [#allocation10], %s4725_s4 }
 0x100   : > { %s3477_s7 = scalar_lea.hbm %s3976_s13, 192  ;;  %s3482_s27 = scalar_lea.hbm %s4687_s1, 384 }
 0x101   : > { %p3478_p6 = scmp.ne.s32.totalorder %s3976_s13, %s3477_s7  ;;  %p3483_p5 = scmp.lt.u32.totalorder %s3976_s13, %s4687_s1 }
 0x102   : > { %p3484_p9 = scmp.lt.u32.totalorder %s3482_s27, %s3477_s7  ;;  %p3486_p4 = scmp.lt.u32.totalorder %s3477_s7, %s3976_s13 }
 0x103   : > { %p3480_p11 = pnand %p3478_p6, %p3449_p8 }
 0x104   : > { %p3485_p10 = por %p3484_p9, %p3483_p5 }
 0x105   : > { %p3481_p0 = pneg %p3480_p11 }
 0x106   : > { %p3487_p13 = por %p3486_p4, %p3485_p10 }
 0x108   : > { %p3488_p1 = pnand %p3487_p13, %p3481_p0 }
 0x10a   : > { %3491 = shalt.err (!%p3488_p1)
}
 0x10b   : > { %s3492_s4 = scalar_lea.vmem %s416_s0, 192  ;;  %s3605_s28 = smov [#allocation9]  }
 0x10c   : > { %p3493_p3 = scmp.ne.s32.totalorder %s416_s0, %s3492_s4  ;;  %s3497_s22 = sshll.u32 %s3605_s28, 4  ;;  %s3498_s22 = int_to_ptr.vmem [resolvable:$false] %s3497_s22 }
 0x10d   : > { %s3499_s12 = scalar_lea.vmem %s3498_s22, 384  ;;  %p3500_p11 = scmp.lt.s32.totalorder %s416_s0, %s3498_s22 }
 0x10e   : > { %p3495_p2 = pnand %p3493_p3, %p3449_p8  ;;  %p3501_p7 = scmp.lt.s32.totalorder %s3499_s12, %s3492_s4 }
 0x110   : > { %p3496_p6 = pneg %p3495_p2  ;;  %p3502_p5 = por %p3501_p7, %p3500_p11 }
 0x112   : > { %p3503_p9 = pnand %p3502_p5, %p3496_p6 }
 0x114   : > { %3506 = shalt.err (!%p3503_p9)
}
 0x115   : > { %3148 = dma.hbm_to_vmem [thread:$0]  (!%p3933_p12), %s3976_s13, 192, %s416_s0, %s404_s6  }
 0x116   : > { %p4726_p0 = scmp.ne.s32.totalorder %s4709_s21, 0 }
 0x117   : > { %s4002_s7 = sand.u32 (!%p4726_p0), 1, %s3585_s16   ;;  %p4727_p7 = scmp.ne.s32.totalorder (!%p4726_p0), %s4719_s9, 0 }
 0x118   : > { %424 = sbr.rel (%p4726_p0) target bundleno = 2394 (0x95a), region = 60  ;;  %s2868_s11 = sshll.u32 (!%p4726_p0), %s4002_s7, 3 }
 0x119   : > { %s427_s30 = scalar_lea.sflag (!%p4726_p0), [#allocation7], %s4002_s7  ;;  %s4006_s24 = scalar_lea.vmem (!%p4726_p0), [#allocation6], %s2868_s11 }
 0x11f   : > { %3552 = dma.done.wait (%p4727_p7), %s427_s30, 128  }
 0x120   : > { %3554 = vsyncadd (%p4727_p7), %s427_s30, 4294967168  ;;  %s435_s0 = sand.u32 1, %s3711_s20   ;;  %s3083_s6 = smul.u32 12, %s4002_s7 }
 0x121   : > { %s436_s21 = scalar_lea.sflag [#allocation10], %s435_s0 }
 0x122   : > { %s4014_s14 = scalar_lea.vmem [#allocation9], %s3083_s6 }
 0x123   : > { %3556 = dma.done.wait (%p4727_p7), %s436_s21, 192  }
 0x124   : > { %3558 = vsyncadd (%p4727_p7), %s436_s21, 4294967104  ;;  %p4728_p12 = scmp.eq.s32.totalorder %s3711_s20, 0 }
 0x126   : > { %3560 = dma.done.wait (%p4728_p12), [#allocation10], 48   ;;  %p4729_p8 = pmov %p4728_p12 }
 0x128   : > { %3562 = vsyncadd (%p4729_p8), [#allocation10], 4294967248  ;;  %p4730_p10 = pmov %p4729_p8 }
 0x129   : > { %p4731_p4 = pmov %p4729_p8 }
 0x12a   : > { %3564 = dma.done.wait (%p4730_p10), [#allocation13], 320  }
 0x12b   : > { %3566 = vsyncadd (%p4731_p4), [#allocation13], 4294966976  ;;  %p4732_p13 = pmov %p4731_p4 }
 0x12c   : > { %p4733_p1 = pmov %p4731_p4 }
 0x12d   : > { %3568 = dma.done.wait (%p4732_p13), [#allocation16], 320  }
 0x12e   : > { %3570 = vsyncadd (%p4733_p1), [#allocation16], 4294966976  ;;  %p4734_p3 = pmov %p4733_p1 }
 0x12f   : > { %p4735_p2 = pmov %p4733_p1 }
 0x130   : > { %3572 = dma.done.wait (%p4734_p3), [#allocation19], 256  }
 0x131   : > { %3574 = vsyncadd (%p4735_p2), [#allocation19], 4294967040  ;;  %v3606_v1 = vmov 0.0   ;;  %vm3607_vm0 = vmmov 0   ;;  %v3237_v2 = vld [vmem:[%s4006_s24] sm:$0xff]   ;;  %s3608_s9 = smov 117  }
 0x132   : > { %2967 = vmatprep.subr.mxu0 %v3606_v1  ;;  %2969 = vmatprep.mubr.msk.bf16.mxu0 %vm3607_vm0, %v3606_v1  ;;  %v3238_v3 = vld [vmem:[%s4006_s24] sm:$0xff]   ;;  %s3609_s13 = smov 97   ;;  %s3610_s25 = smov 107   ;;  %vm521_vm1 = vcmask 64512   ;;  %vm599_vm2 = vcmask 146432   ;;  %vm691_vm3 = vcmask 294032  }
 0x133   : > { %2973 = vmatprep.subr.mxu1 %v3606_v1  ;;  %2975 = vmatprep.mubr.msk.bf16.mxu1 %vm3607_vm0, %v3606_v1  ;;  %v3239_v4 = vld [vmem:[%s4006_s24] sm:$0xff]   ;;  %s3611_s19 = smov 87   ;;  %s3612_s27 = smov 77   ;;  %vm783_vm4 = vcmask 441632   ;;  %vm875_vm5 = vcmask 589232   ;;  %vm967_vm6 = vcmask 736832  }
 0x134   : > { %519 = vrot.lane.b32.xlu0 %v3237_v2, %s3608_s9  ;;  %700 = vrot.lane.b32.xlu1 %v3239_v4, %s3609_s13  ;;  %v3240_v5 = vld [vmem:[%s4006_s24] sm:$0xff]   ;;  %s3613_s23 = smov 67   ;;  %s3614_s2 = smov 57   ;;  %vm1059_vm7 = vcmask 884432   ;;  %vm1151_vm8 = vcmask 1032032   ;;  %vm1243_vm9 = vcmask 1048560  }
 0x135   : > { %v3241_v6 = vld [vmem:[%s4006_s24] sm:$0xff]   ;;  %s3615_s4 = smov 47   ;;  %s3616_s28 = smov 18   ;;  %vm1245_vm10 = vcmask 130048   ;;  %vm1578_vm11 = vcmask 900096   ;;  %vm1248_vm12 = vcmask 556432  }
 0x136   : > { %v3242_v7 = vld [vmem:[%s4006_s24] sm:$0xff]   ;;  %s3617_s22 = smov 36   ;;  %s3618_s12 = smov 54   ;;  %vm1432_vm13 = vcmask 277632   ;;  %vm1456_vm14 = vcmask 425232   ;;  %vm1480_vm15 = vcmask 572832  }
 0x137   : > { %v511_v8 = vld [vmem:[#allocation12] sm:$0xff]  ;;  %s3619_s11 = smov 72   ;;  %s3620_s30 = smov 90  }
 0x138   : > { %608 = vrot.lane.b32.xlu0 %v3238_v3, %s3610_s25  ;;  %792 = vrot.lane.b32.xlu1 %v3240_v5, %s3611_s19  ;;  %v3243_v9 = vld [vmem:[%s4006_s24] sm:$0xff]   ;;  %s3622_s0 = smov 126   ;;  %s3623_s6 = smov 110  }
 0x139   : > { %2968 = vmatpush3.msra.mxu0 %v511_v8  ;;  %2974 = vmatpush3.msra.mxu1 %v511_v8  ;;  %v3244_v10 = vld [vmem:[%s4006_s24] sm:$0xff]   ;;  %s3621_s24 = smov 108   ;;  %s3624_s21 = smov 34  }
 0x13a   : > { %2979 = vmatprep.subr.mxu0 %v3606_v1  ;;  %2985 = vmatprep.subr.mxu1 %v3606_v1  ;;  %s3626_s9 = smov 16   ;;  %s3627_s13 = smov 127  }
 0x13b   : > { %s3629_s25 = smov 19   ;;  %s3084_s19 = smul.u32 3, %s4002_s7 }
 0x13c   : > { %884 = vrot.lane.b32.xlu0 %v3241_v6, %s3612_s27  ;;  %976 = vrot.lane.b32.xlu1 %v3242_v7, %s3613_s23  ;;  %s3085_s23 = smul.u32 48, %s3711_s20  ;;  %p4736_p11 = scmp.ne.s32.totalorder %s4720_s5, 0 }
 0x13d   : > { %s508_s27 = scalar_lea.vmem [#allocation21], %s3084_s19  ;;  %s3631_s20 = smov [#allocation21]  }
 0x140   : > { %1068 = vrot.lane.b32.xlu0 %v3243_v9, %s3614_s2  ;;  %1160 = vrot.lane.b32.xlu1 %v3244_v10, %s3615_s4  ;;  %s2694_s2 = sshll.u32 %s508_s27, 4  ;;  %s4643_s2 = int_to_ptr.vmem [resolvable:$true] %s2694_s2 }
 0x1a6   : > { %v520_v11 = vpop.permute.xlu0 %519  ;;  %v701_v13 = vpop.permute.xlu1 %700 }
 0x1a7   : > { %2970 = vmatmul.mubr.msk.bf16.vlgmr.msra.gmra.mrb[0].mxu0 %vm521_vm1, %v520_v11 }
 0x1a8   : > { %2980 = vmatpush3.msra.mxu0 %v511_v8  ;;  %2981 = vmatprep.mubr.msk.bf16.mxu0 %vm3607_vm0, %v3606_v1 }
 0x1a9   : > { %2991 = vmatprep.subr.mxu0 %v3606_v1 }
 0x1aa   : > { %v609_v12 = vpop.permute.xlu0 %608  ;;  %v793_v14 = vpop.permute.xlu1 %792 }
 0x1ab   : > { %2976 = vmatmul.mubr.msk.bf16.vlgmr.msra.gmra.mrb[0].mxu1 %vm521_vm1, %v609_v12 }
 0x1ac   : > { %2986 = vmatpush3.msra.mxu1 %v511_v8  ;;  %2987 = vmatprep.mubr.msk.bf16.mxu1 %vm3607_vm0, %v3606_v1 }
 0x1ad   : > { %2997 = vmatprep.subr.mxu1 %v3606_v1 }
 0x1ae   : > { %v885_v15 = vpop.permute.xlu0 %884  ;;  %v977_v16 = vpop.permute.xlu1 %976 }
 0x1af   : > { %2982 = vmatmul.mubr.msk.bf16.vlgmr.msra.gmra.mrb[4].mxu0 %vm521_vm1, %v701_v13 }
 0x1b0   : > { %2992 = vmatpush3.msra.mxu0 %v511_v8  ;;  %2993 = vmatprep.mubr.msk.bf16.mxu0 %vm3607_vm0, %v3606_v1 }
 0x1b1   : > { %3003 = vmatprep.subr.mxu0 %v3606_v1 }
 0x1b2   : > { %v1069_v17 = vpop.permute.xlu0 %1068  ;;  %v1161_v18 = vpop.permute.xlu1 %1160 }
 0x1b3   : > { %2988 = vmatmul.mubr.msk.bf16.vlgmr.msra.gmra.mrb[4].mxu1 %vm521_vm1, %v793_v14 }
 0x1b4   : > { %2998 = vmatpush3.msra.mxu1 %v511_v8  ;;  %2999 = vmatprep.mubr.msk.bf16.mxu1 %vm3607_vm0, %v3606_v1 }
 0x1b5   : > { %3009 = vmatprep.subr.mxu1 %v3606_v1 }
 0x1b7   : > { %2994 = vmatmul.mubr.msk.bf16.vlgmr.msra.gmra.mrb[8].mxu0 %vm521_vm1, %v885_v15 }
 0x1b8   : > { %3004 = vmatpush3.msra.mxu0 %v511_v8  ;;  %3005 = vmatprep.mubr.msk.bf16.mxu0 %vm3607_vm0, %v3606_v1 }
 0x1bb   : > { %3000 = vmatmul.mubr.msk.bf16.vlgmr.msra.gmra.mrb[8].mxu1 %vm521_vm1, %v977_v16 }
 0x1bc   : > { %3010 = vmatpush3.msra.mxu1 %v511_v8  ;;  %3011 = vmatprep.mubr.msk.bf16.mxu1 %vm3607_vm0, %v3606_v1 }
 0x1bd   : > { %3015 = vmatprep.subr.bf16.mxu1 %v3606_v1 }
 0x1bf   : > { %3006 = vmatmul.mubr.msk.bf16.vlgmr.msra.gmra.mrb[12].mxu0 %vm521_vm1, %v1069_v17 }
 0x1c3   : > { %3012 = vmatmul.mubr.msk.bf16.vlgmr.msra.gmra.mrb[12].mxu1 %vm521_vm1, %v1161_v18  ;;  %vm1504_vm1 = vcmask 720432  }
 0x1c4   : > { %3025 = vmatprep.mubr.msk.bf16.mxu1 %vm3607_vm0, %v3606_v1 }
 0x27a   : > { %v591_v19 = vpop.f32.mrb[0].mxu0 }
 0x27b   : > { %v2971_v20 = vpop.f32.mrb[1].mxu0 }
 0x27c   : > { %v594_v21 = vpop.f32.mrb[2].mxu0 }
 0x27d   : > { %v598_v22 = vpack.c.bf16 %v594_v21, %v591_v19  ;;  %v2972_v23 = vpop.f32.mrb[3].mxu0 }
 0x27e   : > { %v679_v24 = vpop.f32.mrb[0].mxu1 }
 0x27f   : > { %600 = vst.msk [vmem:[#allocation3] sm:$0xff] %vm599_vm2, %v598_v22  ;;  %v2977_v25 = vpop.f32.mrb[1].mxu1 }
 0x280   : > { %v682_v26 = vpop.f32.mrb[2].mxu1 }
 0x281   : > { %v686_v27 = vpack.c.bf16 %v682_v26, %v679_v24  ;;  %v2978_v28 = vpop.f32.mrb[3].mxu1 }
 0x282   : > { %v771_v29 = vpop.f32.mrb[4].mxu0 }
 0x283   : > { %688 = vrot.lane.b32.xlu0 %v686_v27, %s3616_s28  ;;  %v2983_v30 = vpop.f32.mrb[5].mxu0 }
 0x284   : > { %v774_v31 = vpop.f32.mrb[6].mxu0 }
 0x285   : > { %v778_v32 = vpack.c.bf16 %v774_v31, %v771_v29  ;;  %v2984_v33 = vpop.f32.mrb[7].mxu0 }
 0x286   : > { %v863_v34 = vpop.f32.mrb[4].mxu1 }
 0x287   : > { %v2989_v35 = vpop.f32.mrb[5].mxu1  ;;  %780 = vrot.lane.b32.xlu1 %v778_v32, %s3617_s22 }
 0x288   : > { %v866_v36 = vpop.f32.mrb[6].mxu1 }
 0x289   : > { %v870_v37 = vpack.c.bf16 %v866_v36, %v863_v34  ;;  %v2990_v38 = vpop.f32.mrb[7].mxu1 }
 0x28a   : > { %v955_v39 = vpop.f32.mrb[8].mxu0 }
 0x28b   : > { %872 = vrot.lane.b32.xlu0 %v870_v37, %s3618_s12  ;;  %v2995_v40 = vpop.f32.mrb[9].mxu0 }
 0x28c   : > { %v958_v41 = vpop.f32.mrb[10].mxu0 }
 0x28d   : > { %v962_v42 = vpack.c.bf16 %v958_v41, %v955_v39  ;;  %v2996_v43 = vpop.f32.mrb[11].mxu0 }
 0x28e   : > { %v1047_v44 = vpop.f32.mrb[8].mxu1 }
 0x28f   : > { %v3001_v45 = vpop.f32.mrb[9].mxu1  ;;  %964 = vrot.lane.b32.xlu1 %v962_v42, %s3619_s11 }
 0x290   : > { %v1050_v46 = vpop.f32.mrb[10].mxu1 }
 0x291   : > { %v1054_v47 = vpack.c.bf16 %v1050_v46, %v1047_v44  ;;  %v3002_v48 = vpop.f32.mrb[11].mxu1 }
 0x292   : > { %v1139_v49 = vpop.f32.mrb[12].mxu0 }
 0x293   : > { %1056 = vrot.lane.b32.xlu0 %v1054_v47, %s3620_s30  ;;  %v3007_v50 = vpop.f32.mrb[13].mxu0 }
 0x294   : > { %v1142_v51 = vpop.f32.mrb[14].mxu0 }
 0x295   : > { %v1146_v52 = vpack.c.bf16 %v1142_v51, %v1139_v49  ;;  %v3008_v53 = vpop.f32.mrb[15].mxu0 }
 0x296   : > { %v1231_v54 = vpop.f32.mrb[12].mxu1 }
 0x297   : > { %v3013_v55 = vpop.f32.mrb[13].mxu1  ;;  %1148 = vrot.lane.b32.xlu1 %v1146_v52, %s3621_s24 }
 0x298   : > { %v1234_v56 = vpop.f32.mrb[14].mxu1 }
 0x299   : > { %v1238_v57 = vpack.c.bf16 %v1234_v56, %v1231_v54  ;;  %v3014_v58 = vpop.f32.mrb[15].mxu1 }
 0x29b   : > { %1240 = vrot.lane.b32.xlu0 %v1238_v57, %s3622_s0 }
 0x2f5   : > { %v689_v59 = vpop.permute.xlu0 %688 }
 0x2f6   : > { %692 = vst.msk [vmem:[#allocation3] sm:$0xff] %vm691_vm3, %v689_v59  ;;  %v3625_v59 = vmov 0  }
 0x2f7   : > { %1247 = vst.msk [vmem:[#allocation2] sm:$0xff] %vm599_vm2, %v3625_v59  ;;  %1858 = vmatprep.mubr.bf16.mxu0 %v3625_v59  ;;  %3235 = vset.pattern.permute.xlu0 %v3625_v59  ;;  %vm1528_vm2 = vcmask 868032  }
 0x2f8   : > { %3236 = vset.pattern.permute.xlu1 %v3625_v59  ;;  %1249 = vst.msk [vmem:[#allocation2 + $0x10] sm:$0xff] %vm1248_vm12, %v3625_v59  ;;  %vm1592_vm12 = vcmask 113664  }
 0x2f9   : > { %v781_v60 = vpop.permute.xlu1 %780 }
 0x2fa   : > { %784 = vst.msk [vmem:[#allocation3] sm:$0xff] %vm783_vm4, %v781_v60 }
 0x2fd   : > { %v873_v61 = vpop.permute.xlu0 %872 }
 0x2fe   : > { %876 = vst.msk [vmem:[#allocation3] sm:$0xff] %vm875_vm5, %v873_v61 }
 0x301   : > { %v965_v62 = vpop.permute.xlu1 %964 }
 0x302   : > { %968 = vst.msk [vmem:[#allocation3] sm:$0xff] %vm967_vm6, %v965_v62 }
 0x305   : > { %v1057_v63 = vpop.permute.xlu0 %1056 }
 0x306   : > { %1060 = vst.msk [vmem:[#allocation3] sm:$0xff] %vm1059_vm7, %v1057_v63 }
 0x309   : > { %v1149_v0 = vpop.permute.xlu1 %1148 }
 0x30a   : > { %1152 = vst.msk [vmem:[#allocation3] sm:$0xff] %vm1151_vm8, %v1149_v0 }
 0x30d   : > { %v1241_v2 = vpop.permute.xlu0 %1240 }
 0x30e   : > { %1244 = vst.msk [vmem:[#allocation3] sm:$0xff] %vm1243_vm9, %v1241_v2 }
 0x30f   : > { %1246 = vst.msk [vmem:[#allocation3 + $0x8] sm:$0xff] %vm1245_vm10, %v1241_v2 }
 0x315   : > { %v1386_v4 = vld [vmem:[#allocation3] sm:$0xff] }
 0x316   : > { %v1557_v3 = vld [vmem:[#allocation3 + $0x8] sm:$0xff]  ;;  %v4095_v6 = vunpack.c.l.bf16 %v1386_v4  ;;  %v4118_v16 = vunpack.c.h.bf16 %v1386_v4 }
 0x317   : > { %v1558_v5 = vunpack.c.l.bf16 %v1557_v3  ;;  %v1559_v9 = vunpack.c.h.bf16 %v1557_v3 }
 0x318   : > { %v4098_v8 = vmul.f32 0.8, %v4095_v6  ;;  %v4104_v11 = vmul.f32 0.26666668, %v4095_v6  ;;  %v4110_v13 = vmul.f32 0.0, %v4095_v6  ;;  %v1254_v25 = vmul.f32 0.0, %v4118_v16 }
 0x319   : > { %v1563_v7 = vmul.f32 0.06666667, %v1558_v5  ;;  %v1565_v10 = vmul.f32 0.06666667, %v1559_v9  ;;  %v1603_v12 = vmul.f32 0.53333336, %v1558_v5 }
 0x31a   : > { %1395 = vrot.lane.b32.xlu1 %v4098_v8, %s3623_s6  ;;  %v1605_v14 = vmul.f32 0.53333336, %v1559_v9  ;;  %v4116_v15 = vmul.f32 0.73333335, %v4095_v6  ;;  %v4124_v17 = vmul.f32 0.8, %v4118_v16  ;;  %v1641_v48 = vadd.f32 %v4095_v6, %v4110_v13 }
 0x31b   : > { %1572 = vrot.lane.b32.xlu0 %v1563_v7, %s3623_s6  ;;  %v4127_v18 = vmul.f32 0.46666667, %v4095_v6  ;;  %v4134_v19 = vmul.f32 0.26666668, %v4118_v16  ;;  %v4137_v20 = vmul.f32 0.2, %v4095_v6  ;;  %v1643_v49 = vadd.f32 %v4118_v16, %v1254_v25 }
 0x31c   : > { %v1638_v21 = vmul.f32 0.0, %v1558_v5  ;;  %v1640_v22 = vmul.f32 0.0, %v1559_v9  ;;  %v4149_v26 = vmul.f32 0.93333334, %v4095_v6  ;;  %v4157_v28 = vmul.f32 0.73333335, %v4118_v16 }
 0x31d   : > { %v4160_v29 = vmul.f32 0.6666667, %v4095_v6  ;;  %v4167_v30 = vmul.f32 0.46666667, %v4118_v16  ;;  %v4170_v31 = vmul.f32 0.06666667, %v4095_v6  ;;  %v1645_v50 = vpack.c.bf16 %v1643_v49, %v1641_v48 }
 0x31e   : > { %1419 = vrot.lane.b32.xlu1 %v4104_v11, %s3623_s6  ;;  %v4143_v23 = vadd.f32 %v1638_v21, %v1558_v5  ;;  %v4145_v24 = vadd.f32 %v1640_v22, %v1559_v9  ;;  %v1464_v32 = vmul.f32 0.2, %v4118_v16  ;;  %v4178_v33 = vmul.f32 0.06666667, %v4118_v16 }
 0x31f   : > { %1576 = vrot.lane.b32.xlu0 %v1565_v10, %s3623_s6  ;;  %v4184_v34 = vmul.f32 0.93333334, %v4118_v16  ;;  %v4187_v35 = vmul.f32 0.4, %v4095_v6  ;;  %v4194_v36 = vmul.f32 0.6666667, %v4118_v16 }
 0x320   : > { %v1646_v27 = vpack.c.bf16 %v4145_v24, %v4143_v23  ;;  %v4197_v37 = vmul.f32 0.13333334, %v4095_v6  ;;  %v4204_v38 = vmul.f32 0.4, %v4118_v16  ;;  %v1602_v39 = vmul.f32 0.53333336, %v4095_v6 }
 0x321   : > { %v4211_v40 = vmul.f32 0.13333334, %v4118_v16  ;;  %v1604_v41 = vmul.f32 0.53333336, %v4118_v16  ;;  %v4218_v42 = vmul.f32 0.8666667, %v4118_v16 }
 0x322   : > { %1257 = vrot.lane.b32.xlu1 %v4110_v13, %s3623_s6  ;;  %v4221_v43 = vmul.f32 0.8666667, %v4095_v6  ;;  %v4228_v44 = vmul.f32 0.6, %v4118_v16  ;;  %v4231_v45 = vmul.f32 0.6, %v4095_v6 }
 0x323   : > { %1612 = vrot.lane.b32.xlu0 %v1603_v12, %s3623_s6  ;;  %v4238_v46 = vmul.f32 0.33333334, %v4118_v16  ;;  %v4241_v47 = vmul.f32 0.33333334, %v4095_v6 }
 0x326   : > { %1443 = vrot.lane.b32.xlu1 %v4116_v15, %s3623_s6 }
 0x327   : > { %1616 = vrot.lane.b32.xlu0 %v1605_v14, %s3623_s6 }
 0x32a   : > { %1280 = vrot.lane.b32.xlu1 %v4127_v18, %s3623_s6 }
 0x32b   : > { %1397 = vrot.lane.b32.xlu0 %v4124_v17, %s3623_s6 }
 0x32e   : > { %1467 = vrot.lane.b32.xlu1 %v4137_v20, %s3623_s6 }
 0x32f   : > { %1421 = vrot.lane.b32.xlu0 %v4134_v19, %s3623_s6 }
 0x332   : > { %1303 = vrot.lane.b32.xlu1 %v4149_v26, %s3623_s6 }
 0x333   : > { %1259 = vrot.lane.b32.xlu0 %v1254_v25, %s3623_s6 }
 0x336   : > { %1491 = vrot.lane.b32.xlu1 %v4160_v29, %s3623_s6 }
 0x337   : > { %1445 = vrot.lane.b32.xlu0 %v4157_v28, %s3623_s6 }
 0x33a   : > { %1570 = vrot.lane.b32.xlu1 %v4170_v31, %s3623_s6 }
 0x33b   : > { %1282 = vrot.lane.b32.xlu0 %v4167_v30, %s3623_s6 }
 0x33e   : > { %1574 = vrot.lane.b32.xlu1 %v4178_v33, %s3623_s6 }
 0x33f   : > { %1469 = vrot.lane.b32.xlu0 %v1464_v32, %s3623_s6 }
 0x342   : > { %1326 = vrot.lane.b32.xlu1 %v4187_v35, %s3623_s6 }
 0x343   : > { %1305 = vrot.lane.b32.xlu0 %v4184_v34, %s3623_s6 }
 0x346   : > { %1515 = vrot.lane.b32.xlu1 %v4197_v37, %s3623_s6 }
 0x347   : > { %1493 = vrot.lane.b32.xlu0 %v4194_v36, %s3623_s6 }
 0x34a   : > { %1610 = vrot.lane.b32.xlu1 %v1602_v39, %s3623_s6 }
 0x34b   : > { %1328 = vrot.lane.b32.xlu0 %v4204_v38, %s3623_s6 }
 0x34e   : > { %1614 = vrot.lane.b32.xlu1 %v1604_v41, %s3623_s6 }
 0x34f   : > { %1517 = vrot.lane.b32.xlu0 %v4211_v40, %s3623_s6 }
 0x352   : > { %1349 = vrot.lane.b32.xlu1 %v4221_v43, %s3623_s6 }
 0x353   : > { %1351 = vrot.lane.b32.xlu0 %v4218_v42, %s3623_s6 }
 0x356   : > { %1539 = vrot.lane.b32.xlu1 %v4231_v45, %s3623_s6 }
 0x357   : > { %1541 = vrot.lane.b32.xlu0 %v4228_v44, %s3623_s6 }
 0x35a   : > { %1372 = vrot.lane.b32.xlu1 %v4241_v47, %s3623_s6 }
 0x35b   : > { %1374 = vrot.lane.b32.xlu0 %v4238_v46, %s3623_s6 }
 0x35e   : > { %1649 = vrot.lane.b32.xlu1 %v1645_v50, %s3624_s21 }
 0x38c   : > { %v1396_v52 = vpop.permute.xlu1 %1395 }
 0x38d   : > { %v4251_v51 = vpop.permute.xlu0 %1572  ;;  %v1401_v62 = vadd.f32 %v4137_v20, %v1396_v52 }
 0x390   : > { %v1420_v54 = vpop.permute.xlu1 %1419 }
 0x391   : > { %v4253_v53 = vpop.permute.xlu0 %1576  ;;  %v1425_v4 = vadd.f32 %v4116_v15, %v1420_v54 }
 0x394   : > { %v1258_v56 = vpop.permute.xlu1 %1257 }
 0x395   : > { %v4255_v55 = vpop.permute.xlu0 %1612  ;;  %v1263_v12 = vadd.f32 %v4095_v6, %v1258_v56 }
 0x398   : > { %v1444_v58 = vpop.permute.xlu1 %1443 }
 0x399   : > { %v4257_v57 = vpop.permute.xlu0 %1616  ;;  %v1449_v22 = vadd.f32 %v1444_v58, %v4104_v11 }
 0x39c   : > { %v1281_v61 = vpop.permute.xlu1 %1280 }
 0x39d   : > { %v1398_v60 = vpop.permute.xlu0 %1397  ;;  %v1286_v48 = vadd.f32 %v1602_v39, %v1281_v61 }
 0x39e   : > { %v1402_v63 = vadd.f32 %v1464_v32, %v1398_v60 }
 0x3a0   : > { %v1403_v0 = vpack.c.bf16 %v1402_v63, %v1401_v62  ;;  %v1468_v3 = vpop.permute.xlu1 %1467 }
 0x3a1   : > { %v1422_v2 = vpop.permute.xlu0 %1421  ;;  %v1473_v52 = vadd.f32 %v1468_v3, %v4098_v8 }
 0x3a2   : > { %v1426_v5 = vadd.f32 %v4157_v28, %v1422_v2  ;;  %1405 = vrot.lane.b32.xlu1 %v1403_v0, %s3620_s30 }
 0x3a4   : > { %v1427_v7 = vpack.c.bf16 %v1426_v5, %v1425_v4  ;;  %v1304_v10 = vpop.permute.xlu1 %1303 }
 0x3a5   : > { %v1260_v9 = vpop.permute.xlu0 %1259  ;;  %v1309_v58 = vadd.f32 %v4170_v31, %v1304_v10 }
 0x3a6   : > { %v1264_v13 = vadd.f32 %v4118_v16, %v1260_v9  ;;  %1429 = vrot.lane.b32.xlu0 %v1427_v7, %s3620_s30  ;;  %s3511_s30 = sshll.u32 %s3631_s20, 4  ;;  %s3512_s30 = int_to_ptr.vmem [resolvable:$false] %s3511_s30 }
 0x3a7   : > { %p3514_p0 = scmp.lt.s32.totalorder %s4643_s2, %s3512_s30 }
 0x3a8   : > { %v1265_v14 = vpack.c.bf16 %v1264_v13, %v1263_v12  ;;  %v1492_v21 = vpop.permute.xlu1 %1491 }
 0x3a9   : > { %v1446_v20 = vpop.permute.xlu0 %1445  ;;  %v1497_v62 = vadd.f32 %v1492_v21, %v4241_v47 }
 0x3aa   : > { %v1450_v15 = vadd.f32 %v1446_v20, %v4134_v19  ;;  %1267 = vrot.lane.b32.xlu1 %v1265_v14, %s3616_s28 }
 0x3ac   : > { %v1451_v25 = vpack.c.bf16 %v1450_v15, %v1449_v22  ;;  %v1571_v32 = vpop.permute.xlu1 %1570 }
 0x3ad   : > { %v1283_v28 = vpop.permute.xlu0 %1282 }
 0x3ae   : > { %v1287_v49 = vadd.f32 %v1604_v41, %v1283_v28  ;;  %1453 = vrot.lane.b32.xlu0 %v1451_v25, %s3621_s24 }
 0x3b0   : > { %v1288_v6 = vpack.c.bf16 %v1287_v49, %v1286_v48  ;;  %v1575_v50 = vpop.permute.xlu1 %1574 }
 0x3b1   : > { %v1470_v16 = vpop.permute.xlu0 %1469 }
 0x3b2   : > { %v1474_v54 = vadd.f32 %v1470_v16, %v4124_v17  ;;  %1290 = vrot.lane.b32.xlu1 %v1288_v6, %s3617_s22  ;;  %s4641_s22 = scalar_lea.hbm %s4696_s10, %s3085_s23 }
 0x3b4   : > { %v1475_v11 = vpack.c.bf16 %v1474_v54, %v1473_v52  ;;  %v1327_v56 = vpop.permute.xlu1 %1326 }
 0x3b5   : > { %v1306_v19 = vpop.permute.xlu0 %1305  ;;  %v1332_v2 = vadd.f32 %v4231_v45, %v1327_v56 }
 0x3b6   : > { %v1310_v60 = vadd.f32 %v4178_v33, %v1306_v19  ;;  %1477 = vrot.lane.b32.xlu0 %v1475_v11, %s3621_s24  ;;  %s3513_s24 = scalar_lea.vmem %s3512_s30, 96 }
 0x3b8   : > { %v1311_v39 = vpack.c.bf16 %v1310_v60, %v1309_v58  ;;  %v1516_v61 = vpop.permute.xlu1 %1515 }
 0x3b9   : > { %v1494_v41 = vpop.permute.xlu0 %1493  ;;  %v1521_v5 = vadd.f32 %v1516_v61, %v4221_v43 }
 0x3ba   : > { %v1498_v8 = vadd.f32 %v1494_v41, %v4238_v46  ;;  %1313 = vrot.lane.b32.xlu1 %v1311_v39, %s3618_s12 }
 0x3bc   : > { %v1499_v17 = vpack.c.bf16 %v1498_v8, %v1497_v62  ;;  %v1611_v0 = vpop.permute.xlu1 %1610 }
 0x3bd   : > { %v1329_v63 = vpop.permute.xlu0 %1328 }
 0x3be   : > { %v1333_v31 = vadd.f32 %v4228_v44, %v1329_v63  ;;  %1501 = vrot.lane.b32.xlu0 %v1499_v17, %s3622_s0 }
 0x3c0   : > { %v1334_v33 = vpack.c.bf16 %v1333_v31, %v1332_v2  ;;  %v1615_v4 = vpop.permute.xlu1 %1614 }
 0x3c1   : > { %v1518_v3 = vpop.permute.xlu0 %1517  ;;  %v1619_v7 = vsel %vm1578_vm11, %v1615_v4, %v4257_v57  ;;  %v1580_v57 = vsel %vm1578_vm11, %v1575_v50, %v4253_v53 }
 0x3c2   : > { %v1522_v47 = vadd.f32 %v1518_v3, %v4218_v42  ;;  %1336 = vrot.lane.b32.xlu1 %v1334_v33, %s3618_s12  ;;  %v1618_v42 = vsel %vm1578_vm11, %v1611_v0, %v4255_v55  ;;  %v1623_v43 = vadd.f32 %v1619_v7, %v4167_v30  ;;  %v1579_v55 = vsel %vm1578_vm11, %v1571_v32, %v4251_v51  ;;  %s2680_s12 = scalar_lea.sflag [#allocation8], %s4002_s7 }
 0x3c3   : > { %v1584_v30 = vadd.f32 %v1580_v57, %v4184_v34  ;;  %v1583_v25 = vadd.f32 %v1579_v55, %v4149_v26  ;;  %v4323_v26 = vld [vmem:[%s4014_s14 + $0x8] ss:$0 sps:$4 sm:$0xff]  }
 0x3c4   : > { %v1523_v46 = vpack.c.bf16 %v1522_v47, %v1521_v5  ;;  %v1350_v45 = vpop.permute.xlu1 %1349 }
 0x3c5   : > { %v1352_v9 = vpop.permute.xlu0 %1351  ;;  %v1355_v10 = vadd.f32 %v4197_v37, %v1350_v45  ;;  %v1585_v28 = vpack.c.bf16 %v1584_v30, %v1583_v25 }
 0x3c6   : > { %v1356_v44 = vadd.f32 %v4211_v40, %v1352_v9  ;;  %1525 = vrot.lane.b32.xlu0 %v1523_v46, %s3622_s0  ;;  %v1622_v40 = vadd.f32 %v1618_v42, %v4127_v18  ;;  %v1659_v18 = vld [vmem:[%s4014_s14] sm:$0xff]  ;;  %s3628_s14 = smov 92  }
 0x3c7   : > { %v4317_v34 = vcombine.high %v1659_v18, %v1659_v18 }
 0x3c8   : > { %v1357_v12 = vpack.c.bf16 %v1356_v44, %v1355_v10  ;;  %v1540_v14 = vpop.permute.xlu1 %1539  ;;  %v1624_v22 = vpack.c.bf16 %v1623_v43, %v1622_v40 }
 0x3c9   : > { %v1542_v13 = vpop.permute.xlu0 %1541  ;;  %v1545_v20 = vadd.f32 %v1540_v14, %v4187_v35 }
 0x3ca   : > { %v1546_v37 = vadd.f32 %v1542_v13, %v4204_v38  ;;  %1359 = vrot.lane.b32.xlu0 %v1357_v12, %s3619_s11 }
 0x3cc   : > { %v1547_v21 = vpack.c.bf16 %v1546_v37, %v1545_v20  ;;  %v1373_v53 = vpop.permute.xlu1 %1372 }
 0x3cd   : > { %v1375_v15 = vpop.permute.xlu0 %1374  ;;  %v1378_v38 = vadd.f32 %v4160_v29, %v1373_v53 }
 0x3ce   : > { %1626 = vrot.lane.b32.xlu0 %v1624_v22, %s3624_s21  ;;  %1549 = vrot.lane.b32.xlu1 %v1547_v21, %s3626_s9  ;;  %v1379_v35 = vadd.f32 %v4194_v36, %v1375_v15  ;;  %v4325_v36 = vcombine.low %v1659_v18, %v1659_v18 }
 0x3d0   : > { %v1380_v51 = vpack.c.bf16 %v1379_v35, %v1378_v38  ;;  %v1650_v23 = vpop.permute.xlu1 %1649 }
 0x3d2   : > { %1651 = vrot.lane.b32.xlu0 %v1646_v27, %s3624_s21  ;;  %1587 = vrot.lane.b32.xlu1 %v1585_v28, %s3626_s9 }
 0x3d6   : > { %1382 = vrot.lane.b32.xlu1 %v1380_v51, %s3619_s11  ;;  %1680 = vrot.lane.b32.xlu0 %v4317_v34, %s3627_s13  ;;  %s3507_s11 = scalar_lea.vmem %s4643_s2, 48 }
 0x3d7   : > { %p3508_p6 = scmp.ne.s32.totalorder %s4643_s2, %s3507_s11  ;;  %p3515_p7 = scmp.lt.s32.totalorder %s3513_s24, %s3507_s11 }
 0x3d9   : > { %p3509_p5 = pnand %p3508_p6, %p4736_p11  ;;  %p3516_p12 = por %p3515_p7, %p3514_p0 }
 0x3da   : > { %1682 = vrot.lane.b32.xlu1 %v4323_v26, %s3627_s13  ;;  %1678 = vrot.lane.b32.xlu0 %v4325_v36, %s3627_s13 }
 0x3db   : > { %p3510_p9 = pneg %p3509_p5 }
 0x3dd   : > { %p3517_p8 = pnand %p3516_p12, %p3510_p9 }
 0x3de   : > { %1700 = vrot.lane.b32.xlu0 %v4317_v34, %s3622_s0  ;;  %1702 = vrot.lane.b32.xlu1 %v4323_v26, %s3622_s0 }
 0x414   : > { %v1406_v24 = vpop.permute.xlu1 %1405 }
 0x415   : > { %1409 = vst.msk [vmem:[#allocation2 + $0x8] sm:$0xff] %vm1245_vm10, %v1406_v24  ;;  %vm1590_vm10 = vcmask 1048544  }
 0x418   : > { %v1430_v27 = vpop.permute.xlu0 %1429 }
 0x419   : > { %1433 = vst.msk [vmem:[#allocation2 + $0x8] sm:$0xff] %vm1432_vm13, %v1430_v27  ;;  %vm1656_vm13 = vcmask 408832  }
 0x41c   : > { %v1268_v29 = vpop.permute.xlu1 %1267 }
 0x41d   : > { %1270 = vst.msk [vmem:[#allocation2] sm:$0xff] %vm691_vm3, %v1268_v29  ;;  %vm1552_vm3 = vcmask 1015632  }
 0x420   : > { %v1454_v32 = vpop.permute.xlu0 %1453 }
 0x421   : > { %1457 = vst.msk [vmem:[#allocation2 + $0x8] sm:$0xff] %vm1456_vm14, %v1454_v32  ;;  %vm2029_vm14 = vcmask 752640  }
 0x424   : > { %v1291_v48 = vpop.permute.xlu1 %1290 }
 0x425   : > { %1293 = vst.msk [vmem:[#allocation2] sm:$0xff] %vm783_vm4, %v1291_v48  ;;  %vm1653_vm4 = vcmask 277504  }
 0x428   : > { %v1478_v49 = vpop.permute.xlu0 %1477 }
 0x429   : > { %1481 = vst.msk [vmem:[#allocation2 + $0x8] sm:$0xff] %vm1480_vm15, %v1478_v49  ;;  %vm2179_vm15 = vcmask 150528  }
 0x42a   : > { %2180 = vst.msk [vmem:[#allocation4] sm:$0xf] %vm2179_vm15, %v3625_v59 }
 0x42c   : > { %v1314_v6 = vpop.permute.xlu1 %1313 }
 0x42d   : > { %1316 = vst.msk [vmem:[#allocation2] sm:$0xff] %vm875_vm5, %v1314_v6  ;;  %vm1629_vm5 = vcmask 261232  }
 0x430   : > { %v1502_v16 = vpop.permute.xlu0 %1501 }
 0x431   : > { %1505 = vst.msk [vmem:[#allocation2 + $0x8] sm:$0xff] %vm1504_vm1, %v1502_v16  ;;  %vm2181_vm1 = vcmask 552328  }
 0x432   : > { %2182 = vst.msk [vmem:[#allocation4 + $0x8] sm:$0xf] %vm2181_vm1, %v3625_v59 }
 0x434   : > { %v1337_v50 = vpop.permute.xlu1 %1336 }
 0x435   : > { %1339 = vst.msk [vmem:[#allocation2] sm:$0xff] %vm967_vm6, %v1337_v50  ;;  %vm1715_vm6 = vcmask 1043456  }
 0x438   : > { %v1526_v52 = vpop.permute.xlu0 %1525 }
 0x439   : > { %1529 = vst.msk [vmem:[#allocation2 + $0x8] sm:$0xff] %vm1528_vm2, %v1526_v52  ;;  %vm2204_vm2 = vcmask 1043608  }
 0x43c   : > { %v1360_v54 = vpop.permute.xlu0 %1359 }
 0x43d   : > { %1362 = vst.msk [vmem:[#allocation2] sm:$0xff] %vm1059_vm7, %v1360_v54  ;;  %vm1684_vm7 = vcmask 1039360  }
 0x440   : > { %v1627_v11 = vpop.permute.xlu0 %1626  ;;  %v1550_v19 = vpop.permute.xlu1 %1549 }
 0x441   : > { %1553 = vst.msk [vmem:[#allocation2 + $0x8] sm:$0xff] %vm1552_vm3, %v1550_v19  ;;  %vm2205_vm3 = vcmask 1047556  }
 0x444   : > { %v1652_v56 = vpop.permute.xlu0 %1651  ;;  %v1588_v58 = vpop.permute.xlu1 %1587 }
 0x445   : > { %v1654_v60 = vsel %vm1653_vm4, %v1650_v23, %v1652_v56  ;;  %1591 = vst.msk [vmem:[#allocation2 + $0x8] sm:$0xff] %vm1590_vm10, %v1588_v58  ;;  %vm2199_vm4 = vcmask 154624   ;;  %vm2206_vm10 = vmor %vm2205_vm3, %vm2204_vm2 }
 0x446   : > { %1593 = vst.msk [vmem:[#allocation2 + $0x10] sm:$0xff] %vm1592_vm12, %v1588_v58  ;;  %vm2208_vm12 = vcmask 396288  }
 0x447   : > { %1630 = vst.msk [vmem:[#allocation2 + $0x10] sm:$0xff] %vm1629_vm5, %v1627_v11  ;;  %vm2273_vm5 = vcmask 195584  }
 0x448   : > { %1657 = vst.msk [vmem:[#allocation2 + $0x10] sm:$0xff] %vm1656_vm13, %v1654_v60  ;;  %v1383_v39 = vpop.permute.xlu1 %1382  ;;  %v1681_v63 = vpop.permute.xlu0 %1680 }
 0x449   : > { %1385 = vst.msk [vmem:[#allocation2] sm:$0xff] %vm1151_vm8, %v1383_v39  ;;  %vm1704_vm8 = vcmask 1031168  }
 0x44a   : > { %1408 = vst.msk [vmem:[#allocation2] sm:$0xff] %vm1243_vm9, %v1406_v24  ;;  %v2148_v24 = vld [vmem:[#allocation15] sm:$0xff]  ;;  %vm1813_vm9 = vcmask 588800  }
 0x44c   : > { %v1662_v61 = vld [vmem:[#allocation2 + $0x8] sm:$0xff]  ;;  %v1683_v0 = vpop.permute.xlu1 %1682  ;;  %v1679_v33 = vpop.permute.xlu0 %1678 }
 0x44d   : > { %v1676_v8 = vrot.slane %v1662_v61, 4  ;;  %v1685_v5 = vsel %vm1684_vm7, %v1679_v33, %v1681_v63  ;;  %v1686_v7 = vsel %vm1684_vm7, %v1681_v63, %v1683_v0 }
 0x44f   : > { %v1663_v41 = vld [vmem:[#allocation2 + $0x10] sm:$0xff]  ;;  %v4371_v47 = vsel %vm1715_vm6, %v4317_v34, %v1676_v8  ;;  %v4382_v9 = vsel %vm1715_vm6, %v1676_v8, %v1686_v7 }
 0x450   : > { %1691 = vrot.lane.b32.xlu0 %v1663_v41, %s3627_s13  ;;  %v1677_v62 = vrot.slane %v1663_v41, 4  ;;  %v1701_v45 = vpop.permute.xlu0 %1700  ;;  %v1703_v44 = vpop.permute.xlu1 %1702 }
 0x451   : > { %v1661_v17 = vld [vmem:[#allocation2] sm:$0xff]  ;;  %v1706_v57 = vsel %vm1704_vm8, %v1701_v45, %v1703_v44 }
 0x452   : > { %1711 = vrot.lane.b32.xlu1 %v1677_v62, %s3622_s0  ;;  %v1675_v2 = vrot.slane %v1661_v17, 4  ;;  %v4351_v31 = vsel %vm1715_vm6, %v1677_v62, %v1683_v0  ;;  %v4364_v4 = vsel %vm1715_vm6, %v4323_v26, %v1677_v62  ;;  %v1750_v62 = vld [vmem:[#allocation14 + $0x4] sm:$0xf] }
 0x454   : > { %1709 = vrot.lane.b32.xlu0 %v1676_v8, %s3622_s0  ;;  %v4358_v3 = vsel %vm1715_vm6, %v4325_v36, %v1675_v2  ;;  %v4376_v46 = vsel %vm1715_vm6, %v1675_v2, %v1685_v5 }
 0x456   : > { %1687 = vrot.lane.b32.xlu1 %v1661_v17, %s3627_s13 }
 0x458   : > { %1698 = vrot.lane.b32.xlu0 %v4325_v36, %s3622_s0 }
 0x45a   : > { %1689 = vrot.lane.b32.xlu1 %v1662_v61, %s3627_s13 }
 0x45c   : > { %1770 = vrot.lane.b32.xlu0 %v4351_v31, %s3623_s6 }
 0x45e   : > { %1707 = vrot.lane.b32.xlu1 %v1675_v2, %s3622_s0 }
 0x460   : > { %1760 = vrot.lane.b32.xlu0 %v4358_v3, %s3623_s6 }
 0x462   : > { %1764 = vrot.lane.b32.xlu1 %v4364_v4, %s3623_s6 }
 0x464   : > { %1762 = vrot.lane.b32.xlu0 %v4371_v47, %s3623_s6 }
 0x466   : > { %1766 = vrot.lane.b32.xlu1 %v4376_v46, %s3623_s6 }
 0x46a   : > { %1768 = vrot.lane.b32.xlu1 %v4382_v9, %s3623_s6 }
 0x4c2   : > { %v4386_v10 = vpop.permute.xlu0 %1691 }
 0x4c3   : > { %1776 = vrot.lane.b32.xlu1 %v4386_v10, %s3623_s6 }
 0x4c4   : > { %v4390_v42 = vpop.permute.xlu1 %1711 }
 0x4c5   : > { %v4394_v43 = vsel %vm1715_vm6, %v1703_v44, %v4390_v42 }
 0x4c6   : > { %v1710_v12 = vpop.permute.xlu0 %1709  ;;  %1782 = vrot.lane.b32.xlu0 %v4394_v43, %s3623_s6 }
 0x4c7   : > { %v4401_v13 = vsel %vm1704_vm8, %v1710_v12, %v4390_v42 }
 0x4c8   : > { %v1688_v14 = vpop.permute.xlu1 %1687  ;;  %v4405_v40 = vsel %vm1715_vm6, %v1706_v57, %v4401_v13 }
 0x4c9   : > { %1780 = vrot.lane.b32.xlu1 %v4405_v40, %s3623_s6 }
 0x4ca   : > { %v1699_v37 = vpop.permute.xlu0 %1698 }
 0x4cb   : > { %v1705_v22 = vsel %vm1704_vm8, %v1699_v37, %v1701_v45 }
 0x4cc   : > { %v1690_v20 = vpop.permute.xlu1 %1689 }
 0x4cd   : > { %v4411_v55 = vsel %vm1684_vm7, %v1690_v20, %v4386_v10  ;;  %v4420_v53 = vsel %vm1684_vm7, %v1688_v14, %v1690_v20 }
 0x4ce   : > { %v1771_v30 = vpop.permute.xlu0 %1770  ;;  %1774 = vrot.lane.b32.xlu0 %v4411_v55, %s3623_s6 }
 0x4d0   : > { %v1708_v21 = vpop.permute.xlu1 %1707 }
 0x4d1   : > { %v4417_v15 = vsel %vm1704_vm8, %v1708_v21, %v1710_v12 }
 0x4d2   : > { %v1761_v25 = vpop.permute.xlu0 %1760  ;;  %1772 = vrot.lane.b32.xlu0 %v4420_v53, %s3623_s6  ;;  %v4426_v18 = vsel %vm1715_vm6, %v1705_v22, %v4417_v15  ;;  %v1910_v5 = vsel %vm1715_vm6, %v4417_v15, 0  ;;  %v1998_v22 = vld [vmem:[#allocation14 + $0x8] sm:$0xf] }
 0x4d3   : > { %1778 = vrot.lane.b32.xlu1 %v4426_v18, %s3623_s6 }
 0x4d4   : > { %v1765_v35 = vpop.permute.xlu1 %1764 }
 0x4d5   : > { %3016 = vmatpush3.bf16.msra.mxu1 %v1765_v35 }
 0x4d6   : > { %v1763_v38 = vpop.permute.xlu0 %1762  ;;  %1784 = vrot.lane.b32.xlu0 %v4417_v15, %s3623_s6  ;;  %3017 = vmatprep.subr.bf16.mxu1 %v3606_v1 }
 0x4d7   : > { %v1791_v28 = vsel %vm1578_vm11, %v1761_v25, %v1763_v38  ;;  %1786 = vrot.lane.b32.xlu1 %v4401_v13, %s3623_s6  ;;  %v1792_v34 = vsel %vm1578_vm11, %v1763_v38, %v1765_v35 }
 0x4d8   : > { %1826 = vmatprep.subr.bf16.mxu0 %v1792_v34  ;;  %v1767_v51 = vpop.permute.xlu1 %1766 }
 0x4d9   : > { %1827 = vmatpush1.bf16.msra.mxu0 %v1791_v28  ;;  %3018 = vmatpush3.bf16.msra.mxu1 %v1771_v30 }
 0x4da   : > { %1788 = vrot.lane.b32.xlu0 %v4390_v42, %s3623_s6  ;;  %3019 = vmatprep.subr.bf16.mxu1 %v3606_v1 }
 0x4db   : > { %2001 = vrot.lane.b32.xlu1 %v4371_v47, %s3628_s14 }
 0x4dc   : > { %v1769_v26 = vpop.permute.xlu1 %1768 }
 0x4dd   : > { %v1793_v36 = vsel %vm1578_vm11, %v1767_v51, %v1769_v26  ;;  %v1794_v23 = vsel %vm1578_vm11, %v1769_v26, %v1771_v30 }
 0x4de   : > { %2003 = vrot.lane.b32.xlu0 %v4364_v4, %s3628_s14  ;;  %1828 = vmatprep.subr.bf16.mxu0 %v1794_v23 }
 0x4df   : > { %1999 = vrot.lane.b32.xlu1 %v4358_v3, %s3628_s14  ;;  %1829 = vmatpush1.bf16.msra.mxu0 %v1793_v36 }
 0x4e2   : > { %2007 = vrot.lane.b32.xlu0 %v4382_v9, %s3628_s14 }
 0x4e3   : > { %2009 = vrot.lane.b32.xlu1 %v4351_v31, %s3628_s14 }
 0x4e6   : > { %2005 = vrot.lane.b32.xlu0 %v4376_v46, %s3628_s14 }
 0x4e7   : > { %2013 = vrot.lane.b32.xlu1 %v4411_v55, %s3628_s14 }
 0x4ea   : > { %2015 = vrot.lane.b32.xlu0 %v4386_v10, %s3628_s14 }
 0x4eb   : > { %2011 = vrot.lane.b32.xlu1 %v4420_v53, %s3628_s14 }
 0x4ee   : > { %2019 = vrot.lane.b32.xlu0 %v4405_v40, %s3628_s14 }
 0x4ef   : > { %2021 = vrot.lane.b32.xlu1 %v4394_v43, %s3628_s14 }
 0x4f2   : > { %2017 = vrot.lane.b32.xlu0 %v4426_v18, %s3628_s14 }
 0x4f3   : > { %2023 = vrot.lane.b32.xlu1 %v4417_v15, %s3628_s14 }
 0x4f6   : > { %2025 = vrot.lane.b32.xlu0 %v4401_v13, %s3628_s14 }
 0x4f7   : > { %2027 = vrot.lane.b32.xlu1 %v4390_v42, %s3628_s14 }
 0x4fa   : > { %2151 = vperm.xlu0 %3235, %v2148_v24  }
 0x535   : > { %v1777_v27 = vpop.permute.xlu1 %1776 }
 0x536   : > { %3020 = vmatpush3.bf16.msra.mxu1 %v1777_v27 }
 0x537   : > { %3021 = vmatprep.subr.bf16.mxu1 %v3606_v1 }
 0x538   : > { %v1783_v29 = vpop.permute.xlu0 %1782 }
 0x53a   : > { %3022 = vmatpush3.bf16.msra.mxu1 %v1783_v29 }
 0x53b   : > { %3023 = vmatprep.subr.bf16.mxu1 %v3606_v1  ;;  %v1781_v48 = vpop.permute.xlu1 %1780 }
 0x53c   : > { %v1798_v52 = vsel %vm1578_vm11, %v1781_v48, %v1783_v29 }
 0x540   : > { %v1775_v32 = vpop.permute.xlu0 %1774 }
 0x541   : > { %v1796_v49 = vsel %vm1578_vm11, %v1775_v32, %v1777_v27 }
 0x542   : > { %1830 = vmatprep.subr.bf16.mxu0 %v1796_v49 }
 0x544   : > { %v1773_v6 = vpop.permute.xlu0 %1772 }
 0x545   : > { %v1795_v16 = vsel %vm1578_vm11, %v1773_v6, %v1775_v32  ;;  %v1779_v50 = vpop.permute.xlu1 %1778 }
 0x546   : > { %1831 = vmatpush1.bf16.msra.mxu0 %v1795_v16  ;;  %v1797_v11 = vsel %vm1578_vm11, %v1779_v50, %v1781_v48  ;;  %v2161_v16 = vlaneseq }
 0x547   : > { %1832 = vmatprep.subr.bf16.mxu0 %v1798_v52 }
 0x548   : > { %v1785_v54 = vpop.permute.xlu0 %1784  ;;  %v4542_v50 = vshrl.u32 %v2161_v16, 7  ;;  %vm2597_vm13 = vcmp.ge.s32.totalorder %v2161_v16, 49 }
 0x549   : > { %v1787_v19 = vpop.permute.xlu1 %1786 }
 0x54a   : > { %1833 = vmatpush1.bf16.msra.mxu0 %v1797_v11  ;;  %v1799_v56 = vsel %vm1578_vm11, %v1785_v54, %v1787_v19  ;;  %v2163_v54 = vsub.s32 0, %v4542_v50 }
 0x54b   : > { %v1818_v61 = vsel %vm1715_vm6, %v1799_v56, 0 }
 0x54c   : > { %v1789_v58 = vpop.permute.xlu0 %1788 }
 0x54d   : > { %v1800_v60 = vsel %vm1578_vm11, %v1787_v19, %v1789_v58  ;;  %v1824_v39 = vsel %vm1715_vm6, %v1789_v58, 0  ;;  %v2002_v41 = vpop.permute.xlu1 %2001  ;;  %v510_v58 = vld [vmem:[#allocation11] sm:$0x7] }
 0x54e   : > { %2895 = vmatprep.subr.msk.bf16.mxu0 %vm1715_vm6, %v1800_v60  ;;  %3024 = vmatpush3.bf16.msra.mxu1 %v1824_v39  ;;  %v2167_v60 = vsub.s32 1, %v4542_v50 }
 0x54f   : > { %1835 = vmatpush1.bf16.msra.mxu0 %v1818_v61  ;;  %3029 = vmatprep.subr.bf16.mxu1 %v3606_v1 }
 0x550   : > { %v2004_v8 = vpop.permute.xlu0 %2003  ;;  %1916 = vmatprep.subr.bf16.mxu0 %v4371_v47  ;;  %v1658_v47 = vld [vmem:[#allocation14] sm:$0xf] }
 0x551   : > { %v2000_v17 = vpop.permute.xlu1 %1999  ;;  %3026 = vmatmul.mubr.msk.bf16.vlgmr.msra.gmra.mrb[16].mxu1 %vm1813_vm9, %v1750_v62 }
 0x552   : > { %2896 = vmatmul.mubr.msk.bf16.vlgmr.msra.gmra.mrb[16].mxu0 %vm1813_vm9, %v1750_v62  ;;  %3030 = vmatpush3.bf16.msra.mxu1 %v4364_v4  ;;  %v2030_v45 = vsel %vm2029_vm14, %v2000_v17, %v2002_v41 }
 0x553   : > { %1917 = vmatpush1.bf16.msra.mxu0 %v4358_v3  ;;  %3031 = vmatprep.subr.bf16.mxu1 %v3606_v1 }
 0x554   : > { %v2008_v63 = vpop.permute.xlu0 %2007  ;;  %1918 = vmatprep.subr.bf16.mxu0 %v4382_v9  ;;  %3039 = vmatprep.mubr.msk.bf16.mxu1 %vm3607_vm0, %v3606_v1 }
 0x555   : > { %v2010_v0 = vpop.permute.xlu1 %2009  ;;  %1948 = vmatprep.mubr.bf16.mxu0 %v3625_v59 }
 0x556   : > { %3032 = vmatpush3.bf16.msra.mxu1 %v4351_v31  ;;  %v1914_v31 = vsel %vm1715_vm6, %v4390_v42, 0  ;;  %v2033_v44 = vsel %vm2029_vm14, %v2008_v63, %v2010_v0 }
 0x557   : > { %1919 = vmatpush1.bf16.msra.mxu0 %v4376_v46  ;;  %3033 = vmatprep.subr.bf16.mxu1 %v3606_v1  ;;  %v2031_v46 = vsel %vm2029_vm14, %v2002_v41, %v2004_v8 }
 0x558   : > { %v2006_v2 = vpop.permute.xlu0 %2005  ;;  %1920 = vmatprep.subr.bf16.mxu0 %v4411_v55 }
 0x559   : > { %v2014_v33 = vpop.permute.xlu1 %2013 }
 0x55a   : > { %3034 = vmatpush3.bf16.msra.mxu1 %v4386_v10  ;;  %v2032_v10 = vsel %vm2029_vm14, %v2006_v2, %v2008_v63 }
 0x55b   : > { %1921 = vmatpush1.bf16.msra.mxu0 %v4420_v53  ;;  %3035 = vmatprep.subr.bf16.mxu1 %v3606_v1 }
 0x55c   : > { %1922 = vmatprep.subr.bf16.mxu0 %v4405_v40  ;;  %v2016_v3 = vpop.permute.xlu0 %2015 }
 0x55d   : > { %v2012_v4 = vpop.permute.xlu1 %2011  ;;  %v2035_v12 = vsel %vm2029_vm14, %v2014_v33, %v2016_v3 }
 0x55e   : > { %3036 = vmatpush3.bf16.msra.mxu1 %v4394_v43  ;;  %v2034_v57 = vsel %vm2029_vm14, %v2012_v4, %v2014_v33 }
 0x55f   : > { %1923 = vmatpush1.bf16.msra.mxu0 %v4426_v18  ;;  %3037 = vmatprep.subr.bf16.mxu1 %v3606_v1 }
 0x560   : > { %2898 = vmatprep.subr.msk.bf16.mxu0 %vm1715_vm6, %v4401_v13  ;;  %v2020_v7 = vpop.permute.xlu0 %2019 }
 0x561   : > { %v2022_v9 = vpop.permute.xlu1 %2021 }
 0x562   : > { %3038 = vmatpush3.bf16.msra.mxu1 %v1914_v31  ;;  %v2037_v13 = vsel %vm2029_vm14, %v2020_v7, %v2022_v9 }
 0x563   : > { %1925 = vmatpush1.bf16.msra.mxu0 %v1910_v5  ;;  %3043 = vmatprep.subr.bf16.mxu1 %v3606_v1  ;;  %v4552_v5 = vrot.slane %v510_v58, %v2167_v60 }
 0x564   : > { %2064 = vmatprep.subr.bf16.mxu0 %v2031_v46  ;;  %v2018_v42 = vpop.permute.xlu0 %2017 }
 0x565   : > { %3040 = vmatmul.mubr.msk.bf16.vlgmr.msra.gmra.mrb[20].mxu1 %vm1813_vm9, %v1658_v47  ;;  %v2024_v43 = vpop.permute.xlu1 %2023  ;;  %v2036_v37 = vsel %vm2029_vm14, %v2018_v42, %v2020_v7 }
 0x566   : > { %2899 = vmatmul.mubr.msk.bf16.vlgmr.msra.gmra.mrb[20].mxu0 %vm1813_vm9, %v1658_v47  ;;  %3044 = vmatpush3.bf16.msra.mxu1 %v2004_v8  ;;  %v2171_v8 = vsub.s32 2, %v4542_v50 }
 0x567   : > { %2065 = vmatpush1.bf16.msra.mxu0 %v2030_v45  ;;  %3045 = vmatprep.subr.bf16.mxu1 %v3606_v1 }
 0x568   : > { %2066 = vmatprep.subr.bf16.mxu0 %v2033_v44  ;;  %3053 = vmatprep.mubr.msk.bf16.mxu1 %vm3607_vm0, %v3606_v1  ;;  %v2026_v14 = vpop.permute.xlu0 %2025  ;;  %v4554_v7 = vrot.slane %v510_v58, %v2171_v8 }
 0x569   : > { %2096 = vmatprep.mubr.bf16.mxu0 %v3625_v59  ;;  %v2028_v40 = vpop.permute.xlu1 %2027  ;;  %v2038_v20 = vsel %vm2029_vm14, %v2024_v43, %v2026_v14 }
 0x56a   : > { %3046 = vmatpush3.bf16.msra.mxu1 %v2010_v0  ;;  %v2039_v55 = vsel %vm2029_vm14, %v2026_v14, %v2028_v40  ;;  %v2062_v30 = vsel %vm1715_vm6, %v2028_v40, 0  ;;  %v2056_v21 = vsel %vm1715_vm6, %v2038_v20, 0 }
 0x56b   : > { %2067 = vmatpush1.bf16.msra.mxu0 %v2032_v10  ;;  %3047 = vmatprep.subr.bf16.mxu1 %v3606_v1 }
 0x56c   : > { %2068 = vmatprep.subr.bf16.mxu0 %v2035_v12 }
 0x56e   : > { %3048 = vmatpush3.bf16.msra.mxu1 %v2016_v3  ;;  %v4549_v3 = vrot.slane %v510_v58, %v2163_v54 }
 0x56f   : > { %2069 = vmatpush1.bf16.msra.mxu0 %v2034_v57  ;;  %3049 = vmatprep.subr.bf16.mxu1 %v3606_v1 }
 0x570   : > { %2070 = vmatprep.subr.bf16.mxu0 %v2037_v13 }
 0x572   : > { %3050 = vmatpush3.bf16.msra.mxu1 %v2022_v9 }
 0x573   : > { %2071 = vmatpush1.bf16.msra.mxu0 %v2036_v37  ;;  %3051 = vmatprep.subr.bf16.mxu1 %v3606_v1 }
 0x574   : > { %2901 = vmatprep.subr.msk.bf16.mxu0 %vm1715_vm6, %v2039_v55 }
 0x576   : > { %3052 = vmatpush3.bf16.msra.mxu1 %v2062_v30 }
 0x577   : > { %2073 = vmatpush1.bf16.msra.mxu0 %v2056_v21  ;;  %3057 = vmatprep.subr.bf16.mxu1 %v3606_v1 }
 0x579   : > { %3054 = vmatmul.mubr.msk.bf16.vlgmr.msra.gmra.mrb[24].mxu1 %vm1813_vm9, %v1998_v22  ;;  %v2152_v11 = vpop.permute.xlu0 %2151 }
 0x57a   : > { %2902 = vmatmul.mubr.msk.bf16.vlgmr.msra.gmra.mrb[24].mxu0 %vm1813_vm9, %v1998_v22  ;;  %3061 = vmatprep.mubr.msk.bf16.mxu1 %vm3607_vm0, %v3606_v1  ;;  %vm2676_vm9 = vcmp.lt.s32.totalorder %v2161_v16, 305 }
 0x57b   : > { %2318 = vmatprep.mubr.bf16.mxu0 %v3625_v59 }
 0x624   : > { %v1901_v15 = vpop.f32.mrb[16].mxu1 }
 0x625   : > { %v1860_v53 = vpop.f32.mrb[16].mxu0  ;;  %v3027_v25 = vpop.f32.mrb[17].mxu1 }
 0x626   : > { %v1862_v18 = vpop.f32.mrb[17].mxu0  ;;  %v1904_v35 = vpop.f32.mrb[18].mxu1 }
 0x627   : > { %v1864_v38 = vpop.f32.mrb[18].mxu0  ;;  %v3028_v28 = vpop.f32.mrb[19].mxu1 }
 0x628   : > { %v1865_v34 = vpop.f32.mrb[19].mxu0 }
 0x638   : > { %v1991_v51 = vpop.f32.mrb[20].mxu1 }
 0x639   : > { %v1992_v26 = vadd.f32 %v1991_v51, %v1901_v15  ;;  %v1950_v36 = vpop.f32.mrb[20].mxu0  ;;  %v3041_v23 = vpop.f32.mrb[21].mxu1 }
 0x63a   : > { %v1951_v24 = vadd.f32 %v1950_v36, %v1860_v53  ;;  %v1952_v27 = vpop.f32.mrb[21].mxu0  ;;  %v1994_v29 = vpop.f32.mrb[22].mxu1  ;;  %v2577_v23 = vld [vmem:[#allocation18] sm:$0xff] }
 0x63b   : > { %v1953_v32 = vadd.f32 %v1952_v27, %v1862_v18  ;;  %v1954_v48 = vpop.f32.mrb[22].mxu0  ;;  %v3042_v49 = vpop.f32.mrb[23].mxu1  ;;  %v2601_v27 = vld [vmem:[#allocation20] sm:$0xff] }
 0x63c   : > { %v1955_v6 = vpop.f32.mrb[23].mxu0 }
 0x64c   : > { %v2139_v52 = vpop.f32.mrb[24].mxu1 }
 0x64d   : > { %v2147_v19 = vadd.f32 %v2139_v52, %v1992_v26  ;;  %v2098_v56 = vpop.f32.mrb[24].mxu0  ;;  %v3055_v39 = vpop.f32.mrb[25].mxu1 }
 0x64e   : > { %v2145_v41 = vadd.f32 %v2098_v56, %v1951_v24  ;;  %v2100_v61 = vpop.f32.mrb[25].mxu0  ;;  %v2142_v62 = vpop.f32.mrb[26].mxu1  ;;  %v2630_v24 = vld [vmem:[#allocation5] sm:$0x1] }
 0x64f   : > { %v2156_v17 = vadd.f32 %v2152_v11, %v2147_v19  ;;  %v2146_v63 = vadd.f32 %v2100_v61, %v1953_v32  ;;  %v2102_v0 = vpop.f32.mrb[26].mxu0  ;;  %v3056_v2 = vpop.f32.mrb[27].mxu1  ;;  %v2250_v61 = vld [vmem:[#allocation17 + $0x4] sm:$0xf] }
 0x650   : > { %v2154_v33 = vadd.f32 %v2152_v11, %v2145_v41  ;;  %v2103_v4 = vpop.f32.mrb[27].mxu0  ;;  %v2210_v2 = vld [vmem:[#allocation17] sm:$0xf] }
 0x651   : > { %v2155_v31 = vadd.f32 %v2152_v11, %v2146_v63  ;;  %v2159_v46 = vmax.f32 %v2156_v17, 0.0 }
 0x652   : > { %v2157_v47 = vmax.f32 %v2154_v33, 0.0 }
 0x653   : > { %v2158_v9 = vmax.f32 %v2155_v31, 0.0  ;;  %v2178_v10 = vmul.f32 %v4554_v7, %v2159_v46 }
 0x654   : > { %v2176_v45 = vmul.f32 %v4549_v3, %v2157_v47 }
 0x655   : > { %v2177_v44 = vmul.f32 %v4552_v5, %v2158_v9  ;;  %v2923_v43 = vpack.c.bf16 %v2178_v10, %v2178_v10  ;;  %v2461_v10 = vld [vmem:[#allocation17 + $0x8] sm:$0xf] }
 0x657   : > { %v2922_v42 = vpack.c.bf16 %v2177_v44, %v2176_v45 }
 0x659   : > { %2194 = vrot.lane.b32.xlu1 %v2922_v42, %s3629_s25 }
 0x65d   : > { %2196 = vrot.lane.b32.xlu1 %v2923_v43, %s3629_s25 }
 0x6cb   : > { %v2195_v12 = vpop.permute.xlu1 %2194 }
 0x6cc   : > { %v2198_v57 = vrot.slane %v2195_v12, 4 }
 0x6ce   : > { %v2200_v13 = vsel %vm2199_vm4, %v2198_v57, %v2195_v12 }
 0x6cf   : > { %2207 = vst.msk [vmem:[#allocation4] sm:$0xff] %vm2206_vm10, %v2200_v13  ;;  %v2197_v14 = vpop.permute.xlu1 %2196 }
 0x6d0   : > { %v2201_v40 = vsel %vm2199_vm4, %v2198_v57, %v2197_v14 }
 0x6d1   : > { %2209 = vst.msk [vmem:[#allocation4 + $0x8] sm:$0xf] %vm2208_vm12, %v2201_v40 }
 0x6d6   : > { %v2211_v37 = vld [vmem:[#allocation4] sm:$0xff] }
 0x6d7   : > { %v2907_v20 = vcombine.high %v2211_v37, %v2211_v37  ;;  %v2906_v30 = vcombine.low %v2211_v37, %v2211_v37 }
 0x6d8   : > { %v3249_v55 = vld [vmem:[#allocation4 + $0x8] ss:$0 sps:$4 sm:$0xff]  }
 0x6d9   : > { %2223 = vrot.lane.b32.xlu0 %v2907_v20, %s3627_s13  ;;  %2225 = vrot.lane.b32.xlu1 %v3249_v55, %s3627_s13 }
 0x6dd   : > { %2221 = vrot.lane.b32.xlu0 %v2906_v30, %s3627_s13  ;;  %2229 = vrot.lane.b32.xlu1 %v2906_v30, %s3622_s0 }
 0x6e1   : > { %2231 = vrot.lane.b32.xlu0 %v2907_v20, %s3622_s0  ;;  %2233 = vrot.lane.b32.xlu1 %v3249_v55, %s3622_s0 }
 0x74b   : > { %v2224_v21 = vpop.permute.xlu0 %2223  ;;  %v2226_v22 = vpop.permute.xlu1 %2225 }
 0x74c   : > { %v2228_v15 = vsel %vm1684_vm7, %v2224_v21, %v2226_v22  ;;  %v2247_v53 = vsel %vm1715_vm6, %v3249_v55, %v2226_v22 }
 0x74d   : > { %2258 = vrot.lane.b32.xlu1 %v2247_v53, %s3623_s6  ;;  %v2243_v25 = vsel %vm1715_vm6, %v2907_v20, %v2228_v15 }
 0x74e   : > { %2256 = vrot.lane.b32.xlu0 %v2243_v25, %s3623_s6 }
 0x74f   : > { %v2222_v18 = vpop.permute.xlu0 %2221  ;;  %v2230_v38 = vpop.permute.xlu1 %2229 }
 0x750   : > { %v2227_v35 = vsel %vm1684_vm7, %v2222_v18, %v2224_v21 }
 0x751   : > { %v2239_v28 = vsel %vm1715_vm6, %v2906_v30, %v2227_v35 }
 0x752   : > { %2254 = vrot.lane.b32.xlu0 %v2239_v28, %s3623_s6 }
 0x753   : > { %v2232_v34 = vpop.permute.xlu0 %2231  ;;  %v2234_v26 = vpop.permute.xlu1 %2233 }
 0x754   : > { %v2235_v51 = vsel %vm1704_vm8, %v2230_v38, %v2232_v34  ;;  %v2236_v36 = vsel %vm1704_vm8, %v2232_v34, %v2234_v26  ;;  %v2377_v63 = vsel %vm1715_vm6, %v2234_v26, 0  ;;  %vm2675_vm8 = vcmp.ge.s32.totalorder %v2161_v16, 19 }
 0x755   : > { %2260 = vrot.lane.b32.xlu1 %v2235_v51, %s3623_s6  ;;  %v2371_v0 = vsel %vm1715_vm6, %v2235_v51, 0 }
 0x756   : > { %2262 = vrot.lane.b32.xlu0 %v2236_v36, %s3623_s6 }
 0x759   : > { %2264 = vrot.lane.b32.xlu1 %v2234_v26, %s3623_s6 }
 0x75a   : > { %2464 = vrot.lane.b32.xlu0 %v2243_v25, %s3628_s14 }
 0x75d   : > { %2466 = vrot.lane.b32.xlu1 %v2247_v53, %s3628_s14 }
 0x75e   : > { %2462 = vrot.lane.b32.xlu0 %v2239_v28, %s3628_s14 }
 0x761   : > { %2468 = vrot.lane.b32.xlu1 %v2235_v51, %s3628_s14 }
 0x762   : > { %2470 = vrot.lane.b32.xlu0 %v2236_v36, %s3628_s14 }
 0x765   : > { %2472 = vrot.lane.b32.xlu1 %v2234_v26, %s3628_s14 }
 0x766   : > { %2580 = vperm.xlu0 %3235, %v2577_v23  }
 0x769   : > { %2604 = vperm.xlu1 %3236, %v2601_v27  }
 0x76a   : > { %2633 = vperm.xlu0 %3235, %v2630_v24  }
 0x7bf   : > { %v2259_v29 = vpop.permute.xlu1 %2258 }
 0x7c0   : > { %v2257_v32 = vpop.permute.xlu0 %2256  ;;  %3058 = vmatpush3.bf16.msra.mxu1 %v2259_v29 }
 0x7c1   : > { %v2267_v48 = vsel %vm1578_vm11, %v2257_v32, %v2259_v29  ;;  %3059 = vmatprep.subr.bf16.mxu1 %v3606_v1 }
 0x7c2   : > { %2286 = vmatprep.subr.bf16.mxu0 %v2267_v48 }
 0x7c4   : > { %v2255_v49 = vpop.permute.xlu0 %2254 }
 0x7c5   : > { %v2266_v6 = vsel %vm1578_vm11, %v2255_v49, %v2257_v32 }
 0x7c6   : > { %2287 = vmatpush1.bf16.msra.mxu0 %v2266_v6 }
 0x7c7   : > { %v2261_v52 = vpop.permute.xlu1 %2260 }
 0x7c8   : > { %v2263_v11 = vpop.permute.xlu0 %2262 }
 0x7c9   : > { %v2268_v19 = vsel %vm1578_vm11, %v2261_v52, %v2263_v11 }
 0x7ca   : > { %v2278_v39 = vsel %vm1715_vm6, %v2268_v19, 0 }
 0x7cb   : > { %v2265_v56 = vpop.permute.xlu1 %2264 }
 0x7cc   : > { %v2269_v58 = vsel %vm1578_vm11, %v2263_v11, %v2265_v56  ;;  %v2284_v60 = vsel %vm1715_vm6, %v2265_v56, 0  ;;  %v2465_v41 = vpop.permute.xlu0 %2464  ;;  %vm2594_vm11 = vcmp.lt.s32.totalorder %v2161_v16, 19 }
 0x7cd   : > { %2909 = vmatprep.subr.msk.bf16.mxu0 %vm1715_vm6, %v2269_v58  ;;  %3060 = vmatpush3.bf16.msra.mxu1 %v2284_v60  ;;  %2596 = vst.msk [vmem:[%s508_s27] sm:$0x1] %vm2594_vm11, %v3606_v1 }
 0x7ce   : > { %2289 = vmatpush1.bf16.msra.mxu0 %v2278_v39  ;;  %3065 = vmatprep.subr.bf16.mxu1 %v3606_v1 }
 0x7cf   : > { %2379 = vmatprep.subr.bf16.mxu0 %v2243_v25  ;;  %v2467_v62 = vpop.permute.xlu1 %2466 }
 0x7d0   : > { %3062 = vmatmul.mubr.msk.bf16.vlgmr.msra.gmra.mrb[28].mxu1 %vm2273_vm5, %v2250_v61  ;;  %v2463_v8 = vpop.permute.xlu0 %2462  ;;  %v2475_v33 = vsel %vm2029_vm14, %v2465_v41, %v2467_v62 }
 0x7d1   : > { %2910 = vmatmul.mubr.msk.bf16.vlgmr.msra.gmra.mrb[28].mxu0 %vm2273_vm5, %v2250_v61  ;;  %3066 = vmatpush3.bf16.msra.mxu1 %v2247_v53  ;;  %v2474_v47 = vsel %vm2029_vm14, %v2463_v8, %v2465_v41 }
 0x7d2   : > { %2380 = vmatpush1.bf16.msra.mxu0 %v2239_v28  ;;  %3067 = vmatprep.subr.bf16.mxu1 %v3606_v1 }
 0x7d3   : > { %2912 = vmatprep.subr.msk.bf16.mxu0 %vm1715_vm6, %v2236_v36  ;;  %v2469_v17 = vpop.permute.xlu1 %2468  ;;  %3069 = vmatprep.mubr.msk.bf16.mxu1 %vm3607_vm0, %v3606_v1 }
 0x7d4   : > { %2411 = vmatprep.mubr.bf16.mxu0 %v3625_v59  ;;  %v2471_v4 = vpop.permute.xlu0 %2470 }
 0x7d5   : > { %3068 = vmatpush3.bf16.msra.mxu1 %v2377_v63  ;;  %v2476_v46 = vsel %vm2029_vm14, %v2469_v17, %v2471_v4 }
 0x7d6   : > { %2382 = vmatpush1.bf16.msra.mxu0 %v2371_v0  ;;  %3073 = vmatprep.subr.bf16.mxu1 %v3606_v1  ;;  %v2485_v44 = vsel %vm1715_vm6, %v2476_v46, 0 }
 0x7d7   : > { %2493 = vmatprep.subr.bf16.mxu0 %v2475_v33  ;;  %v2473_v31 = vpop.permute.xlu1 %2472 }
 0x7d8   : > { %3070 = vmatmul.mubr.msk.bf16.vlgmr.msra.gmra.mrb[32].mxu1 %vm2273_vm5, %v2210_v2  ;;  %v2477_v9 = vsel %vm2029_vm14, %v2471_v4, %v2473_v31  ;;  %v2491_v45 = vsel %vm1715_vm6, %v2473_v31, 0  ;;  %vm2677_vm14 = vmand %vm2675_vm8, %vm2676_vm9 }
 0x7d9   : > { %2913 = vmatmul.mubr.msk.bf16.vlgmr.msra.gmra.mrb[32].mxu0 %vm2273_vm5, %v2210_v2  ;;  %3074 = vmatpush3.bf16.msra.mxu1 %v2467_v62 }
 0x7da   : > { %2494 = vmatpush1.bf16.msra.mxu0 %v2474_v47  ;;  %3075 = vmatprep.subr.bf16.mxu1 %v3606_v1 }
 0x7db   : > { %2915 = vmatprep.subr.msk.bf16.mxu0 %vm1715_vm6, %v2477_v9  ;;  %3077 = vmatprep.mubr.msk.bf16.mxu1 %vm3607_vm0, %v3606_v1  ;;  %vm2622_vm0 = vcmask 244736   ;;  %vm2598_vm6 = vcmp.lt.s32.totalorder %v2161_v16, 68 }
 0x7dc   : > { %2525 = vmatprep.mubr.bf16.mxu0 %v3625_v59  ;;  %vm2599_vm7 = vmand %vm2597_vm13, %vm2598_vm6 }
 0x7dd   : > { %3076 = vmatpush3.bf16.msra.mxu1 %v2491_v45  ;;  %2600 = vst.msk [vmem:[%s508_s27 + $0x2] sm:$0x1] %vm2599_vm7, %v3606_v1 }
 0x7de   : > { %2496 = vmatpush1.bf16.msra.mxu0 %v2485_v44 }
 0x7e0   : > { %3078 = vmatmul.mubr.msk.bf16.vlgmr.msra.gmra.mrb[36].mxu1 %vm2273_vm5, %v2461_v10 }
 0x7e1   : > { %2916 = vmatmul.mubr.msk.bf16.vlgmr.msra.gmra.mrb[36].mxu0 %vm2273_vm5, %v2461_v10 }
 0x7e5   : > { %v2581_v38 = vpop.permute.xlu0 %2580 }
 0x7e8   : > { %v2605_v56 = vpop.permute.xlu1 %2604 }
 0x7e9   : > { %v2634_v10 = vpop.permute.xlu0 %2633 }
 0x8a3   : > { %v2361_v42 = vpop.f32.mrb[28].mxu1 }
 0x8a4   : > { %v2320_v43 = vpop.f32.mrb[28].mxu0  ;;  %v3063_v12 = vpop.f32.mrb[29].mxu1 }
 0x8a5   : > { %v2322_v57 = vpop.f32.mrb[29].mxu0  ;;  %v2364_v13 = vpop.f32.mrb[30].mxu1 }
 0x8a6   : > { %v2324_v14 = vpop.f32.mrb[30].mxu0  ;;  %v3064_v40 = vpop.f32.mrb[31].mxu1  ;;  %v2639_v13 = vrot.slane %v2634_v10, %v2163_v54 }
 0x8a7   : > { %v2325_v37 = vpop.f32.mrb[31].mxu0 }
 0x8ab   : > { %v2454_v20 = vpop.f32.mrb[32].mxu1 }
 0x8ac   : > { %v2455_v55 = vadd.f32 %v2454_v20, %v2361_v42  ;;  %v2413_v59 = vpop.f32.mrb[32].mxu0  ;;  %v3071_v30 = vpop.f32.mrb[33].mxu1 }
 0x8ad   : > { %v2414_v21 = vadd.f32 %v2413_v59, %v2320_v43  ;;  %v2415_v22 = vpop.f32.mrb[33].mxu0  ;;  %v2457_v15 = vpop.f32.mrb[34].mxu1 }
 0x8ae   : > { %v2416_v53 = vadd.f32 %v2415_v22, %v2322_v57  ;;  %v2417_v25 = vpop.f32.mrb[34].mxu0  ;;  %v3072_v18 = vpop.f32.mrb[35].mxu1 }
 0x8af   : > { %v2418_v35 = vpop.f32.mrb[35].mxu0 }
 0x8b3   : > { %v2568_v28 = vpop.f32.mrb[36].mxu1 }
 0x8b4   : > { %v2576_v34 = vadd.f32 %v2568_v28, %v2455_v55  ;;  %v2527_v51 = vpop.f32.mrb[36].mxu0  ;;  %v3079_v26 = vpop.f32.mrb[37].mxu1 }
 0x8b5   : > { %v2574_v36 = vadd.f32 %v2527_v51, %v2414_v21  ;;  %v2529_v23 = vpop.f32.mrb[37].mxu0  ;;  %v2571_v24 = vpop.f32.mrb[38].mxu1 }
 0x8b6   : > { %v2585_v27 = vadd.f32 %v2581_v38, %v2576_v34  ;;  %v2575_v29 = vadd.f32 %v2529_v23, %v2416_v53  ;;  %v2531_v32 = vpop.f32.mrb[38].mxu0  ;;  %v3080_v48 = vpop.f32.mrb[39].mxu1 }
 0x8b7   : > { %v2583_v49 = vadd.f32 %v2581_v38, %v2574_v36  ;;  %v2532_v6 = vpop.f32.mrb[39].mxu0 }
 0x8b8   : > { %v2588_v52 = vmax.f32 %v2585_v27, 0.0  ;;  %v2584_v11 = vadd.f32 %v2581_v38, %v2575_v29 }
 0x8b9   : > { %v2586_v19 = vmax.f32 %v2583_v49, 0.0 }
 0x8ba   : > { %v2591_v58 = vmul.f32 %v2588_v52, %v4554_v7  ;;  %v2587_v60 = vmax.f32 %v2584_v11, 0.0  ;;  %v3630_v7 = vmov 1966171168  }
 0x8bb   : > { %v2589_v39 = vmul.f32 %v2586_v19, %v4549_v3  ;;  %v2648_v45 = vunpack.c.l.s4 %v3630_v7 }
 0x8bc   : > { %v2590_v41 = vmul.f32 %v2587_v60, %v4552_v5  ;;  %v2609_v61 = vmul.f32 %v2605_v56, %v2591_v58 }
 0x8bd   : > { %v2607_v62 = vmul.f32 %v2605_v56, %v2589_v39  ;;  %v2649_v57 = vunpack.c.0.s8 %v2648_v45 }
 0x8be   : > { %v2608_v8 = vmul.f32 %v2605_v56, %v2590_v41  ;;  %v2623_v17 = vsel %vm2622_vm0, %v2609_v61, 0.0 }
 0x8bf   : > { %v2610_v63 = vrot.slane %v2607_v62, 4  ;;  %v2624_v0 = vrot.slane %v2623_v17, 4  ;;  %v2652_v30 = vsub.s32 %v2649_v57, %v4542_v50 }
 0x8c0   : > { %v2616_v2 = vrot.slane %v2608_v8, 4 }
 0x8c1   : > { %v2611_v33 = vadd.f32 %v2610_v63, %v2607_v62  ;;  %v2625_v4 = vadd.f32 %v2624_v0, %v2623_v17 }
 0x8c2   : > { %v2617_v31 = vadd.f32 %v2616_v2, %v2608_v8 }
 0x8c3   : > { %v2612_v47 = vrot.slane %v2611_v33, 2  ;;  %v2626_v46 = vrot.slane %v2625_v4, 2 }
 0x8c4   : > { %v2618_v9 = vrot.slane %v2617_v31, 2 }
 0x8c5   : > { %v2613_v3 = vadd.f32 %v2612_v47, %v2611_v33  ;;  %v2627_v44 = vadd.f32 %v2626_v46, %v2625_v4 }
 0x8c6   : > { %v2619_v5 = vadd.f32 %v2618_v9, %v2617_v31 }
 0x8c7   : > { %v2614_v42 = vrot.slane %v2613_v3, 1  ;;  %v2628_v43 = vrot.slane %v2627_v44, 1 }
 0x8c8   : > { %v2620_v12 = vrot.slane %v2619_v5, 1 }
 0x8c9   : > { %v2615_v14 = vadd.f32 %v2614_v42, %v2613_v3  ;;  %v2629_v40 = vadd.f32 %v2628_v43, %v2627_v44 }
 0x8ca   : > { %v2621_v37 = vadd.f32 %v2620_v12, %v2619_v5 }
 0x8cb   : > { %v2640_v20 = vadd.f32 %v2639_v13, %v2615_v14  ;;  %v2642_v59 = vadd.f32 %v2639_v13, %v2629_v40 }
 0x8cc   : > { %v2641_v55 = vadd.f32 %v2639_v13, %v2621_v37 }
 0x8cd   : > { %v2660_v22 = vrot.slane %v2642_v59, %v2652_v30 }
 0x8ce   : > { %v2646_v21 = vcombine.low %v2640_v20, %v2641_v55 }
 0x8d0   : > { %v2653_v54 = vrot.slane %v2646_v21, %v2652_v30 }
 0x8d2   : > { %v2661_v15 = vcombine.low %v2653_v54, %v2660_v22 }
 0x8d4   : > { %v2668_v53 = vrot.slane %v2661_v15, %v2652_v30 }
 0x8d6   : > { %2669 = vrot.lane.b32.xlu1 %v2668_v53, %s3629_s25 }
 0x948   : > { %v2670_v50 = vpop.permute.xlu1 %2669 }
 0x949   : > { %v2671_v25 = vrot.slane %v2670_v50, 7 }
 0x94b   : > { %v2673_v1 = vsel %vm2199_vm4, %v2671_v25, %v2670_v50 }
 0x94c   : > { %2678 = vst.msk [vmem:[%s508_s27] sm:$0x7] %vm2677_vm14, %v2673_v1 }
 0x94d   : > { %3520 = shalt.err (!%p3517_p8)
}
 0x94e   : > { %s3521_s7 = scalar_lea.hbm %s4641_s22, 48  ;;  %s3525_s21 = scalar_lea.hbm %s4696_s10, 96 }
 0x94f   : > { %p3522_p10 = scmp.ne.s32.totalorder %s4641_s22, %s3521_s7  ;;  %p3526_p1 = scmp.lt.u32.totalorder %s4641_s22, %s4696_s10 }
 0x950   : > { %p3527_p3 = scmp.lt.u32.totalorder %s3525_s21, %s3521_s7  ;;  %p3529_p6 = scmp.lt.u32.totalorder %s3521_s7, %s4641_s22 }
 0x951   : > { %p3523_p4 = pnand %p3522_p10, %p4736_p11 }
 0x952   : > { %p3528_p2 = por %p3527_p3, %p3526_p1 }
 0x953   : > { %p3524_p13 = pneg %p3523_p4 }
 0x954   : > { %p3530_p5 = por %p3529_p6, %p3528_p2 }
 0x956   : > { %p3531_p9 = pnand %p3530_p5, %p3524_p13 }
 0x958   : > { %3534 = shalt.err (!%p3531_p9)
}
 0x959   : > { %3118 = dma.vmem_to_hbm [thread:$0]  (%p4736_p11), %s4643_s2, 48, %s4641_s22, %s2680_s12  }
 0x95a PF: > { %s2706_s14 = sand.u32 1, %s3581_s15   ;;  %p4737_p0 = scmp.ne.s32.totalorder %s4721_s29, 0 }
 0x95b   : > { %p4738_p7 = scmp.ge.s32.totalorder %s3593_s18, 2  ;;  %s2707_s25 = scalar_lea.sflag [#allocation8], %s2706_s14 }
 0x95d   : > { %p3150_p12 = pnand %p4738_p7, %p4737_p0 }
 0x95f   : > { %3576 = dma.done.wait (!%p3150_p12), %s2707_s25, 48  }
 0x960   : > { %3578 = vsyncadd (!%p3150_p12), %s2707_s25, 4294967248  ;;  %p31_p8 = scmp.ge.s32.totalorder %s3894_s26, 4   ;;  %s4739_s15 = smov %s3585_s16 }
 0x961   : > { %s4740_s16 = smov %s3589_s17  ;;  %s4741_s17 = smov %s3906_s3 }
 0x962   : > { %s4742_s18 = smov %s3894_s26  ;;  %33 = sbr.rel (!%p31_p8) target bundleno = 18 (0x12), region = 150 }
 0x969   :  { %2712 = vsyncpa [#allocation7], 1 }
 0x96a   :  { %2714 = vsyncpa [#allocation7 + $0x1], 1 }
 0x96b   :  { %2715 = vsyncpa [#allocation10], 1 }
 0x96c   :  { %2717 = vsyncpa [#allocation10 + $0x1], 1 }
 0x96d   :  { %2718 = vsyncpa [#allocation13], 1 }
 0x96e   :  { %2719 = vsyncpa [#allocation16], 1 }
 0x96f   :  { %2720 = vsyncpa [#allocation19], 1 }
 0x970   :  { %2721 = vsyncpa [#allocation8], 1 }
 0x971   :  { %2723 = vsyncpa [#allocation8 + $0x1], 1 }

</bundles_post_ra>
